<compile_context>
chip_gen: v6e
topology: v6e:2x2x1
jax: 0.10.0
libtpu: 0.0.40
codegen_flags: <defaults>
</compile_context>

<pallas_src>
import functools

import jax
import jax.numpy as jnp
from jax import lax
from jax.experimental import pallas as pl
from jax.experimental.pallas import tpu as pltpu


# ----------------------------- Pallas kernels -----------------------------

def _dual_conv_kernel(p_ref, w1_ref, sc1_ref, sh1_ref, w3_ref, sc3_ref, sh3_ref,
                      o1_ref, o3_ref):
    """One im2col tile -> Res_2d conv_1 (+BN+ReLU) and conv_3 shortcut (+BN).

    The shared (TM, 9*Cin) bf16 tile is loaded once and feeds two MXU matmuls
    (K = 9*Cin); conv bias + BatchNorm are folded into per-channel f32
    scale/shift applied on the f32 accumulator."""
    p = p_ref[...]                                               # (TM, 9*Cin) bf16
    y1 = jnp.dot(p, w1_ref[...], preferred_element_type=jnp.float32)
    o1_ref[...] = jnp.maximum(y1 * sc1_ref[...] + sh1_ref[...], 0.0)
    y3 = jnp.dot(p, w3_ref[...], preferred_element_type=jnp.float32)
    o3_ref[...] = y3 * sc3_ref[...] + sh3_ref[...]


def _conv_res_kernel(p_ref, w_ref, sc_ref, sh_ref, r_ref, o_ref):
    """Res_2d conv_2 + BN + residual add + ReLU, fused."""
    y = jnp.dot(p_ref[...], w_ref[...], preferred_element_type=jnp.float32)
    o_ref[...] = jnp.maximum(y * sc_ref[...] + sh_ref[...] + r_ref[...], 0.0)


def _head_kernel(f_ref, w1_ref, sc1_ref, sh1_ref, w2_ref, b2_ref, o_ref):
    """max-pool over time -> dense1 + BN1d + ReLU -> dense2 -> softmax."""
    pooled = jnp.max(f_ref[...], axis=1)                         # (N, C4)
    h = jnp.dot(pooled, w1_ref[...], preferred_element_type=jnp.float32)
    h = jnp.maximum(h * sc1_ref[...] + sh1_ref[...], 0.0)        # dropout = identity (eval)
    logits = jnp.dot(h, w2_ref[...], preferred_element_type=jnp.float32) + b2_ref[...]
    m = jnp.max(logits, axis=-1, keepdims=True)
    e = jnp.exp(logits - m)
    denom = jnp.sum(e, axis=-1, keepdims=True)
    # Exact divide: tiny (N, n_class) tile, and the approx EUP reciprocal is
    # not accurate enough for probabilities that must sum to 1.
    o_ref[...] = e / denom


# ------------------------- conv wrapper (im2col glue) ----------------------

def _round_up(x, m):
    return ((x + m - 1) // m) * m


def _extract_patches(x, k, stride, pad, pad_value):
    """x: (N, H, W, C) NHWC -> im2col matrix (N*Ho*Wo, k*k*C), bf16."""
    x = x.astype(jnp.bfloat16)
    n, h, w, c = x.shape
    xp = lax.pad(x, jnp.asarray(pad_value).astype(x.dtype),
                 ((0, 0, 0), (pad, pad, 0), (pad, pad, 0), (0, 0, 0)))
    ho = (h + 2 * pad - k) // stride + 1
    wo = (w + 2 * pad - k) // stride + 1
    cols = []
    for i in range(k):
        for j in range(k):
            sl = lax.slice(xp, (0, i, j, 0),
                           (n, i + (ho - 1) * stride + 1,
                            j + (wo - 1) * stride + 1, c),
                           (1, stride, stride, 1))
            cols.append(sl.reshape(n * ho * wo, c))
    return jnp.concatenate(cols, axis=1), (n, ho, wo)


def _full_spec(arr):
    """Whole-array block (weights / scale / shift): same block every grid step."""
    return pl.BlockSpec(arr.shape, lambda i: (0,) * arr.ndim)


def _grid_params(m, tm_max, vmem_limit):
    tm = min(tm_max, _round_up(m, 8))
    m_pad = _round_up(m, tm)
    cp = pltpu.CompilerParams(dimension_semantics=("parallel",),
                              vmem_limit_bytes=vmem_limit)
    return tm, m_pad, cp


def res_block(x, lp, *, pad_value, tm_max, vmem_limit):
    """One Res_2d(stride=2) block:
       out = relu(bn3(conv3(x)) + bn2(conv2(relu(bn1(conv1(x))))))."""
    w1, sc1, sh1 = lp["c1"]
    w3, sc3, sh3 = lp["c3"]
    w2, sc2, sh2 = lp["c2"]
    cout = w1.shape[-1]

    # -- conv_1 (ReLU) and conv_3 (shortcut) share the same im2col tile -------
    patches, (n, ho, wo) = _extract_patches(x, 3, 2, 1, pad_value)
    m = n * ho * wo
    tm, m_pad, cp = _grid_params(m, tm_max, vmem_limit)
    patches = jnp.pad(patches, ((0, m_pad - m), (0, 0)))
    row_in = pl.BlockSpec((tm, patches.shape[-1]), lambda i: (i, 0))
    row_out = pl.BlockSpec((tm, cout), lambda i: (i, 0))
    h, shortcut = pl.pallas_call(
        _dual_conv_kernel,
        out_shape=(jax.ShapeDtypeStruct((m_pad, cout), jnp.float32),
                   jax.ShapeDtypeStruct((m_pad, cout), jnp.float32)),
        grid=(m_pad // tm,),
        in_specs=[row_in, _full_spec(w1), _full_spec(sc1), _full_spec(sh1),
                  _full_spec(w3), _full_spec(sc3), _full_spec(sh3)],
        out_specs=(row_out, row_out),
        compiler_params=cp,
    )(patches, w1, sc1, sh1, w3, sc3, sh3)

    # -- conv_2 + BN + residual add + ReLU (stride 1, same spatial size) ------
    h_nhwc = h[:m].reshape(n, ho, wo, cout)
    patches2, _ = _extract_patches(h_nhwc, 3, 1, 1, 0.0)
    patches2 = jnp.pad(patches2, ((0, m_pad - m), (0, 0)))
    row_in2 = pl.BlockSpec((tm, patches2.shape[-1]), lambda i: (i, 0))
    out = pl.pallas_call(
        _conv_res_kernel,
        out_shape=jax.ShapeDtypeStruct((m_pad, cout), jnp.float32),
        grid=(m_pad // tm,),
        in_specs=[row_in2, _full_spec(w2), _full_spec(sc2), _full_spec(sh2),
                  row_out],
        out_specs=row_out,
        compiler_params=cp,
    )(patches2, w2, sc2, sh2, shortcut)
    return out[:m].reshape(n, ho, wo, cout)


# -------------------- Mel spectrogram front-end (plain JAX) ----------------

def _hz_to_mel(f):
    return 2595.0 * jnp.log10(1.0 + f / 700.0)


def _mel_to_hz(m):
    return 700.0 * (10.0 ** (m / 2595.0) - 1.0)


def _mel_fbanks(n_freqs, f_min, f_max, n_mels, sr):
    all_freqs = jnp.linspace(0.0, sr / 2.0, n_freqs)
    m_pts = jnp.linspace(_hz_to_mel(f_min), _hz_to_mel(f_max), n_mels + 2)
    f_pts = _mel_to_hz(m_pts)
    f_diff = f_pts[1:] - f_pts[:-1]
    slopes = f_pts[None, :] - all_freqs[:, None]
    down = -slopes[:, :-2] / f_diff[:-1]
    up = slopes[:, 2:] / f_diff[1:]
    return jnp.clip(jnp.minimum(down, up), 0.0, None)     # (n_freqs, n_mels)


def mel_spectrogram_db(wave, *, sr, n_fft, hop, f_min, f_max, n_mels):
    pad = n_fft // 2
    wp = jnp.pad(wave, ((0, 0), (pad, pad)), mode="reflect")        # center=True
    n_frames = 1 + (wp.shape[1] - n_fft) // hop
    idx = jnp.arange(n_frames)[:, None] * hop + jnp.arange(n_fft)[None, :]
    window = 0.5 - 0.5 * jnp.cos(2.0 * jnp.pi * jnp.arange(n_fft) / n_fft)  # periodic Hann
    frames = wp[:, idx] * window                                     # (N, frames, n_fft)
    power = jnp.abs(jnp.fft.rfft(frames, axis=-1)) ** 2              # power spectrogram
    mel = power @ _mel_fbanks(n_fft // 2 + 1, f_min, f_max, n_mels, sr)
    mel = jnp.transpose(mel, (0, 2, 1))                              # (N, n_mels, frames)
    return 10.0 * jnp.log10(jnp.maximum(mel, 1e-10))                 # AmplitudeToDB (power)


# ------------------------- parameter initialization ------------------------

def _fold_conv_bn(w, b, gamma, beta, mean, var, eps=1e-5):
    """conv(bias) + BN(eval) -> (w_flat (9*Cin, Cout), scale (1,Cout), shift (1,Cout))."""
    scale = gamma / jnp.sqrt(var + eps)
    shift = (b - mean) * scale + beta
    cout, cin, kh, kw = w.shape
    w_flat = jnp.transpose(w, (2, 3, 1, 0)).reshape(kh * kw * cin, cout)
    return w_flat, scale.reshape(1, cout), shift.reshape(1, cout)


def _conv_bn_init(key, cin, cout, k=3):
    ks = jax.random.split(key, 6)
    fan_in = cin * k * k
    w = jax.random.normal(ks[0], (cout, cin, k, k), jnp.float32) / jnp.sqrt(fan_in)
    b = 0.1 * jax.random.normal(ks[1], (cout,), jnp.float32)
    gamma = 1.0 + 0.1 * jax.random.normal(ks[2], (cout,), jnp.float32)
    beta = 0.1 * jax.random.normal(ks[3], (cout,), jnp.float32)
    mean = 0.1 * jax.random.normal(ks[4], (cout,), jnp.float32)
    var = 1.0 + 0.1 * jax.random.uniform(ks[5], (cout,), jnp.float32)
    return _fold_conv_bn(w, b, gamma, beta, mean, var)


def _fold_spec_bn(convp, s, t):
    """Exactly fold spec_bn(x) = s*x + t into a layer-1 conv's (w, scale, shift).

    With the layer-1 input padded by pad_val = -t/s (so s*pad_val + t == 0),
    conv(pad0(s*x + t)) == s*conv(pad_{pad_val}(x)) + t*sum(w) at EVERY output
    position (including boundaries)."""
    w, sc, sh = convp
    wsum = jnp.sum(w, axis=0, keepdims=True)              # (1, Cout), over taps & Cin
    return (w * s, sc, sh + sc * t * wsum)


def init_params(key, n_channels, n_class):
    c1, c2, c4 = n_channels, n_channels * 2, n_channels * 4
    plan = [(1, c1), (c1, c1), (c1, c2), (c2, c2), (c2, c2), (c2, c2), (c2, c4)]
    keys = jax.random.split(key, len(plan) * 3 + 3)
    layers = []
    for li, (cin, cout) in enumerate(plan):
        layers.append({
            "c1": _conv_bn_init(keys[3 * li + 0], cin, cout),
            "c2": _conv_bn_init(keys[3 * li + 1], cout, cout),
            "c3": _conv_bn_init(keys[3 * li + 2], cin, cout),
        })

    # spec_bn = BatchNorm2d(1): scalar affine s*x + t, folded into layer 1.
    sp = 0.1 * jax.random.normal(jax.random.fold_in(key, 999), (4,), jnp.float32)
    g, bb, mu, var = 1.0 + sp[0], sp[1], sp[2], 1.0 + jnp.abs(sp[3])
    s = g / jnp.sqrt(var + 1e-5)
    t = bb - mu * s
    layers[0]["c1"] = _fold_spec_bn(layers[0]["c1"], s, t)
    layers[0]["c3"] = _fold_spec_bn(layers[0]["c3"], s, t)
    pad_val = -t / s

    # bf16 conv weights (native MXU input); scale/shift stay f32.
    layers = [{name: (w.astype(jnp.bfloat16), sc, sh)
               for name, (w, sc, sh) in lp.items()} for lp in layers]

    kd1, kd2, kbn = keys[-3], keys[-2], keys[-1]
    # dense1 (torch Linear weight is (out, in)) folded with BatchNorm1d
    w1 = jax.random.normal(jax.random.fold_in(kd1, 0), (c4, c4), jnp.float32) / jnp.sqrt(c4)
    b1 = 0.1 * jax.random.normal(jax.random.fold_in(kd1, 1), (c4,), jnp.float32)
    gamma = 1.0 + 0.1 * jax.random.normal(jax.random.fold_in(kbn, 0), (c4,), jnp.float32)
    beta = 0.1 * jax.random.normal(jax.random.fold_in(kbn, 1), (c4,), jnp.float32)
    mean = 0.1 * jax.random.normal(jax.random.fold_in(kbn, 2), (c4,), jnp.float32)
    var1 = 1.0 + 0.1 * jax.random.uniform(jax.random.fold_in(kbn, 3), (c4,), jnp.float32)
    scale = gamma / jnp.sqrt(var1 + 1e-5)
    sc1 = scale.reshape(1, c4)
    sh1 = ((b1 - mean) * scale + beta).reshape(1, c4)
    w2 = jax.random.normal(jax.random.fold_in(kd2, 0), (n_class, c4), jnp.float32) / jnp.sqrt(c4)
    b2 = 0.1 * jax.random.normal(jax.random.fold_in(kd2, 1), (n_class,), jnp.float32)

    return {"layers": layers, "pad_val": pad_val,
            "w1": jnp.transpose(w1), "sc1": sc1, "sh1": sh1,
            "w2": jnp.transpose(w2), "b2": b2.reshape(1, n_class)}


# -------------------------------- forward ----------------------------------

def short_chunk_cnn_res(wave, params, *, sr, n_fft, hop, f_min, f_max, n_mels,
                        tm_max=512, vmem_limit=None):
    x = mel_spectrogram_db(wave, sr=sr, n_fft=n_fft, hop=hop,
                           f_min=f_min, f_max=f_max, n_mels=n_mels)
    x = x[:, :, :, None].astype(jnp.float32)                 # NHWC (N, n_mels, T, 1)

    # 7 x Res_2d(stride=2); spec_bn is already folded into layer-1's conv params
    # and reproduced on the padding via pad_val.
    for li, lp in enumerate(params["layers"]):
        pv = params["pad_val"] if li == 0 else 0.0
        x = res_block(x, lp, pad_value=pv, tm_max=tm_max, vmem_limit=vmem_limit)

    n, hh, ww, c = x.shape
    if hh != 1:   # mirrors the PyTorch x.squeeze(2) requirement (H must collapse to 1)
        raise ValueError("frequency axis must collapse to 1 after 7 stride-2 layers")
    feat = x.reshape(n, ww, c)

    n_class = params["w2"].shape[-1]
    args = [feat, params["w1"], params["sc1"], params["sh1"], params["w2"], params["b2"]]
    return pl.pallas_call(
        _head_kernel,
        out_shape=jax.ShapeDtypeStruct((n, n_class), jnp.float32),
        in_specs=[pl.BlockSpec(memory_space=pltpu.MemorySpace.VMEM)] * len(args),
        out_specs=pl.BlockSpec(memory_space=pltpu.MemorySpace.VMEM),
    )(*args)


# ------------------ per-generation tile / VMEM tuning -----------------------

def _tpu_tuning():
    """(tm_max, vmem_limit_bytes) per TPU generation."""
    try:
        kind = jax.devices()[0].device_kind.lower()
    except Exception:
        kind = ""
    if "v6" in kind:                      # 128 MiB VMEM, 1.4 TB/s HBM: big tiles
        return 2048, 100 * 1024 * 1024
    if "v5e" in kind or "v5 lite" in kind or "v5lite" in kind:
        return 512, 64 * 1024 * 1024      # default scoped limit (16 MiB) too small
    if "v7" in kind:                      # 64 MiB physical VMEM: keep defaults
        return 512, None
    return 512, None


# ---------------------------------- main ------------------------------------

if __name__ == "__main__":
    # Small synthetic configuration consistent with the module's architecture.
    N_CHANNELS = 8          # model width (original 128)
    N_CLASS = 11
    SR, N_FFT, HOP = 16000, 64, 16
    F_MIN, F_MAX, N_MELS = 0.0, 8000.0, 16
    N_SAMPLES = 2048        # -> 129 time frames; 7 stride-2 layers -> (H=1, W=2)

    key = jax.random.PRNGKey(0)
    kx, kp = jax.random.split(key)
    wave = 0.5 * jax.random.normal(kx, (2, N_SAMPLES), jnp.float32)
    params = init_params(kp, N_CHANNELS, N_CLASS)

    tm_max, vmem_limit = _tpu_tuning()
    fwd = jax.jit(functools.partial(
        short_chunk_cnn_res, sr=SR, n_fft=N_FFT, hop=HOP,
        f_min=F_MIN, f_max=F_MAX, n_mels=N_MELS,
        tm_max=tm_max, vmem_limit=vmem_limit))

    probs = jax.block_until_ready(fwd(wave, params))

    assert probs.shape == (2, N_CLASS)
    assert bool(jnp.all(jnp.isfinite(probs)))
    assert bool(jnp.all(probs >= 0.0))
    assert bool(jnp.allclose(jnp.sum(probs, axis=-1), 1.0, atol=2e-3))
    print("KERNEL_OK")
</pallas_src>

<mosaic_0001>
module attributes {stable_mosaic.version = 11 : i64} {
  func.func @_dual_conv_kernel(%arg0: i32, %arg1: memref<512x9xbf16, #tpu.memory_space<vmem>>, %arg2: memref<9x8xbf16, #tpu.memory_space<vmem>>, %arg3: memref<1x8xf32, #tpu.memory_space<vmem>>, %arg4: memref<1x8xf32, #tpu.memory_space<vmem>>, %arg5: memref<9x8xbf16, #tpu.memory_space<vmem>>, %arg6: memref<1x8xf32, #tpu.memory_space<vmem>>, %arg7: memref<1x8xf32, #tpu.memory_space<vmem>>, %arg8: memref<512x8xf32, #tpu.memory_space<vmem>>, %arg9: memref<512x8xf32, #tpu.memory_space<vmem>>) attributes {dimension_semantics = [#tpu.dimension_semantics<parallel>], iteration_bounds = array<i64: 3>, scalar_prefetch = 0 : i64, scratch_operands = 0 : i64, tpu.core_type = #tpu.core_type<tc>, window_params = [{transform_indices = @transform_0, window_bounds = array<i64: 512, 9>}, {pipeline_mode = #tpu.pipeline_mode<synchronous>, transform_indices = @transform_1, window_bounds = array<i64: 9, 8>}, {pipeline_mode = #tpu.pipeline_mode<synchronous>, transform_indices = @transform_2, window_bounds = array<i64: 1, 8>}, {pipeline_mode = #tpu.pipeline_mode<synchronous>, transform_indices = @transform_3, window_bounds = array<i64: 1, 8>}, {pipeline_mode = #tpu.pipeline_mode<synchronous>, transform_indices = @transform_4, window_bounds = array<i64: 9, 8>}, {pipeline_mode = #tpu.pipeline_mode<synchronous>, transform_indices = @transform_5, window_bounds = array<i64: 1, 8>}, {pipeline_mode = #tpu.pipeline_mode<synchronous>, transform_indices = @transform_6, window_bounds = array<i64: 1, 8>}, {transform_indices = @transform_7, window_bounds = array<i64: 512, 8>}, {transform_indices = @transform_8, window_bounds = array<i64: 512, 8>}]} {
    %c0 = arith.constant 0 : index
    %c0_0 = arith.constant 0 : index
    %0 = vector.load %arg1[%c0, %c0_0] : memref<512x9xbf16, #tpu.memory_space<vmem>>, vector<512x9xbf16>
    %c0_1 = arith.constant 0 : index
    %c0_2 = arith.constant 0 : index
    %1 = vector.load %arg2[%c0_1, %c0_2] : memref<9x8xbf16, #tpu.memory_space<vmem>>, vector<9x8xbf16>
    %cst = arith.constant dense<0.000000e+00> : vector<512x8xf32>
    %2 = tpu.matmul %0, %1, %cst {dimension_numbers = #tpu.dot_dimension_numbers<[1], [0], [0], [1], [0, 0, 1, 1], [], []>} : vector<512x9xbf16>, vector<9x8xbf16>, vector<512x8xf32> -> vector<512x8xf32>
    %c0_3 = arith.constant 0 : index
    %c0_4 = arith.constant 0 : index
    %3 = vector.load %arg3[%c0_3, %c0_4] : memref<1x8xf32, #tpu.memory_space<vmem>>, vector<1x8xf32>
    %4 = vector.broadcast %3 : vector<1x8xf32> to vector<512x8xf32>
    %5 = arith.mulf %2, %4 : vector<512x8xf32>
    %c0_5 = arith.constant 0 : index
    %c0_6 = arith.constant 0 : index
    %6 = vector.load %arg4[%c0_5, %c0_6] : memref<1x8xf32, #tpu.memory_space<vmem>>, vector<1x8xf32>
    %7 = vector.broadcast %6 : vector<1x8xf32> to vector<512x8xf32>
    %8 = arith.addf %5, %7 : vector<512x8xf32>
    %cst_7 = arith.constant 0.000000e+00 : f32
    %9 = vector.broadcast %cst_7 : f32 to vector<512x8xf32>
    %10 = arith.maximumf %8, %9 : vector<512x8xf32>
    %c0_8 = arith.constant 0 : index
    %c0_9 = arith.constant 0 : index
    %11 = vector.load %arg8[%c0_8, %c0_9] : memref<512x8xf32, #tpu.memory_space<vmem>>, vector<512x8xf32>
    tpu.vector_store %arg8[%c0_8, %c0_9], %10 {strides = array<i32>} : memref<512x8xf32, #tpu.memory_space<vmem>>, vector<512x8xf32>,
    %c0_10 = arith.constant 0 : index
    %c0_11 = arith.constant 0 : index
    %12 = vector.load %arg5[%c0_10, %c0_11] : memref<9x8xbf16, #tpu.memory_space<vmem>>, vector<9x8xbf16>
    %cst_12 = arith.constant dense<0.000000e+00> : vector<512x8xf32>
    %13 = tpu.matmul %0, %12, %cst_12 {dimension_numbers = #tpu.dot_dimension_numbers<[1], [0], [0], [1], [0, 0, 1, 1], [], []>} : vector<512x9xbf16>, vector<9x8xbf16>, vector<512x8xf32> -> vector<512x8xf32>
    %c0_13 = arith.constant 0 : index
    %c0_14 = arith.constant 0 : index
    %14 = vector.load %arg6[%c0_13, %c0_14] : memref<1x8xf32, #tpu.memory_space<vmem>>, vector<1x8xf32>
    %15 = vector.broadcast %14 : vector<1x8xf32> to vector<512x8xf32>
    %16 = arith.mulf %13, %15 : vector<512x8xf32>
    %c0_15 = arith.constant 0 : index
    %c0_16 = arith.constant 0 : index
    %17 = vector.load %arg7[%c0_15, %c0_16] : memref<1x8xf32, #tpu.memory_space<vmem>>, vector<1x8xf32>
    %18 = vector.broadcast %17 : vector<1x8xf32> to vector<512x8xf32>
    %19 = arith.addf %16, %18 : vector<512x8xf32>
    %c0_17 = arith.constant 0 : index
    %c0_18 = arith.constant 0 : index
    %20 = vector.load %arg9[%c0_17, %c0_18] : memref<512x8xf32, #tpu.memory_space<vmem>>, vector<512x8xf32>
    tpu.vector_store %arg9[%c0_17, %c0_18], %19 {strides = array<i32>} : memref<512x8xf32, #tpu.memory_space<vmem>>, vector<512x8xf32>,
    return
  }
  func.func @transform_0(%arg0: i32) -> (i32, i32) {
    %c0_i32 = arith.constant 0 : i32
    %c0_i32_0 = arith.constant 0 : i32
    return %arg0, %c0_i32 : i32, i32
  }
  func.func @transform_1(%arg0: i32) -> (i32, i32) {
    %c0_i32 = arith.constant 0 : i32
    %c0_i32_0 = arith.constant 0 : i32
    %c0_i32_1 = arith.constant 0 : i32
    return %c0_i32, %c0_i32_0 : i32, i32
  }
  func.func @transform_2(%arg0: i32) -> (i32, i32) {
    %c0_i32 = arith.constant 0 : i32
    %c0_i32_0 = arith.constant 0 : i32
    %c0_i32_1 = arith.constant 0 : i32
    return %c0_i32, %c0_i32_0 : i32, i32
  }
  func.func @transform_3(%arg0: i32) -> (i32, i32) {
    %c0_i32 = arith.constant 0 : i32
    %c0_i32_0 = arith.constant 0 : i32
    %c0_i32_1 = arith.constant 0 : i32
    return %c0_i32, %c0_i32_0 : i32, i32
  }
  func.func @transform_4(%arg0: i32) -> (i32, i32) {
    %c0_i32 = arith.constant 0 : i32
    %c0_i32_0 = arith.constant 0 : i32
    %c0_i32_1 = arith.constant 0 : i32
    return %c0_i32, %c0_i32_0 : i32, i32
  }
  func.func @transform_5(%arg0: i32) -> (i32, i32) {
    %c0_i32 = arith.constant 0 : i32
    %c0_i32_0 = arith.constant 0 : i32
    %c0_i32_1 = arith.constant 0 : i32
    return %c0_i32, %c0_i32_0 : i32, i32
  }
  func.func @transform_6(%arg0: i32) -> (i32, i32) {
    %c0_i32 = arith.constant 0 : i32
    %c0_i32_0 = arith.constant 0 : i32
    %c0_i32_1 = arith.constant 0 : i32
    return %c0_i32, %c0_i32_0 : i32, i32
  }
  func.func @transform_7(%arg0: i32) -> (i32, i32) {
    %c0_i32 = arith.constant 0 : i32
    %c0_i32_0 = arith.constant 0 : i32
    return %arg0, %c0_i32 : i32, i32
  }
  func.func @transform_8(%arg0: i32) -> (i32, i32) {
    %c0_i32 = arith.constant 0 : i32
    %c0_i32_0 = arith.constant 0 : i32
    return %arg0, %c0_i32 : i32, i32
  }
}

module attributes {stable_mosaic.version = 11 : i64} {
  func.func @_conv_res_kernel(%arg0: i32, %arg1: memref<512x72xbf16, #tpu.memory_space<vmem>>, %arg2: memref<72x8xbf16, #tpu.memory_space<vmem>>, %arg3: memref<1x8xf32, #tpu.memory_space<vmem>>, %arg4: memref<1x8xf32, #tpu.memory_space<vmem>>, %arg5: memref<512x8xf32, #tpu.memory_space<vmem>>, %arg6: memref<512x8xf32, #tpu.memory_space<vmem>>) attributes {dimension_semantics = [#tpu.dimension_semantics<parallel>], iteration_bounds = array<i64: 3>, scalar_prefetch = 0 : i64, scratch_operands = 0 : i64, tpu.core_type = #tpu.core_type<tc>, window_params = [{transform_indices = @transform_0, window_bounds = array<i64: 512, 72>}, {pipeline_mode = #tpu.pipeline_mode<synchronous>, transform_indices = @transform_1, window_bounds = array<i64: 72, 8>}, {pipeline_mode = #tpu.pipeline_mode<synchronous>, transform_indices = @transform_2, window_bounds = array<i64: 1, 8>}, {pipeline_mode = #tpu.pipeline_mode<synchronous>, transform_indices = @transform_3, window_bounds = array<i64: 1, 8>}, {transform_indices = @transform_4, window_bounds = array<i64: 512, 8>}, {transform_indices = @transform_5, window_bounds = array<i64: 512, 8>}]} {
    %c0 = arith.constant 0 : index
    %c0_0 = arith.constant 0 : index
    %0 = vector.load %arg1[%c0, %c0_0] : memref<512x72xbf16, #tpu.memory_space<vmem>>, vector<512x72xbf16>
    %c0_1 = arith.constant 0 : index
    %c0_2 = arith.constant 0 : index
    %1 = vector.load %arg2[%c0_1, %c0_2] : memref<72x8xbf16, #tpu.memory_space<vmem>>, vector<72x8xbf16>
    %cst = arith.constant dense<0.000000e+00> : vector<512x8xf32>
    %2 = tpu.matmul %0, %1, %cst {dimension_numbers = #tpu.dot_dimension_numbers<[1], [0], [0], [1], [0, 0, 1, 1], [], []>} : vector<512x72xbf16>, vector<72x8xbf16>, vector<512x8xf32> -> vector<512x8xf32>
    %c0_3 = arith.constant 0 : index
    %c0_4 = arith.constant 0 : index
    %3 = vector.load %arg3[%c0_3, %c0_4] : memref<1x8xf32, #tpu.memory_space<vmem>>, vector<1x8xf32>
    %4 = vector.broadcast %3 : vector<1x8xf32> to vector<512x8xf32>
    %5 = arith.mulf %2, %4 : vector<512x8xf32>
    %c0_5 = arith.constant 0 : index
    %c0_6 = arith.constant 0 : index
    %6 = vector.load %arg4[%c0_5, %c0_6] : memref<1x8xf32, #tpu.memory_space<vmem>>, vector<1x8xf32>
    %7 = vector.broadcast %6 : vector<1x8xf32> to vector<512x8xf32>
    %8 = arith.addf %5, %7 : vector<512x8xf32>
    %c0_7 = arith.constant 0 : index
    %c0_8 = arith.constant 0 : index
    %9 = vector.load %arg5[%c0_7, %c0_8] : memref<512x8xf32, #tpu.memory_space<vmem>>, vector<512x8xf32>
    %10 = arith.addf %8, %9 : vector<512x8xf32>
    %cst_9 = arith.constant 0.000000e+00 : f32
    %11 = vector.broadcast %cst_9 : f32 to vector<512x8xf32>
    %12 = arith.maximumf %10, %11 : vector<512x8xf32>
    %c0_10 = arith.constant 0 : index
    %c0_11 = arith.constant 0 : index
    %13 = vector.load %arg6[%c0_10, %c0_11] : memref<512x8xf32, #tpu.memory_space<vmem>>, vector<512x8xf32>
    tpu.vector_store %arg6[%c0_10, %c0_11], %12 {strides = array<i32>} : memref<512x8xf32, #tpu.memory_space<vmem>>, vector<512x8xf32>,
    return
  }
  func.func @transform_0(%arg0: i32) -> (i32, i32) {
    %c0_i32 = arith.constant 0 : i32
    %c0_i32_0 = arith.constant 0 : i32
    return %arg0, %c0_i32 : i32, i32
  }
  func.func @transform_1(%arg0: i32) -> (i32, i32) {
    %c0_i32 = arith.constant 0 : i32
    %c0_i32_0 = arith.constant 0 : i32
    %c0_i32_1 = arith.constant 0 : i32
    return %c0_i32, %c0_i32_0 : i32, i32
  }
  func.func @transform_2(%arg0: i32) -> (i32, i32) {
    %c0_i32 = arith.constant 0 : i32
    %c0_i32_0 = arith.constant 0 : i32
    %c0_i32_1 = arith.constant 0 : i32
    return %c0_i32, %c0_i32_0 : i32, i32
  }
  func.func @transform_3(%arg0: i32) -> (i32, i32) {
    %c0_i32 = arith.constant 0 : i32
    %c0_i32_0 = arith.constant 0 : i32
    %c0_i32_1 = arith.constant 0 : i32
    return %c0_i32, %c0_i32_0 : i32, i32
  }
  func.func @transform_4(%arg0: i32) -> (i32, i32) {
    %c0_i32 = arith.constant 0 : i32
    %c0_i32_0 = arith.constant 0 : i32
    return %arg0, %c0_i32 : i32, i32
  }
  func.func @transform_5(%arg0: i32) -> (i32, i32) {
    %c0_i32 = arith.constant 0 : i32
    %c0_i32_0 = arith.constant 0 : i32
    return %arg0, %c0_i32 : i32, i32
  }
}

module attributes {stable_mosaic.version = 11 : i64} {
  func.func @_dual_conv_kernel(%arg0: i32, %arg1: memref<264x72xbf16, #tpu.memory_space<vmem>>, %arg2: memref<72x8xbf16, #tpu.memory_space<vmem>>, %arg3: memref<1x8xf32, #tpu.memory_space<vmem>>, %arg4: memref<1x8xf32, #tpu.memory_space<vmem>>, %arg5: memref<72x8xbf16, #tpu.memory_space<vmem>>, %arg6: memref<1x8xf32, #tpu.memory_space<vmem>>, %arg7: memref<1x8xf32, #tpu.memory_space<vmem>>, %arg8: memref<264x8xf32, #tpu.memory_space<vmem>>, %arg9: memref<264x8xf32, #tpu.memory_space<vmem>>) attributes {dimension_semantics = [#tpu.dimension_semantics<parallel>], iteration_bounds = array<i64: 1>, scalar_prefetch = 0 : i64, scratch_operands = 0 : i64, tpu.core_type = #tpu.core_type<tc>, window_params = [{transform_indices = @transform_0, window_bounds = array<i64: 264, 72>}, {pipeline_mode = #tpu.pipeline_mode<synchronous>, transform_indices = @transform_1, window_bounds = array<i64: 72, 8>}, {pipeline_mode = #tpu.pipeline_mode<synchronous>, transform_indices = @transform_2, window_bounds = array<i64: 1, 8>}, {pipeline_mode = #tpu.pipeline_mode<synchronous>, transform_indices = @transform_3, window_bounds = array<i64: 1, 8>}, {pipeline_mode = #tpu.pipeline_mode<synchronous>, transform_indices = @transform_4, window_bounds = array<i64: 72, 8>}, {pipeline_mode = #tpu.pipeline_mode<synchronous>, transform_indices = @transform_5, window_bounds = array<i64: 1, 8>}, {pipeline_mode = #tpu.pipeline_mode<synchronous>, transform_indices = @transform_6, window_bounds = array<i64: 1, 8>}, {transform_indices = @transform_7, window_bounds = array<i64: 264, 8>}, {transform_indices = @transform_8, window_bounds = array<i64: 264, 8>}]} {
    %c0 = arith.constant 0 : index
    %c0_0 = arith.constant 0 : index
    %0 = vector.load %arg1[%c0, %c0_0] : memref<264x72xbf16, #tpu.memory_space<vmem>>, vector<264x72xbf16>
    %c0_1 = arith.constant 0 : index
    %c0_2 = arith.constant 0 : index
    %1 = vector.load %arg2[%c0_1, %c0_2] : memref<72x8xbf16, #tpu.memory_space<vmem>>, vector<72x8xbf16>
    %cst = arith.constant dense<0.000000e+00> : vector<264x8xf32>
    %2 = tpu.matmul %0, %1, %cst {dimension_numbers = #tpu.dot_dimension_numbers<[1], [0], [0], [1], [0, 0, 1, 1], [], []>} : vector<264x72xbf16>, vector<72x8xbf16>, vector<264x8xf32> -> vector<264x8xf32>
    %c0_3 = arith.constant 0 : index
    %c0_4 = arith.constant 0 : index
    %3 = vector.load %arg3[%c0_3, %c0_4] : memref<1x8xf32, #tpu.memory_space<vmem>>, vector<1x8xf32>
    %4 = vector.broadcast %3 : vector<1x8xf32> to vector<264x8xf32>
    %5 = arith.mulf %2, %4 : vector<264x8xf32>
    %c0_5 = arith.constant 0 : index
    %c0_6 = arith.constant 0 : index
    %6 = vector.load %arg4[%c0_5, %c0_6] : memref<1x8xf32, #tpu.memory_space<vmem>>, vector<1x8xf32>
    %7 = vector.broadcast %6 : vector<1x8xf32> to vector<264x8xf32>
    %8 = arith.addf %5, %7 : vector<264x8xf32>
    %cst_7 = arith.constant 0.000000e+00 : f32
    %9 = vector.broadcast %cst_7 : f32 to vector<264x8xf32>
    %10 = arith.maximumf %8, %9 : vector<264x8xf32>
    %c0_8 = arith.constant 0 : index
    %c0_9 = arith.constant 0 : index
    %11 = vector.load %arg8[%c0_8, %c0_9] : memref<264x8xf32, #tpu.memory_space<vmem>>, vector<264x8xf32>
    tpu.vector_store %arg8[%c0_8, %c0_9], %10 {strides = array<i32>} : memref<264x8xf32, #tpu.memory_space<vmem>>, vector<264x8xf32>,
    %c0_10 = arith.constant 0 : index
    %c0_11 = arith.constant 0 : index
    %12 = vector.load %arg5[%c0_10, %c0_11] : memref<72x8xbf16, #tpu.memory_space<vmem>>, vector<72x8xbf16>
    %cst_12 = arith.constant dense<0.000000e+00> : vector<264x8xf32>
    %13 = tpu.matmul %0, %12, %cst_12 {dimension_numbers = #tpu.dot_dimension_numbers<[1], [0], [0], [1], [0, 0, 1, 1], [], []>} : vector<264x72xbf16>, vector<72x8xbf16>, vector<264x8xf32> -> vector<264x8xf32>
    %c0_13 = arith.constant 0 : index
    %c0_14 = arith.constant 0 : index
    %14 = vector.load %arg6[%c0_13, %c0_14] : memref<1x8xf32, #tpu.memory_space<vmem>>, vector<1x8xf32>
    %15 = vector.broadcast %14 : vector<1x8xf32> to vector<264x8xf32>
    %16 = arith.mulf %13, %15 : vector<264x8xf32>
    %c0_15 = arith.constant 0 : index
    %c0_16 = arith.constant 0 : index
    %17 = vector.load %arg7[%c0_15, %c0_16] : memref<1x8xf32, #tpu.memory_space<vmem>>, vector<1x8xf32>
    %18 = vector.broadcast %17 : vector<1x8xf32> to vector<264x8xf32>
    %19 = arith.addf %16, %18 : vector<264x8xf32>
    %c0_17 = arith.constant 0 : index
    %c0_18 = arith.constant 0 : index
    %20 = vector.load %arg9[%c0_17, %c0_18] : memref<264x8xf32, #tpu.memory_space<vmem>>, vector<264x8xf32>
    tpu.vector_store %arg9[%c0_17, %c0_18], %19 {strides = array<i32>} : memref<264x8xf32, #tpu.memory_space<vmem>>, vector<264x8xf32>,
    return
  }
  func.func @transform_0(%arg0: i32) -> (i32, i32) {
    %c0_i32 = arith.constant 0 : i32
    %c0_i32_0 = arith.constant 0 : i32
    return %arg0, %c0_i32 : i32, i32
  }
  func.func @transform_1(%arg0: i32) -> (i32, i32) {
    %c0_i32 = arith.constant 0 : i32
    %c0_i32_0 = arith.constant 0 : i32
    %c0_i32_1 = arith.constant 0 : i32
    return %c0_i32, %c0_i32_0 : i32, i32
  }
  func.func @transform_2(%arg0: i32) -> (i32, i32) {
    %c0_i32 = arith.constant 0 : i32
    %c0_i32_0 = arith.constant 0 : i32
    %c0_i32_1 = arith.constant 0 : i32
    return %c0_i32, %c0_i32_0 : i32, i32
  }
  func.func @transform_3(%arg0: i32) -> (i32, i32) {
    %c0_i32 = arith.constant 0 : i32
    %c0_i32_0 = arith.constant 0 : i32
    %c0_i32_1 = arith.constant 0 : i32
    return %c0_i32, %c0_i32_0 : i32, i32
  }
  func.func @transform_4(%arg0: i32) -> (i32, i32) {
    %c0_i32 = arith.constant 0 : i32
    %c0_i32_0 = arith.constant 0 : i32
    %c0_i32_1 = arith.constant 0 : i32
    return %c0_i32, %c0_i32_0 : i32, i32
  }
  func.func @transform_5(%arg0: i32) -> (i32, i32) {
    %c0_i32 = arith.constant 0 : i32
    %c0_i32_0 = arith.constant 0 : i32
    %c0_i32_1 = arith.constant 0 : i32
    return %c0_i32, %c0_i32_0 : i32, i32
  }
  func.func @transform_6(%arg0: i32) -> (i32, i32) {
    %c0_i32 = arith.constant 0 : i32
    %c0_i32_0 = arith.constant 0 : i32
    %c0_i32_1 = arith.constant 0 : i32
    return %c0_i32, %c0_i32_0 : i32, i32
  }
  func.func @transform_7(%arg0: i32) -> (i32, i32) {
    %c0_i32 = arith.constant 0 : i32
    %c0_i32_0 = arith.constant 0 : i32
    return %arg0, %c0_i32 : i32, i32
  }
  func.func @transform_8(%arg0: i32) -> (i32, i32) {
    %c0_i32 = arith.constant 0 : i32
    %c0_i32_0 = arith.constant 0 : i32
    return %arg0, %c0_i32 : i32, i32
  }
}

module attributes {stable_mosaic.version = 11 : i64} {
  func.func @_conv_res_kernel(%arg0: i32, %arg1: memref<264x72xbf16, #tpu.memory_space<vmem>>, %arg2: memref<72x8xbf16, #tpu.memory_space<vmem>>, %arg3: memref<1x8xf32, #tpu.memory_space<vmem>>, %arg4: memref<1x8xf32, #tpu.memory_space<vmem>>, %arg5: memref<264x8xf32, #tpu.memory_space<vmem>>, %arg6: memref<264x8xf32, #tpu.memory_space<vmem>>) attributes {dimension_semantics = [#tpu.dimension_semantics<parallel>], iteration_bounds = array<i64: 1>, scalar_prefetch = 0 : i64, scratch_operands = 0 : i64, tpu.core_type = #tpu.core_type<tc>, window_params = [{transform_indices = @transform_0, window_bounds = array<i64: 264, 72>}, {pipeline_mode = #tpu.pipeline_mode<synchronous>, transform_indices = @transform_1, window_bounds = array<i64: 72, 8>}, {pipeline_mode = #tpu.pipeline_mode<synchronous>, transform_indices = @transform_2, window_bounds = array<i64: 1, 8>}, {pipeline_mode = #tpu.pipeline_mode<synchronous>, transform_indices = @transform_3, window_bounds = array<i64: 1, 8>}, {transform_indices = @transform_4, window_bounds = array<i64: 264, 8>}, {transform_indices = @transform_5, window_bounds = array<i64: 264, 8>}]} {
    %c0 = arith.constant 0 : index
    %c0_0 = arith.constant 0 : index
    %0 = vector.load %arg1[%c0, %c0_0] : memref<264x72xbf16, #tpu.memory_space<vmem>>, vector<264x72xbf16>
    %c0_1 = arith.constant 0 : index
    %c0_2 = arith.constant 0 : index
    %1 = vector.load %arg2[%c0_1, %c0_2] : memref<72x8xbf16, #tpu.memory_space<vmem>>, vector<72x8xbf16>
    %cst = arith.constant dense<0.000000e+00> : vector<264x8xf32>
    %2 = tpu.matmul %0, %1, %cst {dimension_numbers = #tpu.dot_dimension_numbers<[1], [0], [0], [1], [0, 0, 1, 1], [], []>} : vector<264x72xbf16>, vector<72x8xbf16>, vector<264x8xf32> -> vector<264x8xf32>
    %c0_3 = arith.constant 0 : index
    %c0_4 = arith.constant 0 : index
    %3 = vector.load %arg3[%c0_3, %c0_4] : memref<1x8xf32, #tpu.memory_space<vmem>>, vector<1x8xf32>
    %4 = vector.broadcast %3 : vector<1x8xf32> to vector<264x8xf32>
    %5 = arith.mulf %2, %4 : vector<264x8xf32>
    %c0_5 = arith.constant 0 : index
    %c0_6 = arith.constant 0 : index
    %6 = vector.load %arg4[%c0_5, %c0_6] : memref<1x8xf32, #tpu.memory_space<vmem>>, vector<1x8xf32>
    %7 = vector.broadcast %6 : vector<1x8xf32> to vector<264x8xf32>
    %8 = arith.addf %5, %7 : vector<264x8xf32>
    %c0_7 = arith.constant 0 : index
    %c0_8 = arith.constant 0 : index
    %9 = vector.load %arg5[%c0_7, %c0_8] : memref<264x8xf32, #tpu.memory_space<vmem>>, vector<264x8xf32>
    %10 = arith.addf %8, %9 : vector<264x8xf32>
    %cst_9 = arith.constant 0.000000e+00 : f32
    %11 = vector.broadcast %cst_9 : f32 to vector<264x8xf32>
    %12 = arith.maximumf %10, %11 : vector<264x8xf32>
    %c0_10 = arith.constant 0 : index
    %c0_11 = arith.constant 0 : index
    %13 = vector.load %arg6[%c0_10, %c0_11] : memref<264x8xf32, #tpu.memory_space<vmem>>, vector<264x8xf32>
    tpu.vector_store %arg6[%c0_10, %c0_11], %12 {strides = array<i32>} : memref<264x8xf32, #tpu.memory_space<vmem>>, vector<264x8xf32>,
    return
  }
  func.func @transform_0(%arg0: i32) -> (i32, i32) {
    %c0_i32 = arith.constant 0 : i32
    %c0_i32_0 = arith.constant 0 : i32
    return %arg0, %c0_i32 : i32, i32
  }
  func.func @transform_1(%arg0: i32) -> (i32, i32) {
    %c0_i32 = arith.constant 0 : i32
    %c0_i32_0 = arith.constant 0 : i32
    %c0_i32_1 = arith.constant 0 : i32
    return %c0_i32, %c0_i32_0 : i32, i32
  }
  func.func @transform_2(%arg0: i32) -> (i32, i32) {
    %c0_i32 = arith.constant 0 : i32
    %c0_i32_0 = arith.constant 0 : i32
    %c0_i32_1 = arith.constant 0 : i32
    return %c0_i32, %c0_i32_0 : i32, i32
  }
  func.func @transform_3(%arg0: i32) -> (i32, i32) {
    %c0_i32 = arith.constant 0 : i32
    %c0_i32_0 = arith.constant 0 : i32
    %c0_i32_1 = arith.constant 0 : i32
    return %c0_i32, %c0_i32_0 : i32, i32
  }
  func.func @transform_4(%arg0: i32) -> (i32, i32) {
    %c0_i32 = arith.constant 0 : i32
    %c0_i32_0 = arith.constant 0 : i32
    return %arg0, %c0_i32 : i32, i32
  }
  func.func @transform_5(%arg0: i32) -> (i32, i32) {
    %c0_i32 = arith.constant 0 : i32
    %c0_i32_0 = arith.constant 0 : i32
    return %arg0, %c0_i32 : i32, i32
  }
}

module attributes {stable_mosaic.version = 11 : i64} {
  func.func @_dual_conv_kernel(%arg0: i32, %arg1: memref<72x72xbf16, #tpu.memory_space<vmem>>, %arg2: memref<72x16xbf16, #tpu.memory_space<vmem>>, %arg3: memref<1x16xf32, #tpu.memory_space<vmem>>, %arg4: memref<1x16xf32, #tpu.memory_space<vmem>>, %arg5: memref<72x16xbf16, #tpu.memory_space<vmem>>, %arg6: memref<1x16xf32, #tpu.memory_space<vmem>>, %arg7: memref<1x16xf32, #tpu.memory_space<vmem>>, %arg8: memref<72x16xf32, #tpu.memory_space<vmem>>, %arg9: memref<72x16xf32, #tpu.memory_space<vmem>>) attributes {dimension_semantics = [#tpu.dimension_semantics<parallel>], iteration_bounds = array<i64: 1>, scalar_prefetch = 0 : i64, scratch_operands = 0 : i64, tpu.core_type = #tpu.core_type<tc>, window_params = [{transform_indices = @transform_0, window_bounds = array<i64: 72, 72>}, {pipeline_mode = #tpu.pipeline_mode<synchronous>, transform_indices = @transform_1, window_bounds = array<i64: 72, 16>}, {pipeline_mode = #tpu.pipeline_mode<synchronous>, transform_indices = @transform_2, window_bounds = array<i64: 1, 16>}, {pipeline_mode = #tpu.pipeline_mode<synchronous>, transform_indices = @transform_3, window_bounds = array<i64: 1, 16>}, {pipeline_mode = #tpu.pipeline_mode<synchronous>, transform_indices = @transform_4, window_bounds = array<i64: 72, 16>}, {pipeline_mode = #tpu.pipeline_mode<synchronous>, transform_indices = @transform_5, window_bounds = array<i64: 1, 16>}, {pipeline_mode = #tpu.pipeline_mode<synchronous>, transform_indices = @transform_6, window_bounds = array<i64: 1, 16>}, {transform_indices = @transform_7, window_bounds = array<i64: 72, 16>}, {transform_indices = @transform_8, window_bounds = array<i64: 72, 16>}]} {
    %c0 = arith.constant 0 : index
    %c0_0 = arith.constant 0 : index
    %0 = vector.load %arg1[%c0, %c0_0] : memref<72x72xbf16, #tpu.memory_space<vmem>>, vector<72x72xbf16>
    %c0_1 = arith.constant 0 : index
    %c0_2 = arith.constant 0 : index
    %1 = vector.load %arg2[%c0_1, %c0_2] : memref<72x16xbf16, #tpu.memory_space<vmem>>, vector<72x16xbf16>
    %cst = arith.constant dense<0.000000e+00> : vector<72x16xf32>
    %2 = tpu.matmul %0, %1, %cst {dimension_numbers = #tpu.dot_dimension_numbers<[1], [0], [0], [1], [0, 0, 1, 1], [], []>} : vector<72x72xbf16>, vector<72x16xbf16>, vector<72x16xf32> -> vector<72x16xf32>
    %c0_3 = arith.constant 0 : index
    %c0_4 = arith.constant 0 : index
    %3 = vector.load %arg3[%c0_3, %c0_4] : memref<1x16xf32, #tpu.memory_space<vmem>>, vector<1x16xf32>
    %4 = vector.broadcast %3 : vector<1x16xf32> to vector<72x16xf32>
    %5 = arith.mulf %2, %4 : vector<72x16xf32>
    %c0_5 = arith.constant 0 : index
    %c0_6 = arith.constant 0 : index
    %6 = vector.load %arg4[%c0_5, %c0_6] : memref<1x16xf32, #tpu.memory_space<vmem>>, vector<1x16xf32>
    %7 = vector.broadcast %6 : vector<1x16xf32> to vector<72x16xf32>
    %8 = arith.addf %5, %7 : vector<72x16xf32>
    %cst_7 = arith.constant 0.000000e+00 : f32
    %9 = vector.broadcast %cst_7 : f32 to vector<72x16xf32>
    %10 = arith.maximumf %8, %9 : vector<72x16xf32>
    %c0_8 = arith.constant 0 : index
    %c0_9 = arith.constant 0 : index
    %11 = vector.load %arg8[%c0_8, %c0_9] : memref<72x16xf32, #tpu.memory_space<vmem>>, vector<72x16xf32>
    tpu.vector_store %arg8[%c0_8, %c0_9], %10 {strides = array<i32>} : memref<72x16xf32, #tpu.memory_space<vmem>>, vector<72x16xf32>,
    %c0_10 = arith.constant 0 : index
    %c0_11 = arith.constant 0 : index
    %12 = vector.load %arg5[%c0_10, %c0_11] : memref<72x16xbf16, #tpu.memory_space<vmem>>, vector<72x16xbf16>
    %cst_12 = arith.constant dense<0.000000e+00> : vector<72x16xf32>
    %13 = tpu.matmul %0, %12, %cst_12 {dimension_numbers = #tpu.dot_dimension_numbers<[1], [0], [0], [1], [0, 0, 1, 1], [], []>} : vector<72x72xbf16>, vector<72x16xbf16>, vector<72x16xf32> -> vector<72x16xf32>
    %c0_13 = arith.constant 0 : index
    %c0_14 = arith.constant 0 : index
    %14 = vector.load %arg6[%c0_13, %c0_14] : memref<1x16xf32, #tpu.memory_space<vmem>>, vector<1x16xf32>
    %15 = vector.broadcast %14 : vector<1x16xf32> to vector<72x16xf32>
    %16 = arith.mulf %13, %15 : vector<72x16xf32>
    %c0_15 = arith.constant 0 : index
    %c0_16 = arith.constant 0 : index
    %17 = vector.load %arg7[%c0_15, %c0_16] : memref<1x16xf32, #tpu.memory_space<vmem>>, vector<1x16xf32>
    %18 = vector.broadcast %17 : vector<1x16xf32> to vector<72x16xf32>
    %19 = arith.addf %16, %18 : vector<72x16xf32>
    %c0_17 = arith.constant 0 : index
    %c0_18 = arith.constant 0 : index
    %20 = vector.load %arg9[%c0_17, %c0_18] : memref<72x16xf32, #tpu.memory_space<vmem>>, vector<72x16xf32>
    tpu.vector_store %arg9[%c0_17, %c0_18], %19 {strides = array<i32>} : memref<72x16xf32, #tpu.memory_space<vmem>>, vector<72x16xf32>,
    return
  }
  func.func @transform_0(%arg0: i32) -> (i32, i32) {
    %c0_i32 = arith.constant 0 : i32
    %c0_i32_0 = arith.constant 0 : i32
    return %arg0, %c0_i32 : i32, i32
  }
  func.func @transform_1(%arg0: i32) -> (i32, i32) {
    %c0_i32 = arith.constant 0 : i32
    %c0_i32_0 = arith.constant 0 : i32
    %c0_i32_1 = arith.constant 0 : i32
    return %c0_i32, %c0_i32_0 : i32, i32
  }
  func.func @transform_2(%arg0: i32) -> (i32, i32) {
    %c0_i32 = arith.constant 0 : i32
    %c0_i32_0 = arith.constant 0 : i32
    %c0_i32_1 = arith.constant 0 : i32
    return %c0_i32, %c0_i32_0 : i32, i32
  }
  func.func @transform_3(%arg0: i32) -> (i32, i32) {
    %c0_i32 = arith.constant 0 : i32
    %c0_i32_0 = arith.constant 0 : i32
    %c0_i32_1 = arith.constant 0 : i32
    return %c0_i32, %c0_i32_0 : i32, i32
  }
  func.func @transform_4(%arg0: i32) -> (i32, i32) {
    %c0_i32 = arith.constant 0 : i32
    %c0_i32_0 = arith.constant 0 : i32
    %c0_i32_1 = arith.constant 0 : i32
    return %c0_i32, %c0_i32_0 : i32, i32
  }
  func.func @transform_5(%arg0: i32) -> (i32, i32) {
    %c0_i32 = arith.constant 0 : i32
    %c0_i32_0 = arith.constant 0 : i32
    %c0_i32_1 = arith.constant 0 : i32
    return %c0_i32, %c0_i32_0 : i32, i32
  }
  func.func @transform_6(%arg0: i32) -> (i32, i32) {
    %c0_i32 = arith.constant 0 : i32
    %c0_i32_0 = arith.constant 0 : i32
    %c0_i32_1 = arith.constant 0 : i32
    return %c0_i32, %c0_i32_0 : i32, i32
  }
  func.func @transform_7(%arg0: i32) -> (i32, i32) {
    %c0_i32 = arith.constant 0 : i32
    %c0_i32_0 = arith.constant 0 : i32
    return %arg0, %c0_i32 : i32, i32
  }
  func.func @transform_8(%arg0: i32) -> (i32, i32) {
    %c0_i32 = arith.constant 0 : i32
    %c0_i32_0 = arith.constant 0 : i32
    return %arg0, %c0_i32 : i32, i32
  }
}

module attributes {stable_mosaic.version = 11 : i64} {
  func.func @_conv_res_kernel(%arg0: i32, %arg1: memref<72x144xbf16, #tpu.memory_space<vmem>>, %arg2: memref<144x16xbf16, #tpu.memory_space<vmem>>, %arg3: memref<1x16xf32, #tpu.memory_space<vmem>>, %arg4: memref<1x16xf32, #tpu.memory_space<vmem>>, %arg5: memref<72x16xf32, #tpu.memory_space<vmem>>, %arg6: memref<72x16xf32, #tpu.memory_space<vmem>>) attributes {dimension_semantics = [#tpu.dimension_semantics<parallel>], iteration_bounds = array<i64: 1>, scalar_prefetch = 0 : i64, scratch_operands = 0 : i64, tpu.core_type = #tpu.core_type<tc>, window_params = [{transform_indices = @transform_0, window_bounds = array<i64: 72, 144>}, {pipeline_mode = #tpu.pipeline_mode<synchronous>, transform_indices = @transform_1, window_bounds = array<i64: 144, 16>}, {pipeline_mode = #tpu.pipeline_mode<synchronous>, transform_indices = @transform_2, window_bounds = array<i64: 1, 16>}, {pipeline_mode = #tpu.pipeline_mode<synchronous>, transform_indices = @transform_3, window_bounds = array<i64: 1, 16>}, {transform_indices = @transform_4, window_bounds = array<i64: 72, 16>}, {transform_indices = @transform_5, window_bounds = array<i64: 72, 16>}]} {
    %c0 = arith.constant 0 : index
    %c0_0 = arith.constant 0 : index
    %0 = vector.load %arg1[%c0, %c0_0] : memref<72x144xbf16, #tpu.memory_space<vmem>>, vector<72x144xbf16>
    %c0_1 = arith.constant 0 : index
    %c0_2 = arith.constant 0 : index
    %1 = vector.load %arg2[%c0_1, %c0_2] : memref<144x16xbf16, #tpu.memory_space<vmem>>, vector<144x16xbf16>
    %cst = arith.constant dense<0.000000e+00> : vector<72x16xf32>
    %2 = tpu.matmul %0, %1, %cst {dimension_numbers = #tpu.dot_dimension_numbers<[1], [0], [0], [1], [0, 0, 1, 1], [], []>} : vector<72x144xbf16>, vector<144x16xbf16>, vector<72x16xf32> -> vector<72x16xf32>
    %c0_3 = arith.constant 0 : index
    %c0_4 = arith.constant 0 : index
    %3 = vector.load %arg3[%c0_3, %c0_4] : memref<1x16xf32, #tpu.memory_space<vmem>>, vector<1x16xf32>
    %4 = vector.broadcast %3 : vector<1x16xf32> to vector<72x16xf32>
    %5 = arith.mulf %2, %4 : vector<72x16xf32>
    %c0_5 = arith.constant 0 : index
    %c0_6 = arith.constant 0 : index
    %6 = vector.load %arg4[%c0_5, %c0_6] : memref<1x16xf32, #tpu.memory_space<vmem>>, vector<1x16xf32>
    %7 = vector.broadcast %6 : vector<1x16xf32> to vector<72x16xf32>
    %8 = arith.addf %5, %7 : vector<72x16xf32>
    %c0_7 = arith.constant 0 : index
    %c0_8 = arith.constant 0 : index
    %9 = vector.load %arg5[%c0_7, %c0_8] : memref<72x16xf32, #tpu.memory_space<vmem>>, vector<72x16xf32>
    %10 = arith.addf %8, %9 : vector<72x16xf32>
    %cst_9 = arith.constant 0.000000e+00 : f32
    %11 = vector.broadcast %cst_9 : f32 to vector<72x16xf32>
    %12 = arith.maximumf %10, %11 : vector<72x16xf32>
    %c0_10 = arith.constant 0 : index
    %c0_11 = arith.constant 0 : index
    %13 = vector.load %arg6[%c0_10, %c0_11] : memref<72x16xf32, #tpu.memory_space<vmem>>, vector<72x16xf32>
    tpu.vector_store %arg6[%c0_10, %c0_11], %12 {strides = array<i32>} : memref<72x16xf32, #tpu.memory_space<vmem>>, vector<72x16xf32>,
    return
  }
  func.func @transform_0(%arg0: i32) -> (i32, i32) {
    %c0_i32 = arith.constant 0 : i32
    %c0_i32_0 = arith.constant 0 : i32
    return %arg0, %c0_i32 : i32, i32
  }
  func.func @transform_1(%arg0: i32) -> (i32, i32) {
    %c0_i32 = arith.constant 0 : i32
    %c0_i32_0 = arith.constant 0 : i32
    %c0_i32_1 = arith.constant 0 : i32
    return %c0_i32, %c0_i32_0 : i32, i32
  }
  func.func @transform_2(%arg0: i32) -> (i32, i32) {
    %c0_i32 = arith.constant 0 : i32
    %c0_i32_0 = arith.constant 0 : i32
    %c0_i32_1 = arith.constant 0 : i32
    return %c0_i32, %c0_i32_0 : i32, i32
  }
  func.func @transform_3(%arg0: i32) -> (i32, i32) {
    %c0_i32 = arith.constant 0 : i32
    %c0_i32_0 = arith.constant 0 : i32
    %c0_i32_1 = arith.constant 0 : i32
    return %c0_i32, %c0_i32_0 : i32, i32
  }
  func.func @transform_4(%arg0: i32) -> (i32, i32) {
    %c0_i32 = arith.constant 0 : i32
    %c0_i32_0 = arith.constant 0 : i32
    return %arg0, %c0_i32 : i32, i32
  }
  func.func @transform_5(%arg0: i32) -> (i32, i32) {
    %c0_i32 = arith.constant 0 : i32
    %c0_i32_0 = arith.constant 0 : i32
    return %arg0, %c0_i32 : i32, i32
  }
}

module attributes {stable_mosaic.version = 11 : i64} {
  func.func @_dual_conv_kernel(%arg0: i32, %arg1: memref<24x144xbf16, #tpu.memory_space<vmem>>, %arg2: memref<144x16xbf16, #tpu.memory_space<vmem>>, %arg3: memref<1x16xf32, #tpu.memory_space<vmem>>, %arg4: memref<1x16xf32, #tpu.memory_space<vmem>>, %arg5: memref<144x16xbf16, #tpu.memory_space<vmem>>, %arg6: memref<1x16xf32, #tpu.memory_space<vmem>>, %arg7: memref<1x16xf32, #tpu.memory_space<vmem>>, %arg8: memref<24x16xf32, #tpu.memory_space<vmem>>, %arg9: memref<24x16xf32, #tpu.memory_space<vmem>>) attributes {dimension_semantics = [#tpu.dimension_semantics<parallel>], iteration_bounds = array<i64: 1>, scalar_prefetch = 0 : i64, scratch_operands = 0 : i64, tpu.core_type = #tpu.core_type<tc>, window_params = [{transform_indices = @transform_0, window_bounds = array<i64: 24, 144>}, {pipeline_mode = #tpu.pipeline_mode<synchronous>, transform_indices = @transform_1, window_bounds = array<i64: 144, 16>}, {pipeline_mode = #tpu.pipeline_mode<synchronous>, transform_indices = @transform_2, window_bounds = array<i64: 1, 16>}, {pipeline_mode = #tpu.pipeline_mode<synchronous>, transform_indices = @transform_3, window_bounds = array<i64: 1, 16>}, {pipeline_mode = #tpu.pipeline_mode<synchronous>, transform_indices = @transform_4, window_bounds = array<i64: 144, 16>}, {pipeline_mode = #tpu.pipeline_mode<synchronous>, transform_indices = @transform_5, window_bounds = array<i64: 1, 16>}, {pipeline_mode = #tpu.pipeline_mode<synchronous>, transform_indices = @transform_6, window_bounds = array<i64: 1, 16>}, {transform_indices = @transform_7, window_bounds = array<i64: 24, 16>}, {transform_indices = @transform_8, window_bounds = array<i64: 24, 16>}]} {
    %c0 = arith.constant 0 : index
    %c0_0 = arith.constant 0 : index
    %0 = vector.load %arg1[%c0, %c0_0] : memref<24x144xbf16, #tpu.memory_space<vmem>>, vector<24x144xbf16>
    %c0_1 = arith.constant 0 : index
    %c0_2 = arith.constant 0 : index
    %1 = vector.load %arg2[%c0_1, %c0_2] : memref<144x16xbf16, #tpu.memory_space<vmem>>, vector<144x16xbf16>
    %cst = arith.constant dense<0.000000e+00> : vector<24x16xf32>
    %2 = tpu.matmul %0, %1, %cst {dimension_numbers = #tpu.dot_dimension_numbers<[1], [0], [0], [1], [0, 0, 1, 1], [], []>} : vector<24x144xbf16>, vector<144x16xbf16>, vector<24x16xf32> -> vector<24x16xf32>
    %c0_3 = arith.constant 0 : index
    %c0_4 = arith.constant 0 : index
    %3 = vector.load %arg3[%c0_3, %c0_4] : memref<1x16xf32, #tpu.memory_space<vmem>>, vector<1x16xf32>
    %4 = vector.broadcast %3 : vector<1x16xf32> to vector<24x16xf32>
    %5 = arith.mulf %2, %4 : vector<24x16xf32>
    %c0_5 = arith.constant 0 : index
    %c0_6 = arith.constant 0 : index
    %6 = vector.load %arg4[%c0_5, %c0_6] : memref<1x16xf32, #tpu.memory_space<vmem>>, vector<1x16xf32>
    %7 = vector.broadcast %6 : vector<1x16xf32> to vector<24x16xf32>
    %8 = arith.addf %5, %7 : vector<24x16xf32>
    %cst_7 = arith.constant 0.000000e+00 : f32
    %9 = vector.broadcast %cst_7 : f32 to vector<24x16xf32>
    %10 = arith.maximumf %8, %9 : vector<24x16xf32>
    %c0_8 = arith.constant 0 : index
    %c0_9 = arith.constant 0 : index
    %11 = vector.load %arg8[%c0_8, %c0_9] : memref<24x16xf32, #tpu.memory_space<vmem>>, vector<24x16xf32>
    tpu.vector_store %arg8[%c0_8, %c0_9], %10 {strides = array<i32>} : memref<24x16xf32, #tpu.memory_space<vmem>>, vector<24x16xf32>,
    %c0_10 = arith.constant 0 : index
    %c0_11 = arith.constant 0 : index
    %12 = vector.load %arg5[%c0_10, %c0_11] : memref<144x16xbf16, #tpu.memory_space<vmem>>, vector<144x16xbf16>
    %cst_12 = arith.constant dense<0.000000e+00> : vector<24x16xf32>
    %13 = tpu.matmul %0, %12, %cst_12 {dimension_numbers = #tpu.dot_dimension_numbers<[1], [0], [0], [1], [0, 0, 1, 1], [], []>} : vector<24x144xbf16>, vector<144x16xbf16>, vector<24x16xf32> -> vector<24x16xf32>
    %c0_13 = arith.constant 0 : index
    %c0_14 = arith.constant 0 : index
    %14 = vector.load %arg6[%c0_13, %c0_14] : memref<1x16xf32, #tpu.memory_space<vmem>>, vector<1x16xf32>
    %15 = vector.broadcast %14 : vector<1x16xf32> to vector<24x16xf32>
    %16 = arith.mulf %13, %15 : vector<24x16xf32>
    %c0_15 = arith.constant 0 : index
    %c0_16 = arith.constant 0 : index
    %17 = vector.load %arg7[%c0_15, %c0_16] : memref<1x16xf32, #tpu.memory_space<vmem>>, vector<1x16xf32>
    %18 = vector.broadcast %17 : vector<1x16xf32> to vector<24x16xf32>
    %19 = arith.addf %16, %18 : vector<24x16xf32>
    %c0_17 = arith.constant 0 : index
    %c0_18 = arith.constant 0 : index
    %20 = vector.load %arg9[%c0_17, %c0_18] : memref<24x16xf32, #tpu.memory_space<vmem>>, vector<24x16xf32>
    tpu.vector_store %arg9[%c0_17, %c0_18], %19 {strides = array<i32>} : memref<24x16xf32, #tpu.memory_space<vmem>>, vector<24x16xf32>,
    return
  }
  func.func @transform_0(%arg0: i32) -> (i32, i32) {
    %c0_i32 = arith.constant 0 : i32
    %c0_i32_0 = arith.constant 0 : i32
    return %arg0, %c0_i32 : i32, i32
  }
  func.func @transform_1(%arg0: i32) -> (i32, i32) {
    %c0_i32 = arith.constant 0 : i32
    %c0_i32_0 = arith.constant 0 : i32
    %c0_i32_1 = arith.constant 0 : i32
    return %c0_i32, %c0_i32_0 : i32, i32
  }
  func.func @transform_2(%arg0: i32) -> (i32, i32) {
    %c0_i32 = arith.constant 0 : i32
    %c0_i32_0 = arith.constant 0 : i32
    %c0_i32_1 = arith.constant 0 : i32
    return %c0_i32, %c0_i32_0 : i32, i32
  }
  func.func @transform_3(%arg0: i32) -> (i32, i32) {
    %c0_i32 = arith.constant 0 : i32
    %c0_i32_0 = arith.constant 0 : i32
    %c0_i32_1 = arith.constant 0 : i32
    return %c0_i32, %c0_i32_0 : i32, i32
  }
  func.func @transform_4(%arg0: i32) -> (i32, i32) {
    %c0_i32 = arith.constant 0 : i32
    %c0_i32_0 = arith.constant 0 : i32
    %c0_i32_1 = arith.constant 0 : i32
    return %c0_i32, %c0_i32_0 : i32, i32
  }
  func.func @transform_5(%arg0: i32) -> (i32, i32) {
    %c0_i32 = arith.constant 0 : i32
    %c0_i32_0 = arith.constant 0 : i32
    %c0_i32_1 = arith.constant 0 : i32
    return %c0_i32, %c0_i32_0 : i32, i32
  }
  func.func @transform_6(%arg0: i32) -> (i32, i32) {
    %c0_i32 = arith.constant 0 : i32
    %c0_i32_0 = arith.constant 0 : i32
    %c0_i32_1 = arith.constant 0 : i32
    return %c0_i32, %c0_i32_0 : i32, i32
  }
  func.func @transform_7(%arg0: i32) -> (i32, i32) {
    %c0_i32 = arith.constant 0 : i32
    %c0_i32_0 = arith.constant 0 : i32
    return %arg0, %c0_i32 : i32, i32
  }
  func.func @transform_8(%arg0: i32) -> (i32, i32) {
    %c0_i32 = arith.constant 0 : i32
    %c0_i32_0 = arith.constant 0 : i32
    return %arg0, %c0_i32 : i32, i32
  }
}

module attributes {stable_mosaic.version = 11 : i64} {
  func.func @_conv_res_kernel(%arg0: i32, %arg1: memref<24x144xbf16, #tpu.memory_space<vmem>>, %arg2: memref<144x16xbf16, #tpu.memory_space<vmem>>, %arg3: memref<1x16xf32, #tpu.memory_space<vmem>>, %arg4: memref<1x16xf32, #tpu.memory_space<vmem>>, %arg5: memref<24x16xf32, #tpu.memory_space<vmem>>, %arg6: memref<24x16xf32, #tpu.memory_space<vmem>>) attributes {dimension_semantics = [#tpu.dimension_semantics<parallel>], iteration_bounds = array<i64: 1>, scalar_prefetch = 0 : i64, scratch_operands = 0 : i64, tpu.core_type = #tpu.core_type<tc>, window_params = [{transform_indices = @transform_0, window_bounds = array<i64: 24, 144>}, {pipeline_mode = #tpu.pipeline_mode<synchronous>, transform_indices = @transform_1, window_bounds = array<i64: 144, 16>}, {pipeline_mode = #tpu.pipeline_mode<synchronous>, transform_indices = @transform_2, window_bounds = array<i64: 1, 16>}, {pipeline_mode = #tpu.pipeline_mode<synchronous>, transform_indices = @transform_3, window_bounds = array<i64: 1, 16>}, {transform_indices = @transform_4, window_bounds = array<i64: 24, 16>}, {transform_indices = @transform_5, window_bounds = array<i64: 24, 16>}]} {
    %c0 = arith.constant 0 : index
    %c0_0 = arith.constant 0 : index
    %0 = vector.load %arg1[%c0, %c0_0] : memref<24x144xbf16, #tpu.memory_space<vmem>>, vector<24x144xbf16>
    %c0_1 = arith.constant 0 : index
    %c0_2 = arith.constant 0 : index
    %1 = vector.load %arg2[%c0_1, %c0_2] : memref<144x16xbf16, #tpu.memory_space<vmem>>, vector<144x16xbf16>
    %cst = arith.constant dense<0.000000e+00> : vector<24x16xf32>
    %2 = tpu.matmul %0, %1, %cst {dimension_numbers = #tpu.dot_dimension_numbers<[1], [0], [0], [1], [0, 0, 1, 1], [], []>} : vector<24x144xbf16>, vector<144x16xbf16>, vector<24x16xf32> -> vector<24x16xf32>
    %c0_3 = arith.constant 0 : index
    %c0_4 = arith.constant 0 : index
    %3 = vector.load %arg3[%c0_3, %c0_4] : memref<1x16xf32, #tpu.memory_space<vmem>>, vector<1x16xf32>
    %4 = vector.broadcast %3 : vector<1x16xf32> to vector<24x16xf32>
    %5 = arith.mulf %2, %4 : vector<24x16xf32>
    %c0_5 = arith.constant 0 : index
    %c0_6 = arith.constant 0 : index
    %6 = vector.load %arg4[%c0_5, %c0_6] : memref<1x16xf32, #tpu.memory_space<vmem>>, vector<1x16xf32>
    %7 = vector.broadcast %6 : vector<1x16xf32> to vector<24x16xf32>
    %8 = arith.addf %5, %7 : vector<24x16xf32>
    %c0_7 = arith.constant 0 : index
    %c0_8 = arith.constant 0 : index
    %9 = vector.load %arg5[%c0_7, %c0_8] : memref<24x16xf32, #tpu.memory_space<vmem>>, vector<24x16xf32>
    %10 = arith.addf %8, %9 : vector<24x16xf32>
    %cst_9 = arith.constant 0.000000e+00 : f32
    %11 = vector.broadcast %cst_9 : f32 to vector<24x16xf32>
    %12 = arith.maximumf %10, %11 : vector<24x16xf32>
    %c0_10 = arith.constant 0 : index
    %c0_11 = arith.constant 0 : index
    %13 = vector.load %arg6[%c0_10, %c0_11] : memref<24x16xf32, #tpu.memory_space<vmem>>, vector<24x16xf32>
    tpu.vector_store %arg6[%c0_10, %c0_11], %12 {strides = array<i32>} : memref<24x16xf32, #tpu.memory_space<vmem>>, vector<24x16xf32>,
    return
  }
  func.func @transform_0(%arg0: i32) -> (i32, i32) {
    %c0_i32 = arith.constant 0 : i32
    %c0_i32_0 = arith.constant 0 : i32
    return %arg0, %c0_i32 : i32, i32
  }
  func.func @transform_1(%arg0: i32) -> (i32, i32) {
    %c0_i32 = arith.constant 0 : i32
    %c0_i32_0 = arith.constant 0 : i32
    %c0_i32_1 = arith.constant 0 : i32
    return %c0_i32, %c0_i32_0 : i32, i32
  }
  func.func @transform_2(%arg0: i32) -> (i32, i32) {
    %c0_i32 = arith.constant 0 : i32
    %c0_i32_0 = arith.constant 0 : i32
    %c0_i32_1 = arith.constant 0 : i32
    return %c0_i32, %c0_i32_0 : i32, i32
  }
  func.func @transform_3(%arg0: i32) -> (i32, i32) {
    %c0_i32 = arith.constant 0 : i32
    %c0_i32_0 = arith.constant 0 : i32
    %c0_i32_1 = arith.constant 0 : i32
    return %c0_i32, %c0_i32_0 : i32, i32
  }
  func.func @transform_4(%arg0: i32) -> (i32, i32) {
    %c0_i32 = arith.constant 0 : i32
    %c0_i32_0 = arith.constant 0 : i32
    return %arg0, %c0_i32 : i32, i32
  }
  func.func @transform_5(%arg0: i32) -> (i32, i32) {
    %c0_i32 = arith.constant 0 : i32
    %c0_i32_0 = arith.constant 0 : i32
    return %arg0, %c0_i32 : i32, i32
  }
}

module attributes {stable_mosaic.version = 11 : i64} {
  func.func @_dual_conv_kernel(%arg0: i32, %arg1: memref<16x144xbf16, #tpu.memory_space<vmem>>, %arg2: memref<144x16xbf16, #tpu.memory_space<vmem>>, %arg3: memref<1x16xf32, #tpu.memory_space<vmem>>, %arg4: memref<1x16xf32, #tpu.memory_space<vmem>>, %arg5: memref<144x16xbf16, #tpu.memory_space<vmem>>, %arg6: memref<1x16xf32, #tpu.memory_space<vmem>>, %arg7: memref<1x16xf32, #tpu.memory_space<vmem>>, %arg8: memref<16x16xf32, #tpu.memory_space<vmem>>, %arg9: memref<16x16xf32, #tpu.memory_space<vmem>>) attributes {dimension_semantics = [#tpu.dimension_semantics<parallel>], iteration_bounds = array<i64: 1>, scalar_prefetch = 0 : i64, scratch_operands = 0 : i64, tpu.core_type = #tpu.core_type<tc>, window_params = [{transform_indices = @transform_0, window_bounds = array<i64: 16, 144>}, {pipeline_mode = #tpu.pipeline_mode<synchronous>, transform_indices = @transform_1, window_bounds = array<i64: 144, 16>}, {pipeline_mode = #tpu.pipeline_mode<synchronous>, transform_indices = @transform_2, window_bounds = array<i64: 1, 16>}, {pipeline_mode = #tpu.pipeline_mode<synchronous>, transform_indices = @transform_3, window_bounds = array<i64: 1, 16>}, {pipeline_mode = #tpu.pipeline_mode<synchronous>, transform_indices = @transform_4, window_bounds = array<i64: 144, 16>}, {pipeline_mode = #tpu.pipeline_mode<synchronous>, transform_indices = @transform_5, window_bounds = array<i64: 1, 16>}, {pipeline_mode = #tpu.pipeline_mode<synchronous>, transform_indices = @transform_6, window_bounds = array<i64: 1, 16>}, {transform_indices = @transform_7, window_bounds = array<i64: 16, 16>}, {transform_indices = @transform_8, window_bounds = array<i64: 16, 16>}]} {
    %c0 = arith.constant 0 : index
    %c0_0 = arith.constant 0 : index
    %0 = vector.load %arg1[%c0, %c0_0] : memref<16x144xbf16, #tpu.memory_space<vmem>>, vector<16x144xbf16>
    %c0_1 = arith.constant 0 : index
    %c0_2 = arith.constant 0 : index
    %1 = vector.load %arg2[%c0_1, %c0_2] : memref<144x16xbf16, #tpu.memory_space<vmem>>, vector<144x16xbf16>
    %cst = arith.constant dense<0.000000e+00> : vector<16x16xf32>
    %2 = tpu.matmul %0, %1, %cst {dimension_numbers = #tpu.dot_dimension_numbers<[1], [0], [0], [1], [0, 0, 1, 1], [], []>} : vector<16x144xbf16>, vector<144x16xbf16>, vector<16x16xf32> -> vector<16x16xf32>
    %c0_3 = arith.constant 0 : index
    %c0_4 = arith.constant 0 : index
    %3 = vector.load %arg3[%c0_3, %c0_4] : memref<1x16xf32, #tpu.memory_space<vmem>>, vector<1x16xf32>
    %4 = vector.broadcast %3 : vector<1x16xf32> to vector<16x16xf32>
    %5 = arith.mulf %2, %4 : vector<16x16xf32>
    %c0_5 = arith.constant 0 : index
    %c0_6 = arith.constant 0 : index
    %6 = vector.load %arg4[%c0_5, %c0_6] : memref<1x16xf32, #tpu.memory_space<vmem>>, vector<1x16xf32>
    %7 = vector.broadcast %6 : vector<1x16xf32> to vector<16x16xf32>
    %8 = arith.addf %5, %7 : vector<16x16xf32>
    %cst_7 = arith.constant 0.000000e+00 : f32
    %9 = vector.broadcast %cst_7 : f32 to vector<16x16xf32>
    %10 = arith.maximumf %8, %9 : vector<16x16xf32>
    %c0_8 = arith.constant 0 : index
    %c0_9 = arith.constant 0 : index
    %11 = vector.load %arg8[%c0_8, %c0_9] : memref<16x16xf32, #tpu.memory_space<vmem>>, vector<16x16xf32>
    tpu.vector_store %arg8[%c0_8, %c0_9], %10 {strides = array<i32>} : memref<16x16xf32, #tpu.memory_space<vmem>>, vector<16x16xf32>,
    %c0_10 = arith.constant 0 : index
    %c0_11 = arith.constant 0 : index
    %12 = vector.load %arg5[%c0_10, %c0_11] : memref<144x16xbf16, #tpu.memory_space<vmem>>, vector<144x16xbf16>
    %cst_12 = arith.constant dense<0.000000e+00> : vector<16x16xf32>
    %13 = tpu.matmul %0, %12, %cst_12 {dimension_numbers = #tpu.dot_dimension_numbers<[1], [0], [0], [1], [0, 0, 1, 1], [], []>} : vector<16x144xbf16>, vector<144x16xbf16>, vector<16x16xf32> -> vector<16x16xf32>
    %c0_13 = arith.constant 0 : index
    %c0_14 = arith.constant 0 : index
    %14 = vector.load %arg6[%c0_13, %c0_14] : memref<1x16xf32, #tpu.memory_space<vmem>>, vector<1x16xf32>
    %15 = vector.broadcast %14 : vector<1x16xf32> to vector<16x16xf32>
    %16 = arith.mulf %13, %15 : vector<16x16xf32>
    %c0_15 = arith.constant 0 : index
    %c0_16 = arith.constant 0 : index
    %17 = vector.load %arg7[%c0_15, %c0_16] : memref<1x16xf32, #tpu.memory_space<vmem>>, vector<1x16xf32>
    %18 = vector.broadcast %17 : vector<1x16xf32> to vector<16x16xf32>
    %19 = arith.addf %16, %18 : vector<16x16xf32>
    %c0_17 = arith.constant 0 : index
    %c0_18 = arith.constant 0 : index
    %20 = vector.load %arg9[%c0_17, %c0_18] : memref<16x16xf32, #tpu.memory_space<vmem>>, vector<16x16xf32>
    tpu.vector_store %arg9[%c0_17, %c0_18], %19 {strides = array<i32>} : memref<16x16xf32, #tpu.memory_space<vmem>>, vector<16x16xf32>,
    return
  }
  func.func @transform_0(%arg0: i32) -> (i32, i32) {
    %c0_i32 = arith.constant 0 : i32
    %c0_i32_0 = arith.constant 0 : i32
    return %arg0, %c0_i32 : i32, i32
  }
  func.func @transform_1(%arg0: i32) -> (i32, i32) {
    %c0_i32 = arith.constant 0 : i32
    %c0_i32_0 = arith.constant 0 : i32
    %c0_i32_1 = arith.constant 0 : i32
    return %c0_i32, %c0_i32_0 : i32, i32
  }
  func.func @transform_2(%arg0: i32) -> (i32, i32) {
    %c0_i32 = arith.constant 0 : i32
    %c0_i32_0 = arith.constant 0 : i32
    %c0_i32_1 = arith.constant 0 : i32
    return %c0_i32, %c0_i32_0 : i32, i32
  }
  func.func @transform_3(%arg0: i32) -> (i32, i32) {
    %c0_i32 = arith.constant 0 : i32
    %c0_i32_0 = arith.constant 0 : i32
    %c0_i32_1 = arith.constant 0 : i32
    return %c0_i32, %c0_i32_0 : i32, i32
  }
  func.func @transform_4(%arg0: i32) -> (i32, i32) {
    %c0_i32 = arith.constant 0 : i32
    %c0_i32_0 = arith.constant 0 : i32
    %c0_i32_1 = arith.constant 0 : i32
    return %c0_i32, %c0_i32_0 : i32, i32
  }
  func.func @transform_5(%arg0: i32) -> (i32, i32) {
    %c0_i32 = arith.constant 0 : i32
    %c0_i32_0 = arith.constant 0 : i32
    %c0_i32_1 = arith.constant 0 : i32
    return %c0_i32, %c0_i32_0 : i32, i32
  }
  func.func @transform_6(%arg0: i32) -> (i32, i32) {
    %c0_i32 = arith.constant 0 : i32
    %c0_i32_0 = arith.constant 0 : i32
    %c0_i32_1 = arith.constant 0 : i32
    return %c0_i32, %c0_i32_0 : i32, i32
  }
  func.func @transform_7(%arg0: i32) -> (i32, i32) {
    %c0_i32 = arith.constant 0 : i32
    %c0_i32_0 = arith.constant 0 : i32
    return %arg0, %c0_i32 : i32, i32
  }
  func.func @transform_8(%arg0: i32) -> (i32, i32) {
    %c0_i32 = arith.constant 0 : i32
    %c0_i32_0 = arith.constant 0 : i32
    return %arg0, %c0_i32 : i32, i32
  }
}

module attributes {stable_mosaic.version = 11 : i64} {
  func.func @_conv_res_kernel(%arg0: i32, %arg1: memref<16x144xbf16, #tpu.memory_space<vmem>>, %arg2: memref<144x16xbf16, #tpu.memory_space<vmem>>, %arg3: memref<1x16xf32, #tpu.memory_space<vmem>>, %arg4: memref<1x16xf32, #tpu.memory_space<vmem>>, %arg5: memref<16x16xf32, #tpu.memory_space<vmem>>, %arg6: memref<16x16xf32, #tpu.memory_space<vmem>>) attributes {dimension_semantics = [#tpu.dimension_semantics<parallel>], iteration_bounds = array<i64: 1>, scalar_prefetch = 0 : i64, scratch_operands = 0 : i64, tpu.core_type = #tpu.core_type<tc>, window_params = [{transform_indices = @transform_0, window_bounds = array<i64: 16, 144>}, {pipeline_mode = #tpu.pipeline_mode<synchronous>, transform_indices = @transform_1, window_bounds = array<i64: 144, 16>}, {pipeline_mode = #tpu.pipeline_mode<synchronous>, transform_indices = @transform_2, window_bounds = array<i64: 1, 16>}, {pipeline_mode = #tpu.pipeline_mode<synchronous>, transform_indices = @transform_3, window_bounds = array<i64: 1, 16>}, {transform_indices = @transform_4, window_bounds = array<i64: 16, 16>}, {transform_indices = @transform_5, window_bounds = array<i64: 16, 16>}]} {
    %c0 = arith.constant 0 : index
    %c0_0 = arith.constant 0 : index
    %0 = vector.load %arg1[%c0, %c0_0] : memref<16x144xbf16, #tpu.memory_space<vmem>>, vector<16x144xbf16>
    %c0_1 = arith.constant 0 : index
    %c0_2 = arith.constant 0 : index
    %1 = vector.load %arg2[%c0_1, %c0_2] : memref<144x16xbf16, #tpu.memory_space<vmem>>, vector<144x16xbf16>
    %cst = arith.constant dense<0.000000e+00> : vector<16x16xf32>
    %2 = tpu.matmul %0, %1, %cst {dimension_numbers = #tpu.dot_dimension_numbers<[1], [0], [0], [1], [0, 0, 1, 1], [], []>} : vector<16x144xbf16>, vector<144x16xbf16>, vector<16x16xf32> -> vector<16x16xf32>
    %c0_3 = arith.constant 0 : index
    %c0_4 = arith.constant 0 : index
    %3 = vector.load %arg3[%c0_3, %c0_4] : memref<1x16xf32, #tpu.memory_space<vmem>>, vector<1x16xf32>
    %4 = vector.broadcast %3 : vector<1x16xf32> to vector<16x16xf32>
    %5 = arith.mulf %2, %4 : vector<16x16xf32>
    %c0_5 = arith.constant 0 : index
    %c0_6 = arith.constant 0 : index
    %6 = vector.load %arg4[%c0_5, %c0_6] : memref<1x16xf32, #tpu.memory_space<vmem>>, vector<1x16xf32>
    %7 = vector.broadcast %6 : vector<1x16xf32> to vector<16x16xf32>
    %8 = arith.addf %5, %7 : vector<16x16xf32>
    %c0_7 = arith.constant 0 : index
    %c0_8 = arith.constant 0 : index
    %9 = vector.load %arg5[%c0_7, %c0_8] : memref<16x16xf32, #tpu.memory_space<vmem>>, vector<16x16xf32>
    %10 = arith.addf %8, %9 : vector<16x16xf32>
    %cst_9 = arith.constant 0.000000e+00 : f32
    %11 = vector.broadcast %cst_9 : f32 to vector<16x16xf32>
    %12 = arith.maximumf %10, %11 : vector<16x16xf32>
    %c0_10 = arith.constant 0 : index
    %c0_11 = arith.constant 0 : index
    %13 = vector.load %arg6[%c0_10, %c0_11] : memref<16x16xf32, #tpu.memory_space<vmem>>, vector<16x16xf32>
    tpu.vector_store %arg6[%c0_10, %c0_11], %12 {strides = array<i32>} : memref<16x16xf32, #tpu.memory_space<vmem>>, vector<16x16xf32>,
    return
  }
  func.func @transform_0(%arg0: i32) -> (i32, i32) {
    %c0_i32 = arith.constant 0 : i32
    %c0_i32_0 = arith.constant 0 : i32
    return %arg0, %c0_i32 : i32, i32
  }
  func.func @transform_1(%arg0: i32) -> (i32, i32) {
    %c0_i32 = arith.constant 0 : i32
    %c0_i32_0 = arith.constant 0 : i32
    %c0_i32_1 = arith.constant 0 : i32
    return %c0_i32, %c0_i32_0 : i32, i32
  }
  func.func @transform_2(%arg0: i32) -> (i32, i32) {
    %c0_i32 = arith.constant 0 : i32
    %c0_i32_0 = arith.constant 0 : i32
    %c0_i32_1 = arith.constant 0 : i32
    return %c0_i32, %c0_i32_0 : i32, i32
  }
  func.func @transform_3(%arg0: i32) -> (i32, i32) {
    %c0_i32 = arith.constant 0 : i32
    %c0_i32_0 = arith.constant 0 : i32
    %c0_i32_1 = arith.constant 0 : i32
    return %c0_i32, %c0_i32_0 : i32, i32
  }
  func.func @transform_4(%arg0: i32) -> (i32, i32) {
    %c0_i32 = arith.constant 0 : i32
    %c0_i32_0 = arith.constant 0 : i32
    return %arg0, %c0_i32 : i32, i32
  }
  func.func @transform_5(%arg0: i32) -> (i32, i32) {
    %c0_i32 = arith.constant 0 : i32
    %c0_i32_0 = arith.constant 0 : i32
    return %arg0, %c0_i32 : i32, i32
  }
}

module attributes {stable_mosaic.version = 11 : i64} {
  func.func @_dual_conv_kernel(%arg0: i32, %arg1: memref<8x144xbf16, #tpu.memory_space<vmem>>, %arg2: memref<144x16xbf16, #tpu.memory_space<vmem>>, %arg3: memref<1x16xf32, #tpu.memory_space<vmem>>, %arg4: memref<1x16xf32, #tpu.memory_space<vmem>>, %arg5: memref<144x16xbf16, #tpu.memory_space<vmem>>, %arg6: memref<1x16xf32, #tpu.memory_space<vmem>>, %arg7: memref<1x16xf32, #tpu.memory_space<vmem>>, %arg8: memref<8x16xf32, #tpu.memory_space<vmem>>, %arg9: memref<8x16xf32, #tpu.memory_space<vmem>>) attributes {dimension_semantics = [#tpu.dimension_semantics<parallel>], iteration_bounds = array<i64: 1>, scalar_prefetch = 0 : i64, scratch_operands = 0 : i64, tpu.core_type = #tpu.core_type<tc>, window_params = [{transform_indices = @transform_0, window_bounds = array<i64: 8, 144>}, {pipeline_mode = #tpu.pipeline_mode<synchronous>, transform_indices = @transform_1, window_bounds = array<i64: 144, 16>}, {pipeline_mode = #tpu.pipeline_mode<synchronous>, transform_indices = @transform_2, window_bounds = array<i64: 1, 16>}, {pipeline_mode = #tpu.pipeline_mode<synchronous>, transform_indices = @transform_3, window_bounds = array<i64: 1, 16>}, {pipeline_mode = #tpu.pipeline_mode<synchronous>, transform_indices = @transform_4, window_bounds = array<i64: 144, 16>}, {pipeline_mode = #tpu.pipeline_mode<synchronous>, transform_indices = @transform_5, window_bounds = array<i64: 1, 16>}, {pipeline_mode = #tpu.pipeline_mode<synchronous>, transform_indices = @transform_6, window_bounds = array<i64: 1, 16>}, {transform_indices = @transform_7, window_bounds = array<i64: 8, 16>}, {transform_indices = @transform_8, window_bounds = array<i64: 8, 16>}]} {
    %c0 = arith.constant 0 : index
    %c0_0 = arith.constant 0 : index
    %0 = vector.load %arg1[%c0, %c0_0] : memref<8x144xbf16, #tpu.memory_space<vmem>>, vector<8x144xbf16>
    %c0_1 = arith.constant 0 : index
    %c0_2 = arith.constant 0 : index
    %1 = vector.load %arg2[%c0_1, %c0_2] : memref<144x16xbf16, #tpu.memory_space<vmem>>, vector<144x16xbf16>
    %cst = arith.constant dense<0.000000e+00> : vector<8x16xf32>
    %2 = tpu.matmul %0, %1, %cst {dimension_numbers = #tpu.dot_dimension_numbers<[1], [0], [0], [1], [0, 0, 1, 1], [], []>} : vector<8x144xbf16>, vector<144x16xbf16>, vector<8x16xf32> -> vector<8x16xf32>
    %c0_3 = arith.constant 0 : index
    %c0_4 = arith.constant 0 : index
    %3 = vector.load %arg3[%c0_3, %c0_4] : memref<1x16xf32, #tpu.memory_space<vmem>>, vector<1x16xf32>
    %4 = vector.broadcast %3 : vector<1x16xf32> to vector<8x16xf32>
    %5 = arith.mulf %2, %4 : vector<8x16xf32>
    %c0_5 = arith.constant 0 : index
    %c0_6 = arith.constant 0 : index
    %6 = vector.load %arg4[%c0_5, %c0_6] : memref<1x16xf32, #tpu.memory_space<vmem>>, vector<1x16xf32>
    %7 = vector.broadcast %6 : vector<1x16xf32> to vector<8x16xf32>
    %8 = arith.addf %5, %7 : vector<8x16xf32>
    %cst_7 = arith.constant 0.000000e+00 : f32
    %9 = vector.broadcast %cst_7 : f32 to vector<8x16xf32>
    %10 = arith.maximumf %8, %9 : vector<8x16xf32>
    %c0_8 = arith.constant 0 : index
    %c0_9 = arith.constant 0 : index
    %11 = vector.load %arg8[%c0_8, %c0_9] : memref<8x16xf32, #tpu.memory_space<vmem>>, vector<8x16xf32>
    tpu.vector_store %arg8[%c0_8, %c0_9], %10 {strides = array<i32>} : memref<8x16xf32, #tpu.memory_space<vmem>>, vector<8x16xf32>,
    %c0_10 = arith.constant 0 : index
    %c0_11 = arith.constant 0 : index
    %12 = vector.load %arg5[%c0_10, %c0_11] : memref<144x16xbf16, #tpu.memory_space<vmem>>, vector<144x16xbf16>
    %cst_12 = arith.constant dense<0.000000e+00> : vector<8x16xf32>
    %13 = tpu.matmul %0, %12, %cst_12 {dimension_numbers = #tpu.dot_dimension_numbers<[1], [0], [0], [1], [0, 0, 1, 1], [], []>} : vector<8x144xbf16>, vector<144x16xbf16>, vector<8x16xf32> -> vector<8x16xf32>
    %c0_13 = arith.constant 0 : index
    %c0_14 = arith.constant 0 : index
    %14 = vector.load %arg6[%c0_13, %c0_14] : memref<1x16xf32, #tpu.memory_space<vmem>>, vector<1x16xf32>
    %15 = vector.broadcast %14 : vector<1x16xf32> to vector<8x16xf32>
    %16 = arith.mulf %13, %15 : vector<8x16xf32>
    %c0_15 = arith.constant 0 : index
    %c0_16 = arith.constant 0 : index
    %17 = vector.load %arg7[%c0_15, %c0_16] : memref<1x16xf32, #tpu.memory_space<vmem>>, vector<1x16xf32>
    %18 = vector.broadcast %17 : vector<1x16xf32> to vector<8x16xf32>
    %19 = arith.addf %16, %18 : vector<8x16xf32>
    %c0_17 = arith.constant 0 : index
    %c0_18 = arith.constant 0 : index
    %20 = vector.load %arg9[%c0_17, %c0_18] : memref<8x16xf32, #tpu.memory_space<vmem>>, vector<8x16xf32>
    tpu.vector_store %arg9[%c0_17, %c0_18], %19 {strides = array<i32>} : memref<8x16xf32, #tpu.memory_space<vmem>>, vector<8x16xf32>,
    return
  }
  func.func @transform_0(%arg0: i32) -> (i32, i32) {
    %c0_i32 = arith.constant 0 : i32
    %c0_i32_0 = arith.constant 0 : i32
    return %arg0, %c0_i32 : i32, i32
  }
  func.func @transform_1(%arg0: i32) -> (i32, i32) {
    %c0_i32 = arith.constant 0 : i32
    %c0_i32_0 = arith.constant 0 : i32
    %c0_i32_1 = arith.constant 0 : i32
    return %c0_i32, %c0_i32_0 : i32, i32
  }
  func.func @transform_2(%arg0: i32) -> (i32, i32) {
    %c0_i32 = arith.constant 0 : i32
    %c0_i32_0 = arith.constant 0 : i32
    %c0_i32_1 = arith.constant 0 : i32
    return %c0_i32, %c0_i32_0 : i32, i32
  }
  func.func @transform_3(%arg0: i32) -> (i32, i32) {
    %c0_i32 = arith.constant 0 : i32
    %c0_i32_0 = arith.constant 0 : i32
    %c0_i32_1 = arith.constant 0 : i32
    return %c0_i32, %c0_i32_0 : i32, i32
  }
  func.func @transform_4(%arg0: i32) -> (i32, i32) {
    %c0_i32 = arith.constant 0 : i32
    %c0_i32_0 = arith.constant 0 : i32
    %c0_i32_1 = arith.constant 0 : i32
    return %c0_i32, %c0_i32_0 : i32, i32
  }
  func.func @transform_5(%arg0: i32) -> (i32, i32) {
    %c0_i32 = arith.constant 0 : i32
    %c0_i32_0 = arith.constant 0 : i32
    %c0_i32_1 = arith.constant 0 : i32
    return %c0_i32, %c0_i32_0 : i32, i32
  }
  func.func @transform_6(%arg0: i32) -> (i32, i32) {
    %c0_i32 = arith.constant 0 : i32
    %c0_i32_0 = arith.constant 0 : i32
    %c0_i32_1 = arith.constant 0 : i32
    return %c0_i32, %c0_i32_0 : i32, i32
  }
  func.func @transform_7(%arg0: i32) -> (i32, i32) {
    %c0_i32 = arith.constant 0 : i32
    %c0_i32_0 = arith.constant 0 : i32
    return %arg0, %c0_i32 : i32, i32
  }
  func.func @transform_8(%arg0: i32) -> (i32, i32) {
    %c0_i32 = arith.constant 0 : i32
    %c0_i32_0 = arith.constant 0 : i32
    return %arg0, %c0_i32 : i32, i32
  }
}

module attributes {stable_mosaic.version = 11 : i64} {
  func.func @_conv_res_kernel(%arg0: i32, %arg1: memref<8x144xbf16, #tpu.memory_space<vmem>>, %arg2: memref<144x16xbf16, #tpu.memory_space<vmem>>, %arg3: memref<1x16xf32, #tpu.memory_space<vmem>>, %arg4: memref<1x16xf32, #tpu.memory_space<vmem>>, %arg5: memref<8x16xf32, #tpu.memory_space<vmem>>, %arg6: memref<8x16xf32, #tpu.memory_space<vmem>>) attributes {dimension_semantics = [#tpu.dimension_semantics<parallel>], iteration_bounds = array<i64: 1>, scalar_prefetch = 0 : i64, scratch_operands = 0 : i64, tpu.core_type = #tpu.core_type<tc>, window_params = [{transform_indices = @transform_0, window_bounds = array<i64: 8, 144>}, {pipeline_mode = #tpu.pipeline_mode<synchronous>, transform_indices = @transform_1, window_bounds = array<i64: 144, 16>}, {pipeline_mode = #tpu.pipeline_mode<synchronous>, transform_indices = @transform_2, window_bounds = array<i64: 1, 16>}, {pipeline_mode = #tpu.pipeline_mode<synchronous>, transform_indices = @transform_3, window_bounds = array<i64: 1, 16>}, {transform_indices = @transform_4, window_bounds = array<i64: 8, 16>}, {transform_indices = @transform_5, window_bounds = array<i64: 8, 16>}]} {
    %c0 = arith.constant 0 : index
    %c0_0 = arith.constant 0 : index
    %0 = vector.load %arg1[%c0, %c0_0] : memref<8x144xbf16, #tpu.memory_space<vmem>>, vector<8x144xbf16>
    %c0_1 = arith.constant 0 : index
    %c0_2 = arith.constant 0 : index
    %1 = vector.load %arg2[%c0_1, %c0_2] : memref<144x16xbf16, #tpu.memory_space<vmem>>, vector<144x16xbf16>
    %cst = arith.constant dense<0.000000e+00> : vector<8x16xf32>
    %2 = tpu.matmul %0, %1, %cst {dimension_numbers = #tpu.dot_dimension_numbers<[1], [0], [0], [1], [0, 0, 1, 1], [], []>} : vector<8x144xbf16>, vector<144x16xbf16>, vector<8x16xf32> -> vector<8x16xf32>
    %c0_3 = arith.constant 0 : index
    %c0_4 = arith.constant 0 : index
    %3 = vector.load %arg3[%c0_3, %c0_4] : memref<1x16xf32, #tpu.memory_space<vmem>>, vector<1x16xf32>
    %4 = vector.broadcast %3 : vector<1x16xf32> to vector<8x16xf32>
    %5 = arith.mulf %2, %4 : vector<8x16xf32>
    %c0_5 = arith.constant 0 : index
    %c0_6 = arith.constant 0 : index
    %6 = vector.load %arg4[%c0_5, %c0_6] : memref<1x16xf32, #tpu.memory_space<vmem>>, vector<1x16xf32>
    %7 = vector.broadcast %6 : vector<1x16xf32> to vector<8x16xf32>
    %8 = arith.addf %5, %7 : vector<8x16xf32>
    %c0_7 = arith.constant 0 : index
    %c0_8 = arith.constant 0 : index
    %9 = vector.load %arg5[%c0_7, %c0_8] : memref<8x16xf32, #tpu.memory_space<vmem>>, vector<8x16xf32>
    %10 = arith.addf %8, %9 : vector<8x16xf32>
    %cst_9 = arith.constant 0.000000e+00 : f32
    %11 = vector.broadcast %cst_9 : f32 to vector<8x16xf32>
    %12 = arith.maximumf %10, %11 : vector<8x16xf32>
    %c0_10 = arith.constant 0 : index
    %c0_11 = arith.constant 0 : index
    %13 = vector.load %arg6[%c0_10, %c0_11] : memref<8x16xf32, #tpu.memory_space<vmem>>, vector<8x16xf32>
    tpu.vector_store %arg6[%c0_10, %c0_11], %12 {strides = array<i32>} : memref<8x16xf32, #tpu.memory_space<vmem>>, vector<8x16xf32>,
    return
  }
  func.func @transform_0(%arg0: i32) -> (i32, i32) {
    %c0_i32 = arith.constant 0 : i32
    %c0_i32_0 = arith.constant 0 : i32
    return %arg0, %c0_i32 : i32, i32
  }
  func.func @transform_1(%arg0: i32) -> (i32, i32) {
    %c0_i32 = arith.constant 0 : i32
    %c0_i32_0 = arith.constant 0 : i32
    %c0_i32_1 = arith.constant 0 : i32
    return %c0_i32, %c0_i32_0 : i32, i32
  }
  func.func @transform_2(%arg0: i32) -> (i32, i32) {
    %c0_i32 = arith.constant 0 : i32
    %c0_i32_0 = arith.constant 0 : i32
    %c0_i32_1 = arith.constant 0 : i32
    return %c0_i32, %c0_i32_0 : i32, i32
  }
  func.func @transform_3(%arg0: i32) -> (i32, i32) {
    %c0_i32 = arith.constant 0 : i32
    %c0_i32_0 = arith.constant 0 : i32
    %c0_i32_1 = arith.constant 0 : i32
    return %c0_i32, %c0_i32_0 : i32, i32
  }
  func.func @transform_4(%arg0: i32) -> (i32, i32) {
    %c0_i32 = arith.constant 0 : i32
    %c0_i32_0 = arith.constant 0 : i32
    return %arg0, %c0_i32 : i32, i32
  }
  func.func @transform_5(%arg0: i32) -> (i32, i32) {
    %c0_i32 = arith.constant 0 : i32
    %c0_i32_0 = arith.constant 0 : i32
    return %arg0, %c0_i32 : i32, i32
  }
}

module attributes {stable_mosaic.version = 11 : i64} {
  func.func @_dual_conv_kernel(%arg0: i32, %arg1: memref<8x144xbf16, #tpu.memory_space<vmem>>, %arg2: memref<144x32xbf16, #tpu.memory_space<vmem>>, %arg3: memref<1x32xf32, #tpu.memory_space<vmem>>, %arg4: memref<1x32xf32, #tpu.memory_space<vmem>>, %arg5: memref<144x32xbf16, #tpu.memory_space<vmem>>, %arg6: memref<1x32xf32, #tpu.memory_space<vmem>>, %arg7: memref<1x32xf32, #tpu.memory_space<vmem>>, %arg8: memref<8x32xf32, #tpu.memory_space<vmem>>, %arg9: memref<8x32xf32, #tpu.memory_space<vmem>>) attributes {dimension_semantics = [#tpu.dimension_semantics<parallel>], iteration_bounds = array<i64: 1>, scalar_prefetch = 0 : i64, scratch_operands = 0 : i64, tpu.core_type = #tpu.core_type<tc>, window_params = [{transform_indices = @transform_0, window_bounds = array<i64: 8, 144>}, {pipeline_mode = #tpu.pipeline_mode<synchronous>, transform_indices = @transform_1, window_bounds = array<i64: 144, 32>}, {pipeline_mode = #tpu.pipeline_mode<synchronous>, transform_indices = @transform_2, window_bounds = array<i64: 1, 32>}, {pipeline_mode = #tpu.pipeline_mode<synchronous>, transform_indices = @transform_3, window_bounds = array<i64: 1, 32>}, {pipeline_mode = #tpu.pipeline_mode<synchronous>, transform_indices = @transform_4, window_bounds = array<i64: 144, 32>}, {pipeline_mode = #tpu.pipeline_mode<synchronous>, transform_indices = @transform_5, window_bounds = array<i64: 1, 32>}, {pipeline_mode = #tpu.pipeline_mode<synchronous>, transform_indices = @transform_6, window_bounds = array<i64: 1, 32>}, {transform_indices = @transform_7, window_bounds = array<i64: 8, 32>}, {transform_indices = @transform_8, window_bounds = array<i64: 8, 32>}]} {
    %c0 = arith.constant 0 : index
    %c0_0 = arith.constant 0 : index
    %0 = vector.load %arg1[%c0, %c0_0] : memref<8x144xbf16, #tpu.memory_space<vmem>>, vector<8x144xbf16>
    %c0_1 = arith.constant 0 : index
    %c0_2 = arith.constant 0 : index
    %1 = vector.load %arg2[%c0_1, %c0_2] : memref<144x32xbf16, #tpu.memory_space<vmem>>, vector<144x32xbf16>
    %cst = arith.constant dense<0.000000e+00> : vector<8x32xf32>
    %2 = tpu.matmul %0, %1, %cst {dimension_numbers = #tpu.dot_dimension_numbers<[1], [0], [0], [1], [0, 0, 1, 1], [], []>} : vector<8x144xbf16>, vector<144x32xbf16>, vector<8x32xf32> -> vector<8x32xf32>
    %c0_3 = arith.constant 0 : index
    %c0_4 = arith.constant 0 : index
    %3 = vector.load %arg3[%c0_3, %c0_4] : memref<1x32xf32, #tpu.memory_space<vmem>>, vector<1x32xf32>
    %4 = vector.broadcast %3 : vector<1x32xf32> to vector<8x32xf32>
    %5 = arith.mulf %2, %4 : vector<8x32xf32>
    %c0_5 = arith.constant 0 : index
    %c0_6 = arith.constant 0 : index
    %6 = vector.load %arg4[%c0_5, %c0_6] : memref<1x32xf32, #tpu.memory_space<vmem>>, vector<1x32xf32>
    %7 = vector.broadcast %6 : vector<1x32xf32> to vector<8x32xf32>
    %8 = arith.addf %5, %7 : vector<8x32xf32>
    %cst_7 = arith.constant 0.000000e+00 : f32
    %9 = vector.broadcast %cst_7 : f32 to vector<8x32xf32>
    %10 = arith.maximumf %8, %9 : vector<8x32xf32>
    %c0_8 = arith.constant 0 : index
    %c0_9 = arith.constant 0 : index
    %11 = vector.load %arg8[%c0_8, %c0_9] : memref<8x32xf32, #tpu.memory_space<vmem>>, vector<8x32xf32>
    tpu.vector_store %arg8[%c0_8, %c0_9], %10 {strides = array<i32>} : memref<8x32xf32, #tpu.memory_space<vmem>>, vector<8x32xf32>,
    %c0_10 = arith.constant 0 : index
    %c0_11 = arith.constant 0 : index
    %12 = vector.load %arg5[%c0_10, %c0_11] : memref<144x32xbf16, #tpu.memory_space<vmem>>, vector<144x32xbf16>
    %cst_12 = arith.constant dense<0.000000e+00> : vector<8x32xf32>
    %13 = tpu.matmul %0, %12, %cst_12 {dimension_numbers = #tpu.dot_dimension_numbers<[1], [0], [0], [1], [0, 0, 1, 1], [], []>} : vector<8x144xbf16>, vector<144x32xbf16>, vector<8x32xf32> -> vector<8x32xf32>
    %c0_13 = arith.constant 0 : index
    %c0_14 = arith.constant 0 : index
    %14 = vector.load %arg6[%c0_13, %c0_14] : memref<1x32xf32, #tpu.memory_space<vmem>>, vector<1x32xf32>
    %15 = vector.broadcast %14 : vector<1x32xf32> to vector<8x32xf32>
    %16 = arith.mulf %13, %15 : vector<8x32xf32>
    %c0_15 = arith.constant 0 : index
    %c0_16 = arith.constant 0 : index
    %17 = vector.load %arg7[%c0_15, %c0_16] : memref<1x32xf32, #tpu.memory_space<vmem>>, vector<1x32xf32>
    %18 = vector.broadcast %17 : vector<1x32xf32> to vector<8x32xf32>
    %19 = arith.addf %16, %18 : vector<8x32xf32>
    %c0_17 = arith.constant 0 : index
    %c0_18 = arith.constant 0 : index
    %20 = vector.load %arg9[%c0_17, %c0_18] : memref<8x32xf32, #tpu.memory_space<vmem>>, vector<8x32xf32>
    tpu.vector_store %arg9[%c0_17, %c0_18], %19 {strides = array<i32>} : memref<8x32xf32, #tpu.memory_space<vmem>>, vector<8x32xf32>,
    return
  }
  func.func @transform_0(%arg0: i32) -> (i32, i32) {
    %c0_i32 = arith.constant 0 : i32
    %c0_i32_0 = arith.constant 0 : i32
    return %arg0, %c0_i32 : i32, i32
  }
  func.func @transform_1(%arg0: i32) -> (i32, i32) {
    %c0_i32 = arith.constant 0 : i32
    %c0_i32_0 = arith.constant 0 : i32
    %c0_i32_1 = arith.constant 0 : i32
    return %c0_i32, %c0_i32_0 : i32, i32
  }
  func.func @transform_2(%arg0: i32) -> (i32, i32) {
    %c0_i32 = arith.constant 0 : i32
    %c0_i32_0 = arith.constant 0 : i32
    %c0_i32_1 = arith.constant 0 : i32
    return %c0_i32, %c0_i32_0 : i32, i32
  }
  func.func @transform_3(%arg0: i32) -> (i32, i32) {
    %c0_i32 = arith.constant 0 : i32
    %c0_i32_0 = arith.constant 0 : i32
    %c0_i32_1 = arith.constant 0 : i32
    return %c0_i32, %c0_i32_0 : i32, i32
  }
  func.func @transform_4(%arg0: i32) -> (i32, i32) {
    %c0_i32 = arith.constant 0 : i32
    %c0_i32_0 = arith.constant 0 : i32
    %c0_i32_1 = arith.constant 0 : i32
    return %c0_i32, %c0_i32_0 : i32, i32
  }
  func.func @transform_5(%arg0: i32) -> (i32, i32) {
    %c0_i32 = arith.constant 0 : i32
    %c0_i32_0 = arith.constant 0 : i32
    %c0_i32_1 = arith.constant 0 : i32
    return %c0_i32, %c0_i32_0 : i32, i32
  }
  func.func @transform_6(%arg0: i32) -> (i32, i32) {
    %c0_i32 = arith.constant 0 : i32
    %c0_i32_0 = arith.constant 0 : i32
    %c0_i32_1 = arith.constant 0 : i32
    return %c0_i32, %c0_i32_0 : i32, i32
  }
  func.func @transform_7(%arg0: i32) -> (i32, i32) {
    %c0_i32 = arith.constant 0 : i32
    %c0_i32_0 = arith.constant 0 : i32
    return %arg0, %c0_i32 : i32, i32
  }
  func.func @transform_8(%arg0: i32) -> (i32, i32) {
    %c0_i32 = arith.constant 0 : i32
    %c0_i32_0 = arith.constant 0 : i32
    return %arg0, %c0_i32 : i32, i32
  }
}

module attributes {stable_mosaic.version = 11 : i64} {
  func.func @_conv_res_kernel(%arg0: i32, %arg1: memref<8x288xbf16, #tpu.memory_space<vmem>>, %arg2: memref<288x32xbf16, #tpu.memory_space<vmem>>, %arg3: memref<1x32xf32, #tpu.memory_space<vmem>>, %arg4: memref<1x32xf32, #tpu.memory_space<vmem>>, %arg5: memref<8x32xf32, #tpu.memory_space<vmem>>, %arg6: memref<8x32xf32, #tpu.memory_space<vmem>>) attributes {dimension_semantics = [#tpu.dimension_semantics<parallel>], iteration_bounds = array<i64: 1>, scalar_prefetch = 0 : i64, scratch_operands = 0 : i64, tpu.core_type = #tpu.core_type<tc>, window_params = [{transform_indices = @transform_0, window_bounds = array<i64: 8, 288>}, {pipeline_mode = #tpu.pipeline_mode<synchronous>, transform_indices = @transform_1, window_bounds = array<i64: 288, 32>}, {pipeline_mode = #tpu.pipeline_mode<synchronous>, transform_indices = @transform_2, window_bounds = array<i64: 1, 32>}, {pipeline_mode = #tpu.pipeline_mode<synchronous>, transform_indices = @transform_3, window_bounds = array<i64: 1, 32>}, {transform_indices = @transform_4, window_bounds = array<i64: 8, 32>}, {transform_indices = @transform_5, window_bounds = array<i64: 8, 32>}]} {
    %c0 = arith.constant 0 : index
    %c0_0 = arith.constant 0 : index
    %0 = vector.load %arg1[%c0, %c0_0] : memref<8x288xbf16, #tpu.memory_space<vmem>>, vector<8x288xbf16>
    %c0_1 = arith.constant 0 : index
    %c0_2 = arith.constant 0 : index
    %1 = vector.load %arg2[%c0_1, %c0_2] : memref<288x32xbf16, #tpu.memory_space<vmem>>, vector<288x32xbf16>
    %cst = arith.constant dense<0.000000e+00> : vector<8x32xf32>
    %2 = tpu.matmul %0, %1, %cst {dimension_numbers = #tpu.dot_dimension_numbers<[1], [0], [0], [1], [0, 0, 1, 1], [], []>} : vector<8x288xbf16>, vector<288x32xbf16>, vector<8x32xf32> -> vector<8x32xf32>
    %c0_3 = arith.constant 0 : index
    %c0_4 = arith.constant 0 : index
    %3 = vector.load %arg3[%c0_3, %c0_4] : memref<1x32xf32, #tpu.memory_space<vmem>>, vector<1x32xf32>
    %4 = vector.broadcast %3 : vector<1x32xf32> to vector<8x32xf32>
    %5 = arith.mulf %2, %4 : vector<8x32xf32>
    %c0_5 = arith.constant 0 : index
    %c0_6 = arith.constant 0 : index
    %6 = vector.load %arg4[%c0_5, %c0_6] : memref<1x32xf32, #tpu.memory_space<vmem>>, vector<1x32xf32>
    %7 = vector.broadcast %6 : vector<1x32xf32> to vector<8x32xf32>
    %8 = arith.addf %5, %7 : vector<8x32xf32>
    %c0_7 = arith.constant 0 : index
    %c0_8 = arith.constant 0 : index
    %9 = vector.load %arg5[%c0_7, %c0_8] : memref<8x32xf32, #tpu.memory_space<vmem>>, vector<8x32xf32>
    %10 = arith.addf %8, %9 : vector<8x32xf32>
    %cst_9 = arith.constant 0.000000e+00 : f32
    %11 = vector.broadcast %cst_9 : f32 to vector<8x32xf32>
    %12 = arith.maximumf %10, %11 : vector<8x32xf32>
    %c0_10 = arith.constant 0 : index
    %c0_11 = arith.constant 0 : index
    %13 = vector.load %arg6[%c0_10, %c0_11] : memref<8x32xf32, #tpu.memory_space<vmem>>, vector<8x32xf32>
    tpu.vector_store %arg6[%c0_10, %c0_11], %12 {strides = array<i32>} : memref<8x32xf32, #tpu.memory_space<vmem>>, vector<8x32xf32>,
    return
  }
  func.func @transform_0(%arg0: i32) -> (i32, i32) {
    %c0_i32 = arith.constant 0 : i32
    %c0_i32_0 = arith.constant 0 : i32
    return %arg0, %c0_i32 : i32, i32
  }
  func.func @transform_1(%arg0: i32) -> (i32, i32) {
    %c0_i32 = arith.constant 0 : i32
    %c0_i32_0 = arith.constant 0 : i32
    %c0_i32_1 = arith.constant 0 : i32
    return %c0_i32, %c0_i32_0 : i32, i32
  }
  func.func @transform_2(%arg0: i32) -> (i32, i32) {
    %c0_i32 = arith.constant 0 : i32
    %c0_i32_0 = arith.constant 0 : i32
    %c0_i32_1 = arith.constant 0 : i32
    return %c0_i32, %c0_i32_0 : i32, i32
  }
  func.func @transform_3(%arg0: i32) -> (i32, i32) {
    %c0_i32 = arith.constant 0 : i32
    %c0_i32_0 = arith.constant 0 : i32
    %c0_i32_1 = arith.constant 0 : i32
    return %c0_i32, %c0_i32_0 : i32, i32
  }
  func.func @transform_4(%arg0: i32) -> (i32, i32) {
    %c0_i32 = arith.constant 0 : i32
    %c0_i32_0 = arith.constant 0 : i32
    return %arg0, %c0_i32 : i32, i32
  }
  func.func @transform_5(%arg0: i32) -> (i32, i32) {
    %c0_i32 = arith.constant 0 : i32
    %c0_i32_0 = arith.constant 0 : i32
    return %arg0, %c0_i32 : i32, i32
  }
}

module attributes {stable_mosaic.version = 11 : i64} {
  func.func @_head_kernel(%arg0: memref<2x2x32xf32, #tpu.memory_space<vmem>>, %arg1: memref<32x32xf32, #tpu.memory_space<vmem>>, %arg2: memref<1x32xf32, #tpu.memory_space<vmem>>, %arg3: memref<1x32xf32, #tpu.memory_space<vmem>>, %arg4: memref<32x11xf32, #tpu.memory_space<vmem>>, %arg5: memref<1x11xf32, #tpu.memory_space<vmem>>, %arg6: memref<2x11xf32, #tpu.memory_space<vmem>>) attributes {dimension_semantics = [], scalar_prefetch = 0 : i64, scratch_operands = 0 : i64, tpu.core_type = #tpu.core_type<tc>} {
    %c0 = arith.constant 0 : index
    %c0_0 = arith.constant 0 : index
    %c0_1 = arith.constant 0 : index
    %0 = vector.load %arg0[%c0, %c0_0, %c0_1] : memref<2x2x32xf32, #tpu.memory_space<vmem>>, vector<2x2x32xf32>
    %cst = arith.constant dense<0xFF800000> : vector<2x32xf32>
    %1 = vector.multi_reduction <maximumf>, %0, %cst [1] : vector<2x2x32xf32> to vector<2x32xf32>
    %c0_2 = arith.constant 0 : index
    %c0_3 = arith.constant 0 : index
    %2 = vector.load %arg1[%c0_2, %c0_3] : memref<32x32xf32, #tpu.memory_space<vmem>>, vector<32x32xf32>
    %cst_4 = arith.constant dense<0.000000e+00> : vector<2x32xf32>
    %3 = tpu.matmul %1, %2, %cst_4 {dimension_numbers = #tpu.dot_dimension_numbers<[1], [0], [0], [1], [0, 0, 1, 1], [], []>} : vector<2x32xf32>, vector<32x32xf32>, vector<2x32xf32> -> vector<2x32xf32>
    %c0_5 = arith.constant 0 : index
    %c0_6 = arith.constant 0 : index
    %4 = vector.load %arg2[%c0_5, %c0_6] : memref<1x32xf32, #tpu.memory_space<vmem>>, vector<1x32xf32>
    %5 = vector.broadcast %4 : vector<1x32xf32> to vector<2x32xf32>
    %6 = arith.mulf %3, %5 : vector<2x32xf32>
    %c0_7 = arith.constant 0 : index
    %c0_8 = arith.constant 0 : index
    %7 = vector.load %arg3[%c0_7, %c0_8] : memref<1x32xf32, #tpu.memory_space<vmem>>, vector<1x32xf32>
    %8 = vector.broadcast %7 : vector<1x32xf32> to vector<2x32xf32>
    %9 = arith.addf %6, %8 : vector<2x32xf32>
    %cst_9 = arith.constant 0.000000e+00 : f32
    %10 = vector.broadcast %cst_9 : f32 to vector<2x32xf32>
    %11 = arith.maximumf %9, %10 : vector<2x32xf32>
    %c0_10 = arith.constant 0 : index
    %c0_11 = arith.constant 0 : index
    %12 = vector.load %arg4[%c0_10, %c0_11] : memref<32x11xf32, #tpu.memory_space<vmem>>, vector<32x11xf32>
    %cst_12 = arith.constant dense<0.000000e+00> : vector<2x11xf32>
    %13 = tpu.matmul %11, %12, %cst_12 {dimension_numbers = #tpu.dot_dimension_numbers<[1], [0], [0], [1], [0, 0, 1, 1], [], []>} : vector<2x32xf32>, vector<32x11xf32>, vector<2x11xf32> -> vector<2x11xf32>
    %c0_13 = arith.constant 0 : index
    %c0_14 = arith.constant 0 : index
    %14 = vector.load %arg5[%c0_13, %c0_14] : memref<1x11xf32, #tpu.memory_space<vmem>>, vector<1x11xf32>
    %15 = vector.broadcast %14 : vector<1x11xf32> to vector<2x11xf32>
    %16 = arith.addf %13, %15 : vector<2x11xf32>
    %cst_15 = arith.constant dense<0xFF800000> : vector<2xf32>
    %17 = vector.multi_reduction <maximumf>, %16, %cst_15 [1] : vector<2x11xf32> to vector<2xf32>
    %18 = vector.shape_cast %17 : vector<2xf32> to vector<2x1xf32>
    %19 = vector.broadcast %18 : vector<2x1xf32> to vector<2x11xf32>
    %20 = arith.subf %16, %19 : vector<2x11xf32>
    %21 = math.exp %20 : vector<2x11xf32>
    %cst_16 = arith.constant dense<0.000000e+00> : vector<2xf32>
    %22 = vector.multi_reduction <add>, %21, %cst_16 [1] : vector<2x11xf32> to vector<2xf32>
    %23 = vector.shape_cast %22 : vector<2xf32> to vector<2x1xf32>
    %24 = vector.broadcast %23 : vector<2x1xf32> to vector<2x11xf32>
    %25 = arith.divf %21, %24 : vector<2x11xf32>
    %c0_17 = arith.constant 0 : index
    %c0_18 = arith.constant 0 : index
    %26 = vector.load %arg6[%c0_17, %c0_18] : memref<2x11xf32, #tpu.memory_space<vmem>>, vector<2x11xf32>
    tpu.vector_store %arg6[%c0_17, %c0_18], %25 {strides = array<i32>} : memref<2x11xf32, #tpu.memory_space<vmem>>, vector<2x11xf32>,
    return
  }
}

</mosaic_0001>

<bundles_post_ra>
// kernel: short_chunk_cnn_res.15
= control target key start
LH: loop header
LB: loop body
LE: loop exit
PB: predicated region body
PF: predicated region fallthrough
CT: control target
= control target key end

     0   :  { %s2228_s27 = smov 0   ;;  %s2884_s0 = inlined_call_operand.vmem [shape: bf16[1536,9], index: 0, kind: input, shape index: {}]   ;;  %s2885_s1 = inlined_call_operand.vmem [shape: bf16[9,8], index: 1, kind: input, shape index: {}]   ;;  %s2886_s2 = inlined_call_operand.vmem [shape: f32[1,8], index: 2, kind: input, shape index: {}]   ;;  %s2887_s3 = inlined_call_operand.vmem [shape: f32[1,8], index: 3, kind: input, shape index: {}]   ;;  %s2888_s4 = inlined_call_operand.vmem [shape: bf16[9,8], index: 4, kind: input, shape index: {}]   ;;  %s2889_s5 = inlined_call_operand.vmem [shape: f32[1,8], index: 5, kind: input, shape index: {}]   ;;  %s2890_s6 = inlined_call_operand.vmem [shape: f32[1,8], index: 6, kind: input, shape index: {}]   ;;  %s2891_s7 = inlined_call_operand.vmem [shape: f32[1536,8], index: 7, kind: output, shape index: {0}]   ;;  %s2892_s8 = inlined_call_operand.vmem [shape: f32[1536,8], index: 8, kind: output, shape index: {1}]  }
   0x1 LB: > { %s1814_s28 = sadd.s32 4294967295, %s2180_s27   ;;  %p1818_p0 = scmp.ge.s32.totalorder %s2180_s27, 1  ;;  %s2180_s27 = sphi %s2228_s27, %s19_s27  }
   0x2   : > { %p266_p1 = scmp.lt.s32.totalorder %s2180_s27, 4 }
   0x4   : > { %p267_p2 = pnand %p1818_p0, %p266_p1 }
   0x5   : > { %s1819_s9 = sshll.u32 (!%p267_p2), %s1814_s28, 6 }
   0x6   : > { %270 = sbr.rel (%p267_p2) target bundleno = 346 (0x15a), region = 48  ;;  %p306_p3 = scmp.lt.s32.totalorder (!%p267_p2), %s1819_s9, 191 }
   0xb   : > { %v2136_v0 = vld [vmem:[%s2885_s1] sm:$0x1f]   ;;  %vm652_vm0 = vcmask 1043456   ;;  %vm653_vm1 = vcmask 1044480   ;;  %v2182_v1 = vmov 65535   ;;  %s2894_s9 = smov (!%p306_p3, %s1819_s9), 191 }
   0xc   : > { %v654_v2 = vsel %vm652_vm0, 4294967295, %v2182_v1  ;;  %v2137_v3 = vld [vmem:[%s2888_s4] sm:$0x1f]   ;;  %s1820_s12 = sshll.u32 %s2894_s9, 2  ;;  %vm555_vm2 = vcmask 72704   ;;  %s1822_s20 = sshll.u32 %s2894_s9, 3 }
   0xd   : > { %v655_v4 = vsel %vm653_vm1, %v654_v2, 0  ;;  %s2248_s15 = scalar_lea.vmem %s2884_s0, %s1820_s12  ;;  %v2349_v39 = vld [vmem:[%s2886_s2] ss:$0 sm:$0xff]  ;;  %vm1154_vm3 = vcmask 64512   ;;  %s2372_s28 = scalar_lea.vmem %s2892_s8, %s1822_s20 }
   0xe   : > { %v657_v5 = vand.u32 %v2136_v0, %v655_v4  ;;  %v1227_v6 = vand.u32 %v2137_v3, %v655_v4  ;;  %v2138_v7 = vld [vmem:[%s2248_s15] sm:$0xff]   ;;  %v2139_v8 = vld [vmem:[%s2248_s15 + $0x8] sm:$0xff]   ;;  %v2140_v9 = vld [vmem:[%s2248_s15 + $0x10] sm:$0xff]   ;;  %s2381_s9 = scalar_lea.vmem %s2891_s7, %s1822_s20 }
   0xf   : > { %1997 = vmatprep.mubr.msk.bf16.mxu0 %vm555_vm2, %v2138_v7  ;;  %2063 = vmatprep.mubr.msk.bf16.mxu1 %vm555_vm2, %v2138_v7  ;;  %v2141_v10 = vld [vmem:[%s2248_s15 + $0x18] sm:$0xff]   ;;  %v2142_v11 = vld [vmem:[%s2248_s15 + $0x20] sm:$0xff]   ;;  %v2143_v12 = vld [vmem:[%s2248_s15 + $0x28] sm:$0xff]  }
  0x10   : > { %1995 = vmatprep.subr.bf16.mxu0 %v657_v5  ;;  %2061 = vmatprep.subr.bf16.mxu1 %v1227_v6  ;;  %v2144_v13 = vld [vmem:[%s2248_s15 + $0x30] sm:$0xff]   ;;  %v2145_v14 = vld [vmem:[%s2248_s15 + $0x38] sm:$0xff]   ;;  %v2146_v15 = vld [vmem:[%s2248_s15 + $0x40] sm:$0xff]  }
  0x11   : > { %1996 = vmatpush3.bf16.msra.mxu0 %v657_v5  ;;  %2062 = vmatpush3.bf16.msra.mxu1 %v1227_v6  ;;  %v2147_v16 = vld [vmem:[%s2248_s15 + $0x48] sm:$0xff]   ;;  %v2148_v17 = vld [vmem:[%s2248_s15 + $0x50] sm:$0xff]   ;;  %v2149_v18 = vld [vmem:[%s2248_s15 + $0x58] sm:$0xff]  }
  0x12   : > { %v2150_v19 = vld [vmem:[%s2248_s15 + $0x60] sm:$0xff]   ;;  %v2151_v20 = vld [vmem:[%s2248_s15 + $0x68] sm:$0xff]   ;;  %v2152_v21 = vld [vmem:[%s2248_s15 + $0x70] sm:$0xff]  }
  0x13   : > { %v2153_v22 = vld [vmem:[%s2248_s15 + $0x78] sm:$0xff]   ;;  %v2154_v23 = vld [vmem:[%s2248_s15 + $0x80] sm:$0xff]   ;;  %v2155_v24 = vld [vmem:[%s2248_s15 + $0x88] sm:$0xff]  }
  0x14   : > { %1998 = vmatmul.mubr.msk.bf16.vlgmr.msra.gmra.mxu0 %vm555_vm2, %v2139_v8  ;;  %2064 = vmatmul.mubr.msk.bf16.vlgmr.msra.gmra.mxu1 %vm555_vm2, %v2139_v8  ;;  %v2156_v25 = vld [vmem:[%s2248_s15 + $0x90] sm:$0xff]   ;;  %v2157_v26 = vld [vmem:[%s2248_s15 + $0x98] sm:$0xff]   ;;  %v2158_v27 = vld [vmem:[%s2248_s15 + $0xa0] sm:$0xff]  }
  0x15   : > { %2001 = vmatprep.mubr.msk.bf16.mxu0 %vm555_vm2, %v2140_v9  ;;  %2067 = vmatprep.mubr.msk.bf16.mxu1 %vm555_vm2, %v2140_v9  ;;  %v2159_v28 = vld [vmem:[%s2248_s15 + $0xa8] sm:$0xff]   ;;  %v2160_v29 = vld [vmem:[%s2248_s15 + $0xb0] sm:$0xff]   ;;  %v2161_v30 = vld [vmem:[%s2248_s15 + $0xb8] sm:$0xff]  }
  0x16   : > { %v2162_v31 = vld [vmem:[%s2248_s15 + $0xc0] sm:$0xff]   ;;  %v2163_v32 = vld [vmem:[%s2248_s15 + $0xc8] sm:$0xff]   ;;  %v2164_v33 = vld [vmem:[%s2248_s15 + $0xd0] sm:$0xff]  }
  0x17   : > { %v2165_v34 = vld [vmem:[%s2248_s15 + $0xd8] sm:$0xff]   ;;  %v2166_v35 = vld [vmem:[%s2248_s15 + $0xe0] sm:$0xff]   ;;  %v2167_v36 = vld [vmem:[%s2248_s15 + $0xe8] sm:$0xff]  }
  0x18   : > { %v2168_v37 = vld [vmem:[%s2248_s15 + $0xf0] sm:$0xff]   ;;  %v2169_v38 = vld [vmem:[%s2248_s15 + $0xf8] sm:$0xff]   ;;  %v2354_v40 = vld [vmem:[%s2889_s5] ss:$0 sm:$0xff] }
  0x19   : > { %v2360_v42 = vld [vmem:[%s2887_s3] ss:$0 sm:$0xff] }
  0x1a   : > { %v2365_v44 = vld [vmem:[%s2890_s6] ss:$0 sm:$0xff] }
  0x1c   : > { %2002 = vmatmul.mubr.msk.bf16.gmra.mxu0 %vm555_vm2, %v2141_v10  ;;  %2068 = vmatmul.mubr.msk.bf16.gmra.mxu1 %vm555_vm2, %v2141_v10 }
  0x1d   : > { %2005 = vmatprep.mubr.msk.bf16.mxu0 %vm555_vm2, %v2142_v11  ;;  %2071 = vmatprep.mubr.msk.bf16.mxu1 %vm555_vm2, %v2142_v11 }
  0x24   : > { %2006 = vmatmul.mubr.msk.bf16.gmra.mxu0 %vm555_vm2, %v2143_v12  ;;  %2072 = vmatmul.mubr.msk.bf16.gmra.mxu1 %vm555_vm2, %v2143_v12 }
  0x25   : > { %2009 = vmatprep.mubr.msk.bf16.mxu0 %vm555_vm2, %v2144_v13  ;;  %2075 = vmatprep.mubr.msk.bf16.mxu1 %vm555_vm2, %v2144_v13 }
  0x2c   : > { %2010 = vmatmul.mubr.msk.bf16.gmra.mxu0 %vm555_vm2, %v2145_v14  ;;  %2076 = vmatmul.mubr.msk.bf16.gmra.mxu1 %vm555_vm2, %v2145_v14 }
  0x2d   : > { %2013 = vmatprep.mubr.msk.bf16.mxu0 %vm555_vm2, %v2146_v15  ;;  %2079 = vmatprep.mubr.msk.bf16.mxu1 %vm555_vm2, %v2146_v15 }
  0x34   : > { %2014 = vmatmul.mubr.msk.bf16.gmra.mxu0 %vm555_vm2, %v2147_v16  ;;  %2080 = vmatmul.mubr.msk.bf16.gmra.mxu1 %vm555_vm2, %v2147_v16 }
  0x35   : > { %2017 = vmatprep.mubr.msk.bf16.mxu0 %vm555_vm2, %v2148_v17  ;;  %2083 = vmatprep.mubr.msk.bf16.mxu1 %vm555_vm2, %v2148_v17 }
  0x3c   : > { %2018 = vmatmul.mubr.msk.bf16.gmra.mxu0 %vm555_vm2, %v2149_v18  ;;  %2084 = vmatmul.mubr.msk.bf16.gmra.mxu1 %vm555_vm2, %v2149_v18 }
  0x3d   : > { %2021 = vmatprep.mubr.msk.bf16.mxu0 %vm555_vm2, %v2150_v19  ;;  %2087 = vmatprep.mubr.msk.bf16.mxu1 %vm555_vm2, %v2150_v19 }
  0x44   : > { %2022 = vmatmul.mubr.msk.bf16.gmra.mxu0 %vm555_vm2, %v2151_v20  ;;  %2088 = vmatmul.mubr.msk.bf16.gmra.mxu1 %vm555_vm2, %v2151_v20 }
  0x45   : > { %2025 = vmatprep.mubr.msk.bf16.mxu0 %vm555_vm2, %v2152_v21  ;;  %2091 = vmatprep.mubr.msk.bf16.mxu1 %vm555_vm2, %v2152_v21 }
  0x4c   : > { %2026 = vmatmul.mubr.msk.bf16.gmra.mxu0 %vm555_vm2, %v2153_v22  ;;  %2092 = vmatmul.mubr.msk.bf16.gmra.mxu1 %vm555_vm2, %v2153_v22 }
  0x4d   : > { %2029 = vmatprep.mubr.msk.bf16.mxu0 %vm555_vm2, %v2154_v23  ;;  %2095 = vmatprep.mubr.msk.bf16.mxu1 %vm555_vm2, %v2154_v23 }
  0x54   : > { %2030 = vmatmul.mubr.msk.bf16.gmra.mxu0 %vm555_vm2, %v2155_v24  ;;  %2096 = vmatmul.mubr.msk.bf16.gmra.mxu1 %vm555_vm2, %v2155_v24 }
  0x55   : > { %2033 = vmatprep.mubr.msk.bf16.mxu0 %vm555_vm2, %v2156_v25  ;;  %2099 = vmatprep.mubr.msk.bf16.mxu1 %vm555_vm2, %v2156_v25 }
  0x5c   : > { %2034 = vmatmul.mubr.msk.bf16.gmra.mxu0 %vm555_vm2, %v2157_v26  ;;  %2100 = vmatmul.mubr.msk.bf16.gmra.mxu1 %vm555_vm2, %v2157_v26 }
  0x5d   : > { %2037 = vmatprep.mubr.msk.bf16.mxu0 %vm555_vm2, %v2158_v27  ;;  %2103 = vmatprep.mubr.msk.bf16.mxu1 %vm555_vm2, %v2158_v27 }
  0x64   : > { %2038 = vmatmul.mubr.msk.bf16.gmra.mxu0 %vm555_vm2, %v2159_v28  ;;  %2104 = vmatmul.mubr.msk.bf16.gmra.mxu1 %vm555_vm2, %v2159_v28 }
  0x65   : > { %2041 = vmatprep.mubr.msk.bf16.mxu0 %vm555_vm2, %v2160_v29  ;;  %2107 = vmatprep.mubr.msk.bf16.mxu1 %vm555_vm2, %v2160_v29 }
  0x6c   : > { %2042 = vmatmul.mubr.msk.bf16.gmra.mxu0 %vm555_vm2, %v2161_v30  ;;  %2108 = vmatmul.mubr.msk.bf16.gmra.mxu1 %vm555_vm2, %v2161_v30 }
  0x6d   : > { %2045 = vmatprep.mubr.msk.bf16.mxu0 %vm555_vm2, %v2162_v31  ;;  %2111 = vmatprep.mubr.msk.bf16.mxu1 %vm555_vm2, %v2162_v31 }
  0x74   : > { %2046 = vmatmul.mubr.msk.bf16.gmra.mxu0 %vm555_vm2, %v2163_v32  ;;  %2112 = vmatmul.mubr.msk.bf16.gmra.mxu1 %vm555_vm2, %v2163_v32 }
  0x75   : > { %2049 = vmatprep.mubr.msk.bf16.mxu0 %vm555_vm2, %v2164_v33  ;;  %2115 = vmatprep.mubr.msk.bf16.mxu1 %vm555_vm2, %v2164_v33 }
  0x7c   : > { %2050 = vmatmul.mubr.msk.bf16.gmra.mxu0 %vm555_vm2, %v2165_v34  ;;  %2116 = vmatmul.mubr.msk.bf16.gmra.mxu1 %vm555_vm2, %v2165_v34 }
  0x7d   : > { %2053 = vmatprep.mubr.msk.bf16.mxu0 %vm555_vm2, %v2166_v35  ;;  %2119 = vmatprep.mubr.msk.bf16.mxu1 %vm555_vm2, %v2166_v35 }
  0x84   : > { %2054 = vmatmul.mubr.msk.bf16.gmra.mxu0 %vm555_vm2, %v2167_v36  ;;  %2120 = vmatmul.mubr.msk.bf16.gmra.mxu1 %vm555_vm2, %v2167_v36 }
  0x85   : > { %2057 = vmatprep.mubr.msk.bf16.mxu0 %vm555_vm2, %v2168_v37  ;;  %2123 = vmatprep.mubr.msk.bf16.mxu1 %vm555_vm2, %v2168_v37 }
  0x8c   : > { %2058 = vmatmul.mubr.msk.bf16.gmra.mxu0 %vm555_vm2, %v2169_v38  ;;  %2124 = vmatmul.mubr.msk.bf16.gmra.mxu1 %vm555_vm2, %v2169_v38 }
  0xd4   : > { %v1999_v41 = vpop.f32.mrf.mxu0  ;;  %v2065_v43 = vpop.f32.mrf.mxu1 }
  0xd5   : > { %v957_v45 = vmul.f32 %v1999_v41, %v2349_v39  ;;  %v1527_v46 = vmul.f32 %v2065_v43, %v2354_v40 }
  0xd6   : > { %v693_v47 = vpop.f32.mrf.mxu0  ;;  %v1263_v48 = vpop.f32.mrf.mxu1 }
  0xd7   : > { %v1028_v49 = vadd.f32 %v2360_v42, %v957_v45  ;;  %v1598_v50 = vadd.f32 %v2365_v44, %v1527_v46  ;;  %v955_v51 = vmul.f32 %v2349_v39, %v693_v47  ;;  %v1525_v52 = vmul.f32 %v2354_v40, %v1263_v48 }
  0xd8   : > { %v2000_v53 = vpop.f32.mrf.mxu0  ;;  %v2066_v54 = vpop.f32.mrf.mxu1 }
  0xd9   : > { %v1092_v55 = vmax.f32 %v1028_v49, 0.0  ;;  %1662 = vst.msk [vmem:[%s2372_s28 + $0x10] sm:$0xff] %vm1154_vm3, %v1598_v50  ;;  %v1026_v56 = vadd.f32 %v2360_v42, %v955_v51  ;;  %v1596_v57 = vadd.f32 %v2365_v44, %v1525_v52  ;;  %v958_v58 = vmul.f32 %v2000_v53, %v2349_v39 }
  0xda   : > { %v1528_v59 = vmul.f32 %v2066_v54, %v2354_v40  ;;  %v696_v60 = vpop.f32.mrf.mxu0  ;;  %v1266_v61 = vpop.f32.mrf.mxu1 }
  0xdb   : > { %1157 = vst.msk [vmem:[%s2381_s9 + $0x10] sm:$0xff] %vm1154_vm3, %v1092_v55  ;;  %v1090_v62 = vmax.f32 %v1026_v56, 0.0  ;;  %1660 = vst.msk [vmem:[%s2372_s28] sm:$0xff] %vm1154_vm3, %v1596_v57  ;;  %v1029_v63 = vadd.f32 %v2360_v42, %v958_v58  ;;  %v956_v0 = vmul.f32 %v2349_v39, %v696_v60  ;;  %v1526_v1 = vmul.f32 %v2354_v40, %v1266_v61 }
  0xdc   : > { %v1599_v2 = vadd.f32 %v2365_v44, %v1528_v59  ;;  %v2003_v3 = vpop.f32.mrf.mxu0  ;;  %v2069_v4 = vpop.f32.mrf.mxu1 }
  0xdd   : > { %1155 = vst.msk [vmem:[%s2381_s9] sm:$0xff] %vm1154_vm3, %v1090_v62  ;;  %v1093_v5 = vmax.f32 %v1029_v63, 0.0  ;;  %v1027_v6 = vadd.f32 %v2360_v42, %v956_v0  ;;  %v1597_v7 = vadd.f32 %v2365_v44, %v1526_v1  ;;  %v961_v8 = vmul.f32 %v2003_v3, %v2349_v39 }
  0xde   : > { %1663 = vst.msk [vmem:[%s2372_s28 + $0x18] sm:$0xff] %vm1154_vm3, %v1599_v2  ;;  %v1531_v9 = vmul.f32 %v2069_v4, %v2354_v40  ;;  %v709_v10 = vpop.f32.mrf.mxu0  ;;  %v1279_v11 = vpop.f32.mrf.mxu1 }
  0xdf   : > { %1158 = vst.msk [vmem:[%s2381_s9 + $0x18] sm:$0xff] %vm1154_vm3, %v1093_v5  ;;  %v1091_v12 = vmax.f32 %v1027_v6, 0.0  ;;  %1661 = vst.msk [vmem:[%s2372_s28 + $0x8] sm:$0xff] %vm1154_vm3, %v1597_v7  ;;  %v1032_v13 = vadd.f32 %v2360_v42, %v961_v8  ;;  %v959_v14 = vmul.f32 %v2349_v39, %v709_v10  ;;  %v1529_v15 = vmul.f32 %v2354_v40, %v1279_v11 }
  0xe0   : > { %v1602_v16 = vadd.f32 %v2365_v44, %v1531_v9  ;;  %v2004_v17 = vpop.f32.mrf.mxu0  ;;  %v2070_v18 = vpop.f32.mrf.mxu1 }
  0xe1   : > { %1156 = vst.msk [vmem:[%s2381_s9 + $0x8] sm:$0xff] %vm1154_vm3, %v1091_v12  ;;  %v1096_v19 = vmax.f32 %v1032_v13, 0.0  ;;  %v1030_v20 = vadd.f32 %v2360_v42, %v959_v14  ;;  %v1600_v21 = vadd.f32 %v2365_v44, %v1529_v15  ;;  %v962_v22 = vmul.f32 %v2004_v17, %v2349_v39 }
  0xe2   : > { %1666 = vst.msk [vmem:[%s2372_s28 + $0x30] sm:$0xff] %vm1154_vm3, %v1602_v16  ;;  %v1532_v23 = vmul.f32 %v2070_v18, %v2354_v40  ;;  %v712_v24 = vpop.f32.mrf.mxu0  ;;  %v1282_v25 = vpop.f32.mrf.mxu1 }
  0xe3   : > { %1161 = vst.msk [vmem:[%s2381_s9 + $0x30] sm:$0xff] %vm1154_vm3, %v1096_v19  ;;  %v1094_v26 = vmax.f32 %v1030_v20, 0.0  ;;  %1664 = vst.msk [vmem:[%s2372_s28 + $0x20] sm:$0xff] %vm1154_vm3, %v1600_v21  ;;  %v1033_v27 = vadd.f32 %v2360_v42, %v962_v22  ;;  %v960_v28 = vmul.f32 %v2349_v39, %v712_v24  ;;  %v1530_v29 = vmul.f32 %v2354_v40, %v1282_v25 }
  0xe4   : > { %v1603_v30 = vadd.f32 %v2365_v44, %v1532_v23  ;;  %v2007_v31 = vpop.f32.mrf.mxu0  ;;  %v2073_v32 = vpop.f32.mrf.mxu1 }
  0xe5   : > { %1159 = vst.msk [vmem:[%s2381_s9 + $0x20] sm:$0xff] %vm1154_vm3, %v1094_v26  ;;  %v1097_v33 = vmax.f32 %v1033_v27, 0.0  ;;  %v1031_v34 = vadd.f32 %v2360_v42, %v960_v28  ;;  %v1601_v35 = vadd.f32 %v2365_v44, %v1530_v29  ;;  %v965_v36 = vmul.f32 %v2007_v31, %v2349_v39 }
  0xe6   : > { %1667 = vst.msk [vmem:[%s2372_s28 + $0x38] sm:$0xff] %vm1154_vm3, %v1603_v30  ;;  %v1535_v37 = vmul.f32 %v2073_v32, %v2354_v40  ;;  %v725_v38 = vpop.f32.mrf.mxu0  ;;  %v1295_v41 = vpop.f32.mrf.mxu1 }
  0xe7   : > { %1162 = vst.msk [vmem:[%s2381_s9 + $0x38] sm:$0xff] %vm1154_vm3, %v1097_v33  ;;  %v1095_v43 = vmax.f32 %v1031_v34, 0.0  ;;  %1665 = vst.msk [vmem:[%s2372_s28 + $0x28] sm:$0xff] %vm1154_vm3, %v1601_v35  ;;  %v1036_v45 = vadd.f32 %v2360_v42, %v965_v36  ;;  %v963_v46 = vmul.f32 %v2349_v39, %v725_v38  ;;  %v1533_v47 = vmul.f32 %v2354_v40, %v1295_v41 }
  0xe8   : > { %v1606_v48 = vadd.f32 %v2365_v44, %v1535_v37  ;;  %v2008_v49 = vpop.f32.mrf.mxu0  ;;  %v2074_v50 = vpop.f32.mrf.mxu1 }
  0xe9   : > { %1160 = vst.msk [vmem:[%s2381_s9 + $0x28] sm:$0xff] %vm1154_vm3, %v1095_v43  ;;  %v1100_v51 = vmax.f32 %v1036_v45, 0.0  ;;  %v1034_v52 = vadd.f32 %v2360_v42, %v963_v46  ;;  %v1604_v53 = vadd.f32 %v2365_v44, %v1533_v47  ;;  %v966_v54 = vmul.f32 %v2008_v49, %v2349_v39 }
  0xea   : > { %1670 = vst.msk [vmem:[%s2372_s28 + $0x50] sm:$0xff] %vm1154_vm3, %v1606_v48  ;;  %v1536_v55 = vmul.f32 %v2074_v50, %v2354_v40  ;;  %v728_v56 = vpop.f32.mrf.mxu0  ;;  %v1298_v57 = vpop.f32.mrf.mxu1 }
  0xeb   : > { %1165 = vst.msk [vmem:[%s2381_s9 + $0x50] sm:$0xff] %vm1154_vm3, %v1100_v51  ;;  %v1098_v58 = vmax.f32 %v1034_v52, 0.0  ;;  %1668 = vst.msk [vmem:[%s2372_s28 + $0x40] sm:$0xff] %vm1154_vm3, %v1604_v53  ;;  %v1037_v59 = vadd.f32 %v2360_v42, %v966_v54  ;;  %v964_v60 = vmul.f32 %v2349_v39, %v728_v56  ;;  %v1534_v61 = vmul.f32 %v2354_v40, %v1298_v57 }
  0xec   : > { %v1607_v62 = vadd.f32 %v2365_v44, %v1536_v55  ;;  %v2011_v63 = vpop.f32.mrf.mxu0  ;;  %v2077_v0 = vpop.f32.mrf.mxu1 }
  0xed   : > { %1163 = vst.msk [vmem:[%s2381_s9 + $0x40] sm:$0xff] %vm1154_vm3, %v1098_v58  ;;  %v1101_v1 = vmax.f32 %v1037_v59, 0.0  ;;  %v1035_v2 = vadd.f32 %v2360_v42, %v964_v60  ;;  %v1605_v3 = vadd.f32 %v2365_v44, %v1534_v61  ;;  %v969_v4 = vmul.f32 %v2011_v63, %v2349_v39 }
  0xee   : > { %1671 = vst.msk [vmem:[%s2372_s28 + $0x58] sm:$0xff] %vm1154_vm3, %v1607_v62  ;;  %v1539_v5 = vmul.f32 %v2077_v0, %v2354_v40  ;;  %v741_v6 = vpop.f32.mrf.mxu0  ;;  %v1311_v7 = vpop.f32.mrf.mxu1 }
  0xef   : > { %1166 = vst.msk [vmem:[%s2381_s9 + $0x58] sm:$0xff] %vm1154_vm3, %v1101_v1  ;;  %v1099_v8 = vmax.f32 %v1035_v2, 0.0  ;;  %1669 = vst.msk [vmem:[%s2372_s28 + $0x48] sm:$0xff] %vm1154_vm3, %v1605_v3  ;;  %v1040_v9 = vadd.f32 %v2360_v42, %v969_v4  ;;  %v967_v10 = vmul.f32 %v2349_v39, %v741_v6  ;;  %v1537_v11 = vmul.f32 %v2354_v40, %v1311_v7 }
  0xf0   : > { %v1610_v12 = vadd.f32 %v2365_v44, %v1539_v5  ;;  %v2012_v13 = vpop.f32.mrf.mxu0  ;;  %v2078_v14 = vpop.f32.mrf.mxu1 }
  0xf1   : > { %1164 = vst.msk [vmem:[%s2381_s9 + $0x48] sm:$0xff] %vm1154_vm3, %v1099_v8  ;;  %v1104_v15 = vmax.f32 %v1040_v9, 0.0  ;;  %v1038_v16 = vadd.f32 %v2360_v42, %v967_v10  ;;  %v1608_v17 = vadd.f32 %v2365_v44, %v1537_v11  ;;  %v970_v18 = vmul.f32 %v2012_v13, %v2349_v39 }
  0xf2   : > { %1674 = vst.msk [vmem:[%s2372_s28 + $0x70] sm:$0xff] %vm1154_vm3, %v1610_v12  ;;  %v1540_v19 = vmul.f32 %v2078_v14, %v2354_v40  ;;  %v744_v20 = vpop.f32.mrf.mxu0  ;;  %v1314_v21 = vpop.f32.mrf.mxu1 }
  0xf3   : > { %1169 = vst.msk [vmem:[%s2381_s9 + $0x70] sm:$0xff] %vm1154_vm3, %v1104_v15  ;;  %v1102_v22 = vmax.f32 %v1038_v16, 0.0  ;;  %1672 = vst.msk [vmem:[%s2372_s28 + $0x60] sm:$0xff] %vm1154_vm3, %v1608_v17  ;;  %v1041_v23 = vadd.f32 %v2360_v42, %v970_v18  ;;  %v968_v24 = vmul.f32 %v2349_v39, %v744_v20  ;;  %v1538_v25 = vmul.f32 %v2354_v40, %v1314_v21 }
  0xf4   : > { %v1611_v26 = vadd.f32 %v2365_v44, %v1540_v19  ;;  %v2015_v27 = vpop.f32.mrf.mxu0  ;;  %v2081_v28 = vpop.f32.mrf.mxu1 }
  0xf5   : > { %1167 = vst.msk [vmem:[%s2381_s9 + $0x60] sm:$0xff] %vm1154_vm3, %v1102_v22  ;;  %v1105_v29 = vmax.f32 %v1041_v23, 0.0  ;;  %v1039_v30 = vadd.f32 %v2360_v42, %v968_v24  ;;  %v1609_v31 = vadd.f32 %v2365_v44, %v1538_v25  ;;  %v973_v32 = vmul.f32 %v2015_v27, %v2349_v39 }
  0xf6   : > { %1675 = vst.msk [vmem:[%s2372_s28 + $0x78] sm:$0xff] %vm1154_vm3, %v1611_v26  ;;  %v1543_v33 = vmul.f32 %v2081_v28, %v2354_v40  ;;  %v757_v34 = vpop.f32.mrf.mxu0  ;;  %v1327_v35 = vpop.f32.mrf.mxu1 }
  0xf7   : > { %1170 = vst.msk [vmem:[%s2381_s9 + $0x78] sm:$0xff] %vm1154_vm3, %v1105_v29  ;;  %v1103_v36 = vmax.f32 %v1039_v30, 0.0  ;;  %1673 = vst.msk [vmem:[%s2372_s28 + $0x68] sm:$0xff] %vm1154_vm3, %v1609_v31  ;;  %v1044_v37 = vadd.f32 %v2360_v42, %v973_v32  ;;  %v971_v38 = vmul.f32 %v2349_v39, %v757_v34  ;;  %v1541_v41 = vmul.f32 %v2354_v40, %v1327_v35 }
  0xf8   : > { %v1614_v43 = vadd.f32 %v2365_v44, %v1543_v33  ;;  %v2016_v45 = vpop.f32.mrf.mxu0  ;;  %v2082_v46 = vpop.f32.mrf.mxu1 }
  0xf9   : > { %1168 = vst.msk [vmem:[%s2381_s9 + $0x68] sm:$0xff] %vm1154_vm3, %v1103_v36  ;;  %v1108_v47 = vmax.f32 %v1044_v37, 0.0  ;;  %v1042_v48 = vadd.f32 %v2360_v42, %v971_v38  ;;  %v1612_v49 = vadd.f32 %v2365_v44, %v1541_v41  ;;  %v974_v50 = vmul.f32 %v2016_v45, %v2349_v39 }
  0xfa   : > { %1678 = vst.msk [vmem:[%s2372_s28 + $0x90] sm:$0xff] %vm1154_vm3, %v1614_v43  ;;  %v1544_v51 = vmul.f32 %v2082_v46, %v2354_v40  ;;  %v760_v52 = vpop.f32.mrf.mxu0  ;;  %v1330_v53 = vpop.f32.mrf.mxu1 }
  0xfb   : > { %1173 = vst.msk [vmem:[%s2381_s9 + $0x90] sm:$0xff] %vm1154_vm3, %v1108_v47  ;;  %v1106_v54 = vmax.f32 %v1042_v48, 0.0  ;;  %1676 = vst.msk [vmem:[%s2372_s28 + $0x80] sm:$0xff] %vm1154_vm3, %v1612_v49  ;;  %v1045_v55 = vadd.f32 %v2360_v42, %v974_v50  ;;  %v972_v56 = vmul.f32 %v2349_v39, %v760_v52  ;;  %v1542_v57 = vmul.f32 %v2354_v40, %v1330_v53 }
  0xfc   : > { %v1615_v58 = vadd.f32 %v2365_v44, %v1544_v51  ;;  %v2019_v59 = vpop.f32.mrf.mxu0  ;;  %v2085_v60 = vpop.f32.mrf.mxu1 }
  0xfd   : > { %1171 = vst.msk [vmem:[%s2381_s9 + $0x80] sm:$0xff] %vm1154_vm3, %v1106_v54  ;;  %v1109_v61 = vmax.f32 %v1045_v55, 0.0  ;;  %v1043_v62 = vadd.f32 %v2360_v42, %v972_v56  ;;  %v1613_v63 = vadd.f32 %v2365_v44, %v1542_v57  ;;  %v977_v0 = vmul.f32 %v2019_v59, %v2349_v39 }
  0xfe   : > { %1679 = vst.msk [vmem:[%s2372_s28 + $0x98] sm:$0xff] %vm1154_vm3, %v1615_v58  ;;  %v1547_v1 = vmul.f32 %v2085_v60, %v2354_v40  ;;  %v773_v2 = vpop.f32.mrf.mxu0  ;;  %v1343_v3 = vpop.f32.mrf.mxu1 }
  0xff   : > { %1174 = vst.msk [vmem:[%s2381_s9 + $0x98] sm:$0xff] %vm1154_vm3, %v1109_v61  ;;  %v1107_v4 = vmax.f32 %v1043_v62, 0.0  ;;  %1677 = vst.msk [vmem:[%s2372_s28 + $0x88] sm:$0xff] %vm1154_vm3, %v1613_v63  ;;  %v1048_v5 = vadd.f32 %v2360_v42, %v977_v0  ;;  %v975_v6 = vmul.f32 %v2349_v39, %v773_v2  ;;  %v1545_v7 = vmul.f32 %v2354_v40, %v1343_v3 }
 0x100   : > { %v1618_v8 = vadd.f32 %v2365_v44, %v1547_v1  ;;  %v2020_v9 = vpop.f32.mrf.mxu0  ;;  %v2086_v10 = vpop.f32.mrf.mxu1 }
 0x101   : > { %1172 = vst.msk [vmem:[%s2381_s9 + $0x88] sm:$0xff] %vm1154_vm3, %v1107_v4  ;;  %v1112_v11 = vmax.f32 %v1048_v5, 0.0  ;;  %v1046_v12 = vadd.f32 %v2360_v42, %v975_v6  ;;  %v1616_v13 = vadd.f32 %v2365_v44, %v1545_v7  ;;  %v978_v14 = vmul.f32 %v2020_v9, %v2349_v39 }
 0x102   : > { %1682 = vst.msk [vmem:[%s2372_s28 + $0xb0] sm:$0xff] %vm1154_vm3, %v1618_v8  ;;  %v1548_v15 = vmul.f32 %v2086_v10, %v2354_v40  ;;  %v776_v16 = vpop.f32.mrf.mxu0  ;;  %v1346_v17 = vpop.f32.mrf.mxu1 }
 0x103   : > { %1177 = vst.msk [vmem:[%s2381_s9 + $0xb0] sm:$0xff] %vm1154_vm3, %v1112_v11  ;;  %v1110_v18 = vmax.f32 %v1046_v12, 0.0  ;;  %1680 = vst.msk [vmem:[%s2372_s28 + $0xa0] sm:$0xff] %vm1154_vm3, %v1616_v13  ;;  %v1049_v19 = vadd.f32 %v2360_v42, %v978_v14  ;;  %v976_v20 = vmul.f32 %v2349_v39, %v776_v16  ;;  %v1546_v21 = vmul.f32 %v2354_v40, %v1346_v17 }
 0x104   : > { %v1619_v22 = vadd.f32 %v2365_v44, %v1548_v15  ;;  %v2023_v23 = vpop.f32.mrf.mxu0  ;;  %v2089_v24 = vpop.f32.mrf.mxu1 }
 0x105   : > { %1175 = vst.msk [vmem:[%s2381_s9 + $0xa0] sm:$0xff] %vm1154_vm3, %v1110_v18  ;;  %v1113_v25 = vmax.f32 %v1049_v19, 0.0  ;;  %v1047_v26 = vadd.f32 %v2360_v42, %v976_v20  ;;  %v1617_v27 = vadd.f32 %v2365_v44, %v1546_v21  ;;  %v981_v28 = vmul.f32 %v2023_v23, %v2349_v39 }
 0x106   : > { %1683 = vst.msk [vmem:[%s2372_s28 + $0xb8] sm:$0xff] %vm1154_vm3, %v1619_v22  ;;  %v1551_v29 = vmul.f32 %v2089_v24, %v2354_v40  ;;  %v789_v30 = vpop.f32.mrf.mxu0  ;;  %v1359_v31 = vpop.f32.mrf.mxu1 }
 0x107   : > { %1178 = vst.msk [vmem:[%s2381_s9 + $0xb8] sm:$0xff] %vm1154_vm3, %v1113_v25  ;;  %v1111_v32 = vmax.f32 %v1047_v26, 0.0  ;;  %1681 = vst.msk [vmem:[%s2372_s28 + $0xa8] sm:$0xff] %vm1154_vm3, %v1617_v27  ;;  %v1052_v33 = vadd.f32 %v2360_v42, %v981_v28  ;;  %v979_v34 = vmul.f32 %v2349_v39, %v789_v30  ;;  %v1549_v35 = vmul.f32 %v2354_v40, %v1359_v31 }
 0x108   : > { %v1622_v36 = vadd.f32 %v2365_v44, %v1551_v29  ;;  %v2024_v37 = vpop.f32.mrf.mxu0  ;;  %v2090_v38 = vpop.f32.mrf.mxu1 }
 0x109   : > { %1176 = vst.msk [vmem:[%s2381_s9 + $0xa8] sm:$0xff] %vm1154_vm3, %v1111_v32  ;;  %v1116_v41 = vmax.f32 %v1052_v33, 0.0  ;;  %v1050_v43 = vadd.f32 %v2360_v42, %v979_v34  ;;  %v1620_v45 = vadd.f32 %v2365_v44, %v1549_v35  ;;  %v982_v46 = vmul.f32 %v2024_v37, %v2349_v39 }
 0x10a   : > { %1686 = vst.msk [vmem:[%s2372_s28 + $0xd0] sm:$0xff] %vm1154_vm3, %v1622_v36  ;;  %v1552_v47 = vmul.f32 %v2090_v38, %v2354_v40  ;;  %v792_v48 = vpop.f32.mrf.mxu0  ;;  %v1362_v49 = vpop.f32.mrf.mxu1 }
 0x10b   : > { %1181 = vst.msk [vmem:[%s2381_s9 + $0xd0] sm:$0xff] %vm1154_vm3, %v1116_v41  ;;  %v1114_v50 = vmax.f32 %v1050_v43, 0.0  ;;  %1684 = vst.msk [vmem:[%s2372_s28 + $0xc0] sm:$0xff] %vm1154_vm3, %v1620_v45  ;;  %v1053_v51 = vadd.f32 %v2360_v42, %v982_v46  ;;  %v980_v52 = vmul.f32 %v2349_v39, %v792_v48  ;;  %v1550_v53 = vmul.f32 %v2354_v40, %v1362_v49 }
 0x10c   : > { %v1623_v54 = vadd.f32 %v2365_v44, %v1552_v47  ;;  %v2027_v55 = vpop.f32.mrf.mxu0  ;;  %v2093_v56 = vpop.f32.mrf.mxu1 }
 0x10d   : > { %1179 = vst.msk [vmem:[%s2381_s9 + $0xc0] sm:$0xff] %vm1154_vm3, %v1114_v50  ;;  %v1117_v57 = vmax.f32 %v1053_v51, 0.0  ;;  %v1051_v58 = vadd.f32 %v2360_v42, %v980_v52  ;;  %v1621_v59 = vadd.f32 %v2365_v44, %v1550_v53  ;;  %v985_v60 = vmul.f32 %v2027_v55, %v2349_v39 }
 0x10e   : > { %1687 = vst.msk [vmem:[%s2372_s28 + $0xd8] sm:$0xff] %vm1154_vm3, %v1623_v54  ;;  %v1555_v61 = vmul.f32 %v2093_v56, %v2354_v40  ;;  %v805_v62 = vpop.f32.mrf.mxu0  ;;  %v1375_v63 = vpop.f32.mrf.mxu1 }
 0x10f   : > { %1182 = vst.msk [vmem:[%s2381_s9 + $0xd8] sm:$0xff] %vm1154_vm3, %v1117_v57  ;;  %v1115_v0 = vmax.f32 %v1051_v58, 0.0  ;;  %1685 = vst.msk [vmem:[%s2372_s28 + $0xc8] sm:$0xff] %vm1154_vm3, %v1621_v59  ;;  %v1056_v1 = vadd.f32 %v2360_v42, %v985_v60  ;;  %v983_v2 = vmul.f32 %v2349_v39, %v805_v62  ;;  %v1553_v3 = vmul.f32 %v2354_v40, %v1375_v63 }
 0x110   : > { %v1626_v4 = vadd.f32 %v2365_v44, %v1555_v61  ;;  %v2028_v5 = vpop.f32.mrf.mxu0  ;;  %v2094_v6 = vpop.f32.mrf.mxu1 }
 0x111   : > { %1180 = vst.msk [vmem:[%s2381_s9 + $0xc8] sm:$0xff] %vm1154_vm3, %v1115_v0  ;;  %v1120_v7 = vmax.f32 %v1056_v1, 0.0  ;;  %v1054_v8 = vadd.f32 %v2360_v42, %v983_v2  ;;  %v1624_v9 = vadd.f32 %v2365_v44, %v1553_v3  ;;  %v986_v10 = vmul.f32 %v2028_v5, %v2349_v39 }
 0x112   : > { %1690 = vst.msk [vmem:[%s2372_s28 + $0xf0] sm:$0xff] %vm1154_vm3, %v1626_v4  ;;  %v1556_v11 = vmul.f32 %v2094_v6, %v2354_v40  ;;  %v808_v12 = vpop.f32.mrf.mxu0  ;;  %v1378_v13 = vpop.f32.mrf.mxu1 }
 0x113   : > { %1185 = vst.msk [vmem:[%s2381_s9 + $0xf0] sm:$0xff] %vm1154_vm3, %v1120_v7  ;;  %v1118_v14 = vmax.f32 %v1054_v8, 0.0  ;;  %1688 = vst.msk [vmem:[%s2372_s28 + $0xe0] sm:$0xff] %vm1154_vm3, %v1624_v9  ;;  %v1057_v15 = vadd.f32 %v2360_v42, %v986_v10  ;;  %v984_v16 = vmul.f32 %v2349_v39, %v808_v12  ;;  %v1554_v17 = vmul.f32 %v2354_v40, %v1378_v13 }
 0x114   : > { %v1627_v18 = vadd.f32 %v2365_v44, %v1556_v11  ;;  %v2031_v19 = vpop.f32.mrf.mxu0  ;;  %v2097_v20 = vpop.f32.mrf.mxu1 }
 0x115   : > { %1183 = vst.msk [vmem:[%s2381_s9 + $0xe0] sm:$0xff] %vm1154_vm3, %v1118_v14  ;;  %v1121_v21 = vmax.f32 %v1057_v15, 0.0  ;;  %v1055_v22 = vadd.f32 %v2360_v42, %v984_v16  ;;  %v1625_v23 = vadd.f32 %v2365_v44, %v1554_v17  ;;  %v989_v24 = vmul.f32 %v2031_v19, %v2349_v39 }
 0x116   : > { %1691 = vst.msk [vmem:[%s2372_s28 + $0xf8] sm:$0xff] %vm1154_vm3, %v1627_v18  ;;  %v1559_v25 = vmul.f32 %v2097_v20, %v2354_v40  ;;  %v821_v26 = vpop.f32.mrf.mxu0  ;;  %v1391_v27 = vpop.f32.mrf.mxu1 }
 0x117   : > { %1186 = vst.msk [vmem:[%s2381_s9 + $0xf8] sm:$0xff] %vm1154_vm3, %v1121_v21  ;;  %v1119_v28 = vmax.f32 %v1055_v22, 0.0  ;;  %1689 = vst.msk [vmem:[%s2372_s28 + $0xe8] sm:$0xff] %vm1154_vm3, %v1625_v23  ;;  %v1060_v29 = vadd.f32 %v2360_v42, %v989_v24  ;;  %v987_v30 = vmul.f32 %v2349_v39, %v821_v26  ;;  %v1557_v31 = vmul.f32 %v2354_v40, %v1391_v27 }
 0x118   : > { %v1630_v32 = vadd.f32 %v2365_v44, %v1559_v25  ;;  %v2032_v33 = vpop.f32.mrf.mxu0  ;;  %v2098_v34 = vpop.f32.mrf.mxu1 }
 0x119   : > { %1184 = vst.msk [vmem:[%s2381_s9 + $0xe8] sm:$0xff] %vm1154_vm3, %v1119_v28  ;;  %v1124_v35 = vmax.f32 %v1060_v29, 0.0  ;;  %v1058_v36 = vadd.f32 %v2360_v42, %v987_v30  ;;  %v1628_v37 = vadd.f32 %v2365_v44, %v1557_v31  ;;  %v990_v38 = vmul.f32 %v2032_v33, %v2349_v39 }
 0x11a   : > { %1694 = vst.msk [vmem:[%s2372_s28 + $0x110] sm:$0xff] %vm1154_vm3, %v1630_v32  ;;  %v1560_v41 = vmul.f32 %v2098_v34, %v2354_v40  ;;  %v824_v43 = vpop.f32.mrf.mxu0  ;;  %v1394_v45 = vpop.f32.mrf.mxu1 }
 0x11b   : > { %1189 = vst.msk [vmem:[%s2381_s9 + $0x110] sm:$0xff] %vm1154_vm3, %v1124_v35  ;;  %v1122_v46 = vmax.f32 %v1058_v36, 0.0  ;;  %1692 = vst.msk [vmem:[%s2372_s28 + $0x100] sm:$0xff] %vm1154_vm3, %v1628_v37  ;;  %v1061_v47 = vadd.f32 %v2360_v42, %v990_v38  ;;  %v988_v48 = vmul.f32 %v2349_v39, %v824_v43  ;;  %v1558_v49 = vmul.f32 %v2354_v40, %v1394_v45 }
 0x11c   : > { %v1631_v50 = vadd.f32 %v2365_v44, %v1560_v41  ;;  %v2035_v51 = vpop.f32.mrf.mxu0  ;;  %v2101_v52 = vpop.f32.mrf.mxu1 }
 0x11d   : > { %1187 = vst.msk [vmem:[%s2381_s9 + $0x100] sm:$0xff] %vm1154_vm3, %v1122_v46  ;;  %v1125_v53 = vmax.f32 %v1061_v47, 0.0  ;;  %v1059_v54 = vadd.f32 %v2360_v42, %v988_v48  ;;  %v1629_v55 = vadd.f32 %v2365_v44, %v1558_v49  ;;  %v993_v56 = vmul.f32 %v2035_v51, %v2349_v39 }
 0x11e   : > { %1695 = vst.msk [vmem:[%s2372_s28 + $0x118] sm:$0xff] %vm1154_vm3, %v1631_v50  ;;  %v1563_v57 = vmul.f32 %v2101_v52, %v2354_v40  ;;  %v837_v58 = vpop.f32.mrf.mxu0  ;;  %v1407_v59 = vpop.f32.mrf.mxu1 }
 0x11f   : > { %1190 = vst.msk [vmem:[%s2381_s9 + $0x118] sm:$0xff] %vm1154_vm3, %v1125_v53  ;;  %v1123_v60 = vmax.f32 %v1059_v54, 0.0  ;;  %1693 = vst.msk [vmem:[%s2372_s28 + $0x108] sm:$0xff] %vm1154_vm3, %v1629_v55  ;;  %v1064_v61 = vadd.f32 %v2360_v42, %v993_v56  ;;  %v991_v62 = vmul.f32 %v2349_v39, %v837_v58  ;;  %v1561_v63 = vmul.f32 %v2354_v40, %v1407_v59 }
 0x120   : > { %v1634_v0 = vadd.f32 %v2365_v44, %v1563_v57  ;;  %v2036_v1 = vpop.f32.mrf.mxu0  ;;  %v2102_v2 = vpop.f32.mrf.mxu1 }
 0x121   : > { %1188 = vst.msk [vmem:[%s2381_s9 + $0x108] sm:$0xff] %vm1154_vm3, %v1123_v60  ;;  %v1128_v3 = vmax.f32 %v1064_v61, 0.0  ;;  %v1062_v4 = vadd.f32 %v2360_v42, %v991_v62  ;;  %v1632_v5 = vadd.f32 %v2365_v44, %v1561_v63  ;;  %v994_v6 = vmul.f32 %v2036_v1, %v2349_v39 }
 0x122   : > { %1698 = vst.msk [vmem:[%s2372_s28 + $0x130] sm:$0xff] %vm1154_vm3, %v1634_v0  ;;  %v1564_v7 = vmul.f32 %v2102_v2, %v2354_v40  ;;  %v840_v8 = vpop.f32.mrf.mxu0  ;;  %v1410_v9 = vpop.f32.mrf.mxu1 }
 0x123   : > { %1193 = vst.msk [vmem:[%s2381_s9 + $0x130] sm:$0xff] %vm1154_vm3, %v1128_v3  ;;  %v1126_v10 = vmax.f32 %v1062_v4, 0.0  ;;  %1696 = vst.msk [vmem:[%s2372_s28 + $0x120] sm:$0xff] %vm1154_vm3, %v1632_v5  ;;  %v1065_v11 = vadd.f32 %v2360_v42, %v994_v6  ;;  %v992_v12 = vmul.f32 %v2349_v39, %v840_v8  ;;  %v1562_v13 = vmul.f32 %v2354_v40, %v1410_v9 }
 0x124   : > { %v1635_v14 = vadd.f32 %v2365_v44, %v1564_v7  ;;  %v2039_v15 = vpop.f32.mrf.mxu0  ;;  %v2105_v16 = vpop.f32.mrf.mxu1 }
 0x125   : > { %1191 = vst.msk [vmem:[%s2381_s9 + $0x120] sm:$0xff] %vm1154_vm3, %v1126_v10  ;;  %v1129_v17 = vmax.f32 %v1065_v11, 0.0  ;;  %v1063_v18 = vadd.f32 %v2360_v42, %v992_v12  ;;  %v1633_v19 = vadd.f32 %v2365_v44, %v1562_v13  ;;  %v997_v20 = vmul.f32 %v2039_v15, %v2349_v39 }
 0x126   : > { %1699 = vst.msk [vmem:[%s2372_s28 + $0x138] sm:$0xff] %vm1154_vm3, %v1635_v14  ;;  %v1567_v21 = vmul.f32 %v2105_v16, %v2354_v40  ;;  %v853_v22 = vpop.f32.mrf.mxu0  ;;  %v1423_v23 = vpop.f32.mrf.mxu1 }
 0x127   : > { %1194 = vst.msk [vmem:[%s2381_s9 + $0x138] sm:$0xff] %vm1154_vm3, %v1129_v17  ;;  %v1127_v24 = vmax.f32 %v1063_v18, 0.0  ;;  %1697 = vst.msk [vmem:[%s2372_s28 + $0x128] sm:$0xff] %vm1154_vm3, %v1633_v19  ;;  %v1068_v25 = vadd.f32 %v2360_v42, %v997_v20  ;;  %v995_v26 = vmul.f32 %v2349_v39, %v853_v22  ;;  %v1565_v27 = vmul.f32 %v2354_v40, %v1423_v23 }
 0x128   : > { %v1638_v28 = vadd.f32 %v2365_v44, %v1567_v21  ;;  %v2040_v29 = vpop.f32.mrf.mxu0  ;;  %v2106_v30 = vpop.f32.mrf.mxu1 }
 0x129   : > { %1192 = vst.msk [vmem:[%s2381_s9 + $0x128] sm:$0xff] %vm1154_vm3, %v1127_v24  ;;  %v1132_v31 = vmax.f32 %v1068_v25, 0.0  ;;  %v1066_v32 = vadd.f32 %v2360_v42, %v995_v26  ;;  %v1636_v33 = vadd.f32 %v2365_v44, %v1565_v27  ;;  %v998_v34 = vmul.f32 %v2040_v29, %v2349_v39 }
 0x12a   : > { %1702 = vst.msk [vmem:[%s2372_s28 + $0x150] sm:$0xff] %vm1154_vm3, %v1638_v28  ;;  %v1568_v35 = vmul.f32 %v2106_v30, %v2354_v40  ;;  %v856_v36 = vpop.f32.mrf.mxu0  ;;  %v1426_v37 = vpop.f32.mrf.mxu1 }
 0x12b   : > { %1197 = vst.msk [vmem:[%s2381_s9 + $0x150] sm:$0xff] %vm1154_vm3, %v1132_v31  ;;  %v1130_v38 = vmax.f32 %v1066_v32, 0.0  ;;  %1700 = vst.msk [vmem:[%s2372_s28 + $0x140] sm:$0xff] %vm1154_vm3, %v1636_v33  ;;  %v1069_v41 = vadd.f32 %v2360_v42, %v998_v34  ;;  %v996_v43 = vmul.f32 %v2349_v39, %v856_v36  ;;  %v1566_v45 = vmul.f32 %v2354_v40, %v1426_v37 }
 0x12c   : > { %v1639_v46 = vadd.f32 %v2365_v44, %v1568_v35  ;;  %v2043_v47 = vpop.f32.mrf.mxu0  ;;  %v2109_v48 = vpop.f32.mrf.mxu1 }
 0x12d   : > { %1195 = vst.msk [vmem:[%s2381_s9 + $0x140] sm:$0xff] %vm1154_vm3, %v1130_v38  ;;  %v1133_v49 = vmax.f32 %v1069_v41, 0.0  ;;  %v1067_v50 = vadd.f32 %v2360_v42, %v996_v43  ;;  %v1637_v51 = vadd.f32 %v2365_v44, %v1566_v45  ;;  %v1001_v52 = vmul.f32 %v2043_v47, %v2349_v39 }
 0x12e   : > { %1703 = vst.msk [vmem:[%s2372_s28 + $0x158] sm:$0xff] %vm1154_vm3, %v1639_v46  ;;  %v1571_v53 = vmul.f32 %v2109_v48, %v2354_v40  ;;  %v869_v54 = vpop.f32.mrf.mxu0  ;;  %v1439_v55 = vpop.f32.mrf.mxu1 }
 0x12f   : > { %1198 = vst.msk [vmem:[%s2381_s9 + $0x158] sm:$0xff] %vm1154_vm3, %v1133_v49  ;;  %v1131_v56 = vmax.f32 %v1067_v50, 0.0  ;;  %1701 = vst.msk [vmem:[%s2372_s28 + $0x148] sm:$0xff] %vm1154_vm3, %v1637_v51  ;;  %v1072_v57 = vadd.f32 %v2360_v42, %v1001_v52  ;;  %v999_v58 = vmul.f32 %v2349_v39, %v869_v54  ;;  %v1569_v59 = vmul.f32 %v2354_v40, %v1439_v55 }
 0x130   : > { %v1642_v60 = vadd.f32 %v2365_v44, %v1571_v53  ;;  %v2044_v61 = vpop.f32.mrf.mxu0  ;;  %v2110_v62 = vpop.f32.mrf.mxu1 }
 0x131   : > { %1196 = vst.msk [vmem:[%s2381_s9 + $0x148] sm:$0xff] %vm1154_vm3, %v1131_v56  ;;  %v1136_v63 = vmax.f32 %v1072_v57, 0.0  ;;  %v1070_v0 = vadd.f32 %v2360_v42, %v999_v58  ;;  %v1640_v1 = vadd.f32 %v2365_v44, %v1569_v59  ;;  %v1002_v2 = vmul.f32 %v2044_v61, %v2349_v39 }
 0x132   : > { %1706 = vst.msk [vmem:[%s2372_s28 + $0x170] sm:$0xff] %vm1154_vm3, %v1642_v60  ;;  %v1572_v3 = vmul.f32 %v2110_v62, %v2354_v40  ;;  %v872_v4 = vpop.f32.mrf.mxu0  ;;  %v1442_v5 = vpop.f32.mrf.mxu1 }
 0x133   : > { %1201 = vst.msk [vmem:[%s2381_s9 + $0x170] sm:$0xff] %vm1154_vm3, %v1136_v63  ;;  %v1134_v6 = vmax.f32 %v1070_v0, 0.0  ;;  %1704 = vst.msk [vmem:[%s2372_s28 + $0x160] sm:$0xff] %vm1154_vm3, %v1640_v1  ;;  %v1073_v7 = vadd.f32 %v2360_v42, %v1002_v2  ;;  %v1000_v8 = vmul.f32 %v2349_v39, %v872_v4  ;;  %v1570_v9 = vmul.f32 %v2354_v40, %v1442_v5 }
 0x134   : > { %v1643_v10 = vadd.f32 %v2365_v44, %v1572_v3  ;;  %v2047_v11 = vpop.f32.mrf.mxu0  ;;  %v2113_v12 = vpop.f32.mrf.mxu1 }
 0x135   : > { %1199 = vst.msk [vmem:[%s2381_s9 + $0x160] sm:$0xff] %vm1154_vm3, %v1134_v6  ;;  %v1137_v13 = vmax.f32 %v1073_v7, 0.0  ;;  %v1071_v14 = vadd.f32 %v2360_v42, %v1000_v8  ;;  %v1641_v15 = vadd.f32 %v2365_v44, %v1570_v9  ;;  %v1005_v16 = vmul.f32 %v2047_v11, %v2349_v39 }
 0x136   : > { %1707 = vst.msk [vmem:[%s2372_s28 + $0x178] sm:$0xff] %vm1154_vm3, %v1643_v10  ;;  %v1575_v17 = vmul.f32 %v2113_v12, %v2354_v40  ;;  %v885_v18 = vpop.f32.mrf.mxu0  ;;  %v1455_v19 = vpop.f32.mrf.mxu1 }
 0x137   : > { %1202 = vst.msk [vmem:[%s2381_s9 + $0x178] sm:$0xff] %vm1154_vm3, %v1137_v13  ;;  %v1135_v20 = vmax.f32 %v1071_v14, 0.0  ;;  %1705 = vst.msk [vmem:[%s2372_s28 + $0x168] sm:$0xff] %vm1154_vm3, %v1641_v15  ;;  %v1076_v21 = vadd.f32 %v2360_v42, %v1005_v16  ;;  %v1003_v22 = vmul.f32 %v2349_v39, %v885_v18  ;;  %v1573_v23 = vmul.f32 %v2354_v40, %v1455_v19  ;;  %v2173_v19 = vld [vmem:[%s2890_s6] ss:$0 sm:$0xff] }
 0x138   : > { %v1646_v24 = vadd.f32 %v2365_v44, %v1575_v17  ;;  %v2048_v25 = vpop.f32.mrf.mxu0  ;;  %v2114_v26 = vpop.f32.mrf.mxu1  ;;  %v2172_v17 = vld [vmem:[%s2889_s5] ss:$0 sm:$0xff] }
 0x139   : > { %1200 = vst.msk [vmem:[%s2381_s9 + $0x168] sm:$0xff] %vm1154_vm3, %v1135_v20  ;;  %v1140_v27 = vmax.f32 %v1076_v21, 0.0  ;;  %v1074_v28 = vadd.f32 %v2360_v42, %v1003_v22  ;;  %v1644_v29 = vadd.f32 %v2365_v44, %v1573_v23  ;;  %v1006_v30 = vmul.f32 %v2048_v25, %v2349_v39 }
 0x13a   : > { %1710 = vst.msk [vmem:[%s2372_s28 + $0x190] sm:$0xff] %vm1154_vm3, %v1646_v24  ;;  %v1576_v31 = vmul.f32 %v2114_v26, %v2354_v40  ;;  %v888_v32 = vpop.f32.mrf.mxu0  ;;  %v1458_v33 = vpop.f32.mrf.mxu1 }
 0x13b   : > { %1205 = vst.msk [vmem:[%s2381_s9 + $0x190] sm:$0xff] %vm1154_vm3, %v1140_v27  ;;  %v1138_v34 = vmax.f32 %v1074_v28, 0.0  ;;  %1708 = vst.msk [vmem:[%s2372_s28 + $0x180] sm:$0xff] %vm1154_vm3, %v1644_v29  ;;  %v1077_v35 = vadd.f32 %v2360_v42, %v1006_v30  ;;  %v1004_v36 = vmul.f32 %v2349_v39, %v888_v32  ;;  %v1574_v37 = vmul.f32 %v2354_v40, %v1458_v33 }
 0x13c   : > { %v1647_v38 = vadd.f32 %v2365_v44, %v1576_v31  ;;  %v2051_v41 = vpop.f32.mrf.mxu0  ;;  %v2117_v43 = vpop.f32.mrf.mxu1 }
 0x13d   : > { %1203 = vst.msk [vmem:[%s2381_s9 + $0x180] sm:$0xff] %vm1154_vm3, %v1138_v34  ;;  %v1141_v45 = vmax.f32 %v1077_v35, 0.0  ;;  %v1075_v46 = vadd.f32 %v2360_v42, %v1004_v36  ;;  %v1645_v47 = vadd.f32 %v2365_v44, %v1574_v37  ;;  %v1009_v48 = vmul.f32 %v2051_v41, %v2349_v39 }
 0x13e   : > { %1711 = vst.msk [vmem:[%s2372_s28 + $0x198] sm:$0xff] %vm1154_vm3, %v1647_v38  ;;  %v1579_v49 = vmul.f32 %v2117_v43, %v2354_v40  ;;  %v901_v50 = vpop.f32.mrf.mxu0  ;;  %v1471_v51 = vpop.f32.mrf.mxu1 }
 0x13f   : > { %1206 = vst.msk [vmem:[%s2381_s9 + $0x198] sm:$0xff] %vm1154_vm3, %v1141_v45  ;;  %v1139_v52 = vmax.f32 %v1075_v46, 0.0  ;;  %1709 = vst.msk [vmem:[%s2372_s28 + $0x188] sm:$0xff] %vm1154_vm3, %v1645_v47  ;;  %v1080_v53 = vadd.f32 %v2360_v42, %v1009_v48  ;;  %v1007_v54 = vmul.f32 %v2349_v39, %v901_v50  ;;  %v1577_v55 = vmul.f32 %v2354_v40, %v1471_v51 }
 0x140   : > { %v1650_v56 = vadd.f32 %v2365_v44, %v1579_v49  ;;  %v2052_v57 = vpop.f32.mrf.mxu0  ;;  %v2118_v58 = vpop.f32.mrf.mxu1 }
 0x141   : > { %1204 = vst.msk [vmem:[%s2381_s9 + $0x188] sm:$0xff] %vm1154_vm3, %v1139_v52  ;;  %v1144_v59 = vmax.f32 %v1080_v53, 0.0  ;;  %v1078_v60 = vadd.f32 %v2360_v42, %v1007_v54  ;;  %v1648_v61 = vadd.f32 %v2365_v44, %v1577_v55  ;;  %v1010_v62 = vmul.f32 %v2052_v57, %v2349_v39 }
 0x142   : > { %1714 = vst.msk [vmem:[%s2372_s28 + $0x1b0] sm:$0xff] %vm1154_vm3, %v1650_v56  ;;  %v1580_v63 = vmul.f32 %v2118_v58, %v2354_v40  ;;  %v904_v0 = vpop.f32.mrf.mxu0  ;;  %v1474_v1 = vpop.f32.mrf.mxu1 }
 0x143   : > { %1209 = vst.msk [vmem:[%s2381_s9 + $0x1b0] sm:$0xff] %vm1154_vm3, %v1144_v59  ;;  %v1142_v2 = vmax.f32 %v1078_v60, 0.0  ;;  %1712 = vst.msk [vmem:[%s2372_s28 + $0x1a0] sm:$0xff] %vm1154_vm3, %v1648_v61  ;;  %v1081_v3 = vadd.f32 %v2360_v42, %v1010_v62  ;;  %v1008_v4 = vmul.f32 %v2349_v39, %v904_v0  ;;  %v1578_v5 = vmul.f32 %v2354_v40, %v1474_v1 }
 0x144   : > { %v1651_v6 = vadd.f32 %v2365_v44, %v1580_v63  ;;  %v2055_v7 = vpop.f32.mrf.mxu0  ;;  %v2121_v8 = vpop.f32.mrf.mxu1 }
 0x145   : > { %1207 = vst.msk [vmem:[%s2381_s9 + $0x1a0] sm:$0xff] %vm1154_vm3, %v1142_v2  ;;  %v1145_v9 = vmax.f32 %v1081_v3, 0.0  ;;  %v1079_v10 = vadd.f32 %v2360_v42, %v1008_v4  ;;  %v1649_v11 = vadd.f32 %v2365_v44, %v1578_v5  ;;  %v1013_v12 = vmul.f32 %v2055_v7, %v2349_v39  ;;  %v2828_v42 = vld [vmem:[%s2887_s3] ss:$0 sm:$0xff] }
 0x146   : > { %1715 = vst.msk [vmem:[%s2372_s28 + $0x1b8] sm:$0xff] %vm1154_vm3, %v1651_v6  ;;  %v1583_v13 = vmul.f32 %v2121_v8, %v2354_v40  ;;  %v917_v14 = vpop.f32.mrf.mxu0  ;;  %v1487_v15 = vpop.f32.mrf.mxu1  ;;  %v2171_v40 = vld [vmem:[%s2886_s2] ss:$0 sm:$0xff] }
 0x147   : > { %1210 = vst.msk [vmem:[%s2381_s9 + $0x1b8] sm:$0xff] %vm1154_vm3, %v1145_v9  ;;  %v1143_v16 = vmax.f32 %v1079_v10, 0.0  ;;  %1713 = vst.msk [vmem:[%s2372_s28 + $0x1a8] sm:$0xff] %vm1154_vm3, %v1649_v11  ;;  %v1084_v39 = vadd.f32 %v2828_v42, %v1013_v12  ;;  %v1011_v44 = vmul.f32 %v2171_v40, %v917_v14  ;;  %v1581_v18 = vmul.f32 %v2172_v17, %v1487_v15 }
 0x148   : > { %v1654_v20 = vadd.f32 %v2173_v19, %v1583_v13  ;;  %v2056_v21 = vpop.f32.mrf.mxu0  ;;  %v2122_v22 = vpop.f32.mrf.mxu1 }
 0x149   : > { %1208 = vst.msk [vmem:[%s2381_s9 + $0x1a8] sm:$0xff] %vm1154_vm3, %v1143_v16  ;;  %v1148_v23 = vmax.f32 %v1084_v39, 0.0  ;;  %v1082_v24 = vadd.f32 %v2828_v42, %v1011_v44  ;;  %v1652_v25 = vadd.f32 %v2173_v19, %v1581_v18  ;;  %v1014_v26 = vmul.f32 %v2171_v40, %v2056_v21 }
 0x14a   : > { %1718 = vst.msk [vmem:[%s2372_s28 + $0x1d0] sm:$0xff] %vm1154_vm3, %v1654_v20  ;;  %v1584_v27 = vmul.f32 %v2172_v17, %v2122_v22  ;;  %v920_v28 = vpop.f32.mrf.mxu0  ;;  %v1490_v29 = vpop.f32.mrf.mxu1 }
 0x14b   : > { %1213 = vst.msk [vmem:[%s2381_s9 + $0x1d0] sm:$0xff] %vm1154_vm3, %v1148_v23  ;;  %v1146_v30 = vmax.f32 %v1082_v24, 0.0  ;;  %1716 = vst.msk [vmem:[%s2372_s28 + $0x1c0] sm:$0xff] %vm1154_vm3, %v1652_v25  ;;  %v1085_v31 = vadd.f32 %v2828_v42, %v1014_v26  ;;  %v1012_v32 = vmul.f32 %v2171_v40, %v920_v28  ;;  %v1582_v33 = vmul.f32 %v2172_v17, %v1490_v29 }
 0x14c   : > { %v1655_v34 = vadd.f32 %v2173_v19, %v1584_v27  ;;  %v2059_v35 = vpop.f32.mrf.mxu0  ;;  %v2125_v36 = vpop.f32.mrf.mxu1 }
 0x14d   : > { %1211 = vst.msk [vmem:[%s2381_s9 + $0x1c0] sm:$0xff] %vm1154_vm3, %v1146_v30  ;;  %v1149_v37 = vmax.f32 %v1085_v31, 0.0  ;;  %v1083_v38 = vadd.f32 %v2828_v42, %v1012_v32  ;;  %v1653_v41 = vadd.f32 %v2173_v19, %v1582_v33  ;;  %v1017_v43 = vmul.f32 %v2171_v40, %v2059_v35 }
 0x14e   : > { %1719 = vst.msk [vmem:[%s2372_s28 + $0x1d8] sm:$0xff] %vm1154_vm3, %v1655_v34  ;;  %v1587_v45 = vmul.f32 %v2172_v17, %v2125_v36  ;;  %v933_v46 = vpop.f32.mrf.mxu0  ;;  %v1503_v47 = vpop.f32.mrf.mxu1 }
 0x14f   : > { %1214 = vst.msk [vmem:[%s2381_s9 + $0x1d8] sm:$0xff] %vm1154_vm3, %v1149_v37  ;;  %v1147_v48 = vmax.f32 %v1083_v38, 0.0  ;;  %1717 = vst.msk [vmem:[%s2372_s28 + $0x1c8] sm:$0xff] %vm1154_vm3, %v1653_v41  ;;  %v1088_v49 = vadd.f32 %v2828_v42, %v1017_v43  ;;  %v1015_v50 = vmul.f32 %v2171_v40, %v933_v46  ;;  %v1585_v51 = vmul.f32 %v2172_v17, %v1503_v47 }
 0x150   : > { %v1658_v52 = vadd.f32 %v2173_v19, %v1587_v45  ;;  %v2060_v53 = vpop.f32.mrf.mxu0  ;;  %v2126_v54 = vpop.f32.mrf.mxu1 }
 0x151   : > { %1212 = vst.msk [vmem:[%s2381_s9 + $0x1c8] sm:$0xff] %vm1154_vm3, %v1147_v48  ;;  %v1152_v55 = vmax.f32 %v1088_v49, 0.0  ;;  %v1086_v56 = vadd.f32 %v2828_v42, %v1015_v50  ;;  %v1656_v57 = vadd.f32 %v2173_v19, %v1585_v51  ;;  %v1018_v58 = vmul.f32 %v2171_v40, %v2060_v53 }
 0x152   : > { %1722 = vst.msk [vmem:[%s2372_s28 + $0x1f0] sm:$0xff] %vm1154_vm3, %v1658_v52  ;;  %v1588_v59 = vmul.f32 %v2172_v17, %v2126_v54  ;;  %v936_v60 = vpop.f32.mrf.mxu0  ;;  %v1506_v61 = vpop.f32.mrf.mxu1 }
 0x153   : > { %1217 = vst.msk [vmem:[%s2381_s9 + $0x1f0] sm:$0xff] %vm1154_vm3, %v1152_v55  ;;  %v1150_v62 = vmax.f32 %v1086_v56, 0.0  ;;  %1720 = vst.msk [vmem:[%s2372_s28 + $0x1e0] sm:$0xff] %vm1154_vm3, %v1656_v57  ;;  %v1089_v63 = vadd.f32 %v2828_v42, %v1018_v58  ;;  %v1016_v0 = vmul.f32 %v2171_v40, %v936_v60  ;;  %v1586_v1 = vmul.f32 %v2172_v17, %v1506_v61 }
 0x154   : > { %v1659_v2 = vadd.f32 %v2173_v19, %v1588_v59 }
 0x155   : > { %1215 = vst.msk [vmem:[%s2381_s9 + $0x1e0] sm:$0xff] %vm1154_vm3, %v1150_v62  ;;  %v1153_v3 = vmax.f32 %v1089_v63, 0.0  ;;  %v1087_v4 = vadd.f32 %v2828_v42, %v1016_v0  ;;  %v1657_v5 = vadd.f32 %v2173_v19, %v1586_v1 }
 0x156   : > { %1723 = vst.msk [vmem:[%s2372_s28 + $0x1f8] sm:$0xff] %vm1154_vm3, %v1659_v2 }
 0x157   : > { %1218 = vst.msk [vmem:[%s2381_s9 + $0x1f8] sm:$0xff] %vm1154_vm3, %v1153_v3  ;;  %v1151_v6 = vmax.f32 %v1087_v4, 0.0  ;;  %1721 = vst.msk [vmem:[%s2372_s28 + $0x1e8] sm:$0xff] %vm1154_vm3, %v1657_v5 }
 0x159   : > { %1216 = vst.msk [vmem:[%s2381_s9 + $0x1e8] sm:$0xff] %vm1154_vm3, %v1151_v6 }
 0x15a PF: > { %s19_s27 = sadd.s32 1, %s2180_s27  }
 0x15b   : > { %p16_p4 = scmp.ge.s32.totalorder %s19_s27, 5  }
 0x15d   :  { %18 = sbr.rel (!%p16_p4) target bundleno = 1 (0x1), region = 90 }

// kernel: short_chunk_cnn_res.16
= control target key start
LH: loop header
LB: loop body
LE: loop exit
PB: predicated region body
PF: predicated region fallthrough
CT: control target
= control target key end

     0   :  { %s1658_s18 = smov 0   ;;  %s2097_s0 = inlined_call_operand.vmem [shape: bf16[1536,72], index: 0, kind: input, shape index: {}]   ;;  %s2098_s1 = inlined_call_operand.vmem [shape: bf16[72,8], index: 1, kind: input, shape index: {}]   ;;  %s2099_s2 = inlined_call_operand.vmem [shape: f32[1,8], index: 2, kind: input, shape index: {}]   ;;  %s2100_s3 = inlined_call_operand.vmem [shape: f32[1,8], index: 3, kind: input, shape index: {}]   ;;  %s2101_s4 = inlined_call_operand.vmem [shape: f32[1536,8], index: 4, kind: input, shape index: {}]   ;;  %s2102_s5 = inlined_call_operand.vmem [shape: f32[1536,8], index: 5, kind: output, shape index: {}]  }
   0x1 LB: > { %s1368_s19 = sadd.s32 4294967295, %s1626_s18   ;;  %p1372_p0 = scmp.ge.s32.totalorder %s1626_s18, 1  ;;  %s1626_s18 = sphi %s1658_s18, %s15_s18  }
   0x2   : > { %p199_p1 = scmp.lt.s32.totalorder %s1626_s18, 4 }
   0x4   : > { %p200_p2 = pnand %p1372_p0, %p199_p1 }
   0x5   : > { %s1373_s24 = sshll.u32 (!%p200_p2), %s1368_s19, 6 }
   0x6   : > { %203 = sbr.rel (%p200_p2) target bundleno = 298 (0x12a), region = 40  ;;  %p233_p3 = scmp.lt.s32.totalorder (!%p200_p2), %s1373_s24, 191 }
   0xb   : > { %v1583_v0 = vld [vmem:[%s2098_s1 + $0x20] ss:$0 sps:$4 sm:$0xff]   ;;  %vm608_vm0 = vcmask 1043456   ;;  %v1584_v1 = vld [vmem:[%s2098_s1 + $0x18] sm:$0xff]   ;;  %v1585_v3 = vld [vmem:[%s2098_s1 + $0x10] sm:$0xff]   ;;  %s2104_s24 = smov (!%p233_p3, %s1373_s24), 191 }
   0xc   : > { %1573 = vmatprep.subr.msk.bf16.mxu0 %vm608_vm0, %v1583_v0  ;;  %1574 = vmatprep.subr.msk.bf16.mxu1 %vm608_vm0, %v1583_v0  ;;  %v610_v2 = vsel %vm608_vm0, %v1583_v0, 0  ;;  %v1586_v4 = vld [vmem:[%s2098_s1 + $0x8] sm:$0xff]   ;;  %s1374_s29 = sshll.u32 %s2104_s24, 2  ;;  %vm511_vm1 = vcmask 588800   ;;  %v1587_v7 = vld [vmem:[%s2098_s1] sm:$0xff]   ;;  %s1376_s10 = sshll.u32 %s2104_s24, 3 }
   0xd   : > { %1490 = vmatpush3.bf16.msra.mxu0 %v610_v2  ;;  %1568 = vmatpush3.bf16.msra.mxu1 %v610_v2  ;;  %s1684_s7 = scalar_lea.vmem %s2097_s0, %s1374_s29  ;;  %v1757_v38 = vld [vmem:[%s2099_s2] ss:$0 sm:$0xff]  ;;  %s1762_s15 = scalar_lea.vmem %s2101_s4, %s1376_s10  ;;  %vm1235_vm2 = vcmask 64512  }
   0xe   : > { %1491 = vmatprep.subr.bf16.mxu0 %v1584_v1  ;;  %1564 = vmatprep.subr.bf16.mxu1 %v1584_v1  ;;  %v1588_v5 = vld [vmem:[%s1684_s7] sm:$0xff]   ;;  %v1590_v8 = vld [vmem:[%s1684_s7 + $0x8] sm:$0xff]   ;;  %v1592_v10 = vld [vmem:[%s1684_s7 + $0x10] sm:$0xff]   ;;  %s1784_s21 = scalar_lea.vmem %s2102_s5, %s1376_s10 }
   0xf   : > { %v1589_v6 = vld [vmem:[%s1684_s7 + $0x80] sm:$0xff]   ;;  %1499 = vmatprep.mubr.msk.bf16.mxu0 %vm511_vm1, %v1588_v5  ;;  %v1591_v9 = vld [vmem:[%s1684_s7 + $0x88] sm:$0xff]   ;;  %v1593_v11 = vld [vmem:[%s1684_s7 + $0x90] sm:$0xff]  }
  0x10   : > { %1531 = vmatprep.mubr.msk.bf16.mxu1 %vm511_vm1, %v1589_v6  ;;  %v1594_v12 = vld [vmem:[%s1684_s7 + $0x18] sm:$0xff]   ;;  %v1596_v14 = vld [vmem:[%s1684_s7 + $0x20] sm:$0xff]   ;;  %v1598_v16 = vld [vmem:[%s1684_s7 + $0x28] sm:$0xff]  }
  0x11   : > { %1492 = vmatpush3.bf16.msra.mxu0 %v1584_v1  ;;  %1569 = vmatpush3.bf16.msra.mxu1 %v1584_v1  ;;  %v1595_v13 = vld [vmem:[%s1684_s7 + $0x98] sm:$0xff]   ;;  %v1597_v15 = vld [vmem:[%s1684_s7 + $0xa0] sm:$0xff]   ;;  %v1599_v17 = vld [vmem:[%s1684_s7 + $0xa8] sm:$0xff]  }
  0x12   : > { %1493 = vmatprep.subr.bf16.mxu0 %v1585_v3  ;;  %1565 = vmatprep.subr.bf16.mxu1 %v1585_v3  ;;  %v1600_v18 = vld [vmem:[%s1684_s7 + $0x30] sm:$0xff]   ;;  %v1602_v20 = vld [vmem:[%s1684_s7 + $0x38] sm:$0xff]   ;;  %v1604_v22 = vld [vmem:[%s1684_s7 + $0x40] sm:$0xff]  }
  0x13   : > { %v1601_v19 = vld [vmem:[%s1684_s7 + $0xb0] sm:$0xff]   ;;  %v1603_v21 = vld [vmem:[%s1684_s7 + $0xb8] sm:$0xff]   ;;  %v1605_v23 = vld [vmem:[%s1684_s7 + $0xc0] sm:$0xff]  }
  0x14   : > { %v1606_v24 = vld [vmem:[%s1684_s7 + $0x48] sm:$0xff]   ;;  %v1608_v26 = vld [vmem:[%s1684_s7 + $0x50] sm:$0xff]   ;;  %v1610_v28 = vld [vmem:[%s1684_s7 + $0x58] sm:$0xff]  }
  0x15   : > { %1494 = vmatpush3.bf16.msra.mxu0 %v1585_v3  ;;  %1570 = vmatpush3.bf16.msra.mxu1 %v1585_v3  ;;  %v1607_v25 = vld [vmem:[%s1684_s7 + $0xc8] sm:$0xff]   ;;  %v1609_v27 = vld [vmem:[%s1684_s7 + $0xd0] sm:$0xff]   ;;  %v1611_v29 = vld [vmem:[%s1684_s7 + $0xd8] sm:$0xff]  }
  0x16   : > { %1495 = vmatprep.subr.bf16.mxu0 %v1586_v4  ;;  %1566 = vmatprep.subr.bf16.mxu1 %v1586_v4  ;;  %v1612_v30 = vld [vmem:[%s1684_s7 + $0x60] sm:$0xff]   ;;  %v1614_v32 = vld [vmem:[%s1684_s7 + $0x68] sm:$0xff]   ;;  %v1616_v34 = vld [vmem:[%s1684_s7 + $0x70] sm:$0xff]  }
  0x17   : > { %v1613_v31 = vld [vmem:[%s1684_s7 + $0xe0] sm:$0xff]   ;;  %v1615_v33 = vld [vmem:[%s1684_s7 + $0xe8] sm:$0xff]   ;;  %v1617_v35 = vld [vmem:[%s1684_s7 + $0xf0] sm:$0xff]  }
  0x18   : > { %v1618_v36 = vld [vmem:[%s1684_s7 + $0x78] sm:$0xff]   ;;  %v1767_v40 = vld [vmem:[%s2100_s3] ss:$0 sm:$0xff]  ;;  %v1045_v44 = vld [vmem:[%s1762_s15 + $0x10] sm:$0xff] }
  0x19   : > { %1496 = vmatpush3.bf16.msra.mxu0 %v1586_v4  ;;  %1571 = vmatpush3.bf16.msra.mxu1 %v1586_v4  ;;  %v1619_v37 = vld [vmem:[%s1684_s7 + $0xf8] sm:$0xff]   ;;  %v1077_v45 = vld [vmem:[%s1762_s15 + $0x110] sm:$0xff]  ;;  %v1043_v52 = vld [vmem:[%s1762_s15] sm:$0xff] }
  0x1a   : > { %1497 = vmatprep.subr.bf16.mxu0 %v1587_v7  ;;  %1567 = vmatprep.subr.bf16.mxu1 %v1587_v7  ;;  %v1075_v53 = vld [vmem:[%s1762_s15 + $0x100] sm:$0xff]  ;;  %v1046_v4 = vld [vmem:[%s1762_s15 + $0x18] sm:$0xff] }
  0x1b   : > { %v1078_v5 = vld [vmem:[%s1762_s15 + $0x118] sm:$0xff] }
  0x1d   : > { %1498 = vmatpush3.bf16.msra.mxu0 %v1587_v7  ;;  %1572 = vmatpush3.bf16.msra.mxu1 %v1587_v7 }
  0x20   : > { %1500 = vmatmul.mubr.msk.bf16.vlgmr.msra.gmra.mxu0 %vm511_vm1, %v1590_v8  ;;  %1532 = vmatmul.mubr.msk.bf16.vlgmr.msra.gmra.mxu1 %vm511_vm1, %v1591_v9 }
  0x21   : > { %1503 = vmatprep.mubr.msk.bf16.mxu0 %vm511_vm1, %v1592_v10  ;;  %1535 = vmatprep.mubr.msk.bf16.mxu1 %vm511_vm1, %v1593_v11 }
  0x28   : > { %1504 = vmatmul.mubr.msk.bf16.gmra.mxu0 %vm511_vm1, %v1594_v12  ;;  %1536 = vmatmul.mubr.msk.bf16.gmra.mxu1 %vm511_vm1, %v1595_v13 }
  0x29   : > { %1507 = vmatprep.mubr.msk.bf16.mxu0 %vm511_vm1, %v1596_v14  ;;  %1539 = vmatprep.mubr.msk.bf16.mxu1 %vm511_vm1, %v1597_v15  ;;  %v1044_v14 = vld [vmem:[%s1762_s15 + $0x8] sm:$0xff] }
  0x2a   : > { %v1076_v15 = vld [vmem:[%s1762_s15 + $0x108] sm:$0xff] }
  0x30   : > { %1508 = vmatmul.mubr.msk.bf16.gmra.mxu0 %vm511_vm1, %v1598_v16  ;;  %1540 = vmatmul.mubr.msk.bf16.gmra.mxu1 %vm511_vm1, %v1599_v17 }
  0x31   : > { %1511 = vmatprep.mubr.msk.bf16.mxu0 %vm511_vm1, %v1600_v18  ;;  %1543 = vmatprep.mubr.msk.bf16.mxu1 %vm511_vm1, %v1601_v19 }
  0x38   : > { %1512 = vmatmul.mubr.msk.bf16.gmra.mxu0 %vm511_vm1, %v1602_v20  ;;  %1544 = vmatmul.mubr.msk.bf16.gmra.mxu1 %vm511_vm1, %v1603_v21 }
  0x39   : > { %1515 = vmatprep.mubr.msk.bf16.mxu0 %vm511_vm1, %v1604_v22  ;;  %1547 = vmatprep.mubr.msk.bf16.mxu1 %vm511_vm1, %v1605_v23  ;;  %v1049_v22 = vld [vmem:[%s1762_s15 + $0x30] sm:$0xff] }
  0x3a   : > { %v1081_v23 = vld [vmem:[%s1762_s15 + $0x130] sm:$0xff] }
  0x40   : > { %1516 = vmatmul.mubr.msk.bf16.gmra.mxu0 %vm511_vm1, %v1606_v24  ;;  %1548 = vmatmul.mubr.msk.bf16.gmra.mxu1 %vm511_vm1, %v1607_v25 }
  0x41   : > { %1519 = vmatprep.mubr.msk.bf16.mxu0 %vm511_vm1, %v1608_v26  ;;  %1551 = vmatprep.mubr.msk.bf16.mxu1 %vm511_vm1, %v1609_v27 }
  0x48   : > { %1520 = vmatmul.mubr.msk.bf16.gmra.mxu0 %vm511_vm1, %v1610_v28  ;;  %1552 = vmatmul.mubr.msk.bf16.gmra.mxu1 %vm511_vm1, %v1611_v29 }
  0x49   : > { %1523 = vmatprep.mubr.msk.bf16.mxu0 %vm511_vm1, %v1612_v30  ;;  %1555 = vmatprep.mubr.msk.bf16.mxu1 %vm511_vm1, %v1613_v31 }
  0x50   : > { %1524 = vmatmul.mubr.msk.bf16.gmra.mxu0 %vm511_vm1, %v1614_v32  ;;  %1556 = vmatmul.mubr.msk.bf16.gmra.mxu1 %vm511_vm1, %v1615_v33 }
  0x51   : > { %1527 = vmatprep.mubr.msk.bf16.mxu0 %vm511_vm1, %v1616_v34  ;;  %1559 = vmatprep.mubr.msk.bf16.mxu1 %vm511_vm1, %v1617_v35  ;;  %v1047_v34 = vld [vmem:[%s1762_s15 + $0x20] sm:$0xff] }
  0x52   : > { %v1079_v35 = vld [vmem:[%s1762_s15 + $0x120] sm:$0xff] }
  0x58   : > { %1528 = vmatmul.mubr.msk.bf16.gmra.mxu0 %vm511_vm1, %v1618_v36  ;;  %1560 = vmatmul.mubr.msk.bf16.gmra.mxu1 %vm511_vm1, %v1619_v37 }
  0xe0   : > { %v1501_v39 = vpop.f32.mrf.mxu0  ;;  %v1533_v41 = vpop.f32.mrf.mxu1 }
  0xe1   : > { %v910_v42 = vmul.f32 %v1501_v39, %v1757_v38  ;;  %v942_v43 = vmul.f32 %v1533_v41, %v1757_v38 }
  0xe2   : > { %v646_v46 = vpop.f32.mrf.mxu0  ;;  %v774_v47 = vpop.f32.mrf.mxu1 }
  0xe3   : > { %v981_v48 = vadd.f32 %v1767_v40, %v910_v42  ;;  %v1013_v49 = vadd.f32 %v1767_v40, %v942_v43  ;;  %v908_v50 = vmul.f32 %v1757_v38, %v646_v46  ;;  %v940_v51 = vmul.f32 %v1757_v38, %v774_v47 }
  0xe4   : > { %v1502_v54 = vpop.f32.mrf.mxu0  ;;  %v1534_v55 = vpop.f32.mrf.mxu1 }
  0xe5   : > { %v1109_v56 = vadd.f32 %v1045_v44, %v981_v48  ;;  %v1141_v57 = vadd.f32 %v1077_v45, %v1013_v49  ;;  %v979_v58 = vadd.f32 %v1767_v40, %v908_v50  ;;  %v1011_v59 = vadd.f32 %v1767_v40, %v940_v51 }
  0xe6   : > { %v911_v60 = vmul.f32 %v1502_v54, %v1757_v38  ;;  %v943_v61 = vmul.f32 %v1534_v55, %v1757_v38  ;;  %v649_v62 = vpop.f32.mrf.mxu0  ;;  %v777_v63 = vpop.f32.mrf.mxu1  ;;  %v1050_v54 = vld [vmem:[%s1762_s15 + $0x38] sm:$0xff] }
  0xe7   : > { %v1173_v0 = vmax.f32 %v1109_v56, 0.0  ;;  %v1205_v1 = vmax.f32 %v1141_v57, 0.0  ;;  %v1107_v2 = vadd.f32 %v1043_v52, %v979_v58  ;;  %v1139_v3 = vadd.f32 %v1075_v53, %v1011_v59  ;;  %v1082_v55 = vld [vmem:[%s1762_s15 + $0x138] sm:$0xff] }
  0xe8   : > { %v982_v6 = vadd.f32 %v1767_v40, %v911_v60  ;;  %v1014_v7 = vadd.f32 %v1767_v40, %v943_v61  ;;  %v909_v8 = vmul.f32 %v1757_v38, %v649_v62  ;;  %v941_v9 = vmul.f32 %v1757_v38, %v777_v63  ;;  %v1505_v10 = vpop.f32.mrf.mxu0  ;;  %v1537_v11 = vpop.f32.mrf.mxu1 }
  0xe9   : > { %1238 = vst.msk [vmem:[%s1784_s21 + $0x10] sm:$0xff] %vm1235_vm2, %v1173_v0  ;;  %1270 = vst.msk [vmem:[%s1784_s21 + $0x110] sm:$0xff] %vm1235_vm2, %v1205_v1  ;;  %v1171_v12 = vmax.f32 %v1107_v2, 0.0  ;;  %v1203_v13 = vmax.f32 %v1139_v3, 0.0  ;;  %v914_v16 = vmul.f32 %v1505_v10, %v1757_v38  ;;  %v946_v17 = vmul.f32 %v1537_v11, %v1757_v38  ;;  %v1048_v0 = vld [vmem:[%s1762_s15 + $0x28] sm:$0xff] }
  0xea   : > { %v1110_v18 = vadd.f32 %v1046_v4, %v982_v6  ;;  %v1142_v19 = vadd.f32 %v1078_v5, %v1014_v7  ;;  %v980_v20 = vadd.f32 %v1767_v40, %v909_v8  ;;  %v1012_v21 = vadd.f32 %v1767_v40, %v941_v9  ;;  %v662_v24 = vpop.f32.mrf.mxu0  ;;  %v790_v25 = vpop.f32.mrf.mxu1  ;;  %v1080_v1 = vld [vmem:[%s1762_s15 + $0x128] sm:$0xff]  ;;  %v1053_v8 = vld [vmem:[%s1762_s15 + $0x50] sm:$0xff] }
  0xeb   : > { %1236 = vst.msk [vmem:[%s1784_s21] sm:$0xff] %vm1235_vm2, %v1171_v12  ;;  %1268 = vst.msk [vmem:[%s1784_s21 + $0x100] sm:$0xff] %vm1235_vm2, %v1203_v13  ;;  %v985_v26 = vadd.f32 %v1767_v40, %v914_v16  ;;  %v1017_v27 = vadd.f32 %v1767_v40, %v946_v17  ;;  %v912_v28 = vmul.f32 %v1757_v38, %v662_v24  ;;  %v1085_v9 = vld [vmem:[%s1762_s15 + $0x150] sm:$0xff] }
  0xec   : > { %v944_v29 = vmul.f32 %v1757_v38, %v790_v25  ;;  %v1174_v30 = vmax.f32 %v1110_v18, 0.0  ;;  %v1206_v31 = vmax.f32 %v1142_v19, 0.0  ;;  %v1108_v32 = vadd.f32 %v1044_v14, %v980_v20  ;;  %v1506_v36 = vpop.f32.mrf.mxu0  ;;  %v1538_v37 = vpop.f32.mrf.mxu1  ;;  %v1051_v20 = vld [vmem:[%s1762_s15 + $0x40] sm:$0xff] }
  0xed   : > { %v1140_v33 = vadd.f32 %v1076_v15, %v1012_v21  ;;  %v1113_v39 = vadd.f32 %v1049_v22, %v985_v26  ;;  %v1145_v41 = vadd.f32 %v1081_v23, %v1017_v27  ;;  %v983_v42 = vadd.f32 %v1767_v40, %v912_v28  ;;  %v1083_v21 = vld [vmem:[%s1762_s15 + $0x140] sm:$0xff] }
  0xee   : > { %v1015_v43 = vadd.f32 %v1767_v40, %v944_v29  ;;  %1239 = vst.msk [vmem:[%s1784_s21 + $0x18] sm:$0xff] %vm1235_vm2, %v1174_v30  ;;  %1271 = vst.msk [vmem:[%s1784_s21 + $0x118] sm:$0xff] %vm1235_vm2, %v1206_v31  ;;  %v1172_v44 = vmax.f32 %v1108_v32, 0.0  ;;  %v915_v46 = vmul.f32 %v1506_v36, %v1757_v38  ;;  %v947_v47 = vmul.f32 %v1538_v37, %v1757_v38  ;;  %v665_v48 = vpop.f32.mrf.mxu0  ;;  %v793_v49 = vpop.f32.mrf.mxu1 }
  0xef   : > { %v1204_v45 = vmax.f32 %v1140_v33, 0.0  ;;  %v1177_v50 = vmax.f32 %v1113_v39, 0.0  ;;  %v1209_v51 = vmax.f32 %v1145_v41, 0.0  ;;  %v1111_v52 = vadd.f32 %v1047_v34, %v983_v42  ;;  %v1054_v39 = vld [vmem:[%s1762_s15 + $0x58] sm:$0xff] }
  0xf0   : > { %v1143_v53 = vadd.f32 %v1079_v35, %v1015_v43  ;;  %1237 = vst.msk [vmem:[%s1784_s21 + $0x8] sm:$0xff] %vm1235_vm2, %v1172_v44  ;;  %v986_v56 = vadd.f32 %v1767_v40, %v915_v46  ;;  %v1018_v57 = vadd.f32 %v1767_v40, %v947_v47  ;;  %v913_v58 = vmul.f32 %v1757_v38, %v665_v48  ;;  %v1509_v60 = vpop.f32.mrf.mxu0  ;;  %v1541_v61 = vpop.f32.mrf.mxu1  ;;  %v1086_v41 = vld [vmem:[%s1762_s15 + $0x158] sm:$0xff] }
  0xf1   : > { %1269 = vst.msk [vmem:[%s1784_s21 + $0x108] sm:$0xff] %vm1235_vm2, %v1204_v45  ;;  %v945_v59 = vmul.f32 %v1757_v38, %v793_v49  ;;  %1242 = vst.msk [vmem:[%s1784_s21 + $0x30] sm:$0xff] %vm1235_vm2, %v1177_v50  ;;  %v1175_v62 = vmax.f32 %v1111_v52, 0.0  ;;  %v918_v2 = vmul.f32 %v1509_v60, %v1757_v38  ;;  %v950_v3 = vmul.f32 %v1541_v61, %v1757_v38  ;;  %v1052_v50 = vld [vmem:[%s1762_s15 + $0x48] sm:$0xff] }
  0xf2   : > { %1274 = vst.msk [vmem:[%s1784_s21 + $0x130] sm:$0xff] %vm1235_vm2, %v1209_v51  ;;  %v1207_v63 = vmax.f32 %v1143_v53, 0.0  ;;  %v1114_v4 = vadd.f32 %v1050_v54, %v986_v56  ;;  %v1146_v5 = vadd.f32 %v1082_v55, %v1018_v57  ;;  %v984_v6 = vadd.f32 %v1767_v40, %v913_v58  ;;  %v678_v10 = vpop.f32.mrf.mxu0  ;;  %v806_v11 = vpop.f32.mrf.mxu1  ;;  %v1084_v51 = vld [vmem:[%s1762_s15 + $0x148] sm:$0xff]  ;;  %v1057_v58 = vld [vmem:[%s1762_s15 + $0x70] sm:$0xff] }
  0xf3   : > { %v1016_v7 = vadd.f32 %v1767_v40, %v945_v59  ;;  %1240 = vst.msk [vmem:[%s1784_s21 + $0x20] sm:$0xff] %vm1235_vm2, %v1175_v62  ;;  %v989_v12 = vadd.f32 %v1767_v40, %v918_v2  ;;  %v1021_v13 = vadd.f32 %v1767_v40, %v950_v3  ;;  %v916_v14 = vmul.f32 %v1757_v38, %v678_v10  ;;  %v1089_v59 = vld [vmem:[%s1762_s15 + $0x170] sm:$0xff] }
  0xf4   : > { %1272 = vst.msk [vmem:[%s1784_s21 + $0x120] sm:$0xff] %vm1235_vm2, %v1207_v63  ;;  %v948_v15 = vmul.f32 %v1757_v38, %v806_v11  ;;  %v1178_v16 = vmax.f32 %v1114_v4, 0.0  ;;  %v1210_v17 = vmax.f32 %v1146_v5, 0.0  ;;  %v1112_v18 = vadd.f32 %v1048_v0, %v984_v6  ;;  %v1510_v22 = vpop.f32.mrf.mxu0  ;;  %v1542_v23 = vpop.f32.mrf.mxu1  ;;  %v1055_v6 = vld [vmem:[%s1762_s15 + $0x60] sm:$0xff] }
  0xf5   : > { %v1144_v19 = vadd.f32 %v1080_v1, %v1016_v7  ;;  %v1117_v24 = vadd.f32 %v1053_v8, %v989_v12  ;;  %v1149_v25 = vadd.f32 %v1085_v9, %v1021_v13  ;;  %v987_v26 = vadd.f32 %v1767_v40, %v916_v14  ;;  %v1087_v7 = vld [vmem:[%s1762_s15 + $0x160] sm:$0xff] }
  0xf6   : > { %v1019_v27 = vadd.f32 %v1767_v40, %v948_v15  ;;  %1243 = vst.msk [vmem:[%s1784_s21 + $0x38] sm:$0xff] %vm1235_vm2, %v1178_v16  ;;  %1275 = vst.msk [vmem:[%s1784_s21 + $0x138] sm:$0xff] %vm1235_vm2, %v1210_v17  ;;  %v1176_v28 = vmax.f32 %v1112_v18, 0.0  ;;  %v919_v30 = vmul.f32 %v1510_v22, %v1757_v38  ;;  %v951_v31 = vmul.f32 %v1542_v23, %v1757_v38  ;;  %v681_v32 = vpop.f32.mrf.mxu0  ;;  %v809_v33 = vpop.f32.mrf.mxu1 }
  0xf7   : > { %v1208_v29 = vmax.f32 %v1144_v19, 0.0  ;;  %v1181_v34 = vmax.f32 %v1117_v24, 0.0  ;;  %v1213_v35 = vmax.f32 %v1149_v25, 0.0  ;;  %v1115_v36 = vadd.f32 %v1051_v20, %v987_v26  ;;  %v1058_v24 = vld [vmem:[%s1762_s15 + $0x78] sm:$0xff] }
  0xf8   : > { %v1147_v37 = vadd.f32 %v1083_v21, %v1019_v27  ;;  %1241 = vst.msk [vmem:[%s1784_s21 + $0x28] sm:$0xff] %vm1235_vm2, %v1176_v28  ;;  %v990_v42 = vadd.f32 %v1767_v40, %v919_v30  ;;  %v1022_v43 = vadd.f32 %v1767_v40, %v951_v31  ;;  %v917_v44 = vmul.f32 %v1757_v38, %v681_v32  ;;  %v1513_v46 = vpop.f32.mrf.mxu0  ;;  %v1545_v47 = vpop.f32.mrf.mxu1  ;;  %v1090_v25 = vld [vmem:[%s1762_s15 + $0x178] sm:$0xff] }
  0xf9   : > { %1273 = vst.msk [vmem:[%s1784_s21 + $0x128] sm:$0xff] %vm1235_vm2, %v1208_v29  ;;  %v949_v45 = vmul.f32 %v1757_v38, %v809_v33  ;;  %1246 = vst.msk [vmem:[%s1784_s21 + $0x50] sm:$0xff] %vm1235_vm2, %v1181_v34  ;;  %v1179_v48 = vmax.f32 %v1115_v36, 0.0  ;;  %v922_v52 = vmul.f32 %v1513_v46, %v1757_v38  ;;  %v954_v53 = vmul.f32 %v1545_v47, %v1757_v38  ;;  %v1056_v34 = vld [vmem:[%s1762_s15 + $0x68] sm:$0xff] }
  0xfa   : > { %1278 = vst.msk [vmem:[%s1784_s21 + $0x150] sm:$0xff] %vm1235_vm2, %v1213_v35  ;;  %v1211_v49 = vmax.f32 %v1147_v37, 0.0  ;;  %v1118_v54 = vadd.f32 %v1054_v39, %v990_v42  ;;  %v1150_v55 = vadd.f32 %v1086_v41, %v1022_v43  ;;  %v988_v56 = vadd.f32 %v1767_v40, %v917_v44  ;;  %v694_v60 = vpop.f32.mrf.mxu0  ;;  %v822_v61 = vpop.f32.mrf.mxu1  ;;  %v1088_v35 = vld [vmem:[%s1762_s15 + $0x168] sm:$0xff]  ;;  %v1061_v44 = vld [vmem:[%s1762_s15 + $0x90] sm:$0xff] }
  0xfb   : > { %v1020_v57 = vadd.f32 %v1767_v40, %v949_v45  ;;  %1244 = vst.msk [vmem:[%s1784_s21 + $0x40] sm:$0xff] %vm1235_vm2, %v1179_v48  ;;  %v993_v62 = vadd.f32 %v1767_v40, %v922_v52  ;;  %v1025_v63 = vadd.f32 %v1767_v40, %v954_v53  ;;  %v920_v0 = vmul.f32 %v1757_v38, %v694_v60  ;;  %v1093_v45 = vld [vmem:[%s1762_s15 + $0x190] sm:$0xff] }
  0xfc   : > { %1276 = vst.msk [vmem:[%s1784_s21 + $0x140] sm:$0xff] %vm1235_vm2, %v1211_v49  ;;  %v952_v1 = vmul.f32 %v1757_v38, %v822_v61  ;;  %v1182_v2 = vmax.f32 %v1118_v54, 0.0  ;;  %v1214_v3 = vmax.f32 %v1150_v55, 0.0  ;;  %v1116_v4 = vadd.f32 %v1052_v50, %v988_v56  ;;  %v1514_v8 = vpop.f32.mrf.mxu0  ;;  %v1546_v9 = vpop.f32.mrf.mxu1  ;;  %v1059_v56 = vld [vmem:[%s1762_s15 + $0x80] sm:$0xff] }
  0xfd   : > { %v1148_v5 = vadd.f32 %v1084_v51, %v1020_v57  ;;  %v1121_v10 = vadd.f32 %v1057_v58, %v993_v62  ;;  %v1153_v11 = vadd.f32 %v1089_v59, %v1025_v63  ;;  %v991_v12 = vadd.f32 %v1767_v40, %v920_v0  ;;  %v1091_v57 = vld [vmem:[%s1762_s15 + $0x180] sm:$0xff] }
  0xfe   : > { %v1023_v13 = vadd.f32 %v1767_v40, %v952_v1  ;;  %1247 = vst.msk [vmem:[%s1784_s21 + $0x58] sm:$0xff] %vm1235_vm2, %v1182_v2  ;;  %1279 = vst.msk [vmem:[%s1784_s21 + $0x158] sm:$0xff] %vm1235_vm2, %v1214_v3  ;;  %v1180_v14 = vmax.f32 %v1116_v4, 0.0  ;;  %v923_v16 = vmul.f32 %v1514_v8, %v1757_v38  ;;  %v955_v17 = vmul.f32 %v1546_v9, %v1757_v38  ;;  %v697_v18 = vpop.f32.mrf.mxu0  ;;  %v825_v19 = vpop.f32.mrf.mxu1 }
  0xff   : > { %v1212_v15 = vmax.f32 %v1148_v5, 0.0  ;;  %v1185_v20 = vmax.f32 %v1121_v10, 0.0  ;;  %v1217_v21 = vmax.f32 %v1153_v11, 0.0  ;;  %v1119_v22 = vadd.f32 %v1055_v6, %v991_v12  ;;  %v1062_v10 = vld [vmem:[%s1762_s15 + $0x98] sm:$0xff] }
 0x100   : > { %v1151_v23 = vadd.f32 %v1087_v7, %v1023_v13  ;;  %1245 = vst.msk [vmem:[%s1784_s21 + $0x48] sm:$0xff] %vm1235_vm2, %v1180_v14  ;;  %v994_v26 = vadd.f32 %v1767_v40, %v923_v16  ;;  %v1026_v27 = vadd.f32 %v1767_v40, %v955_v17  ;;  %v921_v28 = vmul.f32 %v1757_v38, %v697_v18  ;;  %v1517_v30 = vpop.f32.mrf.mxu0  ;;  %v1549_v31 = vpop.f32.mrf.mxu1  ;;  %v1094_v11 = vld [vmem:[%s1762_s15 + $0x198] sm:$0xff] }
 0x101   : > { %1277 = vst.msk [vmem:[%s1784_s21 + $0x148] sm:$0xff] %vm1235_vm2, %v1212_v15  ;;  %v953_v29 = vmul.f32 %v1757_v38, %v825_v19  ;;  %1250 = vst.msk [vmem:[%s1784_s21 + $0x70] sm:$0xff] %vm1235_vm2, %v1185_v20  ;;  %v1183_v32 = vmax.f32 %v1119_v22, 0.0  ;;  %v926_v36 = vmul.f32 %v1517_v30, %v1757_v38  ;;  %v958_v37 = vmul.f32 %v1549_v31, %v1757_v38  ;;  %v1060_v20 = vld [vmem:[%s1762_s15 + $0x88] sm:$0xff] }
 0x102   : > { %1282 = vst.msk [vmem:[%s1784_s21 + $0x170] sm:$0xff] %vm1235_vm2, %v1217_v21  ;;  %v1215_v33 = vmax.f32 %v1151_v23, 0.0  ;;  %v1122_v39 = vadd.f32 %v1058_v24, %v994_v26  ;;  %v1154_v41 = vadd.f32 %v1090_v25, %v1026_v27  ;;  %v992_v42 = vadd.f32 %v1767_v40, %v921_v28  ;;  %v710_v46 = vpop.f32.mrf.mxu0  ;;  %v838_v47 = vpop.f32.mrf.mxu1  ;;  %v1092_v21 = vld [vmem:[%s1762_s15 + $0x188] sm:$0xff]  ;;  %v1065_v28 = vld [vmem:[%s1762_s15 + $0xb0] sm:$0xff] }
 0x103   : > { %v1024_v43 = vadd.f32 %v1767_v40, %v953_v29  ;;  %1248 = vst.msk [vmem:[%s1784_s21 + $0x60] sm:$0xff] %vm1235_vm2, %v1183_v32  ;;  %v997_v48 = vadd.f32 %v1767_v40, %v926_v36  ;;  %v1029_v49 = vadd.f32 %v1767_v40, %v958_v37  ;;  %v924_v50 = vmul.f32 %v1757_v38, %v710_v46  ;;  %v1097_v29 = vld [vmem:[%s1762_s15 + $0x1b0] sm:$0xff] }
 0x104   : > { %1280 = vst.msk [vmem:[%s1784_s21 + $0x160] sm:$0xff] %vm1235_vm2, %v1215_v33  ;;  %v956_v51 = vmul.f32 %v1757_v38, %v838_v47  ;;  %v1186_v52 = vmax.f32 %v1122_v39, 0.0  ;;  %v1218_v53 = vmax.f32 %v1154_v41, 0.0  ;;  %v1120_v54 = vadd.f32 %v1056_v34, %v992_v42  ;;  %v1518_v58 = vpop.f32.mrf.mxu0  ;;  %v1550_v59 = vpop.f32.mrf.mxu1  ;;  %v1063_v42 = vld [vmem:[%s1762_s15 + $0xa0] sm:$0xff] }
 0x105   : > { %v1152_v55 = vadd.f32 %v1088_v35, %v1024_v43  ;;  %v1125_v60 = vadd.f32 %v1061_v44, %v997_v48  ;;  %v1157_v61 = vadd.f32 %v1093_v45, %v1029_v49  ;;  %v995_v62 = vadd.f32 %v1767_v40, %v924_v50  ;;  %v1095_v43 = vld [vmem:[%s1762_s15 + $0x1a0] sm:$0xff] }
 0x106   : > { %v1027_v63 = vadd.f32 %v1767_v40, %v956_v51  ;;  %1251 = vst.msk [vmem:[%s1784_s21 + $0x78] sm:$0xff] %vm1235_vm2, %v1186_v52  ;;  %1283 = vst.msk [vmem:[%s1784_s21 + $0x178] sm:$0xff] %vm1235_vm2, %v1218_v53  ;;  %v1184_v0 = vmax.f32 %v1120_v54, 0.0  ;;  %v927_v2 = vmul.f32 %v1518_v58, %v1757_v38  ;;  %v959_v3 = vmul.f32 %v1550_v59, %v1757_v38  ;;  %v713_v4 = vpop.f32.mrf.mxu0  ;;  %v841_v5 = vpop.f32.mrf.mxu1 }
 0x107   : > { %v1216_v1 = vmax.f32 %v1152_v55, 0.0  ;;  %v1189_v6 = vmax.f32 %v1125_v60, 0.0  ;;  %v1221_v7 = vmax.f32 %v1157_v61, 0.0  ;;  %v1123_v8 = vadd.f32 %v1059_v56, %v995_v62  ;;  %v1066_v60 = vld [vmem:[%s1762_s15 + $0xb8] sm:$0xff] }
 0x108   : > { %v1155_v9 = vadd.f32 %v1091_v57, %v1027_v63  ;;  %1249 = vst.msk [vmem:[%s1784_s21 + $0x68] sm:$0xff] %vm1235_vm2, %v1184_v0  ;;  %v998_v12 = vadd.f32 %v1767_v40, %v927_v2  ;;  %v1030_v13 = vadd.f32 %v1767_v40, %v959_v3  ;;  %v925_v14 = vmul.f32 %v1757_v38, %v713_v4  ;;  %v1521_v16 = vpop.f32.mrf.mxu0  ;;  %v1553_v17 = vpop.f32.mrf.mxu1  ;;  %v1098_v61 = vld [vmem:[%s1762_s15 + $0x1b8] sm:$0xff] }
 0x109   : > { %1281 = vst.msk [vmem:[%s1784_s21 + $0x168] sm:$0xff] %vm1235_vm2, %v1216_v1  ;;  %v957_v15 = vmul.f32 %v1757_v38, %v841_v5  ;;  %1254 = vst.msk [vmem:[%s1784_s21 + $0x90] sm:$0xff] %vm1235_vm2, %v1189_v6  ;;  %v1187_v18 = vmax.f32 %v1123_v8, 0.0  ;;  %v930_v22 = vmul.f32 %v1521_v16, %v1757_v38  ;;  %v962_v23 = vmul.f32 %v1553_v17, %v1757_v38  ;;  %v1064_v6 = vld [vmem:[%s1762_s15 + $0xa8] sm:$0xff] }
 0x10a   : > { %1286 = vst.msk [vmem:[%s1784_s21 + $0x190] sm:$0xff] %vm1235_vm2, %v1221_v7  ;;  %v1219_v19 = vmax.f32 %v1155_v9, 0.0  ;;  %v1126_v24 = vadd.f32 %v1062_v10, %v998_v12  ;;  %v1158_v25 = vadd.f32 %v1094_v11, %v1030_v13  ;;  %v996_v26 = vadd.f32 %v1767_v40, %v925_v14  ;;  %v726_v30 = vpop.f32.mrf.mxu0  ;;  %v854_v31 = vpop.f32.mrf.mxu1  ;;  %v1096_v7 = vld [vmem:[%s1762_s15 + $0x1a8] sm:$0xff]  ;;  %v1069_v14 = vld [vmem:[%s1762_s15 + $0xd0] sm:$0xff] }
 0x10b   : > { %v1028_v27 = vadd.f32 %v1767_v40, %v957_v15  ;;  %1252 = vst.msk [vmem:[%s1784_s21 + $0x80] sm:$0xff] %vm1235_vm2, %v1187_v18  ;;  %v1001_v32 = vadd.f32 %v1767_v40, %v930_v22  ;;  %v1033_v33 = vadd.f32 %v1767_v40, %v962_v23  ;;  %v928_v34 = vmul.f32 %v1757_v38, %v726_v30  ;;  %v1101_v15 = vld [vmem:[%s1762_s15 + $0x1d0] sm:$0xff] }
 0x10c   : > { %1284 = vst.msk [vmem:[%s1784_s21 + $0x180] sm:$0xff] %vm1235_vm2, %v1219_v19  ;;  %v960_v35 = vmul.f32 %v1757_v38, %v854_v31  ;;  %v1190_v36 = vmax.f32 %v1126_v24, 0.0  ;;  %v1222_v37 = vmax.f32 %v1158_v25, 0.0  ;;  %v1124_v39 = vadd.f32 %v1060_v20, %v996_v26  ;;  %v1522_v44 = vpop.f32.mrf.mxu0  ;;  %v1554_v45 = vpop.f32.mrf.mxu1  ;;  %v1067_v26 = vld [vmem:[%s1762_s15 + $0xc0] sm:$0xff] }
 0x10d   : > { %v1156_v41 = vadd.f32 %v1092_v21, %v1028_v27  ;;  %v1129_v46 = vadd.f32 %v1065_v28, %v1001_v32  ;;  %v1161_v47 = vadd.f32 %v1097_v29, %v1033_v33  ;;  %v999_v48 = vadd.f32 %v1767_v40, %v928_v34  ;;  %v1099_v27 = vld [vmem:[%s1762_s15 + $0x1c0] sm:$0xff] }
 0x10e   : > { %v1031_v49 = vadd.f32 %v1767_v40, %v960_v35  ;;  %1255 = vst.msk [vmem:[%s1784_s21 + $0x98] sm:$0xff] %vm1235_vm2, %v1190_v36  ;;  %1287 = vst.msk [vmem:[%s1784_s21 + $0x198] sm:$0xff] %vm1235_vm2, %v1222_v37  ;;  %v1188_v50 = vmax.f32 %v1124_v39, 0.0  ;;  %v931_v52 = vmul.f32 %v1522_v44, %v1757_v38  ;;  %v963_v53 = vmul.f32 %v1554_v45, %v1757_v38  ;;  %v729_v54 = vpop.f32.mrf.mxu0  ;;  %v857_v55 = vpop.f32.mrf.mxu1 }
 0x10f   : > { %v1220_v51 = vmax.f32 %v1156_v41, 0.0  ;;  %v1193_v56 = vmax.f32 %v1129_v46, 0.0  ;;  %v1225_v57 = vmax.f32 %v1161_v47, 0.0  ;;  %v1127_v58 = vadd.f32 %v1063_v42, %v999_v48  ;;  %v1070_v46 = vld [vmem:[%s1762_s15 + $0xd8] sm:$0xff] }
 0x110   : > { %v1159_v59 = vadd.f32 %v1095_v43, %v1031_v49  ;;  %1253 = vst.msk [vmem:[%s1784_s21 + $0x88] sm:$0xff] %vm1235_vm2, %v1188_v50  ;;  %v1002_v62 = vadd.f32 %v1767_v40, %v931_v52  ;;  %v1034_v63 = vadd.f32 %v1767_v40, %v963_v53  ;;  %v929_v0 = vmul.f32 %v1757_v38, %v729_v54  ;;  %v1525_v2 = vpop.f32.mrf.mxu0  ;;  %v1557_v3 = vpop.f32.mrf.mxu1  ;;  %v1102_v47 = vld [vmem:[%s1762_s15 + $0x1d8] sm:$0xff] }
 0x111   : > { %1285 = vst.msk [vmem:[%s1784_s21 + $0x188] sm:$0xff] %vm1235_vm2, %v1220_v51  ;;  %v961_v1 = vmul.f32 %v1757_v38, %v857_v55  ;;  %1258 = vst.msk [vmem:[%s1784_s21 + $0xb0] sm:$0xff] %vm1235_vm2, %v1193_v56  ;;  %v1191_v4 = vmax.f32 %v1127_v58, 0.0  ;;  %v934_v8 = vmul.f32 %v1525_v2, %v1757_v38  ;;  %v966_v9 = vmul.f32 %v1557_v3, %v1757_v38  ;;  %v1068_v56 = vld [vmem:[%s1762_s15 + $0xc8] sm:$0xff] }
 0x112   : > { %1290 = vst.msk [vmem:[%s1784_s21 + $0x1b0] sm:$0xff] %vm1235_vm2, %v1225_v57  ;;  %v1223_v5 = vmax.f32 %v1159_v59, 0.0  ;;  %v1130_v10 = vadd.f32 %v1066_v60, %v1002_v62  ;;  %v1162_v11 = vadd.f32 %v1098_v61, %v1034_v63  ;;  %v1000_v12 = vadd.f32 %v1767_v40, %v929_v0  ;;  %v742_v16 = vpop.f32.mrf.mxu0  ;;  %v870_v17 = vpop.f32.mrf.mxu1  ;;  %v1100_v57 = vld [vmem:[%s1762_s15 + $0x1c8] sm:$0xff]  ;;  %v1073_v0 = vld [vmem:[%s1762_s15 + $0xf0] sm:$0xff] }
 0x113   : > { %v1032_v13 = vadd.f32 %v1767_v40, %v961_v1  ;;  %1256 = vst.msk [vmem:[%s1784_s21 + $0xa0] sm:$0xff] %vm1235_vm2, %v1191_v4  ;;  %v1005_v18 = vadd.f32 %v1767_v40, %v934_v8  ;;  %v1037_v19 = vadd.f32 %v1767_v40, %v966_v9  ;;  %v932_v20 = vmul.f32 %v1757_v38, %v742_v16  ;;  %v1105_v1 = vld [vmem:[%s1762_s15 + $0x1f0] sm:$0xff] }
 0x114   : > { %1288 = vst.msk [vmem:[%s1784_s21 + $0x1a0] sm:$0xff] %vm1235_vm2, %v1223_v5  ;;  %v964_v21 = vmul.f32 %v1757_v38, %v870_v17  ;;  %v1194_v22 = vmax.f32 %v1130_v10, 0.0  ;;  %v1226_v23 = vmax.f32 %v1162_v11, 0.0  ;;  %v1128_v24 = vadd.f32 %v1064_v6, %v1000_v12  ;;  %v1526_v28 = vpop.f32.mrf.mxu0  ;;  %v1558_v29 = vpop.f32.mrf.mxu1  ;;  %v1071_v12 = vld [vmem:[%s1762_s15 + $0xe0] sm:$0xff] }
 0x115   : > { %v1160_v25 = vadd.f32 %v1096_v7, %v1032_v13  ;;  %v1133_v30 = vadd.f32 %v1069_v14, %v1005_v18  ;;  %v1165_v31 = vadd.f32 %v1101_v15, %v1037_v19  ;;  %v1003_v32 = vadd.f32 %v1767_v40, %v932_v20  ;;  %v1103_v13 = vld [vmem:[%s1762_s15 + $0x1e0] sm:$0xff] }
 0x116   : > { %v1035_v33 = vadd.f32 %v1767_v40, %v964_v21  ;;  %1259 = vst.msk [vmem:[%s1784_s21 + $0xb8] sm:$0xff] %vm1235_vm2, %v1194_v22  ;;  %1291 = vst.msk [vmem:[%s1784_s21 + $0x1b8] sm:$0xff] %vm1235_vm2, %v1226_v23  ;;  %v1192_v34 = vmax.f32 %v1128_v24, 0.0  ;;  %v935_v36 = vmul.f32 %v1526_v28, %v1757_v38  ;;  %v967_v37 = vmul.f32 %v1558_v29, %v1757_v38  ;;  %v745_v39 = vpop.f32.mrf.mxu0  ;;  %v873_v41 = vpop.f32.mrf.mxu1 }
 0x117   : > { %v1224_v35 = vmax.f32 %v1160_v25, 0.0  ;;  %v1197_v42 = vmax.f32 %v1133_v30, 0.0  ;;  %v1229_v43 = vmax.f32 %v1165_v31, 0.0  ;;  %v1131_v44 = vadd.f32 %v1067_v26, %v1003_v32  ;;  %v1074_v30 = vld [vmem:[%s1762_s15 + $0xf8] sm:$0xff] }
 0x118   : > { %v1163_v45 = vadd.f32 %v1099_v27, %v1035_v33  ;;  %1257 = vst.msk [vmem:[%s1784_s21 + $0xa8] sm:$0xff] %vm1235_vm2, %v1192_v34  ;;  %v1006_v48 = vadd.f32 %v1767_v40, %v935_v36  ;;  %v1038_v49 = vadd.f32 %v1767_v40, %v967_v37  ;;  %v933_v50 = vmul.f32 %v1757_v38, %v745_v39  ;;  %v1529_v52 = vpop.f32.mrf.mxu0  ;;  %v1561_v53 = vpop.f32.mrf.mxu1  ;;  %v1106_v31 = vld [vmem:[%s1762_s15 + $0x1f8] sm:$0xff]  ;;  %v1072_v39 = vld [vmem:[%s1762_s15 + $0xe8] sm:$0xff] }
 0x119   : > { %1289 = vst.msk [vmem:[%s1784_s21 + $0x1a8] sm:$0xff] %vm1235_vm2, %v1224_v35  ;;  %v965_v51 = vmul.f32 %v1757_v38, %v873_v41  ;;  %1262 = vst.msk [vmem:[%s1784_s21 + $0xd0] sm:$0xff] %vm1235_vm2, %v1197_v42  ;;  %v1195_v54 = vmax.f32 %v1131_v44, 0.0  ;;  %v938_v58 = vmul.f32 %v1529_v52, %v1757_v38  ;;  %v970_v59 = vmul.f32 %v1561_v53, %v1757_v38  ;;  %v1104_v41 = vld [vmem:[%s1762_s15 + $0x1e8] sm:$0xff] }
 0x11a   : > { %1294 = vst.msk [vmem:[%s1784_s21 + $0x1d0] sm:$0xff] %vm1235_vm2, %v1229_v43  ;;  %v1227_v55 = vmax.f32 %v1163_v45, 0.0  ;;  %v1134_v60 = vadd.f32 %v1070_v46, %v1006_v48  ;;  %v1166_v61 = vadd.f32 %v1102_v47, %v1038_v49  ;;  %v1004_v62 = vadd.f32 %v1767_v40, %v933_v50  ;;  %v758_v2 = vpop.f32.mrf.mxu0  ;;  %v886_v3 = vpop.f32.mrf.mxu1 }
 0x11b   : > { %v1036_v63 = vadd.f32 %v1767_v40, %v965_v51  ;;  %1260 = vst.msk [vmem:[%s1784_s21 + $0xc0] sm:$0xff] %vm1235_vm2, %v1195_v54  ;;  %v1009_v4 = vadd.f32 %v1767_v40, %v938_v58  ;;  %v1041_v5 = vadd.f32 %v1767_v40, %v970_v59  ;;  %v936_v6 = vmul.f32 %v1757_v38, %v758_v2 }
 0x11c   : > { %1292 = vst.msk [vmem:[%s1784_s21 + $0x1c0] sm:$0xff] %vm1235_vm2, %v1227_v55  ;;  %v968_v7 = vmul.f32 %v1757_v38, %v886_v3  ;;  %v1198_v8 = vmax.f32 %v1134_v60, 0.0  ;;  %v1230_v9 = vmax.f32 %v1166_v61, 0.0  ;;  %v1132_v10 = vadd.f32 %v1068_v56, %v1004_v62  ;;  %v1530_v14 = vpop.f32.mrf.mxu0  ;;  %v1562_v15 = vpop.f32.mrf.mxu1 }
 0x11d   : > { %v1164_v11 = vadd.f32 %v1100_v57, %v1036_v63  ;;  %v1137_v16 = vadd.f32 %v1073_v0, %v1009_v4  ;;  %v1169_v17 = vadd.f32 %v1105_v1, %v1041_v5  ;;  %v1007_v18 = vadd.f32 %v1767_v40, %v936_v6 }
 0x11e   : > { %v1039_v19 = vadd.f32 %v1767_v40, %v968_v7  ;;  %1263 = vst.msk [vmem:[%s1784_s21 + $0xd8] sm:$0xff] %vm1235_vm2, %v1198_v8  ;;  %1295 = vst.msk [vmem:[%s1784_s21 + $0x1d8] sm:$0xff] %vm1235_vm2, %v1230_v9  ;;  %v1196_v20 = vmax.f32 %v1132_v10, 0.0  ;;  %v939_v22 = vmul.f32 %v1530_v14, %v1757_v38  ;;  %v971_v23 = vmul.f32 %v1562_v15, %v1757_v38  ;;  %v761_v24 = vpop.f32.mrf.mxu0  ;;  %v889_v25 = vpop.f32.mrf.mxu1 }
 0x11f   : > { %v1228_v21 = vmax.f32 %v1164_v11, 0.0  ;;  %v1201_v26 = vmax.f32 %v1137_v16, 0.0  ;;  %v1233_v27 = vmax.f32 %v1169_v17, 0.0  ;;  %v1135_v28 = vadd.f32 %v1071_v12, %v1007_v18 }
 0x120   : > { %v1167_v29 = vadd.f32 %v1103_v13, %v1039_v19  ;;  %1261 = vst.msk [vmem:[%s1784_s21 + $0xc8] sm:$0xff] %vm1235_vm2, %v1196_v20  ;;  %v1010_v32 = vadd.f32 %v1767_v40, %v939_v22  ;;  %v1042_v33 = vadd.f32 %v1767_v40, %v971_v23  ;;  %v937_v34 = vmul.f32 %v1757_v38, %v761_v24 }
 0x121   : > { %1293 = vst.msk [vmem:[%s1784_s21 + $0x1c8] sm:$0xff] %vm1235_vm2, %v1228_v21  ;;  %v969_v35 = vmul.f32 %v1757_v38, %v889_v25  ;;  %1266 = vst.msk [vmem:[%s1784_s21 + $0xf0] sm:$0xff] %vm1235_vm2, %v1201_v26  ;;  %v1199_v36 = vmax.f32 %v1135_v28, 0.0 }
 0x122   : > { %1298 = vst.msk [vmem:[%s1784_s21 + $0x1f0] sm:$0xff] %vm1235_vm2, %v1233_v27  ;;  %v1231_v37 = vmax.f32 %v1167_v29, 0.0  ;;  %v1138_v42 = vadd.f32 %v1074_v30, %v1010_v32  ;;  %v1170_v43 = vadd.f32 %v1106_v31, %v1042_v33  ;;  %v1008_v44 = vadd.f32 %v1767_v40, %v937_v34 }
 0x123   : > { %v1040_v45 = vadd.f32 %v1767_v40, %v969_v35  ;;  %1264 = vst.msk [vmem:[%s1784_s21 + $0xe0] sm:$0xff] %vm1235_vm2, %v1199_v36 }
 0x124   : > { %1296 = vst.msk [vmem:[%s1784_s21 + $0x1e0] sm:$0xff] %vm1235_vm2, %v1231_v37  ;;  %v1202_v38 = vmax.f32 %v1138_v42, 0.0  ;;  %v1234_v46 = vmax.f32 %v1170_v43, 0.0  ;;  %v1136_v47 = vadd.f32 %v1072_v39, %v1008_v44 }
 0x125   : > { %v1168_v48 = vadd.f32 %v1104_v41, %v1040_v45 }
 0x126   : > { %1267 = vst.msk [vmem:[%s1784_s21 + $0xf8] sm:$0xff] %vm1235_vm2, %v1202_v38  ;;  %1299 = vst.msk [vmem:[%s1784_s21 + $0x1f8] sm:$0xff] %vm1235_vm2, %v1234_v46  ;;  %v1200_v49 = vmax.f32 %v1136_v47, 0.0 }
 0x127   : > { %v1232_v50 = vmax.f32 %v1168_v48, 0.0 }
 0x128   : > { %1265 = vst.msk [vmem:[%s1784_s21 + $0xe8] sm:$0xff] %vm1235_vm2, %v1200_v49 }
 0x129   : > { %1297 = vst.msk [vmem:[%s1784_s21 + $0x1e8] sm:$0xff] %vm1235_vm2, %v1232_v50 }
 0x12a PF: > { %s15_s18 = sadd.s32 1, %s1626_s18  }
 0x12b   : > { %p12_p4 = scmp.ge.s32.totalorder %s15_s18, 5  }
 0x12d   :  { %14 = sbr.rel (!%p12_p4) target bundleno = 1 (0x1), region = 73 }

// kernel: short_chunk_cnn_res.17
= control target key start
LH: loop header
LB: loop body
LE: loop exit
PB: predicated region body
PF: predicated region fallthrough
CT: control target
= control target key end

     0   :  { %vm233_vm0 = vcmask 1043456   ;;  %v1174_v0 = vmov 0.0   ;;  %vm1175_vm1 = vmmov 0   ;;  %vm181_vm2 = vcmask 588800   ;;  %s1830_s1 = inlined_call_operand.vmem [shape: bf16[72,8], index: 1, kind: input, shape index: {}]   ;;  %s1831_s4 = inlined_call_operand.vmem [shape: bf16[72,8], index: 4, kind: input, shape index: {}]   ;;  %s1832_s0 = inlined_call_operand.vmem [shape: bf16[264,72], index: 0, kind: input, shape index: {}]   ;;  %s1833_s2 = inlined_call_operand.vmem [shape: f32[1,8], index: 2, kind: input, shape index: {}]   ;;  %s1834_s5 = inlined_call_operand.vmem [shape: f32[1,8], index: 5, kind: input, shape index: {}]   ;;  %s1835_s3 = inlined_call_operand.vmem [shape: f32[1,8], index: 3, kind: input, shape index: {}]   ;;  %s1836_s6 = inlined_call_operand.vmem [shape: f32[1,8], index: 6, kind: input, shape index: {}]   ;;  %s1837_s8 = inlined_call_operand.vmem [shape: f32[264,8], index: 8, kind: output, shape index: {1}]   ;;  %s1838_s7 = inlined_call_operand.vmem [shape: f32[264,8], index: 7, kind: output, shape index: {0}]  }
   0x1   :  { %989 = vmatprep.subr.bf16.mxu0 %v1174_v0  ;;  %1067 = vmatprep.subr.bf16.mxu1 %v1174_v0  ;;  %v1147_v1 = vld [vmem:[%s1830_s1 + $0x20] ss:$0 sps:$4 sm:$0xff]   ;;  %v1149_v5 = vld [vmem:[%s1830_s1 + $0x18] sm:$0xff]   ;;  %v1151_v7 = vld [vmem:[%s1830_s1 + $0x10] sm:$0xff]   ;;  %vm518_vm3 = vcmask 64512  }
   0x2   :  { %v1148_v2 = vld [vmem:[%s1831_s4 + $0x20] ss:$0 sps:$4 sm:$0xff]   ;;  %999 = vmatprep.mubr.msk.bf16.mxu0 %vm1175_vm1, %v1174_v0  ;;  %1077 = vmatprep.mubr.msk.bf16.mxu1 %vm1175_vm1, %v1174_v0  ;;  %v235_v3 = vsel %vm233_vm0, %v1147_v1, 0  ;;  %v1150_v6 = vld [vmem:[%s1831_s4 + $0x18] sm:$0xff]   ;;  %v1152_v8 = vld [vmem:[%s1831_s4 + $0x10] sm:$0xff]  }
   0x3   :  { %990 = vmatpush3.bf16.msra.mxu0 %v235_v3  ;;  %v589_v4 = vsel %vm233_vm0, %v1148_v2, 0  ;;  %v1153_v9 = vld [vmem:[%s1830_s1 + $0x8] sm:$0xff]   ;;  %v1155_v11 = vld [vmem:[%s1830_s1] sm:$0xff]   ;;  %v1159_v15 = vld [vmem:[%s1832_s0 + $0x10] sm:$0xff]  }
   0x4   :  { %1068 = vmatpush3.bf16.msra.mxu1 %v589_v4  ;;  %991 = vmatprep.subr.bf16.mxu0 %v1174_v0  ;;  %v1154_v10 = vld [vmem:[%s1831_s4 + $0x8] sm:$0xff]   ;;  %v1156_v12 = vld [vmem:[%s1831_s4] sm:$0xff]   ;;  %v1160_v16 = vld [vmem:[%s1832_s0 + $0x18] sm:$0xff]  }
   0x5   :  { %1069 = vmatprep.subr.bf16.mxu1 %v1174_v0  ;;  %v1157_v13 = vld [vmem:[%s1832_s0] sm:$0xff]   ;;  %v1158_v14 = vld [vmem:[%s1832_s0 + $0x8] sm:$0xff]   ;;  %v1163_v19 = vld [vmem:[%s1832_s0 + $0x30] sm:$0xff]  }
   0x6   :  { %v1161_v17 = vld [vmem:[%s1832_s0 + $0x20] sm:$0xff]   ;;  %v1162_v18 = vld [vmem:[%s1832_s0 + $0x28] sm:$0xff]   ;;  %v1164_v20 = vld [vmem:[%s1832_s0 + $0x38] sm:$0xff]  }
   0x7   :  { %992 = vmatpush3.bf16.msra.mxu0 %v1149_v5  ;;  %v1165_v21 = vld [vmem:[%s1832_s0 + $0x40] sm:$0xff]   ;;  %v1166_v22 = vld [vmem:[%s1832_s0 + $0x48] sm:$0xff]   ;;  %v1167_v23 = vld [vmem:[%s1832_s0 + $0x50] sm:$0xff]  }
   0x8   :  { %1070 = vmatpush3.bf16.msra.mxu1 %v1150_v6  ;;  %993 = vmatprep.subr.bf16.mxu0 %v1174_v0  ;;  %v1168_v24 = vld [vmem:[%s1832_s0 + $0x58] sm:$0xff]   ;;  %v1169_v25 = vld [vmem:[%s1832_s0 + $0x60] sm:$0xff]   ;;  %v1170_v26 = vld [vmem:[%s1832_s0 + $0x68] sm:$0xff]  }
   0x9   :  { %1071 = vmatprep.subr.bf16.mxu1 %v1174_v0  ;;  %v1171_v27 = vld [vmem:[%s1832_s0 + $0x70] sm:$0xff]   ;;  %v1172_v28 = vld [vmem:[%s1832_s0 + $0x78] sm:$0xff]   ;;  %v1173_v29 = vld [vmem:[%s1832_s0 + $0x80] ss:$0 sps:$4 sm:$0xff]  }
   0xa   :  { %v1417_v30 = vld [vmem:[%s1833_s2] ss:$0 sm:$0xff] }
   0xb   :  { %994 = vmatpush3.bf16.msra.mxu0 %v1151_v7  ;;  %v1422_v31 = vld [vmem:[%s1834_s5] ss:$0 sm:$0xff] }
   0xc   :  { %1072 = vmatpush3.bf16.msra.mxu1 %v1152_v8  ;;  %995 = vmatprep.subr.bf16.mxu0 %v1174_v0  ;;  %v1427_v33 = vld [vmem:[%s1835_s3] ss:$0 sm:$0xff] }
   0xd   :  { %1073 = vmatprep.subr.bf16.mxu1 %v1174_v0  ;;  %v1433_v36 = vld [vmem:[%s1836_s6] ss:$0 sm:$0xff] }
   0xf   :  { %996 = vmatpush3.bf16.msra.mxu0 %v1153_v9 }
  0x10   :  { %1074 = vmatpush3.bf16.msra.mxu1 %v1154_v10  ;;  %997 = vmatprep.subr.bf16.mxu0 %v1174_v0 }
  0x11   :  { %1075 = vmatprep.subr.bf16.mxu1 %v1174_v0 }
  0x13   :  { %998 = vmatpush3.bf16.msra.mxu0 %v1155_v11 }
  0x14   :  { %1076 = vmatpush3.bf16.msra.mxu1 %v1156_v12 }
  0x16   :  { %1000 = vmatmul.mubr.msk.bf16.vlgmr.msra.gmra.mxu0 %vm181_vm2, %v1157_v13 }
  0x17   :  { %1078 = vmatmul.mubr.msk.bf16.vlgmr.msra.gmra.mxu1 %vm181_vm2, %v1157_v13  ;;  %1003 = vmatprep.mubr.msk.bf16.mxu0 %vm1175_vm1, %v1174_v0 }
  0x18   :  { %1081 = vmatprep.mubr.msk.bf16.mxu1 %vm1175_vm1, %v1174_v0 }
  0x1e   :  { %1004 = vmatmul.mubr.msk.bf16.gmra.mxu0 %vm181_vm2, %v1158_v14 }
  0x1f   :  { %1082 = vmatmul.mubr.msk.bf16.gmra.mxu1 %vm181_vm2, %v1158_v14  ;;  %1007 = vmatprep.mubr.msk.bf16.mxu0 %vm1175_vm1, %v1174_v0 }
  0x20   :  { %1085 = vmatprep.mubr.msk.bf16.mxu1 %vm1175_vm1, %v1174_v0 }
  0x26   :  { %1008 = vmatmul.mubr.msk.bf16.gmra.mxu0 %vm181_vm2, %v1159_v15 }
  0x27   :  { %1086 = vmatmul.mubr.msk.bf16.gmra.mxu1 %vm181_vm2, %v1159_v15  ;;  %1011 = vmatprep.mubr.msk.bf16.mxu0 %vm1175_vm1, %v1174_v0 }
  0x28   :  { %1089 = vmatprep.mubr.msk.bf16.mxu1 %vm1175_vm1, %v1174_v0 }
  0x2e   :  { %1012 = vmatmul.mubr.msk.bf16.gmra.mxu0 %vm181_vm2, %v1160_v16 }
  0x2f   :  { %1090 = vmatmul.mubr.msk.bf16.gmra.mxu1 %vm181_vm2, %v1160_v16  ;;  %1015 = vmatprep.mubr.msk.bf16.mxu0 %vm1175_vm1, %v1174_v0 }
  0x30   :  { %1093 = vmatprep.mubr.msk.bf16.mxu1 %vm1175_vm1, %v1174_v0 }
  0x36   :  { %1016 = vmatmul.mubr.msk.bf16.gmra.mxu0 %vm181_vm2, %v1161_v17 }
  0x37   :  { %1094 = vmatmul.mubr.msk.bf16.gmra.mxu1 %vm181_vm2, %v1161_v17  ;;  %1019 = vmatprep.mubr.msk.bf16.mxu0 %vm1175_vm1, %v1174_v0 }
  0x38   :  { %1097 = vmatprep.mubr.msk.bf16.mxu1 %vm1175_vm1, %v1174_v0 }
  0x3e   :  { %1020 = vmatmul.mubr.msk.bf16.gmra.mxu0 %vm181_vm2, %v1162_v18 }
  0x3f   :  { %1098 = vmatmul.mubr.msk.bf16.gmra.mxu1 %vm181_vm2, %v1162_v18  ;;  %1023 = vmatprep.mubr.msk.bf16.mxu0 %vm1175_vm1, %v1174_v0 }
  0x40   :  { %1101 = vmatprep.mubr.msk.bf16.mxu1 %vm1175_vm1, %v1174_v0 }
  0x46   :  { %1024 = vmatmul.mubr.msk.bf16.gmra.mxu0 %vm181_vm2, %v1163_v19 }
  0x47   :  { %1102 = vmatmul.mubr.msk.bf16.gmra.mxu1 %vm181_vm2, %v1163_v19  ;;  %1027 = vmatprep.mubr.msk.bf16.mxu0 %vm1175_vm1, %v1174_v0 }
  0x48   :  { %1105 = vmatprep.mubr.msk.bf16.mxu1 %vm1175_vm1, %v1174_v0 }
  0x4e   :  { %1028 = vmatmul.mubr.msk.bf16.gmra.mxu0 %vm181_vm2, %v1164_v20 }
  0x4f   :  { %1106 = vmatmul.mubr.msk.bf16.gmra.mxu1 %vm181_vm2, %v1164_v20  ;;  %1031 = vmatprep.mubr.msk.bf16.mxu0 %vm1175_vm1, %v1174_v0 }
  0x50   :  { %1109 = vmatprep.mubr.msk.bf16.mxu1 %vm1175_vm1, %v1174_v0 }
  0x56   :  { %1032 = vmatmul.mubr.msk.bf16.gmra.mxu0 %vm181_vm2, %v1165_v21 }
  0x57   :  { %1110 = vmatmul.mubr.msk.bf16.gmra.mxu1 %vm181_vm2, %v1165_v21  ;;  %1035 = vmatprep.mubr.msk.bf16.mxu0 %vm1175_vm1, %v1174_v0 }
  0x58   :  { %1113 = vmatprep.mubr.msk.bf16.mxu1 %vm1175_vm1, %v1174_v0 }
  0x5e   :  { %1036 = vmatmul.mubr.msk.bf16.gmra.mxu0 %vm181_vm2, %v1166_v22 }
  0x5f   :  { %1114 = vmatmul.mubr.msk.bf16.gmra.mxu1 %vm181_vm2, %v1166_v22  ;;  %1039 = vmatprep.mubr.msk.bf16.mxu0 %vm1175_vm1, %v1174_v0 }
  0x60   :  { %1117 = vmatprep.mubr.msk.bf16.mxu1 %vm1175_vm1, %v1174_v0 }
  0x66   :  { %1040 = vmatmul.mubr.msk.bf16.gmra.mxu0 %vm181_vm2, %v1167_v23 }
  0x67   :  { %1118 = vmatmul.mubr.msk.bf16.gmra.mxu1 %vm181_vm2, %v1167_v23  ;;  %1043 = vmatprep.mubr.msk.bf16.mxu0 %vm1175_vm1, %v1174_v0 }
  0x68   :  { %1121 = vmatprep.mubr.msk.bf16.mxu1 %vm1175_vm1, %v1174_v0 }
  0x6e   :  { %1044 = vmatmul.mubr.msk.bf16.gmra.mxu0 %vm181_vm2, %v1168_v24 }
  0x6f   :  { %1122 = vmatmul.mubr.msk.bf16.gmra.mxu1 %vm181_vm2, %v1168_v24  ;;  %1047 = vmatprep.mubr.msk.bf16.mxu0 %vm1175_vm1, %v1174_v0 }
  0x70   :  { %1125 = vmatprep.mubr.msk.bf16.mxu1 %vm1175_vm1, %v1174_v0 }
  0x76   :  { %1048 = vmatmul.mubr.msk.bf16.gmra.mxu0 %vm181_vm2, %v1169_v25 }
  0x77   :  { %1126 = vmatmul.mubr.msk.bf16.gmra.mxu1 %vm181_vm2, %v1169_v25  ;;  %1051 = vmatprep.mubr.msk.bf16.mxu0 %vm1175_vm1, %v1174_v0 }
  0x78   :  { %1129 = vmatprep.mubr.msk.bf16.mxu1 %vm1175_vm1, %v1174_v0 }
  0x7e   :  { %1052 = vmatmul.mubr.msk.bf16.gmra.mxu0 %vm181_vm2, %v1170_v26 }
  0x7f   :  { %1130 = vmatmul.mubr.msk.bf16.gmra.mxu1 %vm181_vm2, %v1170_v26  ;;  %1055 = vmatprep.mubr.msk.bf16.mxu0 %vm1175_vm1, %v1174_v0 }
  0x80   :  { %1133 = vmatprep.mubr.msk.bf16.mxu1 %vm1175_vm1, %v1174_v0 }
  0x86   :  { %1056 = vmatmul.mubr.msk.bf16.gmra.mxu0 %vm181_vm2, %v1171_v27 }
  0x87   :  { %1134 = vmatmul.mubr.msk.bf16.gmra.mxu1 %vm181_vm2, %v1171_v27  ;;  %1059 = vmatprep.mubr.msk.bf16.mxu0 %vm1175_vm1, %v1174_v0 }
  0x88   :  { %1137 = vmatprep.mubr.msk.bf16.mxu1 %vm1175_vm1, %v1174_v0 }
  0x8e   :  { %1060 = vmatmul.mubr.msk.bf16.gmra.mxu0 %vm181_vm2, %v1172_v28 }
  0x8f   :  { %1138 = vmatmul.mubr.msk.bf16.gmra.mxu1 %vm181_vm2, %v1172_v28  ;;  %1063 = vmatprep.mubr.msk.bf16.mxu0 %vm1175_vm1, %v1174_v0 }
  0x90   :  { %1141 = vmatprep.mubr.msk.bf16.mxu1 %vm1175_vm1, %v1174_v0 }
  0x96   :  { %1064 = vmatmul.mubr.msk.bf16.gmra.mxu0 %vm181_vm2, %v1173_v29 }
  0x97   :  { %1142 = vmatmul.mubr.msk.bf16.gmra.mxu1 %vm181_vm2, %v1173_v29 }
  0xd6   :  { %v271_v32 = vpop.f32.mrf.mxu0 }
  0xd7   :  { %v412_v34 = vmul.f32 %v1417_v30, %v271_v32  ;;  %v625_v35 = vpop.f32.mrf.mxu1 }
  0xd8   :  { %v766_v37 = vmul.f32 %v1422_v31, %v625_v35  ;;  %v1001_v38 = vpop.f32.mrf.mxu0 }
  0xd9   :  { %v452_v39 = vadd.f32 %v1427_v33, %v412_v34  ;;  %v1079_v40 = vpop.f32.mrf.mxu1 }
  0xda   :  { %v806_v41 = vadd.f32 %v1433_v36, %v766_v37  ;;  %v274_v42 = vpop.f32.mrf.mxu0 }
  0xdb   :  { %v485_v43 = vmax.f32 %v452_v39, 0.0  ;;  %v413_v44 = vmul.f32 %v1417_v30, %v274_v42  ;;  %v628_v45 = vpop.f32.mrf.mxu1 }
  0xdc   :  { %839 = vst.msk [vmem:[%s1837_s8] sm:$0xff] %vm518_vm3, %v806_v41  ;;  %v767_v46 = vmul.f32 %v1422_v31, %v628_v45  ;;  %v1002_v47 = vpop.f32.mrf.mxu0 }
  0xdd   :  { %519 = vst.msk [vmem:[%s1838_s7] sm:$0xff] %vm518_vm3, %v485_v43  ;;  %v453_v48 = vadd.f32 %v1427_v33, %v413_v44  ;;  %v1080_v49 = vpop.f32.mrf.mxu1 }
  0xde   :  { %v807_v50 = vadd.f32 %v1433_v36, %v767_v46  ;;  %v279_v51 = vpop.f32.mrf.mxu0 }
  0xdf   :  { %v486_v52 = vmax.f32 %v453_v48, 0.0  ;;  %v414_v53 = vmul.f32 %v1417_v30, %v279_v51  ;;  %v633_v54 = vpop.f32.mrf.mxu1 }
  0xe0   :  { %840 = vst.msk [vmem:[%s1837_s8 + $0x8] sm:$0xff] %vm518_vm3, %v807_v50  ;;  %v768_v55 = vmul.f32 %v1422_v31, %v633_v54  ;;  %v1005_v56 = vpop.f32.mrf.mxu0 }
  0xe1   :  { %520 = vst.msk [vmem:[%s1838_s7 + $0x8] sm:$0xff] %vm518_vm3, %v486_v52  ;;  %v454_v57 = vadd.f32 %v1427_v33, %v414_v53  ;;  %v1083_v58 = vpop.f32.mrf.mxu1 }
  0xe2   :  { %v808_v59 = vadd.f32 %v1433_v36, %v768_v55  ;;  %v282_v60 = vpop.f32.mrf.mxu0 }
  0xe3   :  { %v487_v61 = vmax.f32 %v454_v57, 0.0  ;;  %v415_v62 = vmul.f32 %v1417_v30, %v282_v60  ;;  %v636_v63 = vpop.f32.mrf.mxu1 }
  0xe4   :  { %841 = vst.msk [vmem:[%s1837_s8 + $0x10] sm:$0xff] %vm518_vm3, %v808_v59  ;;  %v769_v0 = vmul.f32 %v1422_v31, %v636_v63  ;;  %v1006_v1 = vpop.f32.mrf.mxu0 }
  0xe5   :  { %521 = vst.msk [vmem:[%s1838_s7 + $0x10] sm:$0xff] %vm518_vm3, %v487_v61  ;;  %v455_v2 = vadd.f32 %v1427_v33, %v415_v62  ;;  %v1084_v3 = vpop.f32.mrf.mxu1 }
  0xe6   :  { %v809_v4 = vadd.f32 %v1433_v36, %v769_v0  ;;  %v287_v5 = vpop.f32.mrf.mxu0 }
  0xe7   :  { %v488_v6 = vmax.f32 %v455_v2, 0.0  ;;  %v416_v7 = vmul.f32 %v1417_v30, %v287_v5  ;;  %v641_v8 = vpop.f32.mrf.mxu1 }
  0xe8   :  { %842 = vst.msk [vmem:[%s1837_s8 + $0x18] sm:$0xff] %vm518_vm3, %v809_v4  ;;  %v770_v9 = vmul.f32 %v1422_v31, %v641_v8  ;;  %v1009_v10 = vpop.f32.mrf.mxu0 }
  0xe9   :  { %522 = vst.msk [vmem:[%s1838_s7 + $0x18] sm:$0xff] %vm518_vm3, %v488_v6  ;;  %v456_v11 = vadd.f32 %v1427_v33, %v416_v7  ;;  %v1087_v12 = vpop.f32.mrf.mxu1 }
  0xea   :  { %v810_v13 = vadd.f32 %v1433_v36, %v770_v9  ;;  %v290_v14 = vpop.f32.mrf.mxu0 }
  0xeb   :  { %v489_v15 = vmax.f32 %v456_v11, 0.0  ;;  %v417_v16 = vmul.f32 %v1417_v30, %v290_v14  ;;  %v644_v17 = vpop.f32.mrf.mxu1 }
  0xec   :  { %843 = vst.msk [vmem:[%s1837_s8 + $0x20] sm:$0xff] %vm518_vm3, %v810_v13  ;;  %v771_v18 = vmul.f32 %v1422_v31, %v644_v17  ;;  %v1010_v19 = vpop.f32.mrf.mxu0 }
  0xed   :  { %523 = vst.msk [vmem:[%s1838_s7 + $0x20] sm:$0xff] %vm518_vm3, %v489_v15  ;;  %v457_v20 = vadd.f32 %v1427_v33, %v417_v16  ;;  %v1088_v21 = vpop.f32.mrf.mxu1 }
  0xee   :  { %v811_v22 = vadd.f32 %v1433_v36, %v771_v18  ;;  %v295_v23 = vpop.f32.mrf.mxu0 }
  0xef   :  { %v490_v24 = vmax.f32 %v457_v20, 0.0  ;;  %v418_v25 = vmul.f32 %v1417_v30, %v295_v23  ;;  %v649_v26 = vpop.f32.mrf.mxu1 }
  0xf0   :  { %844 = vst.msk [vmem:[%s1837_s8 + $0x28] sm:$0xff] %vm518_vm3, %v811_v22  ;;  %v772_v27 = vmul.f32 %v1422_v31, %v649_v26  ;;  %v1013_v28 = vpop.f32.mrf.mxu0 }
  0xf1   :  { %524 = vst.msk [vmem:[%s1838_s7 + $0x28] sm:$0xff] %vm518_vm3, %v490_v24  ;;  %v458_v29 = vadd.f32 %v1427_v33, %v418_v25  ;;  %v1091_v32 = vpop.f32.mrf.mxu1 }
  0xf2   :  { %v812_v34 = vadd.f32 %v1433_v36, %v772_v27  ;;  %v298_v35 = vpop.f32.mrf.mxu0 }
  0xf3   :  { %v491_v37 = vmax.f32 %v458_v29, 0.0  ;;  %v419_v38 = vmul.f32 %v1417_v30, %v298_v35  ;;  %v652_v39 = vpop.f32.mrf.mxu1 }
  0xf4   :  { %845 = vst.msk [vmem:[%s1837_s8 + $0x30] sm:$0xff] %vm518_vm3, %v812_v34  ;;  %v773_v40 = vmul.f32 %v1422_v31, %v652_v39  ;;  %v1014_v41 = vpop.f32.mrf.mxu0 }
  0xf5   :  { %525 = vst.msk [vmem:[%s1838_s7 + $0x30] sm:$0xff] %vm518_vm3, %v491_v37  ;;  %v459_v42 = vadd.f32 %v1427_v33, %v419_v38  ;;  %v1092_v43 = vpop.f32.mrf.mxu1 }
  0xf6   :  { %v813_v44 = vadd.f32 %v1433_v36, %v773_v40  ;;  %v303_v45 = vpop.f32.mrf.mxu0 }
  0xf7   :  { %v492_v46 = vmax.f32 %v459_v42, 0.0  ;;  %v420_v47 = vmul.f32 %v1417_v30, %v303_v45  ;;  %v657_v48 = vpop.f32.mrf.mxu1 }
  0xf8   :  { %846 = vst.msk [vmem:[%s1837_s8 + $0x38] sm:$0xff] %vm518_vm3, %v813_v44  ;;  %v774_v49 = vmul.f32 %v1422_v31, %v657_v48  ;;  %v1017_v50 = vpop.f32.mrf.mxu0 }
  0xf9   :  { %526 = vst.msk [vmem:[%s1838_s7 + $0x38] sm:$0xff] %vm518_vm3, %v492_v46  ;;  %v460_v51 = vadd.f32 %v1427_v33, %v420_v47  ;;  %v1095_v52 = vpop.f32.mrf.mxu1 }
  0xfa   :  { %v814_v53 = vadd.f32 %v1433_v36, %v774_v49  ;;  %v306_v54 = vpop.f32.mrf.mxu0 }
  0xfb   :  { %v493_v55 = vmax.f32 %v460_v51, 0.0  ;;  %v421_v56 = vmul.f32 %v1417_v30, %v306_v54  ;;  %v660_v57 = vpop.f32.mrf.mxu1 }
  0xfc   :  { %847 = vst.msk [vmem:[%s1837_s8 + $0x40] sm:$0xff] %vm518_vm3, %v814_v53  ;;  %v775_v58 = vmul.f32 %v1422_v31, %v660_v57  ;;  %v1018_v59 = vpop.f32.mrf.mxu0 }
  0xfd   :  { %527 = vst.msk [vmem:[%s1838_s7 + $0x40] sm:$0xff] %vm518_vm3, %v493_v55  ;;  %v461_v60 = vadd.f32 %v1427_v33, %v421_v56  ;;  %v1096_v61 = vpop.f32.mrf.mxu1 }
  0xfe   :  { %v815_v62 = vadd.f32 %v1433_v36, %v775_v58  ;;  %v311_v63 = vpop.f32.mrf.mxu0 }
  0xff   :  { %v494_v0 = vmax.f32 %v461_v60, 0.0  ;;  %v422_v1 = vmul.f32 %v1417_v30, %v311_v63  ;;  %v665_v2 = vpop.f32.mrf.mxu1 }
 0x100   :  { %848 = vst.msk [vmem:[%s1837_s8 + $0x48] sm:$0xff] %vm518_vm3, %v815_v62  ;;  %v776_v3 = vmul.f32 %v1422_v31, %v665_v2  ;;  %v1021_v4 = vpop.f32.mrf.mxu0 }
 0x101   :  { %528 = vst.msk [vmem:[%s1838_s7 + $0x48] sm:$0xff] %vm518_vm3, %v494_v0  ;;  %v462_v5 = vadd.f32 %v1427_v33, %v422_v1  ;;  %v1099_v6 = vpop.f32.mrf.mxu1 }
 0x102   :  { %v816_v7 = vadd.f32 %v1433_v36, %v776_v3  ;;  %v314_v8 = vpop.f32.mrf.mxu0 }
 0x103   :  { %v495_v9 = vmax.f32 %v462_v5, 0.0  ;;  %v423_v10 = vmul.f32 %v1417_v30, %v314_v8  ;;  %v668_v11 = vpop.f32.mrf.mxu1 }
 0x104   :  { %849 = vst.msk [vmem:[%s1837_s8 + $0x50] sm:$0xff] %vm518_vm3, %v816_v7  ;;  %v777_v12 = vmul.f32 %v1422_v31, %v668_v11  ;;  %v1022_v13 = vpop.f32.mrf.mxu0 }
 0x105   :  { %529 = vst.msk [vmem:[%s1838_s7 + $0x50] sm:$0xff] %vm518_vm3, %v495_v9  ;;  %v463_v14 = vadd.f32 %v1427_v33, %v423_v10  ;;  %v1100_v15 = vpop.f32.mrf.mxu1 }
 0x106   :  { %v817_v16 = vadd.f32 %v1433_v36, %v777_v12  ;;  %v319_v17 = vpop.f32.mrf.mxu0 }
 0x107   :  { %v496_v18 = vmax.f32 %v463_v14, 0.0  ;;  %v424_v19 = vmul.f32 %v1417_v30, %v319_v17  ;;  %v673_v20 = vpop.f32.mrf.mxu1 }
 0x108   :  { %850 = vst.msk [vmem:[%s1837_s8 + $0x58] sm:$0xff] %vm518_vm3, %v817_v16  ;;  %v778_v21 = vmul.f32 %v1422_v31, %v673_v20  ;;  %v1025_v22 = vpop.f32.mrf.mxu0 }
 0x109   :  { %530 = vst.msk [vmem:[%s1838_s7 + $0x58] sm:$0xff] %vm518_vm3, %v496_v18  ;;  %v464_v23 = vadd.f32 %v1427_v33, %v424_v19  ;;  %v1103_v24 = vpop.f32.mrf.mxu1 }
 0x10a   :  { %v818_v25 = vadd.f32 %v1433_v36, %v778_v21  ;;  %v322_v26 = vpop.f32.mrf.mxu0 }
 0x10b   :  { %v497_v27 = vmax.f32 %v464_v23, 0.0  ;;  %v425_v28 = vmul.f32 %v1417_v30, %v322_v26  ;;  %v676_v29 = vpop.f32.mrf.mxu1 }
 0x10c   :  { %851 = vst.msk [vmem:[%s1837_s8 + $0x60] sm:$0xff] %vm518_vm3, %v818_v25  ;;  %v779_v32 = vmul.f32 %v1422_v31, %v676_v29  ;;  %v1026_v34 = vpop.f32.mrf.mxu0 }
 0x10d   :  { %531 = vst.msk [vmem:[%s1838_s7 + $0x60] sm:$0xff] %vm518_vm3, %v497_v27  ;;  %v465_v35 = vadd.f32 %v1427_v33, %v425_v28  ;;  %v1104_v37 = vpop.f32.mrf.mxu1 }
 0x10e   :  { %v819_v38 = vadd.f32 %v1433_v36, %v779_v32  ;;  %v327_v39 = vpop.f32.mrf.mxu0 }
 0x10f   :  { %v498_v40 = vmax.f32 %v465_v35, 0.0  ;;  %v426_v41 = vmul.f32 %v1417_v30, %v327_v39  ;;  %v681_v42 = vpop.f32.mrf.mxu1 }
 0x110   :  { %852 = vst.msk [vmem:[%s1837_s8 + $0x68] sm:$0xff] %vm518_vm3, %v819_v38  ;;  %v780_v43 = vmul.f32 %v1422_v31, %v681_v42  ;;  %v1029_v44 = vpop.f32.mrf.mxu0 }
 0x111   :  { %532 = vst.msk [vmem:[%s1838_s7 + $0x68] sm:$0xff] %vm518_vm3, %v498_v40  ;;  %v466_v45 = vadd.f32 %v1427_v33, %v426_v41  ;;  %v1107_v46 = vpop.f32.mrf.mxu1 }
 0x112   :  { %v820_v47 = vadd.f32 %v1433_v36, %v780_v43  ;;  %v330_v48 = vpop.f32.mrf.mxu0 }
 0x113   :  { %v499_v49 = vmax.f32 %v466_v45, 0.0  ;;  %v427_v50 = vmul.f32 %v1417_v30, %v330_v48  ;;  %v684_v51 = vpop.f32.mrf.mxu1 }
 0x114   :  { %853 = vst.msk [vmem:[%s1837_s8 + $0x70] sm:$0xff] %vm518_vm3, %v820_v47  ;;  %v781_v52 = vmul.f32 %v1422_v31, %v684_v51  ;;  %v1030_v53 = vpop.f32.mrf.mxu0 }
 0x115   :  { %533 = vst.msk [vmem:[%s1838_s7 + $0x70] sm:$0xff] %vm518_vm3, %v499_v49  ;;  %v467_v54 = vadd.f32 %v1427_v33, %v427_v50  ;;  %v1108_v55 = vpop.f32.mrf.mxu1 }
 0x116   :  { %v821_v56 = vadd.f32 %v1433_v36, %v781_v52  ;;  %v335_v57 = vpop.f32.mrf.mxu0 }
 0x117   :  { %v500_v58 = vmax.f32 %v467_v54, 0.0  ;;  %v428_v59 = vmul.f32 %v1417_v30, %v335_v57  ;;  %v689_v60 = vpop.f32.mrf.mxu1 }
 0x118   :  { %854 = vst.msk [vmem:[%s1837_s8 + $0x78] sm:$0xff] %vm518_vm3, %v821_v56  ;;  %v782_v61 = vmul.f32 %v1422_v31, %v689_v60  ;;  %v1033_v62 = vpop.f32.mrf.mxu0 }
 0x119   :  { %534 = vst.msk [vmem:[%s1838_s7 + $0x78] sm:$0xff] %vm518_vm3, %v500_v58  ;;  %v468_v63 = vadd.f32 %v1427_v33, %v428_v59  ;;  %v1111_v0 = vpop.f32.mrf.mxu1 }
 0x11a   :  { %v822_v1 = vadd.f32 %v1433_v36, %v782_v61  ;;  %v338_v2 = vpop.f32.mrf.mxu0 }
 0x11b   :  { %v501_v3 = vmax.f32 %v468_v63, 0.0  ;;  %v429_v4 = vmul.f32 %v1417_v30, %v338_v2  ;;  %v692_v5 = vpop.f32.mrf.mxu1 }
 0x11c   :  { %855 = vst.msk [vmem:[%s1837_s8 + $0x80] sm:$0xff] %vm518_vm3, %v822_v1  ;;  %v783_v6 = vmul.f32 %v1422_v31, %v692_v5  ;;  %v1034_v7 = vpop.f32.mrf.mxu0 }
 0x11d   :  { %535 = vst.msk [vmem:[%s1838_s7 + $0x80] sm:$0xff] %vm518_vm3, %v501_v3  ;;  %v469_v8 = vadd.f32 %v1427_v33, %v429_v4  ;;  %v1112_v9 = vpop.f32.mrf.mxu1 }
 0x11e   :  { %v823_v10 = vadd.f32 %v1433_v36, %v783_v6  ;;  %v343_v11 = vpop.f32.mrf.mxu0 }
 0x11f   :  { %v502_v12 = vmax.f32 %v469_v8, 0.0  ;;  %v430_v13 = vmul.f32 %v1417_v30, %v343_v11  ;;  %v697_v14 = vpop.f32.mrf.mxu1 }
 0x120   :  { %856 = vst.msk [vmem:[%s1837_s8 + $0x88] sm:$0xff] %vm518_vm3, %v823_v10  ;;  %v784_v15 = vmul.f32 %v1422_v31, %v697_v14  ;;  %v1037_v16 = vpop.f32.mrf.mxu0 }
 0x121   :  { %536 = vst.msk [vmem:[%s1838_s7 + $0x88] sm:$0xff] %vm518_vm3, %v502_v12  ;;  %v470_v17 = vadd.f32 %v1427_v33, %v430_v13  ;;  %v1115_v18 = vpop.f32.mrf.mxu1 }
 0x122   :  { %v824_v19 = vadd.f32 %v1433_v36, %v784_v15  ;;  %v346_v20 = vpop.f32.mrf.mxu0 }
 0x123   :  { %v503_v21 = vmax.f32 %v470_v17, 0.0  ;;  %v431_v22 = vmul.f32 %v1417_v30, %v346_v20  ;;  %v700_v23 = vpop.f32.mrf.mxu1 }
 0x124   :  { %857 = vst.msk [vmem:[%s1837_s8 + $0x90] sm:$0xff] %vm518_vm3, %v824_v19  ;;  %v785_v24 = vmul.f32 %v1422_v31, %v700_v23  ;;  %v1038_v25 = vpop.f32.mrf.mxu0 }
 0x125   :  { %537 = vst.msk [vmem:[%s1838_s7 + $0x90] sm:$0xff] %vm518_vm3, %v503_v21  ;;  %v471_v26 = vadd.f32 %v1427_v33, %v431_v22  ;;  %v1116_v27 = vpop.f32.mrf.mxu1 }
 0x126   :  { %v825_v28 = vadd.f32 %v1433_v36, %v785_v24  ;;  %v351_v29 = vpop.f32.mrf.mxu0 }
 0x127   :  { %v504_v32 = vmax.f32 %v471_v26, 0.0  ;;  %v432_v34 = vmul.f32 %v1417_v30, %v351_v29  ;;  %v705_v35 = vpop.f32.mrf.mxu1 }
 0x128   :  { %858 = vst.msk [vmem:[%s1837_s8 + $0x98] sm:$0xff] %vm518_vm3, %v825_v28  ;;  %v786_v37 = vmul.f32 %v1422_v31, %v705_v35  ;;  %v1041_v38 = vpop.f32.mrf.mxu0 }
 0x129   :  { %538 = vst.msk [vmem:[%s1838_s7 + $0x98] sm:$0xff] %vm518_vm3, %v504_v32  ;;  %v472_v39 = vadd.f32 %v1427_v33, %v432_v34  ;;  %v1119_v40 = vpop.f32.mrf.mxu1 }
 0x12a   :  { %v826_v41 = vadd.f32 %v1433_v36, %v786_v37  ;;  %v354_v42 = vpop.f32.mrf.mxu0 }
 0x12b   :  { %v505_v43 = vmax.f32 %v472_v39, 0.0  ;;  %v433_v44 = vmul.f32 %v1417_v30, %v354_v42  ;;  %v708_v45 = vpop.f32.mrf.mxu1 }
 0x12c   :  { %859 = vst.msk [vmem:[%s1837_s8 + $0xa0] sm:$0xff] %vm518_vm3, %v826_v41  ;;  %v787_v46 = vmul.f32 %v1422_v31, %v708_v45  ;;  %v1042_v47 = vpop.f32.mrf.mxu0 }
 0x12d   :  { %539 = vst.msk [vmem:[%s1838_s7 + $0xa0] sm:$0xff] %vm518_vm3, %v505_v43  ;;  %v473_v48 = vadd.f32 %v1427_v33, %v433_v44  ;;  %v1120_v49 = vpop.f32.mrf.mxu1 }
 0x12e   :  { %v827_v50 = vadd.f32 %v1433_v36, %v787_v46  ;;  %v359_v51 = vpop.f32.mrf.mxu0 }
 0x12f   :  { %v506_v52 = vmax.f32 %v473_v48, 0.0  ;;  %v434_v53 = vmul.f32 %v1417_v30, %v359_v51  ;;  %v713_v54 = vpop.f32.mrf.mxu1 }
 0x130   :  { %860 = vst.msk [vmem:[%s1837_s8 + $0xa8] sm:$0xff] %vm518_vm3, %v827_v50  ;;  %v788_v55 = vmul.f32 %v1422_v31, %v713_v54  ;;  %v1045_v56 = vpop.f32.mrf.mxu0 }
 0x131   :  { %540 = vst.msk [vmem:[%s1838_s7 + $0xa8] sm:$0xff] %vm518_vm3, %v506_v52  ;;  %v474_v57 = vadd.f32 %v1427_v33, %v434_v53  ;;  %v1123_v58 = vpop.f32.mrf.mxu1 }
 0x132   :  { %v828_v59 = vadd.f32 %v1433_v36, %v788_v55  ;;  %v362_v60 = vpop.f32.mrf.mxu0 }
 0x133   :  { %v507_v61 = vmax.f32 %v474_v57, 0.0  ;;  %v435_v62 = vmul.f32 %v1417_v30, %v362_v60  ;;  %v716_v63 = vpop.f32.mrf.mxu1 }
 0x134   :  { %861 = vst.msk [vmem:[%s1837_s8 + $0xb0] sm:$0xff] %vm518_vm3, %v828_v59  ;;  %v789_v0 = vmul.f32 %v1422_v31, %v716_v63  ;;  %v1046_v1 = vpop.f32.mrf.mxu0 }
 0x135   :  { %541 = vst.msk [vmem:[%s1838_s7 + $0xb0] sm:$0xff] %vm518_vm3, %v507_v61  ;;  %v475_v2 = vadd.f32 %v1427_v33, %v435_v62  ;;  %v1124_v3 = vpop.f32.mrf.mxu1 }
 0x136   :  { %v829_v4 = vadd.f32 %v1433_v36, %v789_v0  ;;  %v367_v5 = vpop.f32.mrf.mxu0 }
 0x137   :  { %v508_v6 = vmax.f32 %v475_v2, 0.0  ;;  %v436_v7 = vmul.f32 %v1417_v30, %v367_v5  ;;  %v721_v8 = vpop.f32.mrf.mxu1 }
 0x138   :  { %862 = vst.msk [vmem:[%s1837_s8 + $0xb8] sm:$0xff] %vm518_vm3, %v829_v4  ;;  %v790_v9 = vmul.f32 %v1422_v31, %v721_v8  ;;  %v1049_v10 = vpop.f32.mrf.mxu0 }
 0x139   :  { %542 = vst.msk [vmem:[%s1838_s7 + $0xb8] sm:$0xff] %vm518_vm3, %v508_v6  ;;  %v476_v11 = vadd.f32 %v1427_v33, %v436_v7  ;;  %v1127_v12 = vpop.f32.mrf.mxu1 }
 0x13a   :  { %v830_v13 = vadd.f32 %v1433_v36, %v790_v9  ;;  %v370_v14 = vpop.f32.mrf.mxu0 }
 0x13b   :  { %v509_v15 = vmax.f32 %v476_v11, 0.0  ;;  %v437_v16 = vmul.f32 %v1417_v30, %v370_v14  ;;  %v724_v17 = vpop.f32.mrf.mxu1 }
 0x13c   :  { %863 = vst.msk [vmem:[%s1837_s8 + $0xc0] sm:$0xff] %vm518_vm3, %v830_v13  ;;  %v791_v18 = vmul.f32 %v1422_v31, %v724_v17  ;;  %v1050_v19 = vpop.f32.mrf.mxu0 }
 0x13d   :  { %543 = vst.msk [vmem:[%s1838_s7 + $0xc0] sm:$0xff] %vm518_vm3, %v509_v15  ;;  %v477_v20 = vadd.f32 %v1427_v33, %v437_v16  ;;  %v1128_v21 = vpop.f32.mrf.mxu1 }
 0x13e   :  { %v831_v22 = vadd.f32 %v1433_v36, %v791_v18  ;;  %v375_v23 = vpop.f32.mrf.mxu0 }
 0x13f   :  { %v510_v24 = vmax.f32 %v477_v20, 0.0  ;;  %v438_v25 = vmul.f32 %v1417_v30, %v375_v23  ;;  %v729_v26 = vpop.f32.mrf.mxu1 }
 0x140   :  { %864 = vst.msk [vmem:[%s1837_s8 + $0xc8] sm:$0xff] %vm518_vm3, %v831_v22  ;;  %v792_v27 = vmul.f32 %v1422_v31, %v729_v26  ;;  %v1053_v28 = vpop.f32.mrf.mxu0 }
 0x141   :  { %544 = vst.msk [vmem:[%s1838_s7 + $0xc8] sm:$0xff] %vm518_vm3, %v510_v24  ;;  %v478_v29 = vadd.f32 %v1427_v33, %v438_v25  ;;  %v1131_v32 = vpop.f32.mrf.mxu1 }
 0x142   :  { %v832_v34 = vadd.f32 %v1433_v36, %v792_v27  ;;  %v378_v35 = vpop.f32.mrf.mxu0 }
 0x143   :  { %v511_v37 = vmax.f32 %v478_v29, 0.0  ;;  %v439_v38 = vmul.f32 %v1417_v30, %v378_v35  ;;  %v732_v39 = vpop.f32.mrf.mxu1 }
 0x144   :  { %865 = vst.msk [vmem:[%s1837_s8 + $0xd0] sm:$0xff] %vm518_vm3, %v832_v34  ;;  %v793_v40 = vmul.f32 %v1422_v31, %v732_v39  ;;  %v1054_v41 = vpop.f32.mrf.mxu0 }
 0x145   :  { %545 = vst.msk [vmem:[%s1838_s7 + $0xd0] sm:$0xff] %vm518_vm3, %v511_v37  ;;  %v479_v42 = vadd.f32 %v1427_v33, %v439_v38  ;;  %v1132_v43 = vpop.f32.mrf.mxu1 }
 0x146   :  { %v833_v44 = vadd.f32 %v1433_v36, %v793_v40  ;;  %v383_v45 = vpop.f32.mrf.mxu0 }
 0x147   :  { %v512_v46 = vmax.f32 %v479_v42, 0.0  ;;  %v440_v47 = vmul.f32 %v1417_v30, %v383_v45  ;;  %v737_v48 = vpop.f32.mrf.mxu1 }
 0x148   :  { %866 = vst.msk [vmem:[%s1837_s8 + $0xd8] sm:$0xff] %vm518_vm3, %v833_v44  ;;  %v794_v49 = vmul.f32 %v1422_v31, %v737_v48  ;;  %v1057_v50 = vpop.f32.mrf.mxu0 }
 0x149   :  { %546 = vst.msk [vmem:[%s1838_s7 + $0xd8] sm:$0xff] %vm518_vm3, %v512_v46  ;;  %v480_v51 = vadd.f32 %v1427_v33, %v440_v47  ;;  %v1135_v52 = vpop.f32.mrf.mxu1 }
 0x14a   :  { %v834_v53 = vadd.f32 %v1433_v36, %v794_v49  ;;  %v386_v54 = vpop.f32.mrf.mxu0 }
 0x14b   :  { %v513_v55 = vmax.f32 %v480_v51, 0.0  ;;  %v441_v56 = vmul.f32 %v1417_v30, %v386_v54  ;;  %v740_v57 = vpop.f32.mrf.mxu1 }
 0x14c   :  { %867 = vst.msk [vmem:[%s1837_s8 + $0xe0] sm:$0xff] %vm518_vm3, %v834_v53  ;;  %v795_v58 = vmul.f32 %v1422_v31, %v740_v57  ;;  %v1058_v59 = vpop.f32.mrf.mxu0 }
 0x14d   :  { %547 = vst.msk [vmem:[%s1838_s7 + $0xe0] sm:$0xff] %vm518_vm3, %v513_v55  ;;  %v481_v60 = vadd.f32 %v1427_v33, %v441_v56  ;;  %v1136_v61 = vpop.f32.mrf.mxu1 }
 0x14e   :  { %v835_v62 = vadd.f32 %v1433_v36, %v795_v58  ;;  %v391_v63 = vpop.f32.mrf.mxu0 }
 0x14f   :  { %v514_v0 = vmax.f32 %v481_v60, 0.0  ;;  %v442_v1 = vmul.f32 %v1417_v30, %v391_v63  ;;  %v745_v2 = vpop.f32.mrf.mxu1 }
 0x150   :  { %868 = vst.msk [vmem:[%s1837_s8 + $0xe8] sm:$0xff] %vm518_vm3, %v835_v62  ;;  %v796_v3 = vmul.f32 %v1422_v31, %v745_v2  ;;  %v1061_v4 = vpop.f32.mrf.mxu0 }
 0x151   :  { %548 = vst.msk [vmem:[%s1838_s7 + $0xe8] sm:$0xff] %vm518_vm3, %v514_v0  ;;  %v482_v5 = vadd.f32 %v1427_v33, %v442_v1  ;;  %v1139_v6 = vpop.f32.mrf.mxu1 }
 0x152   :  { %v836_v7 = vadd.f32 %v1433_v36, %v796_v3  ;;  %v394_v8 = vpop.f32.mrf.mxu0 }
 0x153   :  { %v515_v9 = vmax.f32 %v482_v5, 0.0  ;;  %v443_v10 = vmul.f32 %v1417_v30, %v394_v8  ;;  %v748_v11 = vpop.f32.mrf.mxu1 }
 0x154   :  { %869 = vst.msk [vmem:[%s1837_s8 + $0xf0] sm:$0xff] %vm518_vm3, %v836_v7  ;;  %v797_v12 = vmul.f32 %v1422_v31, %v748_v11  ;;  %v1062_v13 = vpop.f32.mrf.mxu0 }
 0x155   :  { %549 = vst.msk [vmem:[%s1838_s7 + $0xf0] sm:$0xff] %vm518_vm3, %v515_v9  ;;  %v483_v14 = vadd.f32 %v1427_v33, %v443_v10  ;;  %v1140_v15 = vpop.f32.mrf.mxu1 }
 0x156   :  { %v837_v16 = vadd.f32 %v1433_v36, %v797_v12  ;;  %v399_v17 = vpop.f32.mrf.mxu0 }
 0x157   :  { %v516_v18 = vmax.f32 %v483_v14, 0.0  ;;  %v444_v19 = vmul.f32 %v1417_v30, %v399_v17  ;;  %v753_v20 = vpop.f32.mrf.mxu1 }
 0x158   :  { %870 = vst.msk [vmem:[%s1837_s8 + $0xf8] sm:$0xff] %vm518_vm3, %v837_v16  ;;  %v798_v21 = vmul.f32 %v1422_v31, %v753_v20  ;;  %v1065_v22 = vpop.f32.mrf.mxu0 }
 0x159   :  { %550 = vst.msk [vmem:[%s1838_s7 + $0xf8] sm:$0xff] %vm518_vm3, %v516_v18  ;;  %v484_v23 = vadd.f32 %v1427_v33, %v444_v19  ;;  %v1143_v24 = vpop.f32.mrf.mxu1 }
 0x15a   :  { %v838_v25 = vadd.f32 %v1433_v36, %v798_v21  ;;  %v402_v30 = vpop.f32.mrf.mxu0 }
 0x15b   :  { %v517_v26 = vmax.f32 %v484_v23, 0.0  ;;  %v756_v27 = vpop.f32.mrf.mxu1 }
 0x15c   :  { %871 = vst.msk [vmem:[%s1837_s8 + $0x100] sm:$0xff] %vm518_vm3, %v838_v25  ;;  %v1066_v31 = vpop.f32.mrf.mxu0 }
 0x15d   :  { %551 = vst.msk [vmem:[%s1838_s7 + $0x100] sm:$0xff] %vm518_vm3, %v517_v26  ;;  %v1144_v28 = vpop.f32.mrf.mxu1 }

// kernel: short_chunk_cnn_res.18
= control target key start
LH: loop header
LB: loop body
LE: loop exit
PB: predicated region body
PF: predicated region fallthrough
CT: control target
= control target key end

     0   :  { %vm225_vm0 = vcmask 1043456   ;;  %v789_v0 = vmov 0.0   ;;  %vm790_vm1 = vmmov 0   ;;  %vm173_vm2 = vcmask 588800   ;;  %s1255_s1 = inlined_call_operand.vmem [shape: bf16[72,8], index: 1, kind: input, shape index: {}]   ;;  %s1256_s0 = inlined_call_operand.vmem [shape: bf16[264,72], index: 0, kind: input, shape index: {}]   ;;  %s1257_s2 = inlined_call_operand.vmem [shape: f32[1,8], index: 2, kind: input, shape index: {}]   ;;  %s1258_s3 = inlined_call_operand.vmem [shape: f32[1,8], index: 3, kind: input, shape index: {}]   ;;  %s1259_s4 = inlined_call_operand.vmem [shape: f32[264,8], index: 4, kind: input, shape index: {}]   ;;  %s1260_s5 = inlined_call_operand.vmem [shape: f32[264,8], index: 5, kind: output, shape index: {}]  }
   0x1   :  { %677 = vmatprep.subr.bf16.mxu0 %v789_v0  ;;  %v767_v1 = vld [vmem:[%s1255_s1 + $0x20] ss:$0 sps:$4 sm:$0xff]   ;;  %755 = vmatprep.subr.bf16.mxu1 %v789_v0  ;;  %v768_v3 = vld [vmem:[%s1255_s1 + $0x18] sm:$0xff]   ;;  %v769_v4 = vld [vmem:[%s1255_s1 + $0x10] sm:$0xff]   ;;  %vm576_vm3 = vcmask 64512  }
   0x2   :  { %687 = vmatprep.mubr.msk.bf16.mxu0 %vm790_vm1, %v789_v0  ;;  %723 = vmatprep.mubr.msk.bf16.mxu1 %vm790_vm1, %v789_v0  ;;  %v227_v2 = vsel %vm225_vm0, %v767_v1, 0  ;;  %v770_v5 = vld [vmem:[%s1255_s1 + $0x8] sm:$0xff]   ;;  %v771_v6 = vld [vmem:[%s1255_s1] sm:$0xff]   ;;  %v775_v10 = vld [vmem:[%s1256_s0 + $0x50] sm:$0xff]  }
   0x3   :  { %678 = vmatpush3.bf16.msra.mxu0 %v227_v2  ;;  %760 = vmatpush3.bf16.msra.mxu1 %v227_v2  ;;  %v772_v7 = vld [vmem:[%s1256_s0] sm:$0xff]   ;;  %v773_v8 = vld [vmem:[%s1256_s0 + $0x48] sm:$0xff]   ;;  %v776_v11 = vld [vmem:[%s1256_s0 + $0x10] sm:$0xff]  }
   0x4   :  { %679 = vmatprep.subr.bf16.mxu0 %v789_v0  ;;  %756 = vmatprep.subr.bf16.mxu1 %v789_v0  ;;  %v774_v9 = vld [vmem:[%s1256_s0 + $0x8] sm:$0xff]   ;;  %v777_v12 = vld [vmem:[%s1256_s0 + $0x58] sm:$0xff]   ;;  %v779_v14 = vld [vmem:[%s1256_s0 + $0x60] sm:$0xff]  }
   0x5   :  { %v778_v13 = vld [vmem:[%s1256_s0 + $0x18] sm:$0xff]   ;;  %v780_v15 = vld [vmem:[%s1256_s0 + $0x20] sm:$0xff]   ;;  %v781_v16 = vld [vmem:[%s1256_s0 + $0x68] sm:$0xff]  }
   0x6   :  { %v782_v17 = vld [vmem:[%s1256_s0 + $0x28] sm:$0xff]   ;;  %v783_v18 = vld [vmem:[%s1256_s0 + $0x70] sm:$0xff]   ;;  %v785_v20 = vld [vmem:[%s1256_s0 + $0x78] sm:$0xff]  }
   0x7   :  { %680 = vmatpush3.bf16.msra.mxu0 %v768_v3  ;;  %761 = vmatpush3.bf16.msra.mxu1 %v768_v3  ;;  %v784_v19 = vld [vmem:[%s1256_s0 + $0x30] sm:$0xff]   ;;  %v786_v21 = vld [vmem:[%s1256_s0 + $0x38] sm:$0xff]   ;;  %v787_v22 = vld [vmem:[%s1256_s0 + $0x80] ss:$0 sps:$4 sm:$0xff]  }
   0x8   :  { %681 = vmatprep.subr.bf16.mxu0 %v789_v0  ;;  %757 = vmatprep.subr.bf16.mxu1 %v789_v0  ;;  %v788_v23 = vld [vmem:[%s1256_s0 + $0x40] sm:$0xff]   ;;  %v495_v32 = vld [vmem:[%s1259_s4 + $0x90] sm:$0xff]  ;;  %v478_v42 = vld [vmem:[%s1259_s4 + $0x8] sm:$0xff] }
   0x9   :  { %v951_v24 = vld [vmem:[%s1257_s2] ss:$0 sm:$0xff]  ;;  %v496_v44 = vld [vmem:[%s1259_s4 + $0x98] sm:$0xff]  ;;  %v479_v56 = vld [vmem:[%s1259_s4 + $0x10] sm:$0xff] }
   0xa   :  { %v956_v26 = vld [vmem:[%s1258_s3] ss:$0 sm:$0xff] }
   0xb   :  { %682 = vmatpush3.bf16.msra.mxu0 %v769_v4  ;;  %762 = vmatpush3.bf16.msra.mxu1 %v769_v4  ;;  %v477_v30 = vld [vmem:[%s1259_s4] sm:$0xff] }
   0xc   :  { %683 = vmatprep.subr.bf16.mxu0 %v789_v0  ;;  %758 = vmatprep.subr.bf16.mxu1 %v789_v0  ;;  %v497_v58 = vld [vmem:[%s1259_s4 + $0xa0] sm:$0xff] }
   0xf   :  { %684 = vmatpush3.bf16.msra.mxu0 %v770_v5  ;;  %763 = vmatpush3.bf16.msra.mxu1 %v770_v5 }
  0x10   :  { %685 = vmatprep.subr.bf16.mxu0 %v789_v0  ;;  %759 = vmatprep.subr.bf16.mxu1 %v789_v0 }
  0x13   :  { %686 = vmatpush3.bf16.msra.mxu0 %v771_v6  ;;  %764 = vmatpush3.bf16.msra.mxu1 %v771_v6  ;;  %v480_v6 = vld [vmem:[%s1259_s4 + $0x18] sm:$0xff] }
  0x16   :  { %688 = vmatmul.mubr.msk.bf16.vlgmr.msra.gmra.mxu0 %vm173_vm2, %v772_v7  ;;  %724 = vmatmul.mubr.msk.bf16.vlgmr.msra.gmra.mxu1 %vm173_vm2, %v773_v8  ;;  %v498_v8 = vld [vmem:[%s1259_s4 + $0xa8] sm:$0xff] }
  0x17   :  { %691 = vmatprep.mubr.msk.bf16.mxu0 %vm790_vm1, %v789_v0  ;;  %727 = vmatprep.mubr.msk.bf16.mxu1 %vm790_vm1, %v789_v0 }
  0x1e   :  { %692 = vmatmul.mubr.msk.bf16.gmra.mxu0 %vm173_vm2, %v774_v9  ;;  %728 = vmatmul.mubr.msk.bf16.gmra.mxu1 %vm173_vm2, %v775_v10 }
  0x1f   :  { %695 = vmatprep.mubr.msk.bf16.mxu0 %vm790_vm1, %v789_v0  ;;  %731 = vmatprep.mubr.msk.bf16.mxu1 %vm790_vm1, %v789_v0 }
  0x26   :  { %696 = vmatmul.mubr.msk.bf16.gmra.mxu0 %vm173_vm2, %v776_v11  ;;  %732 = vmatmul.mubr.msk.bf16.gmra.mxu1 %vm173_vm2, %v777_v12 }
  0x27   :  { %699 = vmatprep.mubr.msk.bf16.mxu0 %vm790_vm1, %v789_v0  ;;  %735 = vmatprep.mubr.msk.bf16.mxu1 %vm790_vm1, %v789_v0 }
  0x2e   :  { %700 = vmatmul.mubr.msk.bf16.gmra.mxu0 %vm173_vm2, %v778_v13  ;;  %736 = vmatmul.mubr.msk.bf16.gmra.mxu1 %vm173_vm2, %v779_v14 }
  0x2f   :  { %703 = vmatprep.mubr.msk.bf16.mxu0 %vm790_vm1, %v789_v0  ;;  %739 = vmatprep.mubr.msk.bf16.mxu1 %vm790_vm1, %v789_v0 }
  0x36   :  { %704 = vmatmul.mubr.msk.bf16.gmra.mxu0 %vm173_vm2, %v780_v15  ;;  %740 = vmatmul.mubr.msk.bf16.gmra.mxu1 %vm173_vm2, %v781_v16 }
  0x37   :  { %707 = vmatprep.mubr.msk.bf16.mxu0 %vm790_vm1, %v789_v0  ;;  %743 = vmatprep.mubr.msk.bf16.mxu1 %vm790_vm1, %v789_v0 }
  0x3e   :  { %708 = vmatmul.mubr.msk.bf16.gmra.mxu0 %vm173_vm2, %v782_v17  ;;  %744 = vmatmul.mubr.msk.bf16.gmra.mxu1 %vm173_vm2, %v783_v18 }
  0x3f   :  { %711 = vmatprep.mubr.msk.bf16.mxu0 %vm790_vm1, %v789_v0  ;;  %747 = vmatprep.mubr.msk.bf16.mxu1 %vm790_vm1, %v789_v0 }
  0x46   :  { %712 = vmatmul.mubr.msk.bf16.gmra.mxu0 %vm173_vm2, %v784_v19  ;;  %748 = vmatmul.mubr.msk.bf16.gmra.mxu1 %vm173_vm2, %v785_v20  ;;  %v481_v20 = vld [vmem:[%s1259_s4 + $0x20] sm:$0xff] }
  0x47   :  { %715 = vmatprep.mubr.msk.bf16.mxu0 %vm790_vm1, %v789_v0  ;;  %751 = vmatprep.mubr.msk.bf16.mxu1 %vm790_vm1, %v789_v0 }
  0x4e   :  { %716 = vmatmul.mubr.msk.bf16.gmra.mxu0 %vm173_vm2, %v786_v21  ;;  %752 = vmatmul.mubr.msk.bf16.gmra.mxu1 %vm173_vm2, %v787_v22  ;;  %v499_v22 = vld [vmem:[%s1259_s4 + $0xb0] sm:$0xff] }
  0x4f   :  { %719 = vmatprep.mubr.msk.bf16.mxu0 %vm790_vm1, %v789_v0 }
  0x56   :  { %720 = vmatmul.mubr.msk.bf16.gmra.mxu0 %vm173_vm2, %v788_v23 }
  0xd6   :  { %v263_v25 = vpop.f32.mrf.mxu0  ;;  %v335_v27 = vpop.f32.mrf.mxu1 }
  0xd7   :  { %v404_v28 = vmul.f32 %v951_v24, %v263_v25  ;;  %v422_v29 = vmul.f32 %v951_v24, %v335_v27 }
  0xd8   :  { %v689_v31 = vpop.f32.mrf.mxu0  ;;  %v725_v33 = vpop.f32.mrf.mxu1 }
  0xd9   :  { %v444_v34 = vadd.f32 %v956_v26, %v404_v28  ;;  %v462_v35 = vadd.f32 %v956_v26, %v422_v29 }
  0xda   :  { %v266_v36 = vpop.f32.mrf.mxu0  ;;  %v338_v37 = vpop.f32.mrf.mxu1 }
  0xdb   :  { %v510_v38 = vadd.f32 %v477_v30, %v444_v34  ;;  %v405_v39 = vmul.f32 %v951_v24, %v266_v36  ;;  %v528_v40 = vadd.f32 %v495_v32, %v462_v35  ;;  %v423_v41 = vmul.f32 %v951_v24, %v338_v37  ;;  %v482_v36 = vld [vmem:[%s1259_s4 + $0x28] sm:$0xff] }
  0xdc   :  { %v690_v43 = vpop.f32.mrf.mxu0  ;;  %v726_v45 = vpop.f32.mrf.mxu1 }
  0xdd   :  { %v543_v46 = vmax.f32 %v510_v38, 0.0  ;;  %v445_v47 = vadd.f32 %v956_v26, %v405_v39  ;;  %v561_v48 = vmax.f32 %v528_v40, 0.0  ;;  %v463_v49 = vadd.f32 %v956_v26, %v423_v41  ;;  %v500_v38 = vld [vmem:[%s1259_s4 + $0xb8] sm:$0xff] }
  0xde   :  { %v271_v50 = vpop.f32.mrf.mxu0  ;;  %v343_v51 = vpop.f32.mrf.mxu1 }
  0xdf   :  { %577 = vst.msk [vmem:[%s1260_s5] sm:$0xff] %vm576_vm3, %v543_v46  ;;  %v511_v52 = vadd.f32 %v478_v42, %v445_v47  ;;  %595 = vst.msk [vmem:[%s1260_s5 + $0x90] sm:$0xff] %vm576_vm3, %v561_v48  ;;  %v406_v53 = vmul.f32 %v951_v24, %v271_v50  ;;  %v529_v54 = vadd.f32 %v496_v44, %v463_v49  ;;  %v483_v50 = vld [vmem:[%s1259_s4 + $0x30] sm:$0xff] }
  0xe0   :  { %v424_v55 = vmul.f32 %v951_v24, %v343_v51  ;;  %v693_v57 = vpop.f32.mrf.mxu0  ;;  %v729_v59 = vpop.f32.mrf.mxu1 }
  0xe1   :  { %v544_v60 = vmax.f32 %v511_v52, 0.0  ;;  %v446_v61 = vadd.f32 %v956_v26, %v406_v53  ;;  %v562_v62 = vmax.f32 %v529_v54, 0.0  ;;  %v501_v52 = vld [vmem:[%s1259_s4 + $0xc0] sm:$0xff] }
  0xe2   :  { %v464_v63 = vadd.f32 %v956_v26, %v424_v55  ;;  %v274_v0 = vpop.f32.mrf.mxu0  ;;  %v346_v1 = vpop.f32.mrf.mxu1 }
  0xe3   :  { %578 = vst.msk [vmem:[%s1260_s5 + $0x8] sm:$0xff] %vm576_vm3, %v544_v60  ;;  %v512_v2 = vadd.f32 %v479_v56, %v446_v61  ;;  %596 = vst.msk [vmem:[%s1260_s5 + $0x98] sm:$0xff] %vm576_vm3, %v562_v62  ;;  %v407_v3 = vmul.f32 %v951_v24, %v274_v0  ;;  %v425_v5 = vmul.f32 %v951_v24, %v346_v1  ;;  %v484_v0 = vld [vmem:[%s1259_s4 + $0x38] sm:$0xff] }
  0xe4   :  { %v530_v4 = vadd.f32 %v497_v58, %v464_v63  ;;  %v694_v7 = vpop.f32.mrf.mxu0  ;;  %v730_v9 = vpop.f32.mrf.mxu1 }
  0xe5   :  { %v545_v10 = vmax.f32 %v512_v2, 0.0  ;;  %v447_v11 = vadd.f32 %v956_v26, %v407_v3  ;;  %v465_v13 = vadd.f32 %v956_v26, %v425_v5  ;;  %v502_v2 = vld [vmem:[%s1259_s4 + $0xc8] sm:$0xff] }
  0xe6   :  { %v563_v12 = vmax.f32 %v530_v4, 0.0  ;;  %v279_v14 = vpop.f32.mrf.mxu0  ;;  %v351_v15 = vpop.f32.mrf.mxu1 }
  0xe7   :  { %579 = vst.msk [vmem:[%s1260_s5 + $0x10] sm:$0xff] %vm576_vm3, %v545_v10  ;;  %v513_v16 = vadd.f32 %v480_v6, %v447_v11  ;;  %v408_v17 = vmul.f32 %v951_v24, %v279_v14  ;;  %v531_v18 = vadd.f32 %v498_v8, %v465_v13  ;;  %v426_v19 = vmul.f32 %v951_v24, %v351_v15  ;;  %v485_v14 = vld [vmem:[%s1259_s4 + $0x40] sm:$0xff] }
  0xe8   :  { %597 = vst.msk [vmem:[%s1260_s5 + $0xa0] sm:$0xff] %vm576_vm3, %v563_v12  ;;  %v697_v21 = vpop.f32.mrf.mxu0  ;;  %v733_v23 = vpop.f32.mrf.mxu1 }
  0xe9   :  { %v546_v25 = vmax.f32 %v513_v16, 0.0  ;;  %v448_v27 = vadd.f32 %v956_v26, %v408_v17  ;;  %v564_v28 = vmax.f32 %v531_v18, 0.0  ;;  %v466_v29 = vadd.f32 %v956_v26, %v426_v19  ;;  %v503_v16 = vld [vmem:[%s1259_s4 + $0xd0] sm:$0xff] }
  0xea   :  { %v282_v30 = vpop.f32.mrf.mxu0  ;;  %v354_v31 = vpop.f32.mrf.mxu1 }
  0xeb   :  { %580 = vst.msk [vmem:[%s1260_s5 + $0x18] sm:$0xff] %vm576_vm3, %v546_v25  ;;  %v514_v32 = vadd.f32 %v481_v20, %v448_v27  ;;  %598 = vst.msk [vmem:[%s1260_s5 + $0xa8] sm:$0xff] %vm576_vm3, %v564_v28  ;;  %v409_v33 = vmul.f32 %v951_v24, %v282_v30  ;;  %v532_v34 = vadd.f32 %v499_v22, %v466_v29  ;;  %v486_v30 = vld [vmem:[%s1259_s4 + $0x48] sm:$0xff] }
  0xec   :  { %v427_v35 = vmul.f32 %v951_v24, %v354_v31  ;;  %v698_v37 = vpop.f32.mrf.mxu0  ;;  %v734_v39 = vpop.f32.mrf.mxu1 }
  0xed   :  { %v547_v40 = vmax.f32 %v514_v32, 0.0  ;;  %v449_v41 = vadd.f32 %v956_v26, %v409_v33  ;;  %v565_v42 = vmax.f32 %v532_v34, 0.0  ;;  %v504_v32 = vld [vmem:[%s1259_s4 + $0xd8] sm:$0xff] }
  0xee   :  { %v467_v43 = vadd.f32 %v956_v26, %v427_v35  ;;  %v287_v44 = vpop.f32.mrf.mxu0  ;;  %v359_v45 = vpop.f32.mrf.mxu1 }
  0xef   :  { %581 = vst.msk [vmem:[%s1260_s5 + $0x20] sm:$0xff] %vm576_vm3, %v547_v40  ;;  %v515_v46 = vadd.f32 %v482_v36, %v449_v41  ;;  %599 = vst.msk [vmem:[%s1260_s5 + $0xb0] sm:$0xff] %vm576_vm3, %v565_v42  ;;  %v410_v47 = vmul.f32 %v951_v24, %v287_v44  ;;  %v428_v49 = vmul.f32 %v951_v24, %v359_v45  ;;  %v487_v44 = vld [vmem:[%s1259_s4 + $0x50] sm:$0xff] }
  0xf0   :  { %v533_v48 = vadd.f32 %v500_v38, %v467_v43  ;;  %v701_v51 = vpop.f32.mrf.mxu0  ;;  %v737_v53 = vpop.f32.mrf.mxu1 }
  0xf1   :  { %v548_v54 = vmax.f32 %v515_v46, 0.0  ;;  %v450_v55 = vadd.f32 %v956_v26, %v410_v47  ;;  %v468_v57 = vadd.f32 %v956_v26, %v428_v49  ;;  %v505_v46 = vld [vmem:[%s1259_s4 + $0xe0] sm:$0xff] }
  0xf2   :  { %v566_v56 = vmax.f32 %v533_v48, 0.0  ;;  %v290_v58 = vpop.f32.mrf.mxu0  ;;  %v362_v59 = vpop.f32.mrf.mxu1 }
  0xf3   :  { %582 = vst.msk [vmem:[%s1260_s5 + $0x28] sm:$0xff] %vm576_vm3, %v548_v54  ;;  %v516_v60 = vadd.f32 %v483_v50, %v450_v55  ;;  %v411_v61 = vmul.f32 %v951_v24, %v290_v58  ;;  %v534_v62 = vadd.f32 %v501_v52, %v468_v57  ;;  %v429_v63 = vmul.f32 %v951_v24, %v362_v59  ;;  %v488_v58 = vld [vmem:[%s1259_s4 + $0x58] sm:$0xff] }
  0xf4   :  { %600 = vst.msk [vmem:[%s1260_s5 + $0xb8] sm:$0xff] %vm576_vm3, %v566_v56  ;;  %v702_v1 = vpop.f32.mrf.mxu0  ;;  %v738_v3 = vpop.f32.mrf.mxu1 }
  0xf5   :  { %v549_v4 = vmax.f32 %v516_v60, 0.0  ;;  %v451_v5 = vadd.f32 %v956_v26, %v411_v61  ;;  %v567_v6 = vmax.f32 %v534_v62, 0.0  ;;  %v469_v7 = vadd.f32 %v956_v26, %v429_v63  ;;  %v506_v60 = vld [vmem:[%s1259_s4 + $0xe8] sm:$0xff] }
  0xf6   :  { %v295_v8 = vpop.f32.mrf.mxu0  ;;  %v367_v9 = vpop.f32.mrf.mxu1 }
  0xf7   :  { %583 = vst.msk [vmem:[%s1260_s5 + $0x30] sm:$0xff] %vm576_vm3, %v549_v4  ;;  %v517_v10 = vadd.f32 %v484_v0, %v451_v5  ;;  %601 = vst.msk [vmem:[%s1260_s5 + $0xc0] sm:$0xff] %vm576_vm3, %v567_v6  ;;  %v412_v11 = vmul.f32 %v951_v24, %v295_v8  ;;  %v535_v12 = vadd.f32 %v502_v2, %v469_v7  ;;  %v489_v8 = vld [vmem:[%s1259_s4 + $0x60] sm:$0xff] }
  0xf8   :  { %v430_v13 = vmul.f32 %v951_v24, %v367_v9  ;;  %v705_v15 = vpop.f32.mrf.mxu0  ;;  %v741_v17 = vpop.f32.mrf.mxu1 }
  0xf9   :  { %v550_v18 = vmax.f32 %v517_v10, 0.0  ;;  %v452_v19 = vadd.f32 %v956_v26, %v412_v11  ;;  %v568_v20 = vmax.f32 %v535_v12, 0.0  ;;  %v507_v10 = vld [vmem:[%s1259_s4 + $0xf0] sm:$0xff] }
  0xfa   :  { %v470_v21 = vadd.f32 %v956_v26, %v430_v13  ;;  %v298_v22 = vpop.f32.mrf.mxu0  ;;  %v370_v23 = vpop.f32.mrf.mxu1 }
  0xfb   :  { %584 = vst.msk [vmem:[%s1260_s5 + $0x38] sm:$0xff] %vm576_vm3, %v550_v18  ;;  %v518_v25 = vadd.f32 %v485_v14, %v452_v19  ;;  %602 = vst.msk [vmem:[%s1260_s5 + $0xc8] sm:$0xff] %vm576_vm3, %v568_v20  ;;  %v413_v27 = vmul.f32 %v951_v24, %v298_v22  ;;  %v431_v29 = vmul.f32 %v951_v24, %v370_v23  ;;  %v490_v22 = vld [vmem:[%s1259_s4 + $0x68] sm:$0xff] }
  0xfc   :  { %v536_v28 = vadd.f32 %v503_v16, %v470_v21  ;;  %v706_v31 = vpop.f32.mrf.mxu0  ;;  %v742_v33 = vpop.f32.mrf.mxu1 }
  0xfd   :  { %v551_v34 = vmax.f32 %v518_v25, 0.0  ;;  %v453_v35 = vadd.f32 %v956_v26, %v413_v27  ;;  %v471_v37 = vadd.f32 %v956_v26, %v431_v29  ;;  %v508_v25 = vld [vmem:[%s1259_s4 + $0xf8] sm:$0xff] }
  0xfe   :  { %v569_v36 = vmax.f32 %v536_v28, 0.0  ;;  %v303_v38 = vpop.f32.mrf.mxu0  ;;  %v375_v39 = vpop.f32.mrf.mxu1 }
  0xff   :  { %585 = vst.msk [vmem:[%s1260_s5 + $0x40] sm:$0xff] %vm576_vm3, %v551_v34  ;;  %v519_v40 = vadd.f32 %v486_v30, %v453_v35  ;;  %v414_v41 = vmul.f32 %v951_v24, %v303_v38  ;;  %v537_v42 = vadd.f32 %v504_v32, %v471_v37  ;;  %v432_v43 = vmul.f32 %v951_v24, %v375_v39  ;;  %v491_v38 = vld [vmem:[%s1259_s4 + $0x70] sm:$0xff] }
 0x100   :  { %603 = vst.msk [vmem:[%s1260_s5 + $0xd0] sm:$0xff] %vm576_vm3, %v569_v36  ;;  %v709_v45 = vpop.f32.mrf.mxu0  ;;  %v745_v47 = vpop.f32.mrf.mxu1 }
 0x101   :  { %v552_v48 = vmax.f32 %v519_v40, 0.0  ;;  %v454_v49 = vadd.f32 %v956_v26, %v414_v41  ;;  %v570_v50 = vmax.f32 %v537_v42, 0.0  ;;  %v472_v51 = vadd.f32 %v956_v26, %v432_v43  ;;  %v509_v40 = vld [vmem:[%s1259_s4 + $0x100] sm:$0xff] }
 0x102   :  { %v306_v52 = vpop.f32.mrf.mxu0  ;;  %v378_v53 = vpop.f32.mrf.mxu1 }
 0x103   :  { %586 = vst.msk [vmem:[%s1260_s5 + $0x48] sm:$0xff] %vm576_vm3, %v552_v48  ;;  %v520_v54 = vadd.f32 %v487_v44, %v454_v49  ;;  %604 = vst.msk [vmem:[%s1260_s5 + $0xd8] sm:$0xff] %vm576_vm3, %v570_v50  ;;  %v415_v55 = vmul.f32 %v951_v24, %v306_v52  ;;  %v538_v56 = vadd.f32 %v505_v46, %v472_v51  ;;  %v492_v51 = vld [vmem:[%s1259_s4 + $0x78] sm:$0xff] }
 0x104   :  { %v433_v57 = vmul.f32 %v951_v24, %v378_v53  ;;  %v710_v59 = vpop.f32.mrf.mxu0  ;;  %v746_v61 = vpop.f32.mrf.mxu1 }
 0x105   :  { %v553_v62 = vmax.f32 %v520_v54, 0.0  ;;  %v455_v63 = vadd.f32 %v956_v26, %v415_v55  ;;  %v571_v0 = vmax.f32 %v538_v56, 0.0 }
 0x106   :  { %v473_v1 = vadd.f32 %v956_v26, %v433_v57  ;;  %v311_v2 = vpop.f32.mrf.mxu0  ;;  %v383_v3 = vpop.f32.mrf.mxu1 }
 0x107   :  { %587 = vst.msk [vmem:[%s1260_s5 + $0x50] sm:$0xff] %vm576_vm3, %v553_v62  ;;  %v521_v4 = vadd.f32 %v488_v58, %v455_v63  ;;  %605 = vst.msk [vmem:[%s1260_s5 + $0xe0] sm:$0xff] %vm576_vm3, %v571_v0  ;;  %v416_v5 = vmul.f32 %v951_v24, %v311_v2  ;;  %v434_v7 = vmul.f32 %v951_v24, %v383_v3  ;;  %v494_v3 = vld [vmem:[%s1259_s4 + $0x88] sm:$0xff] }
 0x108   :  { %v539_v6 = vadd.f32 %v506_v60, %v473_v1  ;;  %v713_v9 = vpop.f32.mrf.mxu0  ;;  %v749_v11 = vpop.f32.mrf.mxu1  ;;  %v493_v60 = vld [vmem:[%s1259_s4 + $0x80] sm:$0xff] }
 0x109   :  { %v554_v12 = vmax.f32 %v521_v4, 0.0  ;;  %v456_v13 = vadd.f32 %v956_v26, %v416_v5  ;;  %v474_v15 = vadd.f32 %v956_v26, %v434_v7 }
 0x10a   :  { %v572_v14 = vmax.f32 %v539_v6, 0.0  ;;  %v314_v16 = vpop.f32.mrf.mxu0  ;;  %v386_v17 = vpop.f32.mrf.mxu1 }
 0x10b   :  { %588 = vst.msk [vmem:[%s1260_s5 + $0x58] sm:$0xff] %vm576_vm3, %v554_v12  ;;  %v522_v18 = vadd.f32 %v489_v8, %v456_v13  ;;  %v417_v19 = vmul.f32 %v951_v24, %v314_v16  ;;  %v540_v20 = vadd.f32 %v507_v10, %v474_v15  ;;  %v435_v21 = vmul.f32 %v951_v24, %v386_v17 }
 0x10c   :  { %606 = vst.msk [vmem:[%s1260_s5 + $0xe8] sm:$0xff] %vm576_vm3, %v572_v14  ;;  %v714_v23 = vpop.f32.mrf.mxu0  ;;  %v750_v27 = vpop.f32.mrf.mxu1 }
 0x10d   :  { %v555_v28 = vmax.f32 %v522_v18, 0.0  ;;  %v457_v29 = vadd.f32 %v956_v26, %v417_v19  ;;  %v573_v30 = vmax.f32 %v540_v20, 0.0  ;;  %v475_v31 = vadd.f32 %v956_v26, %v435_v21 }
 0x10e   :  { %v319_v32 = vpop.f32.mrf.mxu0  ;;  %v391_v33 = vpop.f32.mrf.mxu1 }
 0x10f   :  { %589 = vst.msk [vmem:[%s1260_s5 + $0x60] sm:$0xff] %vm576_vm3, %v555_v28  ;;  %v523_v34 = vadd.f32 %v490_v22, %v457_v29  ;;  %607 = vst.msk [vmem:[%s1260_s5 + $0xf0] sm:$0xff] %vm576_vm3, %v573_v30  ;;  %v418_v35 = vmul.f32 %v951_v24, %v319_v32  ;;  %v541_v36 = vadd.f32 %v508_v25, %v475_v31 }
 0x110   :  { %v436_v37 = vmul.f32 %v951_v24, %v391_v33  ;;  %v717_v39 = vpop.f32.mrf.mxu0  ;;  %v753_v41 = vpop.f32.mrf.mxu1 }
 0x111   :  { %v556_v42 = vmax.f32 %v523_v34, 0.0  ;;  %v458_v43 = vadd.f32 %v956_v26, %v418_v35  ;;  %v574_v44 = vmax.f32 %v541_v36, 0.0 }
 0x112   :  { %v476_v45 = vadd.f32 %v956_v26, %v436_v37  ;;  %v322_v46 = vpop.f32.mrf.mxu0  ;;  %v394_v47 = vpop.f32.mrf.mxu1 }
 0x113   :  { %590 = vst.msk [vmem:[%s1260_s5 + $0x68] sm:$0xff] %vm576_vm3, %v556_v42  ;;  %v524_v48 = vadd.f32 %v491_v38, %v458_v43  ;;  %608 = vst.msk [vmem:[%s1260_s5 + $0xf8] sm:$0xff] %vm576_vm3, %v574_v44  ;;  %v419_v49 = vmul.f32 %v951_v24, %v322_v46 }
 0x114   :  { %v542_v50 = vadd.f32 %v509_v40, %v476_v45  ;;  %v718_v52 = vpop.f32.mrf.mxu0  ;;  %v754_v53 = vpop.f32.mrf.mxu1 }
 0x115   :  { %v557_v54 = vmax.f32 %v524_v48, 0.0  ;;  %v459_v55 = vadd.f32 %v956_v26, %v419_v49 }
 0x116   :  { %v575_v56 = vmax.f32 %v542_v50, 0.0  ;;  %v327_v57 = vpop.f32.mrf.mxu0 }
 0x117   :  { %591 = vst.msk [vmem:[%s1260_s5 + $0x70] sm:$0xff] %vm576_vm3, %v557_v54  ;;  %v525_v58 = vadd.f32 %v492_v51, %v459_v55  ;;  %v420_v59 = vmul.f32 %v951_v24, %v327_v57 }
 0x118   :  { %609 = vst.msk [vmem:[%s1260_s5 + $0x100] sm:$0xff] %vm576_vm3, %v575_v56  ;;  %v721_v61 = vpop.f32.mrf.mxu0 }
 0x119   :  { %v558_v62 = vmax.f32 %v525_v58, 0.0  ;;  %v460_v63 = vadd.f32 %v956_v26, %v420_v59 }
 0x11a   :  { %v330_v0 = vpop.f32.mrf.mxu0 }
 0x11b   :  { %592 = vst.msk [vmem:[%s1260_s5 + $0x78] sm:$0xff] %vm576_vm3, %v558_v62  ;;  %v526_v1 = vadd.f32 %v493_v60, %v460_v63  ;;  %v421_v2 = vmul.f32 %v951_v24, %v330_v0 }
 0x11c   :  { %v722_v4 = vpop.f32.mrf.mxu0 }
 0x11d   :  { %v559_v5 = vmax.f32 %v526_v1, 0.0  ;;  %v461_v6 = vadd.f32 %v956_v26, %v421_v2 }
 0x11f   :  { %593 = vst.msk [vmem:[%s1260_s5 + $0x80] sm:$0xff] %vm576_vm3, %v559_v5  ;;  %v527_v7 = vadd.f32 %v494_v3, %v461_v6 }
 0x121   :  { %v560_v8 = vmax.f32 %v527_v7, 0.0 }
 0x123   :  { %594 = vst.msk [vmem:[%s1260_s5 + $0x88] sm:$0xff] %vm576_vm3, %v560_v8 }

// kernel: short_chunk_cnn_res.19
= control target key start
LH: loop header
LB: loop body
LE: loop exit
PB: predicated region body
PF: predicated region fallthrough
CT: control target
= control target key end

     0   :  { %vm113_vm0 = vcmask 1043456   ;;  %v526_v0 = vmov 0.0   ;;  %vm527_vm1 = vmmov 0   ;;  %vm97_vm2 = vcmask 588800   ;;  %s766_s1 = inlined_call_operand.vmem [shape: bf16[72,16], index: 1, kind: input, shape index: {}]   ;;  %s767_s4 = inlined_call_operand.vmem [shape: bf16[72,16], index: 4, kind: input, shape index: {}]   ;;  %s768_s0 = inlined_call_operand.vmem [shape: bf16[72,72], index: 0, kind: input, shape index: {}]   ;;  %s769_s2 = inlined_call_operand.vmem [shape: f32[1,16], index: 2, kind: input, shape index: {}]   ;;  %s770_s5 = inlined_call_operand.vmem [shape: f32[1,16], index: 5, kind: input, shape index: {}]   ;;  %s771_s3 = inlined_call_operand.vmem [shape: f32[1,16], index: 3, kind: input, shape index: {}]   ;;  %s772_s6 = inlined_call_operand.vmem [shape: f32[1,16], index: 6, kind: input, shape index: {}]   ;;  %s773_s8 = inlined_call_operand.vmem [shape: f32[72,16], index: 8, kind: output, shape index: {1}]   ;;  %s774_s7 = inlined_call_operand.vmem [shape: f32[72,16], index: 7, kind: output, shape index: {0}]  }
   0x1   :  { %449 = vmatprep.subr.bf16.mxu0 %v526_v0  ;;  %479 = vmatprep.subr.bf16.mxu1 %v526_v0  ;;  %v511_v1 = vld [vmem:[%s766_s1 + $0x20] ss:$0 sps:$4 sm:$0xff]   ;;  %v513_v5 = vld [vmem:[%s766_s1 + $0x18] sm:$0xff]   ;;  %v515_v7 = vld [vmem:[%s766_s1 + $0x10] sm:$0xff]   ;;  %vm230_vm3 = vcmask 130048  }
   0x2   :  { %v512_v2 = vld [vmem:[%s767_s4 + $0x20] ss:$0 sps:$4 sm:$0xff]   ;;  %459 = vmatprep.mubr.msk.bf16.mxu0 %vm527_vm1, %v526_v0  ;;  %489 = vmatprep.mubr.msk.bf16.mxu1 %vm527_vm1, %v526_v0  ;;  %v115_v3 = vsel %vm113_vm0, %v511_v1, 0  ;;  %v514_v6 = vld [vmem:[%s767_s4 + $0x18] sm:$0xff]   ;;  %v516_v8 = vld [vmem:[%s767_s4 + $0x10] sm:$0xff]  }
   0x3   :  { %450 = vmatpush3.bf16.msra.mxu0 %v115_v3  ;;  %v277_v4 = vsel %vm113_vm0, %v512_v2, 0  ;;  %v517_v9 = vld [vmem:[%s766_s1 + $0x8] sm:$0xff]   ;;  %v519_v11 = vld [vmem:[%s766_s1] sm:$0xff]   ;;  %v523_v15 = vld [vmem:[%s768_s0 + $0x10] sm:$0xff]  }
   0x4   :  { %480 = vmatpush3.bf16.msra.mxu1 %v277_v4  ;;  %451 = vmatprep.subr.bf16.mxu0 %v526_v0  ;;  %v518_v10 = vld [vmem:[%s767_s4 + $0x8] sm:$0xff]   ;;  %v520_v12 = vld [vmem:[%s767_s4] sm:$0xff]   ;;  %v524_v16 = vld [vmem:[%s768_s0 + $0x18] sm:$0xff]  }
   0x5   :  { %481 = vmatprep.subr.bf16.mxu1 %v526_v0  ;;  %v521_v13 = vld [vmem:[%s768_s0] sm:$0xff]   ;;  %v522_v14 = vld [vmem:[%s768_s0 + $0x8] sm:$0xff]  }
   0x6   :  { %v525_v17 = vld [vmem:[%s768_s0 + $0x20] ss:$0 sps:$4 sm:$0xff]  }
   0x7   :  { %452 = vmatpush3.bf16.msra.mxu0 %v513_v5  ;;  %v641_v18 = vld [vmem:[%s769_s2] ss:$0 sm:$0xff] }
   0x8   :  { %482 = vmatpush3.bf16.msra.mxu1 %v514_v6  ;;  %453 = vmatprep.subr.bf16.mxu0 %v526_v0  ;;  %v646_v19 = vld [vmem:[%s770_s5] ss:$0 sm:$0xff] }
   0x9   :  { %483 = vmatprep.subr.bf16.mxu1 %v526_v0  ;;  %v651_v21 = vld [vmem:[%s771_s3] ss:$0 sm:$0xff] }
   0xa   :  { %v657_v24 = vld [vmem:[%s772_s6] ss:$0 sm:$0xff] }
   0xb   :  { %454 = vmatpush3.bf16.msra.mxu0 %v515_v7 }
   0xc   :  { %484 = vmatpush3.bf16.msra.mxu1 %v516_v8  ;;  %455 = vmatprep.subr.bf16.mxu0 %v526_v0 }
   0xd   :  { %485 = vmatprep.subr.bf16.mxu1 %v526_v0 }
   0xf   :  { %456 = vmatpush3.bf16.msra.mxu0 %v517_v9 }
  0x10   :  { %486 = vmatpush3.bf16.msra.mxu1 %v518_v10  ;;  %457 = vmatprep.subr.bf16.mxu0 %v526_v0 }
  0x11   :  { %487 = vmatprep.subr.bf16.mxu1 %v526_v0 }
  0x13   :  { %458 = vmatpush3.bf16.msra.mxu0 %v519_v11 }
  0x14   :  { %488 = vmatpush3.bf16.msra.mxu1 %v520_v12 }
  0x16   :  { %460 = vmatmul.mubr.msk.bf16.vlgmr.msra.gmra.mxu0 %vm97_vm2, %v521_v13 }
  0x17   :  { %490 = vmatmul.mubr.msk.bf16.vlgmr.msra.gmra.mxu1 %vm97_vm2, %v521_v13  ;;  %463 = vmatprep.mubr.msk.bf16.mxu0 %vm527_vm1, %v526_v0 }
  0x18   :  { %493 = vmatprep.mubr.msk.bf16.mxu1 %vm527_vm1, %v526_v0 }
  0x1e   :  { %464 = vmatmul.mubr.msk.bf16.gmra.mxu0 %vm97_vm2, %v522_v14 }
  0x1f   :  { %494 = vmatmul.mubr.msk.bf16.gmra.mxu1 %vm97_vm2, %v522_v14  ;;  %467 = vmatprep.mubr.msk.bf16.mxu0 %vm527_vm1, %v526_v0 }
  0x20   :  { %497 = vmatprep.mubr.msk.bf16.mxu1 %vm527_vm1, %v526_v0 }
  0x26   :  { %468 = vmatmul.mubr.msk.bf16.gmra.mxu0 %vm97_vm2, %v523_v15 }
  0x27   :  { %498 = vmatmul.mubr.msk.bf16.gmra.mxu1 %vm97_vm2, %v523_v15  ;;  %471 = vmatprep.mubr.msk.bf16.mxu0 %vm527_vm1, %v526_v0 }
  0x28   :  { %501 = vmatprep.mubr.msk.bf16.mxu1 %vm527_vm1, %v526_v0 }
  0x2e   :  { %472 = vmatmul.mubr.msk.bf16.gmra.mxu0 %vm97_vm2, %v524_v16 }
  0x2f   :  { %502 = vmatmul.mubr.msk.bf16.gmra.mxu1 %vm97_vm2, %v524_v16  ;;  %475 = vmatprep.mubr.msk.bf16.mxu0 %vm527_vm1, %v526_v0 }
  0x30   :  { %505 = vmatprep.mubr.msk.bf16.mxu1 %vm527_vm1, %v526_v0 }
  0x36   :  { %476 = vmatmul.mubr.msk.bf16.gmra.mxu0 %vm97_vm2, %v525_v17 }
  0x37   :  { %506 = vmatmul.mubr.msk.bf16.gmra.mxu1 %vm97_vm2, %v525_v17 }
  0xd6   :  { %v151_v20 = vpop.f32.mrf.mxu0 }
  0xd7   :  { %v196_v22 = vmul.f32 %v641_v18, %v151_v20  ;;  %v313_v23 = vpop.f32.mrf.mxu1 }
  0xd8   :  { %v358_v25 = vmul.f32 %v646_v19, %v313_v23  ;;  %v461_v26 = vpop.f32.mrf.mxu0 }
  0xd9   :  { %v212_v27 = vadd.f32 %v651_v21, %v196_v22  ;;  %v491_v28 = vpop.f32.mrf.mxu1 }
  0xda   :  { %v374_v29 = vadd.f32 %v657_v24, %v358_v25  ;;  %v154_v30 = vpop.f32.mrf.mxu0 }
  0xdb   :  { %v221_v31 = vmax.f32 %v212_v27, 0.0  ;;  %v197_v32 = vmul.f32 %v641_v18, %v154_v30  ;;  %v316_v33 = vpop.f32.mrf.mxu1 }
  0xdc   :  { %383 = vst.msk [vmem:[%s773_s8] sm:$0xff] %vm230_vm3, %v374_v29  ;;  %v359_v34 = vmul.f32 %v646_v19, %v316_v33  ;;  %v462_v35 = vpop.f32.mrf.mxu0 }
  0xdd   :  { %231 = vst.msk [vmem:[%s774_s7] sm:$0xff] %vm230_vm3, %v221_v31  ;;  %v213_v36 = vadd.f32 %v651_v21, %v197_v32  ;;  %v492_v37 = vpop.f32.mrf.mxu1 }
  0xde   :  { %v375_v38 = vadd.f32 %v657_v24, %v359_v34  ;;  %v159_v39 = vpop.f32.mrf.mxu0 }
  0xdf   :  { %v222_v40 = vmax.f32 %v213_v36, 0.0  ;;  %v198_v41 = vmul.f32 %v641_v18, %v159_v39  ;;  %v321_v42 = vpop.f32.mrf.mxu1 }
  0xe0   :  { %384 = vst.msk [vmem:[%s773_s8 + $0x8] sm:$0xff] %vm230_vm3, %v375_v38  ;;  %v360_v43 = vmul.f32 %v646_v19, %v321_v42  ;;  %v465_v44 = vpop.f32.mrf.mxu0 }
  0xe1   :  { %232 = vst.msk [vmem:[%s774_s7 + $0x8] sm:$0xff] %vm230_vm3, %v222_v40  ;;  %v214_v45 = vadd.f32 %v651_v21, %v198_v41  ;;  %v495_v46 = vpop.f32.mrf.mxu1 }
  0xe2   :  { %v376_v47 = vadd.f32 %v657_v24, %v360_v43  ;;  %v162_v48 = vpop.f32.mrf.mxu0 }
  0xe3   :  { %v223_v49 = vmax.f32 %v214_v45, 0.0  ;;  %v199_v50 = vmul.f32 %v641_v18, %v162_v48  ;;  %v324_v51 = vpop.f32.mrf.mxu1 }
  0xe4   :  { %385 = vst.msk [vmem:[%s773_s8 + $0x10] sm:$0xff] %vm230_vm3, %v376_v47  ;;  %v361_v52 = vmul.f32 %v646_v19, %v324_v51  ;;  %v466_v53 = vpop.f32.mrf.mxu0 }
  0xe5   :  { %233 = vst.msk [vmem:[%s774_s7 + $0x10] sm:$0xff] %vm230_vm3, %v223_v49  ;;  %v215_v54 = vadd.f32 %v651_v21, %v199_v50  ;;  %v496_v55 = vpop.f32.mrf.mxu1 }
  0xe6   :  { %v377_v56 = vadd.f32 %v657_v24, %v361_v52  ;;  %v167_v57 = vpop.f32.mrf.mxu0 }
  0xe7   :  { %v224_v58 = vmax.f32 %v215_v54, 0.0  ;;  %v200_v59 = vmul.f32 %v641_v18, %v167_v57  ;;  %v329_v60 = vpop.f32.mrf.mxu1 }
  0xe8   :  { %386 = vst.msk [vmem:[%s773_s8 + $0x18] sm:$0xff] %vm230_vm3, %v377_v56  ;;  %v362_v61 = vmul.f32 %v646_v19, %v329_v60  ;;  %v469_v62 = vpop.f32.mrf.mxu0 }
  0xe9   :  { %234 = vst.msk [vmem:[%s774_s7 + $0x18] sm:$0xff] %vm230_vm3, %v224_v58  ;;  %v216_v63 = vadd.f32 %v651_v21, %v200_v59  ;;  %v499_v0 = vpop.f32.mrf.mxu1 }
  0xea   :  { %v378_v1 = vadd.f32 %v657_v24, %v362_v61  ;;  %v170_v2 = vpop.f32.mrf.mxu0 }
  0xeb   :  { %v225_v3 = vmax.f32 %v216_v63, 0.0  ;;  %v201_v4 = vmul.f32 %v641_v18, %v170_v2  ;;  %v332_v5 = vpop.f32.mrf.mxu1 }
  0xec   :  { %387 = vst.msk [vmem:[%s773_s8 + $0x20] sm:$0xff] %vm230_vm3, %v378_v1  ;;  %v363_v6 = vmul.f32 %v646_v19, %v332_v5  ;;  %v470_v7 = vpop.f32.mrf.mxu0 }
  0xed   :  { %235 = vst.msk [vmem:[%s774_s7 + $0x20] sm:$0xff] %vm230_vm3, %v225_v3  ;;  %v217_v8 = vadd.f32 %v651_v21, %v201_v4  ;;  %v500_v9 = vpop.f32.mrf.mxu1 }
  0xee   :  { %v379_v10 = vadd.f32 %v657_v24, %v363_v6  ;;  %v175_v11 = vpop.f32.mrf.mxu0 }
  0xef   :  { %v226_v12 = vmax.f32 %v217_v8, 0.0  ;;  %v202_v13 = vmul.f32 %v641_v18, %v175_v11  ;;  %v337_v14 = vpop.f32.mrf.mxu1 }
  0xf0   :  { %388 = vst.msk [vmem:[%s773_s8 + $0x28] sm:$0xff] %vm230_vm3, %v379_v10  ;;  %v364_v15 = vmul.f32 %v646_v19, %v337_v14  ;;  %v473_v16 = vpop.f32.mrf.mxu0 }
  0xf1   :  { %236 = vst.msk [vmem:[%s774_s7 + $0x28] sm:$0xff] %vm230_vm3, %v226_v12  ;;  %v218_v17 = vadd.f32 %v651_v21, %v202_v13  ;;  %v503_v20 = vpop.f32.mrf.mxu1 }
  0xf2   :  { %v380_v22 = vadd.f32 %v657_v24, %v364_v15  ;;  %v178_v23 = vpop.f32.mrf.mxu0 }
  0xf3   :  { %v227_v25 = vmax.f32 %v218_v17, 0.0  ;;  %v203_v26 = vmul.f32 %v641_v18, %v178_v23  ;;  %v340_v27 = vpop.f32.mrf.mxu1 }
  0xf4   :  { %389 = vst.msk [vmem:[%s773_s8 + $0x30] sm:$0xff] %vm230_vm3, %v380_v22  ;;  %v365_v28 = vmul.f32 %v646_v19, %v340_v27  ;;  %v474_v29 = vpop.f32.mrf.mxu0 }
  0xf5   :  { %237 = vst.msk [vmem:[%s774_s7 + $0x30] sm:$0xff] %vm230_vm3, %v227_v25  ;;  %v219_v30 = vadd.f32 %v651_v21, %v203_v26  ;;  %v504_v31 = vpop.f32.mrf.mxu1 }
  0xf6   :  { %v381_v32 = vadd.f32 %v657_v24, %v365_v28  ;;  %v183_v33 = vpop.f32.mrf.mxu0 }
  0xf7   :  { %v228_v34 = vmax.f32 %v219_v30, 0.0  ;;  %v204_v35 = vmul.f32 %v641_v18, %v183_v33  ;;  %v345_v36 = vpop.f32.mrf.mxu1 }
  0xf8   :  { %390 = vst.msk [vmem:[%s773_s8 + $0x38] sm:$0xff] %vm230_vm3, %v381_v32  ;;  %v366_v37 = vmul.f32 %v646_v19, %v345_v36  ;;  %v477_v38 = vpop.f32.mrf.mxu0 }
  0xf9   :  { %238 = vst.msk [vmem:[%s774_s7 + $0x38] sm:$0xff] %vm230_vm3, %v228_v34  ;;  %v220_v39 = vadd.f32 %v651_v21, %v204_v35  ;;  %v507_v40 = vpop.f32.mrf.mxu1 }
  0xfa   :  { %v382_v41 = vadd.f32 %v657_v24, %v366_v37  ;;  %v186_v18 = vpop.f32.mrf.mxu0 }
  0xfb   :  { %v229_v42 = vmax.f32 %v220_v39, 0.0  ;;  %v348_v43 = vpop.f32.mrf.mxu1 }
  0xfc   :  { %391 = vst.msk [vmem:[%s773_s8 + $0x40] sm:$0xff] %vm230_vm3, %v382_v41  ;;  %v478_v19 = vpop.f32.mrf.mxu0 }
  0xfd   :  { %239 = vst.msk [vmem:[%s774_s7 + $0x40] sm:$0xff] %vm230_vm3, %v229_v42  ;;  %v508_v44 = vpop.f32.mrf.mxu1 }

// kernel: short_chunk_cnn_res.20
= control target key start
LH: loop header
LB: loop body
LE: loop exit
PB: predicated region body
PF: predicated region fallthrough
CT: control target
= control target key end

     0   :  { %v372_v0 = vmov 0   ;;  %vm144_vm0 = vcmask 130048   ;;  %s553_s1 = inlined_call_operand.vmem [shape: bf16[144,16], index: 1, kind: input, shape index: {}]   ;;  %s554_s0 = inlined_call_operand.vmem [shape: bf16[72,144], index: 0, kind: input, shape index: {}]   ;;  %s555_s2 = inlined_call_operand.vmem [shape: f32[1,16], index: 2, kind: input, shape index: {}]   ;;  %s556_s3 = inlined_call_operand.vmem [shape: f32[1,16], index: 3, kind: input, shape index: {}]   ;;  %s557_s4 = inlined_call_operand.vmem [shape: f32[72,16], index: 4, kind: input, shape index: {}]   ;;  %s558_s5 = inlined_call_operand.vmem [shape: f32[72,16], index: 5, kind: output, shape index: {}]  }
   0x1   :  { %160 = vmatprep.subr.bf16.mxu0 %v372_v0  ;;  %v349_v1 = vld [vmem:[%s553_s1 + $0x38] sm:$0xff]   ;;  %330 = vmatprep.subr.bf16.mxu1 %v372_v0  ;;  %v350_v2 = vld [vmem:[%s553_s1 + $0x30] sm:$0xff]   ;;  %v351_v3 = vld [vmem:[%s553_s1 + $0x28] sm:$0xff]  }
   0x2   :  { %161 = vmatpush1.bf16.msra.mxu0 %v349_v1  ;;  %339 = vmatpush1.bf16.msra.mxu1 %v349_v1  ;;  %v352_v4 = vld [vmem:[%s553_s1 + $0x20] sm:$0xff]   ;;  %v363_v6 = vld [vmem:[%s554_s0 + $0x34] ss:$8 sps:$4 sm:$0xff]   ;;  %v355_v9 = vld [vmem:[%s553_s1 + $0x8] sm:$0xff]  }
   0x3   :  { %162 = vmatprep.subr.bf16.mxu0 %v372_v0  ;;  %331 = vmatprep.subr.bf16.mxu1 %v372_v0  ;;  %v360_v5 = vld [vmem:[%s554_s0 + $0x4] ss:$8 sps:$4 sm:$0xff]   ;;  %v353_v7 = vld [vmem:[%s553_s1 + $0x18] sm:$0xff]   ;;  %v354_v8 = vld [vmem:[%s553_s1 + $0x10] sm:$0xff]  }
   0x4   :  { %323 = vmatprep.mubr.msk.bf16.mxu0 %vm144_vm0, %v360_v5  ;;  %326 = vmatprep.mubr.msk.bf16.mxu1 %vm144_vm0, %v363_v6  ;;  %v356_v10 = vld [vmem:[%s553_s1] sm:$0xff]   ;;  %v361_v14 = vld [vmem:[%s554_s0 + $0x30] ss:$8 sps:$4 sm:$0xff]   ;;  %v364_v15 = vld [vmem:[%s554_s0 + $0x14] ss:$8 sps:$4 sm:$0xff]  }
   0x5   :  { %v357_v11 = vld [vmem:[%s553_s1 + $0x40] sm:$0xff]   ;;  %v366_v17 = vld [vmem:[%s554_s0 + $0x10] ss:$8 sps:$4 sm:$0xff]   ;;  %v265_v39 = vld [vmem:[%s557_s4 + $0x8] sm:$0xff] }
   0x6   :  { %163 = vmatpush1.bf16.msra.mxu0 %v350_v2  ;;  %340 = vmatpush1.bf16.msra.mxu1 %v350_v2  ;;  %v29_v12 = vld [vmem:[%s554_s0 + $0x40] sm:$0xff]  ;;  %v270_v29 = vld [vmem:[%s557_s4 + $0x30] sm:$0xff]  ;;  %v271_v41 = vld [vmem:[%s557_s4 + $0x38] sm:$0xff] }
   0x7   :  { %164 = vmatprep.subr.bf16.mxu0 %v372_v0  ;;  %332 = vmatprep.subr.bf16.mxu1 %v372_v0  ;;  %v358_v13 = vld [vmem:[%s554_s0] ss:$8 sps:$4 sm:$0xff]   ;;  %v313_v16 = vcombine.high %v29_v12, %v29_v12  ;;  %v312_v18 = vcombine.low %v29_v12, %v29_v12  ;;  %v369_v19 = vld [vmem:[%s554_s0 + $0x24] ss:$8 sps:$4 sm:$0xff]   ;;  %v266_v53 = vld [vmem:[%s557_s4 + $0x10] sm:$0xff] }
   0x8   :  { %v371_v20 = vld [vmem:[%s554_s0 + $0x20] ss:$8 sps:$4 sm:$0xff]   ;;  %v267_v2 = vld [vmem:[%s557_s4 + $0x18] sm:$0xff] }
   0x9   :  { %v465_v21 = vld [vmem:[%s555_s2] ss:$0 sm:$0xff] }
   0xa   :  { %165 = vmatpush1.bf16.msra.mxu0 %v351_v3  ;;  %341 = vmatpush1.bf16.msra.mxu1 %v351_v3  ;;  %v470_v23 = vld [vmem:[%s556_s3] ss:$0 sm:$0xff] }
   0xb   :  { %166 = vmatprep.subr.bf16.mxu0 %v372_v0  ;;  %333 = vmatprep.subr.bf16.mxu1 %v372_v0  ;;  %v264_v27 = vld [vmem:[%s557_s4] sm:$0xff] }
   0xc   :  { %v272_v55 = vld [vmem:[%s557_s4 + $0x40] sm:$0xff] }
   0xe   :  { %167 = vmatpush1.bf16.msra.mxu0 %v352_v4  ;;  %342 = vmatpush1.bf16.msra.mxu1 %v352_v4 }
   0xf   :  { %168 = vmatprep.subr.bf16.mxu0 %v372_v0  ;;  %334 = vmatprep.subr.bf16.mxu1 %v372_v0 }
  0x12   :  { %169 = vmatpush1.bf16.msra.mxu0 %v353_v7  ;;  %343 = vmatpush1.bf16.msra.mxu1 %v353_v7 }
  0x13   :  { %170 = vmatprep.subr.bf16.mxu0 %v372_v0  ;;  %335 = vmatprep.subr.bf16.mxu1 %v372_v0 }
  0x16   :  { %171 = vmatpush1.bf16.msra.mxu0 %v354_v8  ;;  %344 = vmatpush1.bf16.msra.mxu1 %v354_v8 }
  0x17   :  { %172 = vmatprep.subr.bf16.mxu0 %v372_v0  ;;  %336 = vmatprep.subr.bf16.mxu1 %v372_v0 }
  0x1a   :  { %173 = vmatpush1.bf16.msra.mxu0 %v355_v9  ;;  %345 = vmatpush1.bf16.msra.mxu1 %v355_v9 }
  0x1b   :  { %174 = vmatprep.subr.bf16.mxu0 %v372_v0  ;;  %337 = vmatprep.subr.bf16.mxu1 %v372_v0 }
  0x1e   :  { %175 = vmatpush1.bf16.msra.mxu0 %v356_v10  ;;  %346 = vmatpush1.bf16.msra.mxu1 %v356_v10 }
  0x1f   :  { %190 = vmatprep.subr.bf16.mxu0 %v372_v0  ;;  %338 = vmatprep.subr.bf16.mxu1 %v372_v0 }
  0x22   :  { %191 = vmatpush2.bf16.msra.mxu0 %v357_v11  ;;  %347 = vmatpush2.bf16.msra.mxu1 %v357_v11  ;;  %v268_v11 = vld [vmem:[%s557_s4 + $0x20] sm:$0xff] }
  0x25   :  { %193 = vmatmul.mubr.bf16.vlgmr.msra.gmra.mxu0 %v358_v13  ;;  %217 = vmatmul.mubr.bf16.vlgmr.msra.gmra.mxu1 %v361_v14 }
  0x26   :  { %324 = vmatprep.mubr.msk.bf16.mxu0 %vm144_vm0, %v364_v15  ;;  %327 = vmatprep.mubr.msk.bf16.mxu1 %vm144_vm0, %v313_v16 }
  0x2d   :  { %201 = vmatmul.mubr.bf16.gmra.mxu0 %v366_v17  ;;  %225 = vmatmul.mubr.bf16.gmra.mxu1 %v312_v18  ;;  %v269_v18 = vld [vmem:[%s557_s4 + $0x28] sm:$0xff] }
  0x2e   :  { %325 = vmatprep.mubr.msk.bf16.mxu0 %vm144_vm0, %v369_v19 }
  0x35   :  { %209 = vmatmul.mubr.bf16.gmra.mxu0 %v371_v20 }
  0xe5   :  { %v194_v22 = vpop.f32.mrf.mxu0  ;;  %v218_v24 = vpop.f32.mrf.mxu1 }
  0xe6   :  { %v239_v25 = vmul.f32 %v465_v21, %v194_v22  ;;  %v245_v26 = vmul.f32 %v465_v21, %v218_v24 }
  0xe7   :  { %v196_v28 = vpop.f32.mrf.mxu0  ;;  %v220_v30 = vpop.f32.mrf.mxu1 }
  0xe8   :  { %v255_v31 = vadd.f32 %v470_v23, %v239_v25  ;;  %v261_v32 = vadd.f32 %v470_v23, %v245_v26 }
  0xe9   :  { %v197_v33 = vpop.f32.mrf.mxu0  ;;  %v221_v34 = vpop.f32.mrf.mxu1 }
  0xea   :  { %v273_v35 = vadd.f32 %v264_v27, %v255_v31  ;;  %v240_v36 = vmul.f32 %v465_v21, %v197_v33  ;;  %v279_v37 = vadd.f32 %v270_v29, %v261_v32  ;;  %v246_v38 = vmul.f32 %v465_v21, %v221_v34 }
  0xeb   :  { %v199_v40 = vpop.f32.mrf.mxu0  ;;  %v223_v42 = vpop.f32.mrf.mxu1 }
  0xec   :  { %v282_v43 = vmax.f32 %v273_v35, 0.0  ;;  %v256_v44 = vadd.f32 %v470_v23, %v240_v36  ;;  %v288_v45 = vmax.f32 %v279_v37, 0.0  ;;  %v262_v46 = vadd.f32 %v470_v23, %v246_v38 }
  0xed   :  { %v202_v47 = vpop.f32.mrf.mxu0  ;;  %v226_v48 = vpop.f32.mrf.mxu1 }
  0xee   :  { %291 = vst.msk [vmem:[%s558_s5] sm:$0xff] %vm144_vm0, %v282_v43  ;;  %v274_v49 = vadd.f32 %v265_v39, %v256_v44  ;;  %297 = vst.msk [vmem:[%s558_s5 + $0x30] sm:$0xff] %vm144_vm0, %v288_v45  ;;  %v241_v50 = vmul.f32 %v465_v21, %v202_v47  ;;  %v280_v51 = vadd.f32 %v271_v41, %v262_v46 }
  0xef   :  { %v247_v52 = vmul.f32 %v465_v21, %v226_v48  ;;  %v204_v54 = vpop.f32.mrf.mxu0  ;;  %v228_v56 = vpop.f32.mrf.mxu1 }
  0xf0   :  { %v283_v57 = vmax.f32 %v274_v49, 0.0  ;;  %v257_v58 = vadd.f32 %v470_v23, %v241_v50  ;;  %v289_v59 = vmax.f32 %v280_v51, 0.0 }
  0xf1   :  { %v263_v60 = vadd.f32 %v470_v23, %v247_v52  ;;  %v205_v61 = vpop.f32.mrf.mxu0  ;;  %v229_v62 = vpop.f32.mrf.mxu1 }
  0xf2   :  { %292 = vst.msk [vmem:[%s558_s5 + $0x8] sm:$0xff] %vm144_vm0, %v283_v57  ;;  %v275_v63 = vadd.f32 %v266_v53, %v257_v58  ;;  %298 = vst.msk [vmem:[%s558_s5 + $0x38] sm:$0xff] %vm144_vm0, %v289_v59  ;;  %v242_v0 = vmul.f32 %v465_v21, %v205_v61 }
  0xf3   :  { %v281_v1 = vadd.f32 %v272_v55, %v263_v60  ;;  %v207_v3 = vpop.f32.mrf.mxu0  ;;  %v230_v4 = vpop.f32.mrf.mxu1 }
  0xf4   :  { %v284_v5 = vmax.f32 %v275_v63, 0.0  ;;  %v258_v6 = vadd.f32 %v470_v23, %v242_v0 }
  0xf5   :  { %v290_v7 = vmax.f32 %v281_v1, 0.0  ;;  %v210_v8 = vpop.f32.mrf.mxu0 }
  0xf6   :  { %293 = vst.msk [vmem:[%s558_s5 + $0x10] sm:$0xff] %vm144_vm0, %v284_v5  ;;  %v276_v9 = vadd.f32 %v267_v2, %v258_v6  ;;  %v243_v10 = vmul.f32 %v465_v21, %v210_v8 }
  0xf7   :  { %299 = vst.msk [vmem:[%s558_s5 + $0x40] sm:$0xff] %vm144_vm0, %v290_v7  ;;  %v212_v12 = vpop.f32.mrf.mxu0 }
  0xf8   :  { %v285_v13 = vmax.f32 %v276_v9, 0.0  ;;  %v259_v14 = vadd.f32 %v470_v23, %v243_v10 }
  0xf9   :  { %v213_v15 = vpop.f32.mrf.mxu0 }
  0xfa   :  { %294 = vst.msk [vmem:[%s558_s5 + $0x18] sm:$0xff] %vm144_vm0, %v285_v13  ;;  %v277_v16 = vadd.f32 %v268_v11, %v259_v14  ;;  %v244_v17 = vmul.f32 %v465_v21, %v213_v15 }
  0xfb   :  { %v215_v19 = vpop.f32.mrf.mxu0 }
  0xfc   :  { %v286_v20 = vmax.f32 %v277_v16, 0.0  ;;  %v260_v22 = vadd.f32 %v470_v23, %v244_v17 }
  0xfe   :  { %295 = vst.msk [vmem:[%s558_s5 + $0x20] sm:$0xff] %vm144_vm0, %v286_v20  ;;  %v278_v24 = vadd.f32 %v269_v18, %v260_v22 }
 0x100   :  { %v287_v25 = vmax.f32 %v278_v24, 0.0 }
 0x102   :  { %296 = vst.msk [vmem:[%s558_s5 + $0x28] sm:$0xff] %vm144_vm0, %v287_v25 }

// kernel: short_chunk_cnn_res.21
= control target key start
LH: loop header
LB: loop body
LE: loop exit
PB: predicated region body
PF: predicated region fallthrough
CT: control target
= control target key end

     0   :  { %v405_v0 = vmov 0   ;;  %vm119_vm0 = vcmask 130048   ;;  %s554_s1 = inlined_call_operand.vmem [shape: bf16[144,16], index: 1, kind: input, shape index: {}]   ;;  %s555_s4 = inlined_call_operand.vmem [shape: bf16[144,16], index: 4, kind: input, shape index: {}]   ;;  %s556_s0 = inlined_call_operand.vmem [shape: bf16[24,144], index: 0, kind: input, shape index: {}]   ;;  %s557_s2 = inlined_call_operand.vmem [shape: f32[1,16], index: 2, kind: input, shape index: {}]   ;;  %s558_s5 = inlined_call_operand.vmem [shape: f32[1,16], index: 5, kind: input, shape index: {}]   ;;  %s559_s3 = inlined_call_operand.vmem [shape: f32[1,16], index: 3, kind: input, shape index: {}]   ;;  %s560_s6 = inlined_call_operand.vmem [shape: f32[1,16], index: 6, kind: input, shape index: {}]   ;;  %s561_s8 = inlined_call_operand.vmem [shape: f32[24,16], index: 8, kind: output, shape index: {1}]   ;;  %s562_s7 = inlined_call_operand.vmem [shape: f32[24,16], index: 7, kind: output, shape index: {0}]  }
   0x1   :  { %126 = vmatprep.subr.bf16.mxu0 %v405_v0  ;;  %272 = vmatprep.subr.bf16.mxu1 %v405_v0  ;;  %v382_v1 = vld [vmem:[%s554_s1 + $0x38] sm:$0xff]   ;;  %v384_v3 = vld [vmem:[%s554_s1 + $0x30] sm:$0xff]   ;;  %v386_v5 = vld [vmem:[%s554_s1 + $0x28] sm:$0xff]  }
   0x2   :  { %v383_v2 = vld [vmem:[%s555_s4 + $0x38] sm:$0xff]   ;;  %127 = vmatpush1.bf16.msra.mxu0 %v382_v1  ;;  %v385_v4 = vld [vmem:[%s555_s4 + $0x30] sm:$0xff]   ;;  %v387_v6 = vld [vmem:[%s555_s4 + $0x28] sm:$0xff]  }
   0x3   :  { %273 = vmatpush1.bf16.msra.mxu1 %v383_v2  ;;  %128 = vmatprep.subr.bf16.mxu0 %v405_v0  ;;  %v388_v7 = vld [vmem:[%s554_s1 + $0x20] sm:$0xff]   ;;  %v390_v9 = vld [vmem:[%s554_s1 + $0x18] sm:$0xff]   ;;  %v392_v11 = vld [vmem:[%s554_s1 + $0x10] sm:$0xff]  }
   0x4   :  { %274 = vmatprep.subr.bf16.mxu1 %v405_v0  ;;  %v389_v8 = vld [vmem:[%s555_s4 + $0x20] sm:$0xff]   ;;  %v391_v10 = vld [vmem:[%s555_s4 + $0x18] sm:$0xff]   ;;  %v393_v12 = vld [vmem:[%s555_s4 + $0x10] sm:$0xff]  }
   0x5   :  { %v402_v13 = vld [vmem:[%s556_s0 + $0x4] ss:$8 sps:$4 sm:$0xff]   ;;  %v31_v20 = vld [vmem:[%s556_s0 + $0x10] sm:$0xff]  ;;  %v400_v21 = vld [vmem:[%s556_s0] ss:$8 sps:$4 sm:$0xff]  }
   0x6   :  { %129 = vmatpush1.bf16.msra.mxu0 %v384_v3  ;;  %364 = vmatprep.mubr.msk.bf16.mxu0 %vm119_vm0, %v402_v13  ;;  %v394_v14 = vld [vmem:[%s554_s1 + $0x8] sm:$0xff]   ;;  %v396_v16 = vld [vmem:[%s554_s1] sm:$0xff]   ;;  %v354_v22 = vcombine.high %v31_v20, %v31_v20  ;;  %v353_v23 = vcombine.low %v31_v20, %v31_v20 }
   0x7   :  { %275 = vmatpush1.bf16.msra.mxu1 %v385_v4  ;;  %130 = vmatprep.subr.bf16.mxu0 %v405_v0  ;;  %v395_v15 = vld [vmem:[%s555_s4 + $0x8] sm:$0xff]   ;;  %v397_v17 = vld [vmem:[%s555_s4] sm:$0xff]  }
   0x8   :  { %276 = vmatprep.subr.bf16.mxu1 %v405_v0  ;;  %377 = vmatprep.mubr.msk.bf16.mxu1 %vm119_vm0, %v402_v13  ;;  %v398_v18 = vld [vmem:[%s554_s1 + $0x40] sm:$0xff]  }
   0x9   :  { %v399_v19 = vld [vmem:[%s555_s4 + $0x40] sm:$0xff]  }
   0xa   :  { %131 = vmatpush1.bf16.msra.mxu0 %v386_v5  ;;  %v366_v24 = vld [vmem:[%s557_s2] ss:$0 sm:$0xff] }
   0xb   :  { %277 = vmatpush1.bf16.msra.mxu1 %v387_v6  ;;  %132 = vmatprep.subr.bf16.mxu0 %v405_v0  ;;  %v379_v25 = vld [vmem:[%s558_s5] ss:$0 sm:$0xff] }
   0xc   :  { %278 = vmatprep.subr.bf16.mxu1 %v405_v0  ;;  %v367_v27 = vld [vmem:[%s559_s3] ss:$0 sm:$0xff] }
   0xd   :  { %v380_v30 = vld [vmem:[%s560_s6] ss:$0 sm:$0xff] }
   0xe   :  { %133 = vmatpush1.bf16.msra.mxu0 %v388_v7 }
   0xf   :  { %279 = vmatpush1.bf16.msra.mxu1 %v389_v8  ;;  %134 = vmatprep.subr.bf16.mxu0 %v405_v0 }
  0x10   :  { %280 = vmatprep.subr.bf16.mxu1 %v405_v0 }
  0x12   :  { %135 = vmatpush1.bf16.msra.mxu0 %v390_v9 }
  0x13   :  { %281 = vmatpush1.bf16.msra.mxu1 %v391_v10  ;;  %136 = vmatprep.subr.bf16.mxu0 %v405_v0 }
  0x14   :  { %282 = vmatprep.subr.bf16.mxu1 %v405_v0 }
  0x16   :  { %137 = vmatpush1.bf16.msra.mxu0 %v392_v11 }
  0x17   :  { %283 = vmatpush1.bf16.msra.mxu1 %v393_v12  ;;  %138 = vmatprep.subr.bf16.mxu0 %v405_v0 }
  0x18   :  { %284 = vmatprep.subr.bf16.mxu1 %v405_v0 }
  0x1a   :  { %139 = vmatpush1.bf16.msra.mxu0 %v394_v14 }
  0x1b   :  { %285 = vmatpush1.bf16.msra.mxu1 %v395_v15  ;;  %140 = vmatprep.subr.bf16.mxu0 %v405_v0 }
  0x1c   :  { %286 = vmatprep.subr.bf16.mxu1 %v405_v0 }
  0x1e   :  { %141 = vmatpush1.bf16.msra.mxu0 %v396_v16 }
  0x1f   :  { %287 = vmatpush1.bf16.msra.mxu1 %v397_v17  ;;  %156 = vmatprep.subr.bf16.mxu0 %v405_v0 }
  0x20   :  { %302 = vmatprep.subr.bf16.mxu1 %v405_v0 }
  0x22   :  { %157 = vmatpush2.bf16.msra.mxu0 %v398_v18 }
  0x23   :  { %303 = vmatpush2.bf16.msra.mxu1 %v399_v19 }
  0x25   :  { %159 = vmatmul.mubr.bf16.vlgmr.msra.gmra.mxu0 %v400_v21 }
  0x26   :  { %305 = vmatmul.mubr.bf16.vlgmr.msra.gmra.mxu1 %v400_v21  ;;  %365 = vmatprep.mubr.msk.bf16.mxu0 %vm119_vm0, %v354_v22 }
  0x27   :  { %378 = vmatprep.mubr.msk.bf16.mxu1 %vm119_vm0, %v354_v22 }
  0x2d   :  { %167 = vmatmul.mubr.bf16.gmra.mxu0 %v353_v23 }
  0x2e   :  { %313 = vmatmul.mubr.bf16.gmra.mxu1 %v353_v23 }
  0xe5   :  { %v160_v26 = vpop.f32.mrf.mxu0 }
  0xe6   :  { %v181_v28 = vmul.f32 %v366_v24, %v160_v26  ;;  %v306_v29 = vpop.f32.mrf.mxu1 }
  0xe7   :  { %v327_v31 = vmul.f32 %v379_v25, %v306_v29  ;;  %v162_v32 = vpop.f32.mrf.mxu0 }
  0xe8   :  { %v191_v33 = vadd.f32 %v367_v27, %v181_v28  ;;  %v308_v34 = vpop.f32.mrf.mxu1 }
  0xe9   :  { %v337_v35 = vadd.f32 %v380_v30, %v327_v31  ;;  %v163_v36 = vpop.f32.mrf.mxu0 }
  0xea   :  { %v194_v37 = vmax.f32 %v191_v33, 0.0  ;;  %v182_v38 = vmul.f32 %v366_v24, %v163_v36  ;;  %v309_v39 = vpop.f32.mrf.mxu1 }
  0xeb   :  { %340 = vst.msk [vmem:[%s561_s8] sm:$0xff] %vm119_vm0, %v337_v35  ;;  %v328_v40 = vmul.f32 %v379_v25, %v309_v39  ;;  %v165_v41 = vpop.f32.mrf.mxu0 }
  0xec   :  { %197 = vst.msk [vmem:[%s562_s7] sm:$0xff] %vm119_vm0, %v194_v37  ;;  %v192_v42 = vadd.f32 %v367_v27, %v182_v38  ;;  %v311_v43 = vpop.f32.mrf.mxu1 }
  0xed   :  { %v338_v44 = vadd.f32 %v380_v30, %v328_v40  ;;  %v168_v45 = vpop.f32.mrf.mxu0 }
  0xee   :  { %v195_v46 = vmax.f32 %v192_v42, 0.0  ;;  %v183_v47 = vmul.f32 %v366_v24, %v168_v45  ;;  %v314_v48 = vpop.f32.mrf.mxu1 }
  0xef   :  { %341 = vst.msk [vmem:[%s561_s8 + $0x8] sm:$0xff] %vm119_vm0, %v338_v44  ;;  %v329_v49 = vmul.f32 %v379_v25, %v314_v48  ;;  %v170_v50 = vpop.f32.mrf.mxu0 }
  0xf0   :  { %198 = vst.msk [vmem:[%s562_s7 + $0x8] sm:$0xff] %vm119_vm0, %v195_v46  ;;  %v193_v51 = vadd.f32 %v367_v27, %v183_v47  ;;  %v316_v52 = vpop.f32.mrf.mxu1 }
  0xf1   :  { %v339_v53 = vadd.f32 %v380_v30, %v329_v49  ;;  %v171_v54 = vpop.f32.mrf.mxu0 }
  0xf2   :  { %v196_v55 = vmax.f32 %v193_v51, 0.0  ;;  %v317_v56 = vpop.f32.mrf.mxu1 }
  0xf3   :  { %342 = vst.msk [vmem:[%s561_s8 + $0x10] sm:$0xff] %vm119_vm0, %v339_v53  ;;  %v172_v57 = vpop.f32.mrf.mxu0 }
  0xf4   :  { %199 = vst.msk [vmem:[%s562_s7 + $0x10] sm:$0xff] %vm119_vm0, %v196_v55  ;;  %v318_v58 = vpop.f32.mrf.mxu1 }

// kernel: short_chunk_cnn_res.22
= control target key start
LH: loop header
LB: loop body
LE: loop exit
PB: predicated region body
PF: predicated region fallthrough
CT: control target
= control target key end

     0   :  { %v252_v0 = vmov 0   ;;  %vm111_vm0 = vcmask 130048   ;;  %s348_s1 = inlined_call_operand.vmem [shape: bf16[144,16], index: 1, kind: input, shape index: {}]   ;;  %s349_s0 = inlined_call_operand.vmem [shape: bf16[24,144], index: 0, kind: input, shape index: {}]   ;;  %s350_s2 = inlined_call_operand.vmem [shape: f32[1,16], index: 2, kind: input, shape index: {}]   ;;  %s351_s3 = inlined_call_operand.vmem [shape: f32[1,16], index: 3, kind: input, shape index: {}]   ;;  %s352_s4 = inlined_call_operand.vmem [shape: f32[24,16], index: 4, kind: input, shape index: {}]   ;;  %s353_s5 = inlined_call_operand.vmem [shape: f32[24,16], index: 5, kind: output, shape index: {}]  }
   0x1   :  { %118 = vmatprep.subr.bf16.mxu0 %v252_v0  ;;  %219 = vmatprep.subr.bf16.mxu1 %v252_v0  ;;  %v238_v1 = vld [vmem:[%s348_s1 + $0x38] sm:$0xff]   ;;  %v239_v2 = vld [vmem:[%s348_s1 + $0x30] sm:$0xff]   ;;  %v240_v3 = vld [vmem:[%s348_s1 + $0x28] sm:$0xff]  }
   0x2   :  { %119 = vmatpush1.bf16.msra.mxu0 %v238_v1  ;;  %228 = vmatpush1.bf16.msra.mxu1 %v238_v1  ;;  %v241_v4 = vld [vmem:[%s348_s1 + $0x20] sm:$0xff]   ;;  %v23_v6 = vld [vmem:[%s349_s0 + $0x10] sm:$0xff]  ;;  %v242_v8 = vld [vmem:[%s348_s1 + $0x18] sm:$0xff]  }
   0x3   :  { %120 = vmatprep.subr.bf16.mxu0 %v252_v0  ;;  %220 = vmatprep.subr.bf16.mxu1 %v252_v0  ;;  %v249_v5 = vld [vmem:[%s349_s0 + $0x4] ss:$8 sps:$4 sm:$0xff]   ;;  %v205_v7 = vcombine.high %v23_v6, %v23_v6  ;;  %v243_v9 = vld [vmem:[%s348_s1 + $0x10] sm:$0xff]   ;;  %v247_v13 = vld [vmem:[%s349_s0] ss:$8 sps:$4 sm:$0xff]   ;;  %v204_v14 = vcombine.low %v23_v6, %v23_v6 }
   0x4   :  { %215 = vmatprep.mubr.msk.bf16.mxu0 %vm111_vm0, %v249_v5  ;;  %v244_v10 = vld [vmem:[%s348_s1 + $0x8] sm:$0xff]   ;;  %v245_v11 = vld [vmem:[%s348_s1] sm:$0xff]   ;;  %v188_v22 = vld [vmem:[%s352_s4 + $0x10] sm:$0xff] }
   0x5   :  { %216 = vmatprep.mubr.msk.bf16.mxu1 %vm111_vm0, %v205_v7  ;;  %v246_v12 = vld [vmem:[%s348_s1 + $0x40] sm:$0xff]   ;;  %v187_v32 = vld [vmem:[%s352_s4 + $0x8] sm:$0xff] }
   0x6   :  { %121 = vmatpush1.bf16.msra.mxu0 %v239_v2  ;;  %229 = vmatpush1.bf16.msra.mxu1 %v239_v2  ;;  %v217_v15 = vld [vmem:[%s350_s2] ss:$0 sm:$0xff] }
   0x7   :  { %122 = vmatprep.subr.bf16.mxu0 %v252_v0  ;;  %221 = vmatprep.subr.bf16.mxu1 %v252_v0  ;;  %v218_v17 = vld [vmem:[%s351_s3] ss:$0 sm:$0xff] }
   0x8   :  { %v186_v21 = vld [vmem:[%s352_s4] sm:$0xff] }
   0xa   :  { %123 = vmatpush1.bf16.msra.mxu0 %v240_v3  ;;  %230 = vmatpush1.bf16.msra.mxu1 %v240_v3 }
   0xb   :  { %124 = vmatprep.subr.bf16.mxu0 %v252_v0  ;;  %222 = vmatprep.subr.bf16.mxu1 %v252_v0 }
   0xe   :  { %125 = vmatpush1.bf16.msra.mxu0 %v241_v4  ;;  %231 = vmatpush1.bf16.msra.mxu1 %v241_v4 }
   0xf   :  { %126 = vmatprep.subr.bf16.mxu0 %v252_v0  ;;  %223 = vmatprep.subr.bf16.mxu1 %v252_v0 }
  0x12   :  { %127 = vmatpush1.bf16.msra.mxu0 %v242_v8  ;;  %232 = vmatpush1.bf16.msra.mxu1 %v242_v8 }
  0x13   :  { %128 = vmatprep.subr.bf16.mxu0 %v252_v0  ;;  %224 = vmatprep.subr.bf16.mxu1 %v252_v0 }
  0x16   :  { %129 = vmatpush1.bf16.msra.mxu0 %v243_v9  ;;  %233 = vmatpush1.bf16.msra.mxu1 %v243_v9 }
  0x17   :  { %130 = vmatprep.subr.bf16.mxu0 %v252_v0  ;;  %225 = vmatprep.subr.bf16.mxu1 %v252_v0 }
  0x1a   :  { %131 = vmatpush1.bf16.msra.mxu0 %v244_v10  ;;  %234 = vmatpush1.bf16.msra.mxu1 %v244_v10 }
  0x1b   :  { %132 = vmatprep.subr.bf16.mxu0 %v252_v0  ;;  %226 = vmatprep.subr.bf16.mxu1 %v252_v0 }
  0x1e   :  { %133 = vmatpush1.bf16.msra.mxu0 %v245_v11  ;;  %235 = vmatpush1.bf16.msra.mxu1 %v245_v11 }
  0x1f   :  { %148 = vmatprep.subr.bf16.mxu0 %v252_v0  ;;  %227 = vmatprep.subr.bf16.mxu1 %v252_v0 }
  0x22   :  { %149 = vmatpush2.bf16.msra.mxu0 %v246_v12  ;;  %236 = vmatpush2.bf16.msra.mxu1 %v246_v12 }
  0x25   :  { %151 = vmatmul.mubr.bf16.vlgmr.msra.gmra.mxu0 %v247_v13  ;;  %159 = vmatmul.mubr.bf16.vlgmr.msra.gmra.mxu1 %v204_v14 }
  0xe5   :  { %v152_v16 = vpop.f32.mrf.mxu0  ;;  %v160_v18 = vpop.f32.mrf.mxu1 }
  0xe6   :  { %v173_v19 = vmul.f32 %v217_v15, %v152_v16  ;;  %v175_v20 = vmul.f32 %v217_v15, %v160_v18 }
  0xe7   :  { %v154_v23 = vpop.f32.mrf.mxu0  ;;  %v162_v24 = vpop.f32.mrf.mxu1 }
  0xe8   :  { %v183_v25 = vadd.f32 %v218_v17, %v173_v19  ;;  %v185_v26 = vadd.f32 %v218_v17, %v175_v20 }
  0xe9   :  { %v155_v27 = vpop.f32.mrf.mxu0  ;;  %v163_v28 = vpop.f32.mrf.mxu1 }
  0xea   :  { %v189_v29 = vadd.f32 %v186_v21, %v183_v25  ;;  %v191_v30 = vadd.f32 %v188_v22, %v185_v26  ;;  %v174_v31 = vmul.f32 %v217_v15, %v155_v27 }
  0xeb   :  { %v157_v33 = vpop.f32.mrf.mxu0  ;;  %v164_v34 = vpop.f32.mrf.mxu1 }
  0xec   :  { %v192_v35 = vmax.f32 %v189_v29, 0.0  ;;  %v194_v36 = vmax.f32 %v191_v30, 0.0  ;;  %v184_v37 = vadd.f32 %v218_v17, %v174_v31 }
  0xee   :  { %195 = vst.msk [vmem:[%s353_s5] sm:$0xff] %vm111_vm0, %v192_v35  ;;  %197 = vst.msk [vmem:[%s353_s5 + $0x10] sm:$0xff] %vm111_vm0, %v194_v36  ;;  %v190_v38 = vadd.f32 %v187_v32, %v184_v37 }
  0xf0   :  { %v193_v39 = vmax.f32 %v190_v38, 0.0 }
  0xf2   :  { %196 = vst.msk [vmem:[%s353_s5 + $0x8] sm:$0xff] %vm111_vm0, %v193_v39 }

// kernel: short_chunk_cnn_res.23
= control target key start
LH: loop header
LB: loop body
LE: loop exit
PB: predicated region body
PF: predicated region fallthrough
CT: control target
= control target key end

     0   :  { %v368_v0 = vmov 0   ;;  %vm112_vm0 = vcmask 130048   ;;  %s504_s1 = inlined_call_operand.vmem [shape: bf16[144,16], index: 1, kind: input, shape index: {}]   ;;  %s505_s4 = inlined_call_operand.vmem [shape: bf16[144,16], index: 4, kind: input, shape index: {}]   ;;  %s506_s0 = inlined_call_operand.vmem [shape: bf16[16,144], index: 0, kind: input, shape index: {}]   ;;  %s507_s2 = inlined_call_operand.vmem [shape: f32[1,16], index: 2, kind: input, shape index: {}]   ;;  %s508_s5 = inlined_call_operand.vmem [shape: f32[1,16], index: 5, kind: input, shape index: {}]   ;;  %s509_s3 = inlined_call_operand.vmem [shape: f32[1,16], index: 3, kind: input, shape index: {}]   ;;  %s510_s6 = inlined_call_operand.vmem [shape: f32[1,16], index: 6, kind: input, shape index: {}]   ;;  %s511_s8 = inlined_call_operand.vmem [shape: f32[16,16], index: 8, kind: output, shape index: {1}]   ;;  %s512_s7 = inlined_call_operand.vmem [shape: f32[16,16], index: 7, kind: output, shape index: {0}]  }
   0x1   :  { %116 = vmatprep.subr.bf16.mxu0 %v368_v0  ;;  %251 = vmatprep.subr.bf16.mxu1 %v368_v0  ;;  %v347_v1 = vld [vmem:[%s504_s1 + $0x38] sm:$0xff]   ;;  %v349_v3 = vld [vmem:[%s504_s1 + $0x30] sm:$0xff]   ;;  %v351_v5 = vld [vmem:[%s504_s1 + $0x28] sm:$0xff]  }
   0x2   :  { %v348_v2 = vld [vmem:[%s505_s4 + $0x38] sm:$0xff]   ;;  %117 = vmatpush1.bf16.msra.mxu0 %v347_v1  ;;  %v350_v4 = vld [vmem:[%s505_s4 + $0x30] sm:$0xff]   ;;  %v352_v6 = vld [vmem:[%s505_s4 + $0x28] sm:$0xff]  }
   0x3   :  { %252 = vmatpush1.bf16.msra.mxu1 %v348_v2  ;;  %118 = vmatprep.subr.bf16.mxu0 %v368_v0  ;;  %v353_v7 = vld [vmem:[%s504_s1 + $0x20] sm:$0xff]   ;;  %v355_v9 = vld [vmem:[%s504_s1 + $0x18] sm:$0xff]   ;;  %v357_v11 = vld [vmem:[%s504_s1 + $0x10] sm:$0xff]  }
   0x4   :  { %253 = vmatprep.subr.bf16.mxu1 %v368_v0  ;;  %v354_v8 = vld [vmem:[%s505_s4 + $0x20] sm:$0xff]   ;;  %v356_v10 = vld [vmem:[%s505_s4 + $0x18] sm:$0xff]   ;;  %v358_v12 = vld [vmem:[%s505_s4 + $0x10] sm:$0xff]  }
   0x5   :  { %v367_v13 = vld [vmem:[%s506_s0 + $0x4] ss:$8 sps:$4 sm:$0xff]   ;;  %v365_v20 = vld [vmem:[%s506_s0] ss:$8 sps:$4 sm:$0xff]  }
   0x6   :  { %119 = vmatpush1.bf16.msra.mxu0 %v349_v3  ;;  %331 = vmatprep.mubr.msk.bf16.mxu0 %vm112_vm0, %v367_v13  ;;  %v359_v14 = vld [vmem:[%s504_s1 + $0x8] sm:$0xff]   ;;  %v361_v16 = vld [vmem:[%s504_s1] sm:$0xff]  }
   0x7   :  { %254 = vmatpush1.bf16.msra.mxu1 %v350_v4  ;;  %120 = vmatprep.subr.bf16.mxu0 %v368_v0  ;;  %v360_v15 = vld [vmem:[%s505_s4 + $0x8] sm:$0xff]   ;;  %v362_v17 = vld [vmem:[%s505_s4] sm:$0xff]  }
   0x8   :  { %255 = vmatprep.subr.bf16.mxu1 %v368_v0  ;;  %343 = vmatprep.mubr.msk.bf16.mxu1 %vm112_vm0, %v367_v13  ;;  %v363_v18 = vld [vmem:[%s504_s1 + $0x40] sm:$0xff]  }
   0x9   :  { %v364_v19 = vld [vmem:[%s505_s4 + $0x40] sm:$0xff]  }
   0xa   :  { %121 = vmatpush1.bf16.msra.mxu0 %v351_v5  ;;  %v332_v21 = vld [vmem:[%s507_s2] ss:$0 sm:$0xff] }
   0xb   :  { %256 = vmatpush1.bf16.msra.mxu1 %v352_v6  ;;  %122 = vmatprep.subr.bf16.mxu0 %v368_v0  ;;  %v344_v22 = vld [vmem:[%s508_s5] ss:$0 sm:$0xff] }
   0xc   :  { %257 = vmatprep.subr.bf16.mxu1 %v368_v0  ;;  %v333_v24 = vld [vmem:[%s509_s3] ss:$0 sm:$0xff] }
   0xd   :  { %v345_v27 = vld [vmem:[%s510_s6] ss:$0 sm:$0xff] }
   0xe   :  { %123 = vmatpush1.bf16.msra.mxu0 %v353_v7 }
   0xf   :  { %258 = vmatpush1.bf16.msra.mxu1 %v354_v8  ;;  %124 = vmatprep.subr.bf16.mxu0 %v368_v0 }
  0x10   :  { %259 = vmatprep.subr.bf16.mxu1 %v368_v0 }
  0x12   :  { %125 = vmatpush1.bf16.msra.mxu0 %v355_v9 }
  0x13   :  { %260 = vmatpush1.bf16.msra.mxu1 %v356_v10  ;;  %126 = vmatprep.subr.bf16.mxu0 %v368_v0 }
  0x14   :  { %261 = vmatprep.subr.bf16.mxu1 %v368_v0 }
  0x16   :  { %127 = vmatpush1.bf16.msra.mxu0 %v357_v11 }
  0x17   :  { %262 = vmatpush1.bf16.msra.mxu1 %v358_v12  ;;  %128 = vmatprep.subr.bf16.mxu0 %v368_v0 }
  0x18   :  { %263 = vmatprep.subr.bf16.mxu1 %v368_v0 }
  0x1a   :  { %129 = vmatpush1.bf16.msra.mxu0 %v359_v14 }
  0x1b   :  { %264 = vmatpush1.bf16.msra.mxu1 %v360_v15  ;;  %130 = vmatprep.subr.bf16.mxu0 %v368_v0 }
  0x1c   :  { %265 = vmatprep.subr.bf16.mxu1 %v368_v0 }
  0x1e   :  { %131 = vmatpush1.bf16.msra.mxu0 %v361_v16 }
  0x1f   :  { %266 = vmatpush1.bf16.msra.mxu1 %v362_v17  ;;  %146 = vmatprep.subr.bf16.mxu0 %v368_v0 }
  0x20   :  { %281 = vmatprep.subr.bf16.mxu1 %v368_v0 }
  0x22   :  { %147 = vmatpush2.bf16.msra.mxu0 %v363_v18 }
  0x23   :  { %282 = vmatpush2.bf16.msra.mxu1 %v364_v19 }
  0x25   :  { %149 = vmatmul.mubr.bf16.vlgmr.msra.gmra.mxu0 %v365_v20 }
  0x26   :  { %284 = vmatmul.mubr.bf16.vlgmr.msra.gmra.mxu1 %v365_v20 }
  0xe5   :  { %v150_v23 = vpop.f32.mrf.mxu0 }
  0xe6   :  { %v164_v25 = vmul.f32 %v332_v21, %v150_v23  ;;  %v285_v26 = vpop.f32.mrf.mxu1 }
  0xe7   :  { %v299_v28 = vmul.f32 %v344_v22, %v285_v26  ;;  %v152_v29 = vpop.f32.mrf.mxu0 }
  0xe8   :  { %v173_v30 = vadd.f32 %v333_v24, %v164_v25  ;;  %v287_v31 = vpop.f32.mrf.mxu1 }
  0xe9   :  { %v308_v32 = vadd.f32 %v345_v27, %v299_v28  ;;  %v153_v33 = vpop.f32.mrf.mxu0 }
  0xea   :  { %v175_v34 = vmax.f32 %v173_v30, 0.0  ;;  %v165_v35 = vmul.f32 %v332_v21, %v153_v33  ;;  %v288_v36 = vpop.f32.mrf.mxu1 }
  0xeb   :  { %310 = vst.msk [vmem:[%s511_s8] sm:$0xff] %vm112_vm0, %v308_v32  ;;  %v300_v37 = vmul.f32 %v344_v22, %v288_v36  ;;  %v155_v38 = vpop.f32.mrf.mxu0 }
  0xec   :  { %177 = vst.msk [vmem:[%s512_s7] sm:$0xff] %vm112_vm0, %v175_v34  ;;  %v174_v39 = vadd.f32 %v333_v24, %v165_v35  ;;  %v290_v40 = vpop.f32.mrf.mxu1 }
  0xed   :  { %v309_v41 = vadd.f32 %v345_v27, %v300_v37 }
  0xee   :  { %v176_v42 = vmax.f32 %v174_v39, 0.0 }
  0xef   :  { %311 = vst.msk [vmem:[%s511_s8 + $0x8] sm:$0xff] %vm112_vm0, %v309_v41 }
  0xf0   :  { %178 = vst.msk [vmem:[%s512_s7 + $0x8] sm:$0xff] %vm112_vm0, %v176_v42 }

// kernel: short_chunk_cnn_res.24
= control target key start
LH: loop header
LB: loop body
LE: loop exit
PB: predicated region body
PF: predicated region fallthrough
CT: control target
= control target key end

     0   :  { %10 = vsyncpa [#allocation3], 0  ;;  %s242_s18 = smov [#allocation2]   ;;  %s328_s0 = inlined_call_operand.vmem [shape: bf16[16,144], index: 0, kind: input, shape index: {}]   ;;  %s329_s1 = inlined_call_operand.vmem [shape: bf16[144,16], index: 1, kind: input, shape index: {}]   ;;  %s330_s2 = inlined_call_operand.vmem [shape: f32[1,16], index: 2, kind: input, shape index: {}]   ;;  %s331_s3 = inlined_call_operand.hbm [shape: f32[1,16], index: 3, kind: input, shape index: {}]   ;;  %s332_s4 = inlined_call_operand.vmem [shape: f32[16,16], index: 4, kind: input, shape index: {}]   ;;  %s333_s5 = inlined_call_operand.vmem [shape: f32[16,16], index: 5, kind: output, shape index: {}]  }
   0x1   :  { %s23_s19 = sshll.u32 %s242_s18, 4  ;;  %s24_s19 = int_to_ptr.vmem [resolvable:$true] %s23_s19 }
   0x2   :  { %s228_s20 = scalar_lea.vmem %s24_s19, 16  ;;  %s232_s21 = scalar_lea.vmem %s24_s19, 32 }
   0x3   :  { %p229_p0 = scmp.ne.s32.totalorder %s24_s19, %s228_s20  ;;  %p233_p1 = scmp.lt.s32.totalorder %s24_s19, %s24_s19 }
   0x4   :  { %p234_p2 = scmp.lt.s32.totalorder %s232_s21, %s228_s20 }
   0x6   :  { %p235_p3 = por %p234_p2, %p233_p1 }
   0x8   :  { %p236_p4 = pnand %p235_p3, %p229_p0 }
   0xa   :  { %239 = shalt.err (!%p236_p4)
}
   0xb   :  { %26 = dma.hbm_to_vmem [thread:$0]  %s331_s3, 16, %s24_s19, [#allocation3]  }
   0xc   :  { %240 = dma.done.wait [#allocation3], 16  }
   0xd   :  { %241 = vsyncadd [#allocation3], 4294967280  ;;  %v243_v0 = vmov 0   ;;  %v208_v1 = vld [vmem:[%s329_s1 + $0x38] sm:$0xff]   ;;  %v209_v2 = vld [vmem:[%s329_s1 + $0x30] sm:$0xff]   ;;  %vm116_vm0 = vcmask 130048  }
   0xe   :  { %120 = vmatprep.subr.bf16.mxu0 %v243_v0  ;;  %v210_v3 = vld [vmem:[%s329_s1 + $0x28] sm:$0xff]   ;;  %v211_v4 = vld [vmem:[%s329_s1 + $0x20] sm:$0xff]   ;;  %v212_v6 = vld [vmem:[%s329_s1 + $0x18] sm:$0xff]  }
   0xf   :  { %121 = vmatpush1.bf16.msra.mxu0 %v208_v1  ;;  %v219_v5 = vld [vmem:[%s328_s0 + $0x4] ss:$8 sps:$4 sm:$0xff]   ;;  %v213_v7 = vld [vmem:[%s329_s1 + $0x10] sm:$0xff]   ;;  %v217_v11 = vld [vmem:[%s328_s0] ss:$8 sps:$4 sm:$0xff]  }
  0x10   :  { %122 = vmatprep.subr.bf16.mxu0 %v243_v0  ;;  %203 = vmatprep.mubr.msk.bf16.mxu0 %vm116_vm0, %v219_v5  ;;  %v214_v8 = vld [vmem:[%s329_s1 + $0x8] sm:$0xff]   ;;  %v215_v9 = vld [vmem:[%s329_s1] sm:$0xff]  }
  0x11   :  { %v216_v10 = vld [vmem:[%s329_s1 + $0x40] sm:$0xff]   ;;  %v180_v22 = vld [vmem:[%s332_s4 + $0x8] sm:$0xff] }
  0x12   :  { %v204_v12 = vld [vmem:[%s330_s2] ss:$0 sm:$0xff] }
  0x13   :  { %123 = vmatpush1.bf16.msra.mxu0 %v209_v2  ;;  %v205_v14 = vld [vmem:[#allocation2] ss:$0 sm:$0xff] }
  0x14   :  { %124 = vmatprep.subr.bf16.mxu0 %v243_v0  ;;  %v179_v16 = vld [vmem:[%s332_s4] sm:$0xff] }
  0x17   :  { %125 = vmatpush1.bf16.msra.mxu0 %v210_v3 }
  0x18   :  { %126 = vmatprep.subr.bf16.mxu0 %v243_v0 }
  0x1b   :  { %127 = vmatpush1.bf16.msra.mxu0 %v211_v4 }
  0x1c   :  { %128 = vmatprep.subr.bf16.mxu0 %v243_v0 }
  0x1f   :  { %129 = vmatpush1.bf16.msra.mxu0 %v212_v6 }
  0x20   :  { %130 = vmatprep.subr.bf16.mxu0 %v243_v0 }
  0x23   :  { %131 = vmatpush1.bf16.msra.mxu0 %v213_v7 }
  0x24   :  { %132 = vmatprep.subr.bf16.mxu0 %v243_v0 }
  0x27   :  { %133 = vmatpush1.bf16.msra.mxu0 %v214_v8 }
  0x28   :  { %134 = vmatprep.subr.bf16.mxu0 %v243_v0 }
  0x2b   :  { %135 = vmatpush1.bf16.msra.mxu0 %v215_v9 }
  0x2c   :  { %150 = vmatprep.subr.bf16.mxu0 %v243_v0 }
  0x2f   :  { %151 = vmatpush2.bf16.msra.mxu0 %v216_v10 }
  0x32   :  { %153 = vmatmul.mubr.bf16.vlgmr.msra.gmra.mxu0 %v217_v11 }
  0xf2   :  { %v154_v13 = vpop.f32.mrf.mxu0 }
  0xf3   :  { %v168_v15 = vmul.f32 %v204_v12, %v154_v13 }
  0xf4   :  { %v156_v17 = vpop.f32.mrf.mxu0 }
  0xf5   :  { %v177_v18 = vadd.f32 %v205_v14, %v168_v15 }
  0xf6   :  { %v157_v19 = vpop.f32.mrf.mxu0 }
  0xf7   :  { %v181_v20 = vadd.f32 %v179_v16, %v177_v18  ;;  %v169_v21 = vmul.f32 %v204_v12, %v157_v19 }
  0xf8   :  { %v159_v23 = vpop.f32.mrf.mxu0 }
  0xf9   :  { %v183_v24 = vmax.f32 %v181_v20, 0.0  ;;  %v178_v25 = vadd.f32 %v205_v14, %v169_v21 }
  0xfb   :  { %185 = vst.msk [vmem:[%s333_s5] sm:$0xff] %vm116_vm0, %v183_v24  ;;  %v182_v26 = vadd.f32 %v180_v22, %v178_v25 }
  0xfd   :  { %v184_v27 = vmax.f32 %v182_v26, 0.0 }
  0xff   :  { %186 = vst.msk [vmem:[%s333_s5 + $0x8] sm:$0xff] %vm116_vm0, %v184_v27 }
 0x100   :  { %191 = vsyncpa [#allocation3], 1 }

// kernel: short_chunk_cnn_res.25
= control target key start
LH: loop header
LB: loop body
LE: loop exit
PB: predicated region body
PF: predicated region fallthrough
CT: control target
= control target key end

     0   :  { %14 = vsyncpa [#allocation3], 0  ;;  %s623_s0 = inlined_call_operand.vmem [shape: bf16[8,144], index: 0, kind: input, shape index: {}]   ;;  %s624_s1 = inlined_call_operand.vmem [shape: bf16[144,16], index: 1, kind: input, shape index: {}]   ;;  %s625_s2 = inlined_call_operand.hbm [shape: f32[1,16], index: 2, kind: input, shape index: {}]   ;;  %s626_s3 = inlined_call_operand.hbm [shape: f32[1,16], index: 3, kind: input, shape index: {}]   ;;  %s627_s4 = inlined_call_operand.vmem [shape: bf16[144,16], index: 4, kind: input, shape index: {}]   ;;  %s628_s5 = inlined_call_operand.hbm [shape: f32[1,16], index: 5, kind: input, shape index: {}]   ;;  %s629_s6 = inlined_call_operand.hbm [shape: f32[1,16], index: 6, kind: input, shape index: {}]   ;;  %s630_s7 = inlined_call_operand.vmem [shape: f32[8,16], index: 7, kind: output, shape index: {0}]   ;;  %s631_s8 = inlined_call_operand.vmem [shape: f32[8,16], index: 8, kind: output, shape index: {1}]  }
   0x1   :  { %15 = vsyncpa [#allocation5], 0 }
   0x2   :  { %16 = vsyncpa [#allocation8], 0  ;;  %s494_s27 = smov [#allocation4]   ;;  %s495_s29 = smov [#allocation2]  }
   0x3   :  { %s37_s28 = sshll.u32 %s494_s27, 4  ;;  %s27_s30 = sshll.u32 %s495_s29, 4  ;;  %s38_s28 = int_to_ptr.vmem [resolvable:$true] %s37_s28  ;;  %s28_s30 = int_to_ptr.vmem [resolvable:$true] %s27_s30 }
   0x4   :  { %s416_s9 = scalar_lea.vmem %s38_s28, 16  ;;  %s420_s10 = scalar_lea.vmem %s38_s28, 32 }
   0x5   :  { %p417_p0 = scmp.ne.s32.totalorder %s38_s28, %s416_s9  ;;  %p421_p1 = scmp.lt.s32.totalorder %s38_s28, %s38_s28 }
   0x6   :  { %p422_p2 = scmp.lt.s32.totalorder %s420_s10, %s416_s9 }
   0x8   :  { %p423_p3 = por %p422_p2, %p421_p1 }
   0xa   :  { %p424_p4 = pnand %p423_p3, %p417_p0 }
   0xc   :  { %427 = shalt.err (!%p424_p4)
}
   0xd   :  { %40 = dma.hbm_to_vmem [thread:$0]  %s626_s3, 16, %s38_s28, [#allocation5]  }
   0xe   :  { %s436_s13 = scalar_lea.vmem %s28_s30, 16  ;;  %s440_s14 = scalar_lea.vmem %s28_s30, 32 }
   0xf   :  { %p437_p5 = scmp.ne.s32.totalorder %s28_s30, %s436_s13  ;;  %p441_p6 = scmp.lt.s32.totalorder %s28_s30, %s28_s30 }
  0x10   :  { %p442_p7 = scmp.lt.s32.totalorder %s440_s14, %s436_s13 }
  0x12   :  { %p443_p8 = por %p442_p7, %p441_p6 }
  0x14   :  { %p444_p9 = pnand %p443_p8, %p437_p5 }
  0x16   :  { %447 = shalt.err (!%p444_p9)
}
  0x17   :  { %30 = dma.hbm_to_vmem [thread:$0]  %s625_s2, 16, %s28_s30, [#allocation3]  }
  0x18   :  { %s496_s17 = smov [#allocation6]   ;;  %s497_s19 = smov [#allocation7]  }
  0x19   :  { %s49_s18 = sshll.u32 %s496_s17, 4  ;;  %s59_s20 = sshll.u32 %s497_s19, 4  ;;  %s50_s18 = int_to_ptr.vmem [resolvable:$true] %s49_s18  ;;  %s60_s20 = int_to_ptr.vmem [resolvable:$true] %s59_s20 }
  0x1a   :  { %s456_s21 = scalar_lea.vmem %s50_s18, 16  ;;  %s460_s3 = scalar_lea.vmem %s50_s18, 32 }
  0x1b   :  { %p457_p10 = scmp.ne.s32.totalorder %s50_s18, %s456_s21  ;;  %p461_p11 = scmp.lt.s32.totalorder %s50_s18, %s50_s18 }
  0x1c   :  { %p462_p12 = scmp.lt.s32.totalorder %s460_s3, %s456_s21 }
  0x1e   :  { %p463_p13 = por %p462_p12, %p461_p11 }
  0x20   :  { %p464_p0 = pnand %p463_p13, %p457_p10 }
  0x22   :  { %467 = shalt.err (!%p464_p0)
}
  0x23   :  { %52 = dma.hbm_to_vmem [thread:$0]  %s628_s5, 16, %s50_s18, [#allocation5]  }
  0x24   :  { %s476_s24 = scalar_lea.vmem %s60_s20, 16  ;;  %s480_s2 = scalar_lea.vmem %s60_s20, 32 }
  0x25   :  { %p477_p1 = scmp.ne.s32.totalorder %s60_s20, %s476_s24  ;;  %p481_p2 = scmp.lt.s32.totalorder %s60_s20, %s60_s20 }
  0x26   :  { %p482_p3 = scmp.lt.s32.totalorder %s480_s2, %s476_s24 }
  0x28   :  { %p483_p4 = por %p482_p3, %p481_p2 }
  0x2a   :  { %p484_p5 = pnand %p483_p4, %p477_p1 }
  0x2c   :  { %487 = shalt.err (!%p484_p5)
}
  0x2d   :  { %62 = dma.hbm_to_vmem [thread:$0]  %s629_s6, 16, %s60_s20, [#allocation8]  }
  0x2e   :  { %488 = dma.done.wait [#allocation3], 16  }
  0x2f   :  { %489 = vsyncadd [#allocation3], 4294967280 }
  0x30   :  { %490 = dma.done.wait [#allocation5], 32  }
  0x31   :  { %491 = vsyncadd [#allocation5], 4294967264 }
  0x32   :  { %492 = dma.done.wait [#allocation8], 16  }
  0x33   :  { %493 = vsyncadd [#allocation8], 4294967280  ;;  %v498_v0 = vmov 0   ;;  %v388_v1 = vld [vmem:[%s624_s1 + $0x38] sm:$0xff]   ;;  %v390_v3 = vld [vmem:[%s624_s1 + $0x30] sm:$0xff]   ;;  %vm155_vm0 = vcmask 130048  }
  0x34   :  { %159 = vmatprep.subr.bf16.mxu0 %v498_v0  ;;  %289 = vmatprep.subr.bf16.mxu1 %v498_v0  ;;  %v389_v2 = vld [vmem:[%s627_s4 + $0x38] sm:$0xff]   ;;  %v391_v4 = vld [vmem:[%s627_s4 + $0x30] sm:$0xff]   ;;  %v392_v5 = vld [vmem:[%s624_s1 + $0x28] sm:$0xff]  }
  0x35   :  { %160 = vmatpush1.bf16.msra.mxu0 %v388_v1  ;;  %290 = vmatpush1.bf16.msra.mxu1 %v389_v2  ;;  %v393_v6 = vld [vmem:[%s627_s4 + $0x28] sm:$0xff]   ;;  %v394_v7 = vld [vmem:[%s624_s1 + $0x20] sm:$0xff]   ;;  %v396_v9 = vld [vmem:[%s624_s1 + $0x18] sm:$0xff]  }
  0x36   :  { %161 = vmatprep.subr.bf16.mxu0 %v498_v0  ;;  %291 = vmatprep.subr.bf16.mxu1 %v498_v0  ;;  %v395_v8 = vld [vmem:[%s627_s4 + $0x20] sm:$0xff]   ;;  %v397_v10 = vld [vmem:[%s627_s4 + $0x18] sm:$0xff]   ;;  %v398_v11 = vld [vmem:[%s624_s1 + $0x10] sm:$0xff]  }
  0x37   :  { %v76_v12 = vld [vmem:[%s623_s0] sm:$0xff]  ;;  %v399_v13 = vld [vmem:[%s627_s4 + $0x10] sm:$0xff]   ;;  %v400_v15 = vld [vmem:[%s624_s1 + $0x8] sm:$0xff]  }
  0x38   :  { %v358_v14 = vcombine.high %v76_v12, %v76_v12  ;;  %v401_v16 = vld [vmem:[%s627_s4 + $0x8] sm:$0xff]   ;;  %v402_v17 = vld [vmem:[%s624_s1] sm:$0xff]   ;;  %v357_v21 = vcombine.low %v76_v12, %v76_v12 }
  0x39   :  { %162 = vmatpush1.bf16.msra.mxu0 %v390_v3  ;;  %292 = vmatpush1.bf16.msra.mxu1 %v391_v4  ;;  %v403_v18 = vld [vmem:[%s627_s4] sm:$0xff]  }
  0x3a   :  { %163 = vmatprep.subr.bf16.mxu0 %v498_v0  ;;  %293 = vmatprep.subr.bf16.mxu1 %v498_v0  ;;  %v404_v19 = vld [vmem:[%s624_s1 + $0x40] sm:$0xff]  }
  0x3b   :  { %368 = vmatprep.mubr.msk.bf16.mxu0 %vm155_vm0, %v358_v14  ;;  %380 = vmatprep.mubr.msk.bf16.mxu1 %vm155_vm0, %v358_v14  ;;  %v405_v20 = vld [vmem:[%s627_s4 + $0x40] sm:$0xff]  }
  0x3c   :  { %v369_v22 = vld [vmem:[#allocation2] ss:$0 sm:$0xff]  ;;  %v381_v23 = vld [vmem:[#allocation6] ss:$0 sm:$0xff]  ;;  %v370_v25 = vld [vmem:[#allocation4] ss:$0 sm:$0xff] }
  0x3d   :  { %164 = vmatpush1.bf16.msra.mxu0 %v392_v5  ;;  %294 = vmatpush1.bf16.msra.mxu1 %v393_v6  ;;  %v382_v28 = vld [vmem:[#allocation7] ss:$0 sm:$0xff] }
  0x3e   :  { %165 = vmatprep.subr.bf16.mxu0 %v498_v0  ;;  %295 = vmatprep.subr.bf16.mxu1 %v498_v0 }
  0x41   :  { %166 = vmatpush1.bf16.msra.mxu0 %v394_v7  ;;  %296 = vmatpush1.bf16.msra.mxu1 %v395_v8 }
  0x42   :  { %167 = vmatprep.subr.bf16.mxu0 %v498_v0  ;;  %297 = vmatprep.subr.bf16.mxu1 %v498_v0 }
  0x45   :  { %168 = vmatpush1.bf16.msra.mxu0 %v396_v9  ;;  %298 = vmatpush1.bf16.msra.mxu1 %v397_v10 }
  0x46   :  { %169 = vmatprep.subr.bf16.mxu0 %v498_v0  ;;  %299 = vmatprep.subr.bf16.mxu1 %v498_v0 }
  0x49   :  { %170 = vmatpush1.bf16.msra.mxu0 %v398_v11  ;;  %300 = vmatpush1.bf16.msra.mxu1 %v399_v13 }
  0x4a   :  { %171 = vmatprep.subr.bf16.mxu0 %v498_v0  ;;  %301 = vmatprep.subr.bf16.mxu1 %v498_v0 }
  0x4d   :  { %172 = vmatpush1.bf16.msra.mxu0 %v400_v15  ;;  %302 = vmatpush1.bf16.msra.mxu1 %v401_v16 }
  0x4e   :  { %173 = vmatprep.subr.bf16.mxu0 %v498_v0  ;;  %303 = vmatprep.subr.bf16.mxu1 %v498_v0 }
  0x51   :  { %174 = vmatpush1.bf16.msra.mxu0 %v402_v17  ;;  %304 = vmatpush1.bf16.msra.mxu1 %v403_v18 }
  0x52   :  { %189 = vmatprep.subr.bf16.mxu0 %v498_v0  ;;  %319 = vmatprep.subr.bf16.mxu1 %v498_v0 }
  0x55   :  { %190 = vmatpush2.bf16.msra.mxu0 %v404_v19  ;;  %320 = vmatpush2.bf16.msra.mxu1 %v405_v20 }
  0x58   :  { %192 = vmatmul.mubr.bf16.vlgmr.msra.gmra.mxu0 %v357_v21  ;;  %322 = vmatmul.mubr.bf16.vlgmr.msra.gmra.mxu1 %v357_v21 }
 0x118   :  { %v193_v24 = vpop.f32.mrf.mxu0  ;;  %v323_v27 = vpop.f32.mrf.mxu1 }
 0x119   :  { %v206_v26 = vmul.f32 %v369_v22, %v193_v24  ;;  %v336_v29 = vmul.f32 %v381_v23, %v323_v27 }
 0x11a   :  { %v195_v30 = vpop.f32.mrf.mxu0  ;;  %v325_v32 = vpop.f32.mrf.mxu1 }
 0x11b   :  { %v214_v31 = vadd.f32 %v370_v25, %v206_v26  ;;  %v344_v33 = vadd.f32 %v382_v28, %v336_v29 }
 0x11c   :  { %v196_v34 = vpop.f32.mrf.mxu0  ;;  %v326_v36 = vpop.f32.mrf.mxu1 }
 0x11d   :  { %v215_v35 = vmax.f32 %v214_v31, 0.0  ;;  %345 = vst.msk [vmem:[%s631_s8] sm:$0xff] %vm155_vm0, %v344_v33 }
 0x11e   :  { %v197_v37 = vpop.f32.mrf.mxu0  ;;  %v327_v38 = vpop.f32.mrf.mxu1 }
 0x11f   :  { %216 = vst.msk [vmem:[%s630_s7] sm:$0xff] %vm155_vm0, %v215_v35 }
 0x120   :  { %354 = vsyncpa [#allocation3], 1 }
 0x121   :  { %355 = vsyncpa [#allocation5], 1 }
 0x122   :  { %356 = vsyncpa [#allocation8], 1 }

// kernel: short_chunk_cnn_res.26
= control target key start
LH: loop header
LB: loop body
LE: loop exit
PB: predicated region body
PF: predicated region fallthrough
CT: control target
= control target key end

     0   :  { %10 = vsyncpa [#allocation3], 0  ;;  %s230_s18 = smov [#allocation2]   ;;  %s306_s0 = inlined_call_operand.vmem [shape: bf16[8,144], index: 0, kind: input, shape index: {}]   ;;  %s307_s1 = inlined_call_operand.vmem [shape: bf16[144,16], index: 1, kind: input, shape index: {}]   ;;  %s308_s2 = inlined_call_operand.vmem [shape: f32[1,16], index: 2, kind: input, shape index: {}]   ;;  %s309_s3 = inlined_call_operand.hbm [shape: f32[1,16], index: 3, kind: input, shape index: {}]   ;;  %s310_s4 = inlined_call_operand.vmem [shape: f32[8,16], index: 4, kind: input, shape index: {}]   ;;  %s311_s5 = inlined_call_operand.vmem [shape: f32[8,16], index: 5, kind: output, shape index: {}]  }
   0x1   :  { %s23_s19 = sshll.u32 %s230_s18, 4  ;;  %s24_s19 = int_to_ptr.vmem [resolvable:$true] %s23_s19 }
   0x2   :  { %s216_s20 = scalar_lea.vmem %s24_s19, 16  ;;  %s220_s21 = scalar_lea.vmem %s24_s19, 32 }
   0x3   :  { %p217_p0 = scmp.ne.s32.totalorder %s24_s19, %s216_s20  ;;  %p221_p1 = scmp.lt.s32.totalorder %s24_s19, %s24_s19 }
   0x4   :  { %p222_p2 = scmp.lt.s32.totalorder %s220_s21, %s216_s20 }
   0x6   :  { %p223_p3 = por %p222_p2, %p221_p1 }
   0x8   :  { %p224_p4 = pnand %p223_p3, %p217_p0 }
   0xa   :  { %227 = shalt.err (!%p224_p4)
}
   0xb   :  { %26 = dma.hbm_to_vmem [thread:$0]  %s309_s3, 16, %s24_s19, [#allocation3]  }
   0xc   :  { %228 = dma.done.wait [#allocation3], 16  }
   0xd   :  { %229 = vsyncadd [#allocation3], 4294967280  ;;  %v231_v0 = vmov 0   ;;  %v197_v1 = vld [vmem:[%s307_s1 + $0x38] sm:$0xff]   ;;  %v198_v2 = vld [vmem:[%s307_s1 + $0x30] sm:$0xff]   ;;  %vm112_vm0 = vcmask 130048  }
   0xe   :  { %116 = vmatprep.subr.bf16.mxu0 %v231_v0  ;;  %v199_v3 = vld [vmem:[%s307_s1 + $0x28] sm:$0xff]   ;;  %v33_v4 = vld [vmem:[%s306_s0] sm:$0xff]  ;;  %v201_v7 = vld [vmem:[%s307_s1 + $0x18] sm:$0xff]  }
   0xf   :  { %117 = vmatpush1.bf16.msra.mxu0 %v197_v1  ;;  %v200_v5 = vld [vmem:[%s307_s1 + $0x20] sm:$0xff]   ;;  %v182_v6 = vcombine.high %v33_v4, %v33_v4  ;;  %v202_v8 = vld [vmem:[%s307_s1 + $0x10] sm:$0xff]   ;;  %v203_v9 = vld [vmem:[%s307_s1 + $0x8] sm:$0xff]   ;;  %v181_v12 = vcombine.low %v33_v4, %v33_v4 }
  0x10   :  { %118 = vmatprep.subr.bf16.mxu0 %v231_v0  ;;  %v204_v10 = vld [vmem:[%s307_s1] sm:$0xff]  }
  0x11   :  { %192 = vmatprep.mubr.msk.bf16.mxu0 %vm112_vm0, %v182_v6  ;;  %v205_v11 = vld [vmem:[%s307_s1 + $0x40] sm:$0xff]  }
  0x12   :  { %v193_v13 = vld [vmem:[%s308_s2] ss:$0 sm:$0xff] }
  0x13   :  { %119 = vmatpush1.bf16.msra.mxu0 %v198_v2  ;;  %v194_v15 = vld [vmem:[#allocation2] ss:$0 sm:$0xff] }
  0x14   :  { %120 = vmatprep.subr.bf16.mxu0 %v231_v0  ;;  %v172_v17 = vld [vmem:[%s310_s4] sm:$0xff] }
  0x17   :  { %121 = vmatpush1.bf16.msra.mxu0 %v199_v3 }
  0x18   :  { %122 = vmatprep.subr.bf16.mxu0 %v231_v0 }
  0x1b   :  { %123 = vmatpush1.bf16.msra.mxu0 %v200_v5 }
  0x1c   :  { %124 = vmatprep.subr.bf16.mxu0 %v231_v0 }
  0x1f   :  { %125 = vmatpush1.bf16.msra.mxu0 %v201_v7 }
  0x20   :  { %126 = vmatprep.subr.bf16.mxu0 %v231_v0 }
  0x23   :  { %127 = vmatpush1.bf16.msra.mxu0 %v202_v8 }
  0x24   :  { %128 = vmatprep.subr.bf16.mxu0 %v231_v0 }
  0x27   :  { %129 = vmatpush1.bf16.msra.mxu0 %v203_v9 }
  0x28   :  { %130 = vmatprep.subr.bf16.mxu0 %v231_v0 }
  0x2b   :  { %131 = vmatpush1.bf16.msra.mxu0 %v204_v10 }
  0x2c   :  { %146 = vmatprep.subr.bf16.mxu0 %v231_v0 }
  0x2f   :  { %147 = vmatpush2.bf16.msra.mxu0 %v205_v11 }
  0x32   :  { %149 = vmatmul.mubr.bf16.vlgmr.msra.gmra.mxu0 %v181_v12 }
  0xf2   :  { %v150_v14 = vpop.f32.mrf.mxu0 }
  0xf3   :  { %v163_v16 = vmul.f32 %v193_v13, %v150_v14 }
  0xf4   :  { %v152_v18 = vpop.f32.mrf.mxu0 }
  0xf5   :  { %v171_v19 = vadd.f32 %v194_v15, %v163_v16 }
  0xf6   :  { %v153_v20 = vpop.f32.mrf.mxu0 }
  0xf7   :  { %v173_v21 = vadd.f32 %v172_v17, %v171_v19 }
  0xf8   :  { %v154_v22 = vpop.f32.mrf.mxu0 }
  0xf9   :  { %v174_v23 = vmax.f32 %v173_v21, 0.0 }
  0xfb   :  { %175 = vst.msk [vmem:[%s311_s5] sm:$0xff] %vm112_vm0, %v174_v23 }
  0xfc   :  { %180 = vsyncpa [#allocation3], 1 }

// kernel: short_chunk_cnn_res.27
= control target key start
LH: loop header
LB: loop body
LE: loop exit
PB: predicated region body
PF: predicated region fallthrough
CT: control target
= control target key end

     0   :  { %14 = vsyncpa [#allocation3], 0  ;;  %s550_s0 = inlined_call_operand.vmem [shape: bf16[8,144], index: 0, kind: input, shape index: {}]   ;;  %s551_s1 = inlined_call_operand.vmem [shape: bf16[144,32], index: 1, kind: input, shape index: {}]   ;;  %s552_s2 = inlined_call_operand.vmem [shape: f32[1,32], index: 2, kind: input, shape index: {}]   ;;  %s553_s3 = inlined_call_operand.vmem [shape: f32[1,32], index: 3, kind: input, shape index: {}]   ;;  %s554_s4 = inlined_call_operand.vmem [shape: bf16[144,32], index: 4, kind: input, shape index: {}]   ;;  %s555_s5 = inlined_call_operand.hbm [shape: f32[1,32], index: 5, kind: input, shape index: {}]   ;;  %s556_s6 = inlined_call_operand.hbm [shape: f32[1,32], index: 6, kind: input, shape index: {}]   ;;  %s557_s7 = inlined_call_operand.vmem [shape: f32[8,32], index: 7, kind: output, shape index: {0}]   ;;  %s558_s8 = inlined_call_operand.vmem [shape: f32[8,32], index: 8, kind: output, shape index: {1}]  }
   0x1   :  { %15 = vsyncpa [#allocation5], 0  ;;  %s427_s27 = smov [#allocation2]   ;;  %s428_s29 = smov [#allocation4]  }
   0x2   :  { %s32_s28 = sshll.u32 %s427_s27, 4  ;;  %s42_s30 = sshll.u32 %s428_s29, 4  ;;  %s33_s28 = int_to_ptr.vmem [resolvable:$true] %s32_s28  ;;  %s43_s30 = int_to_ptr.vmem [resolvable:$true] %s42_s30 }
   0x3   :  { %s391_s9 = scalar_lea.vmem %s33_s28, 16  ;;  %s395_s10 = scalar_lea.vmem %s33_s28, 32 }
   0x4   :  { %p392_p0 = scmp.ne.s32.totalorder %s33_s28, %s391_s9  ;;  %p396_p1 = scmp.lt.s32.totalorder %s33_s28, %s33_s28 }
   0x5   :  { %p397_p2 = scmp.lt.s32.totalorder %s395_s10, %s391_s9 }
   0x7   :  { %p398_p3 = por %p397_p2, %p396_p1 }
   0x9   :  { %p399_p4 = pnand %p398_p3, %p392_p0 }
   0xb   :  { %402 = shalt.err (!%p399_p4)
}
   0xc   :  { %35 = dma.hbm_to_vmem [thread:$0]  %s555_s5, 16, %s33_s28, [#allocation3]  }
   0xd   :  { %s411_s13 = scalar_lea.vmem %s43_s30, 16  ;;  %s415_s14 = scalar_lea.vmem %s43_s30, 32 }
   0xe   :  { %p412_p5 = scmp.ne.s32.totalorder %s43_s30, %s411_s13  ;;  %p416_p6 = scmp.lt.s32.totalorder %s43_s30, %s43_s30 }
   0xf   :  { %p417_p7 = scmp.lt.s32.totalorder %s415_s14, %s411_s13 }
  0x11   :  { %p418_p8 = por %p417_p7, %p416_p6 }
  0x13   :  { %p419_p9 = pnand %p418_p8, %p412_p5 }
  0x15   :  { %422 = shalt.err (!%p419_p9)
}
  0x16   :  { %45 = dma.hbm_to_vmem [thread:$0]  %s556_s6, 16, %s43_s30, [#allocation5]  }
  0x17   :  { %423 = dma.done.wait [#allocation3], 16  }
  0x18   :  { %424 = vsyncadd [#allocation3], 4294967280 }
  0x19   :  { %425 = dma.done.wait [#allocation5], 16  }
  0x1a   :  { %426 = vsyncadd [#allocation5], 4294967280  ;;  %v429_v0 = vmov 0   ;;  %v363_v1 = vld [vmem:[%s551_s1 + $0x38] sm:$0xff]   ;;  %v365_v3 = vld [vmem:[%s551_s1 + $0x30] sm:$0xff]   ;;  %vm132_vm0 = vcmask 130048  }
  0x1b   :  { %136 = vmatprep.subr.bf16.mxu0 %v429_v0  ;;  %267 = vmatprep.subr.bf16.mxu1 %v429_v0  ;;  %v364_v2 = vld [vmem:[%s554_s4 + $0x38] sm:$0xff]   ;;  %v366_v4 = vld [vmem:[%s554_s4 + $0x30] sm:$0xff]   ;;  %v367_v5 = vld [vmem:[%s551_s1 + $0x28] sm:$0xff]   ;;  %vm193_vm1 = vcmask 261120  }
  0x1c   :  { %137 = vmatpush1.bf16.msra.mxu0 %v363_v1  ;;  %268 = vmatpush1.bf16.msra.mxu1 %v364_v2  ;;  %v368_v6 = vld [vmem:[%s554_s4 + $0x28] sm:$0xff]   ;;  %v369_v7 = vld [vmem:[%s551_s1 + $0x20] sm:$0xff]   ;;  %v371_v9 = vld [vmem:[%s551_s1 + $0x18] sm:$0xff]  }
  0x1d   :  { %138 = vmatprep.subr.bf16.mxu0 %v429_v0  ;;  %269 = vmatprep.subr.bf16.mxu1 %v429_v0  ;;  %v370_v8 = vld [vmem:[%s554_s4 + $0x20] sm:$0xff]   ;;  %v372_v10 = vld [vmem:[%s554_s4 + $0x18] sm:$0xff]   ;;  %v373_v11 = vld [vmem:[%s551_s1 + $0x10] sm:$0xff]  }
  0x1e   :  { %v53_v12 = vld [vmem:[%s550_s0] sm:$0xff]  ;;  %v374_v13 = vld [vmem:[%s554_s4 + $0x10] sm:$0xff]   ;;  %v375_v15 = vld [vmem:[%s551_s1 + $0x8] sm:$0xff]  }
  0x1f   :  { %v335_v14 = vcombine.high %v53_v12, %v53_v12  ;;  %v376_v16 = vld [vmem:[%s554_s4 + $0x8] sm:$0xff]   ;;  %v377_v17 = vld [vmem:[%s551_s1] sm:$0xff]   ;;  %v334_v21 = vcombine.low %v53_v12, %v53_v12 }
  0x20   :  { %139 = vmatpush1.bf16.msra.mxu0 %v365_v3  ;;  %270 = vmatpush1.bf16.msra.mxu1 %v366_v4  ;;  %v378_v18 = vld [vmem:[%s554_s4] sm:$0xff]  }
  0x21   :  { %140 = vmatprep.subr.bf16.mxu0 %v429_v0  ;;  %271 = vmatprep.subr.bf16.mxu1 %v429_v0  ;;  %v379_v19 = vld [vmem:[%s551_s1 + $0x40] sm:$0xff]  }
  0x22   :  { %345 = vmatprep.mubr.msk.bf16.mxu0 %vm132_vm0, %v335_v14  ;;  %357 = vmatprep.mubr.msk.bf16.mxu1 %vm132_vm0, %v335_v14  ;;  %v380_v20 = vld [vmem:[%s554_s4 + $0x40] sm:$0xff]  }
  0x23   :  { %v346_v22 = vld [vmem:[%s552_s2] ss:$0 sm:$0xff]  ;;  %v359_v28 = vld [vmem:[#allocation4] ss:$0 sm:$0xff] }
  0x24   :  { %141 = vmatpush1.bf16.msra.mxu0 %v367_v5  ;;  %272 = vmatpush1.bf16.msra.mxu1 %v368_v6  ;;  %v358_v23 = vld [vmem:[#allocation2] ss:$0 sm:$0xff] }
  0x25   :  { %142 = vmatprep.subr.bf16.mxu0 %v429_v0  ;;  %273 = vmatprep.subr.bf16.mxu1 %v429_v0  ;;  %v347_v25 = vld [vmem:[%s553_s3] ss:$0 sm:$0xff] }
  0x28   :  { %143 = vmatpush1.bf16.msra.mxu0 %v369_v7  ;;  %274 = vmatpush1.bf16.msra.mxu1 %v370_v8 }
  0x29   :  { %144 = vmatprep.subr.bf16.mxu0 %v429_v0  ;;  %275 = vmatprep.subr.bf16.mxu1 %v429_v0 }
  0x2c   :  { %145 = vmatpush1.bf16.msra.mxu0 %v371_v9  ;;  %276 = vmatpush1.bf16.msra.mxu1 %v372_v10 }
  0x2d   :  { %146 = vmatprep.subr.bf16.mxu0 %v429_v0  ;;  %277 = vmatprep.subr.bf16.mxu1 %v429_v0 }
  0x30   :  { %147 = vmatpush1.bf16.msra.mxu0 %v373_v11  ;;  %278 = vmatpush1.bf16.msra.mxu1 %v374_v13 }
  0x31   :  { %148 = vmatprep.subr.bf16.mxu0 %v429_v0  ;;  %279 = vmatprep.subr.bf16.mxu1 %v429_v0 }
  0x34   :  { %149 = vmatpush1.bf16.msra.mxu0 %v375_v15  ;;  %280 = vmatpush1.bf16.msra.mxu1 %v376_v16 }
  0x35   :  { %150 = vmatprep.subr.bf16.mxu0 %v429_v0  ;;  %281 = vmatprep.subr.bf16.mxu1 %v429_v0 }
  0x38   :  { %151 = vmatpush1.bf16.msra.mxu0 %v377_v17  ;;  %282 = vmatpush1.bf16.msra.mxu1 %v378_v18 }
  0x39   :  { %166 = vmatprep.subr.bf16.mxu0 %v429_v0  ;;  %297 = vmatprep.subr.bf16.mxu1 %v429_v0 }
  0x3c   :  { %167 = vmatpush2.bf16.msra.mxu0 %v379_v19  ;;  %298 = vmatpush2.bf16.msra.mxu1 %v380_v20 }
  0x3f   :  { %169 = vmatmul.mubr.bf16.vlgmr.msra.gmra.mxu0 %v334_v21  ;;  %300 = vmatmul.mubr.bf16.vlgmr.msra.gmra.mxu1 %v334_v21 }
  0xff   :  { %v170_v24 = vpop.f32.mrf.mxu0  ;;  %v301_v27 = vpop.f32.mrf.mxu1 }
 0x100   :  { %v183_v26 = vmul.f32 %v346_v22, %v170_v24  ;;  %v314_v29 = vmul.f32 %v358_v23, %v301_v27 }
 0x101   :  { %v172_v30 = vpop.f32.mrf.mxu0  ;;  %v303_v32 = vpop.f32.mrf.mxu1 }
 0x102   :  { %v191_v31 = vadd.f32 %v347_v25, %v183_v26  ;;  %v322_v33 = vadd.f32 %v359_v28, %v314_v29 }
 0x103   :  { %v173_v34 = vpop.f32.mrf.mxu0  ;;  %v304_v36 = vpop.f32.mrf.mxu1 }
 0x104   :  { %v192_v35 = vmax.f32 %v191_v31, 0.0  ;;  %323 = vst.msk [vmem:[%s558_s8] sm:$0xff] %vm193_vm1, %v322_v33 }
 0x105   :  { %v174_v37 = vpop.f32.mrf.mxu0  ;;  %v305_v38 = vpop.f32.mrf.mxu1 }
 0x106   :  { %194 = vst.msk [vmem:[%s557_s7] sm:$0xff] %vm193_vm1, %v192_v35 }
 0x107   :  { %332 = vsyncpa [#allocation3], 1 }
 0x108   :  { %333 = vsyncpa [#allocation5], 1 }

// kernel: short_chunk_cnn_res.28
= control target key start
LH: loop header
LB: loop body
LE: loop exit
PB: predicated region body
PF: predicated region fallthrough
CT: control target
= control target key end

     0   :  { %10 = vsyncpa [#allocation3], 0  ;;  %s545_s0 = inlined_call_operand.vmem [shape: bf16[8,288], index: 0, kind: input, shape index: {}]   ;;  %s546_s1 = inlined_call_operand.vmem [shape: bf16[288,32], index: 1, kind: input, shape index: {}]   ;;  %s547_s2 = inlined_call_operand.hbm [shape: f32[1,32], index: 2, kind: input, shape index: {}]   ;;  %s548_s3 = inlined_call_operand.hbm [shape: f32[1,32], index: 3, kind: input, shape index: {}]   ;;  %s549_s4 = inlined_call_operand.vmem [shape: f32[8,32], index: 4, kind: input, shape index: {}]   ;;  %s550_s5 = inlined_call_operand.vmem [shape: f32[8,32], index: 5, kind: output, shape index: {}]  }
   0x1   :  { %11 = vsyncpa [#allocation5], 0  ;;  %s437_s18 = smov [#allocation2]   ;;  %s438_s20 = smov [#allocation4]  }
   0x2   :  { %s22_s19 = sshll.u32 %s437_s18, 4  ;;  %s32_s21 = sshll.u32 %s438_s20, 4  ;;  %s23_s19 = int_to_ptr.vmem [resolvable:$true] %s22_s19  ;;  %s33_s21 = int_to_ptr.vmem [resolvable:$true] %s32_s21 }
   0x3   :  { %s401_s22 = scalar_lea.vmem %s23_s19, 16  ;;  %s405_s23 = scalar_lea.vmem %s23_s19, 32 }
   0x4   :  { %p402_p0 = scmp.ne.s32.totalorder %s23_s19, %s401_s22  ;;  %p406_p1 = scmp.lt.s32.totalorder %s23_s19, %s23_s19 }
   0x5   :  { %p407_p2 = scmp.lt.s32.totalorder %s405_s23, %s401_s22 }
   0x7   :  { %p408_p3 = por %p407_p2, %p406_p1 }
   0x9   :  { %p409_p4 = pnand %p408_p3, %p402_p0 }
   0xb   :  { %412 = shalt.err (!%p409_p4)
}
   0xc   :  { %25 = dma.hbm_to_vmem [thread:$0]  %s547_s2, 16, %s23_s19, [#allocation3]  }
   0xd   :  { %s421_s26 = scalar_lea.vmem %s33_s21, 16  ;;  %s425_s27 = scalar_lea.vmem %s33_s21, 32 }
   0xe   :  { %p422_p5 = scmp.ne.s32.totalorder %s33_s21, %s421_s26  ;;  %p426_p6 = scmp.lt.s32.totalorder %s33_s21, %s33_s21 }
   0xf   :  { %p427_p7 = scmp.lt.s32.totalorder %s425_s27, %s421_s26 }
  0x11   :  { %p428_p8 = por %p427_p7, %p426_p6 }
  0x13   :  { %p429_p9 = pnand %p428_p8, %p422_p5 }
  0x15   :  { %432 = shalt.err (!%p429_p9)
}
  0x16   :  { %35 = dma.hbm_to_vmem [thread:$0]  %s548_s3, 16, %s33_s21, [#allocation5]  }
  0x17   :  { %433 = dma.done.wait [#allocation3], 16  }
  0x18   :  { %434 = vsyncadd [#allocation3], 4294967280 }
  0x19   :  { %435 = dma.done.wait [#allocation5], 16  }
  0x1a   :  { %436 = vsyncadd [#allocation5], 4294967280  ;;  %v439_v0 = vmov 0.0   ;;  %vm440_vm0 = vmmov 0   ;;  %v372_v1 = vld [vmem:[%s546_s1 + $0x78] sm:$0xff]   ;;  %v374_v3 = vld [vmem:[%s546_s1 + $0x70] sm:$0xff]  }
  0x1b   :  { %360 = vmatprep.subr.bf16.mxu1 %v439_v0  ;;  %364 = vmatprep.mubr.msk.bf16.mxu1 %vm440_vm0, %v439_v0  ;;  %v373_v2 = vld [vmem:[%s546_s1 + $0x38] sm:$0xff]   ;;  %v375_v4 = vld [vmem:[%s546_s1 + $0x30] sm:$0xff]   ;;  %v376_v5 = vld [vmem:[%s546_s1 + $0x68] sm:$0xff]   ;;  %vm201_vm1 = vcmask 261120  }
  0x1c   :  { %335 = vmatprep.subr.bf16.mxu0 %v372_v1  ;;  %v377_v6 = vld [vmem:[%s546_s1 + $0x28] sm:$0xff]   ;;  %v378_v7 = vld [vmem:[%s546_s1 + $0x60] sm:$0xff]   ;;  %v380_v9 = vld [vmem:[%s546_s1 + $0x58] sm:$0xff]  }
  0x1d   :  { %336 = vmatpush3.bf16.msra.mxu0 %v373_v2  ;;  %v379_v8 = vld [vmem:[%s546_s1 + $0x20] sm:$0xff]   ;;  %v384_v10 = vld [vmem:[%s546_s1 + $0x88] sm:$0xff]   ;;  %v381_v11 = vld [vmem:[%s546_s1 + $0x18] sm:$0xff]  }
  0x1e   :  { %337 = vmatprep.subr.bf16.mxu0 %v374_v3  ;;  %361 = vmatpush3.bf16.msra.mxu1 %v384_v10  ;;  %v387_v12 = vld [vmem:[%s546_s1 + $0x80] sm:$0xff]   ;;  %v382_v13 = vld [vmem:[%s546_s1 + $0x50] sm:$0xff]   ;;  %v390_v14 = vld [vmem:[%s545_s0 + $0x8] ss:$0 sps:$4 sm:$0xff]  }
  0x1f   :  { %362 = vmatprep.subr.bf16.mxu1 %v439_v0  ;;  %v45_v15 = vld [vmem:[%s545_s0] sm:$0xff]  ;;  %v383_v16 = vld [vmem:[%s546_s1 + $0x10] sm:$0xff]   ;;  %v385_v18 = vld [vmem:[%s546_s1 + $0x48] sm:$0xff]  }
  0x20   :  { %v312_v17 = vcombine.high %v45_v15, %v45_v15  ;;  %v386_v19 = vld [vmem:[%s546_s1 + $0x8] sm:$0xff]   ;;  %v388_v20 = vld [vmem:[%s546_s1 + $0x40] sm:$0xff]   ;;  %v311_v22 = vcombine.low %v45_v15, %v45_v15 }
  0x21   :  { %338 = vmatpush3.bf16.msra.mxu0 %v375_v4  ;;  %v389_v21 = vld [vmem:[%s546_s1] sm:$0xff]  }
  0x22   :  { %339 = vmatprep.subr.bf16.mxu0 %v376_v5  ;;  %363 = vmatpush3.bf16.msra.mxu1 %v387_v12  ;;  %v333_v30 = vld [vmem:[#allocation2] ss:$0 sm:$0xff]  ;;  %v334_v33 = vld [vmem:[#allocation4] ss:$0 sm:$0xff] }
  0x23   :  { %237 = vmatprep.mubr.bf16.mxu0 %v312_v17  ;;  %v301_v36 = vld [vmem:[%s549_s4] sm:$0xff] }
  0x25   :  { %340 = vmatpush3.bf16.msra.mxu0 %v377_v6  ;;  %365 = vmatmul.mubr.msk.bf16.vlgmr.msra.gmra.mxu1 %vm201_vm1, %v390_v14 }
  0x26   :  { %341 = vmatprep.subr.bf16.mxu0 %v378_v7 }
  0x29   :  { %342 = vmatpush3.bf16.msra.mxu0 %v379_v8 }
  0x2a   :  { %343 = vmatprep.subr.bf16.mxu0 %v380_v9 }
  0x2d   :  { %344 = vmatpush3.bf16.msra.mxu0 %v381_v11 }
  0x2e   :  { %345 = vmatprep.subr.bf16.mxu0 %v382_v13 }
  0x31   :  { %346 = vmatpush3.bf16.msra.mxu0 %v383_v16 }
  0x32   :  { %347 = vmatprep.subr.bf16.mxu0 %v385_v18 }
  0x35   :  { %348 = vmatpush3.bf16.msra.mxu0 %v386_v19 }
  0x36   :  { %349 = vmatprep.subr.bf16.mxu0 %v388_v20 }
  0x39   :  { %350 = vmatpush3.bf16.msra.mxu0 %v389_v21 }
  0x3c   :  { %238 = vmatmul.mubr.bf16.vlgmr.msra.gmra.mxu0 %v311_v22 }
  0xe5   :  { %v279_v23 = vpop.f32.mrf.mxu1 }
  0xe7   :  { %v366_v24 = vpop.f32.mrf.mxu1 }
  0xe9   :  { %v282_v25 = vpop.f32.mrf.mxu1 }
  0xeb   :  { %v367_v26 = vpop.f32.mrf.mxu1 }
  0xfc   :  { %v351_v27 = vpop.f32.mrf.mxu0 }
  0xfe   :  { %v352_v28 = vpop.f32.mrf.mxu0 }
  0xff   :  { %v353_v29 = vadd.f32 %v352_v28, %v351_v27 }
 0x100   :  { %v354_v31 = vpop.f32.mrf.mxu0 }
 0x101   :  { %v280_v32 = vadd.f32 %v353_v29, %v279_v23 }
 0x102   :  { %v355_v34 = vpop.f32.mrf.mxu0 }
 0x103   :  { %v292_v35 = vmul.f32 %v333_v30, %v280_v32 }
 0x105   :  { %v300_v37 = vadd.f32 %v334_v33, %v292_v35 }
 0x107   :  { %v302_v38 = vadd.f32 %v301_v36, %v300_v37 }
 0x109   :  { %v303_v39 = vmax.f32 %v302_v38, 0.0 }
 0x10b   :  { %304 = vst.msk [vmem:[%s550_s5] sm:$0xff] %vm201_vm1, %v303_v39 }
 0x10c   :  { %309 = vsyncpa [#allocation3], 1 }
 0x10d   :  { %310 = vsyncpa [#allocation5], 1 }

// kernel: short_chunk_cnn_res.29
= control target key start
LH: loop header
LB: loop body
LE: loop exit
PB: predicated region body
PF: predicated region fallthrough
CT: control target
= control target key end

     0   :  { %vm26_vm0 = vcmask 254976   ;;  %v316_v1 = vmov 0.0   ;;  %vm317_vm1 = vmmov 0   ;;  %s401_s0 = inlined_call_operand.vmem [shape: f32[2,2,32], index: 0, kind: input, shape index: {}]   ;;  %s402_s1 = inlined_call_operand.vmem [shape: f32[32,32], index: 1, kind: input, shape index: {}]   ;;  %s403_s2 = inlined_call_operand.vmem [shape: f32[1,32], index: 2, kind: input, shape index: {}]   ;;  %s404_s3 = inlined_call_operand.vmem [shape: f32[1,32], index: 3, kind: input, shape index: {}]   ;;  %s405_s4 = inlined_call_operand.vmem [shape: f32[32,11], index: 4, kind: input, shape index: {}]   ;;  %s406_s5 = inlined_call_operand.vmem [shape: f32[1,11], index: 5, kind: input, shape index: {}]   ;;  %s407_s6 = inlined_call_operand.hbm [shape: f32[2,11], index: 6, kind: output, shape index: {}]  }
   0x1   :  { %v44_v0 = vld [vmem:[%s402_s1 + $0x18] sm:$0xff]  ;;  %265 = vmatprep.subr.mxu0 %v316_v1  ;;  %v43_v2 = vld [vmem:[%s402_s1 + $0x10] sm:$0xff]  ;;  %273 = vmatprep.mubr.msk.f32.mxu0 %vm317_vm1, %v316_v1  ;;  %v24_v3 = vld [vmem:[%s401_s0] sm:$0x3] }
   0x2   :  { %v25_v4 = vld [vmem:[%s401_s0 + $0x2] sm:$0x3]  ;;  %266 = vmatpush3.msra.mxu0 %v44_v0  ;;  %v27_v5 = vsel %vm26_vm0, %v24_v3, -inf  ;;  %276 = vmatprep.subr.mxu1 %v316_v1 }
   0x3   :  { %v34_v6 = vsel %vm26_vm0, %v25_v4, -inf }
   0x4   :  { %11 = vsyncpa [#allocation3], 0  ;;  %267 = vmatprep.subr.mxu0 %v316_v1  ;;  %v42_v7 = vld [vmem:[%s402_s1 + $0x8] sm:$0xff]  ;;  %v28_v8 = vrot.slane %v27_v5, 4  ;;  %v35_v9 = vrot.slane %v34_v6, 4  ;;  %284 = vmatprep.mubr.msk.f32.mxu1 %vm317_vm1, %v316_v1  ;;  %v41_v10 = vld [vmem:[%s402_s1] sm:$0xff] }
   0x5   :  { %268 = vmatpush3.msra.mxu0 %v43_v2  ;;  %vm47_vm2 = vcmask 1041409   ;;  %vm49_vm3 = vcmask 261120   ;;  %v142_v22 = vld [vmem:[%s405_s4 + $0x18] sm:$0xff]  ;;  %v141_v23 = vld [vmem:[%s405_s4 + $0x10] sm:$0xff]  ;;  %v140_v24 = vld [vmem:[%s405_s4 + $0x8] sm:$0xff]  ;;  %vm223_vm4 = vcmask 82944  }
   0x6   :  { %269 = vmatprep.subr.mxu0 %v316_v1  ;;  %v29_v11 = vmax.f32 %v27_v5, %v28_v8  ;;  %v36_v12 = vmax.f32 %v34_v6, %v35_v9  ;;  %277 = vmatpush3.msra.mxu1 %v142_v22  ;;  %v139_v25 = vld [vmem:[%s405_s4] sm:$0xff] }
   0x7   :  { %270 = vmatpush3.msra.mxu0 %v42_v7  ;;  %278 = vmatprep.subr.mxu1 %v316_v1  ;;  %v251_v26 = vld [vmem:[%s403_s2] ss:$0 sm:$0xff]  ;;  %s318_s2 = smov [#allocation2]  }
   0x8   :  { %271 = vmatprep.subr.mxu0 %v316_v1  ;;  %v30_v13 = vrot.slane %v29_v11, 2  ;;  %v37_v14 = vrot.slane %v36_v12, 2  ;;  %279 = vmatpush3.msra.mxu1 %v141_v23  ;;  %v252_v28 = vld [vmem:[%s404_s3] ss:$0 sm:$0xff]  ;;  %s242_s3 = sshll.u32 %s318_s2, 4  ;;  %s243_s3 = int_to_ptr.vmem [resolvable:$true] %s242_s3 }
   0x9   :  { %272 = vmatpush3.msra.mxu0 %v41_v10  ;;  %280 = vmatprep.subr.mxu1 %v316_v1  ;;  %v253_v33 = vld [vmem:[%s406_s5] ss:$0 sm:$0xff]  ;;  %s294_s4 = scalar_lea.vmem %s243_s3, 32  ;;  %p299_p1 = scmp.lt.s32.totalorder %s243_s3, %s243_s3 }
   0xa   :  { %v31_v15 = vmax.f32 %v29_v11, %v30_v13  ;;  %v38_v16 = vmax.f32 %v36_v12, %v37_v14  ;;  %281 = vmatpush3.msra.mxu1 %v140_v24  ;;  %p295_p0 = scmp.ne.s32.totalorder %s243_s3, %s294_s4  ;;  %p300_p2 = scmp.lt.s32.totalorder %s294_s4, %s294_s4 }
   0xb   :  { %282 = vmatprep.subr.mxu1 %v316_v1 }
   0xc   :  { %v32_v17 = vrot.slane %v31_v15, 1  ;;  %v39_v18 = vrot.slane %v38_v16, 1  ;;  %283 = vmatpush3.msra.mxu1 %v139_v25  ;;  %p301_p3 = por %p300_p2, %p299_p1 }
   0xe   :  { %v33_v19 = vmax.f32 %v31_v15, %v32_v17  ;;  %v40_v20 = vmax.f32 %v38_v16, %v39_v18  ;;  %p302_p4 = pnand %p301_p3, %p295_p0 }
  0x10   :  { %v48_v21 = vsel %vm47_vm2, %v40_v20, %v33_v19 }
  0x11   :  { %274 = vmatmul.mubr.msk.f32.vlgmr.msra.gmra.mxu0 %vm49_vm3, %v48_v21 }
  0xd1   :  { %v118_v27 = vpop.f32.mrf.mxu0 }
  0xd2   :  { %v129_v29 = vmul.f32 %v251_v26, %v118_v27 }
  0xd3   :  { %v275_v30 = vpop.f32.mrf.mxu0 }
  0xd4   :  { %v137_v31 = vadd.f32 %v252_v28, %v129_v29 }
  0xd6   :  { %v138_v32 = vmax.f32 %v137_v31, 0.0 }
  0xd8   :  { %285 = vmatmul.mubr.msk.f32.vlgmr.msra.gmra.mxu1 %vm49_vm3, %v138_v32 }
 0x198   :  { %v219_v34 = vpop.f32.mrf.mxu1 }
 0x199   :  { %v220_v35 = vadd.f32 %v253_v33, %v219_v34 }
 0x19a   :  { %v286_v36 = vpop.f32.mrf.mxu1 }
 0x19b   :  { %v224_v37 = vsel %vm223_vm4, %v220_v35, -inf }
 0x19c   :  { %225 = vmax.xlane.f32.xlu0 %v224_v37 }
 0x225   :  { %v226_v38 = vpop.xlane.xlu0 %225 }
 0x226   :  { %v227_v39 = vsub.f32 %v220_v35, %v226_v38 }
 0x228   :  { %v228_v40 = vmul.f32 1.442695, %v227_v39 }
 0x22a   :  { %290 = vpow2.f32 %v228_v40 }
 0x237   :  { %v291_v41 = vpop.eup %290 }
 0x238   :  { %v230_v42 = vsel %vm223_vm4, %v291_v41, 0.0 }
 0x239   :  { %231 = vadd.xlane.f32.xlu0 %v230_v42 }
 0x2c2   :  { %v232_v43 = vpop.xlane.xlu0 %231 }
 0x2c3   :  { %292 = vrcp.f32 %v232_v43 }
 0x2d0   :  { %v293_v44 = vpop.eup %292 }
 0x2d1   :  { %v234_v45 = vmul.f32 %v293_v44, %v291_v41 }
 0x2d3   :  { %235 = vst.msk [vmem:[#allocation2] sm:$0x3] %vm223_vm4, %v234_v45 }
 0x2d4   :  { %305 = shalt.err (!%p302_p4)
}
 0x2d5   :  { %245 = dma.vmem_to_hbm [thread:$0]  %s243_s3, 32, %s407_s6, [#allocation3]  }
 0x2d6   :  { %314 = dma.done.wait [#allocation3], 32  }
 0x2d7   :  { %315 = vsyncadd [#allocation3], 4294967264 }
 0x2d8   :  { %249 = vsyncpa [#allocation3], 1 }

</bundles_post_ra>
